<compile_context>
chip_gen: v5e
topology: v5e:2x2
jax: 0.10.0
libtpu: 0.0.40
codegen_flags: <defaults>
</compile_context>

<pallas_src>
import functools

import jax
import jax.numpy as jnp
from jax.experimental import pallas as pl
from jax.experimental.pallas import tpu as pltpu


# ---------------------------------------------------------------------------
# Fused GRU layer kernel: input projection + hidden recurrence per time block.
# ---------------------------------------------------------------------------
def gru_fused_layer_kernel(x_ref, wih_ref, bih_ref, whh_ref, bhh_ref,
                           out_ref, h_ref, *, ts, hidden):
    """One (batch-block, time-block) grid step of a fused GRU layer.

    x_ref   : (Bblk, TS, E)  layer input block
    wih_ref : (E, 3H)        fused input->hidden weights   (grid-invariant)
    bih_ref : (1, 3H)        input bias                    (grid-invariant)
    whh_ref : (H, 3H)        fused hidden->hidden weights  (grid-invariant)
    bhh_ref : (1, 3H)        hidden bias                   (grid-invariant)
    out_ref : (Bblk, TS, H)  hidden states emitted for this block
    h_ref   : (Bblk, H)      VMEM scratch carrying h across time blocks
    Gate order along the 3H axis is (r, z, n), matching PyTorch nn.GRU.
    """
    H = hidden
    G = 3 * H
    b_blk = x_ref.shape[0]

    # New batch block -> reset the hidden-state carry (h0 = 0).
    @pl.when(pl.program_id(1) == 0)
    def _():
        h_ref[...] = jnp.zeros_like(h_ref)

    # Hoisted bias broadcasts (re-emitted per step otherwise; JAX has no CSE
    # for broadcast_in_dim).
    bih_b = jnp.broadcast_to(bih_ref[...], (b_blk, G))
    bhh_b = jnp.broadcast_to(bhh_ref[...], (b_blk, G))

    h = h_ref[...]
    # Statically unrolled time loop (TS is small and compile-time fixed);
    # static ref indices guarantee clean lowering, per-step loads keep live
    # ranges bounded.
    for s in range(ts):
        x_s = x_ref[:, s, :]                                       # (Bblk, E)
        # Fused input projection: independent of h -> pipelines off the
        # serial critical path, under the recurrent dot's latency.
        gi = jnp.dot(x_s, wih_ref[...],
                     preferred_element_type=jnp.float32) + bih_b   # (Bblk, 3H)
        gh = jnp.dot(h, whh_ref[...],
                     preferred_element_type=jnp.float32) + bhh_b   # (Bblk, 3H)
        # r and z share a single sigmoid (one EUP push), then static split.
        rz = jax.nn.sigmoid(gi[:, :2 * H] + gh[:, :2 * H])
        r = rz[:, :H]
        z = rz[:, H:]
        n = jnp.tanh(gi[:, 2 * H:] + r * gh[:, 2 * H:])
        h = (1.0 - z) * n + z * h
        out_ref[:, s, :] = h.astype(out_ref.dtype)
    h_ref[...] = h


def gru_layer(x, w_ih, b_ih, w_hh, b_hh, *, time_block=8):
    """Single GRU layer: x (B, T, E) -> hidden sequence (B, T, H), h0 = 0."""
    B, T, E = x.shape
    H = w_hh.shape[0]
    G = 3 * H
    assert w_ih.shape == (E, G) and w_hh.shape == (H, G)

    # Batch split only when it can feed both v7x TensorCores with sublane-
    # aligned blocks; splitting on a 1-TC chip would just serialize extra
    # recurrence sweeps (the step dot is latency-bound, not throughput-bound).
    b_blk = B // 2 if (B >= 16 and B % 16 == 0) else B
    nb = B // b_blk

    # Time tile: multiple of 8 sublanes, shrunk until the (double-buffered)
    # VMEM footprint fits a conservative budget (v7x: 64 MiB physical VMEM).
    ts = max(8, (int(time_block) + 7) // 8 * 8)
    ts = min(ts, (T + 7) // 8 * 8)

    def vmem_bytes(ts_):
        return 4 * (2 * b_blk * ts_ * E            # x blocks (double-buffered)
                    + 2 * b_blk * ts_ * H          # out blocks
                    + b_blk * H                    # h carry scratch
                    + 2 * (E * G + H * G + 2 * G))  # weights/biases

    budget = 40 << 20
    while ts > 8 and vmem_bytes(ts) > budget:
        ts -= 8

    # Pad T up to a multiple of ts; padded steps are causal-safe (never read
    # by any real time step) and sliced off below.
    t_pad = -(-T // ts) * ts
    if t_pad != T:
        x = jnp.pad(x, ((0, 0), (0, t_pad - T), (0, 0)))
    nt = t_pad // ts

    kernel = functools.partial(gru_fused_layer_kernel, ts=ts, hidden=H)
    # TODO(synk): mark the grid-invariant weight specs with
    #             pipeline_mode=pl.Buffered(1) when single-buffered residency
    #             is needed at production sizes (v7x 64 MiB VMEM).
    out = pl.pallas_call(
        kernel,
        out_shape=jax.ShapeDtypeStruct((B, t_pad, H), jnp.float32),
        grid=(nb, nt),
        in_specs=[
            pl.BlockSpec((b_blk, ts, E), lambda b, t: (b, t, 0)),   # x
            pl.BlockSpec((E, G), lambda b, t: (0, 0)),              # w_ih
            pl.BlockSpec((1, G), lambda b, t: (0, 0)),              # b_ih
            pl.BlockSpec((H, G), lambda b, t: (0, 0)),              # w_hh
            pl.BlockSpec((1, G), lambda b, t: (0, 0)),              # b_hh
        ],
        out_specs=pl.BlockSpec((b_blk, ts, H), lambda b, t: (b, t, 0)),
        scratch_shapes=[pltpu.VMEM((b_blk, H), jnp.float32)],
        compiler_params=pltpu.CompilerParams(
            # batch blocks independent (megacore-shardable); time is serial.
            dimension_semantics=("parallel", "arbitrary"),
            vmem_limit_bytes=int(min(max(2 * vmem_bytes(ts), 16 << 20),
                                     48 << 20))),
    )(x, w_ih, b_ih, w_hh, b_hh)

    if t_pad != T:
        out = out[:, :T, :]
    return out


# ---------------------------------------------------------------------------
# Forward pass: embedding lookup (glue gather) + stacked fused GRU layers
# ---------------------------------------------------------------------------
@functools.partial(jax.jit, static_argnames=("num_layers", "time_block"))
def seq2seq_encoder_forward(tokens, embedding, params, num_layers, time_block):
    """tokens: (B, T) int32 -> (output (B, T, H), state (L, B, H))."""
    # TODO(synk): fuse this gather into the layer-0 kernel via scalar-prefetched
    #             token ids; kept as XLA glue here.
    x = embedding[tokens]                                  # (B, T, E)
    finals = []
    for layer in range(num_layers):
        w_ih, w_hh, b_ih, b_hh = params[layer]
        x = gru_layer(x, w_ih, b_ih, w_hh, b_hh, time_block=time_block)
        finals.append(x[:, -1, :])                         # final hidden of layer
        # TODO(synk): inter-layer dropout (p=0.1) omitted (eval mode).
    state = jnp.stack(finals, axis=0)                      # (L, B, H)
    return x, state


# ---------------------------------------------------------------------------
# Pure-JAX reference (for correctness check) and init
# ---------------------------------------------------------------------------
def gru_reference(tokens, embedding, params):
    x = embedding[tokens].astype(jnp.float32)
    B = x.shape[0]
    finals = []
    for (w_ih, w_hh, b_ih, b_hh) in params:
        H = w_hh.shape[0]
        gi_all = jnp.einsum("bte,eg->btg", x, w_ih) + b_ih   # (B, T, 3H)

        def step(h, gi_t):
            gh = h @ w_hh + b_hh
            r = jax.nn.sigmoid(gi_t[:, :H] + gh[:, :H])
            z = jax.nn.sigmoid(gi_t[:, H:2 * H] + gh[:, H:2 * H])
            n = jnp.tanh(gi_t[:, 2 * H:] + r * gh[:, 2 * H:])
            h_new = (1.0 - z) * n + z * h
            return h_new, h_new

        h0 = jnp.zeros((B, H), jnp.float32)
        _, ys = jax.lax.scan(step, h0, jnp.swapaxes(gi_all, 0, 1))
        x = jnp.swapaxes(ys, 0, 1)
        finals.append(x[:, -1, :])
    return x, jnp.stack(finals, axis=0)


def init_params(key, vocab_size, embed_size, num_hiddens, num_layers):
    """PyTorch-like init: Embedding ~ N(0,1); GRU params ~ U(-k, k), k=1/sqrt(H).

    Weights stored pre-fused: W_ih (in, 3H), W_hh (H, 3H), biases (1, 3H),
    gate order (r, z, n) along the 3H axis (matches PyTorch row order after
    transpose + concat).
    """
    keys = jax.random.split(key, 1 + 4 * num_layers)
    embedding = jax.random.normal(keys[0], (vocab_size, embed_size), jnp.float32)
    k = 1.0 / jnp.sqrt(jnp.float32(num_hiddens))
    params = []
    for layer in range(num_layers):
        in_dim = embed_size if layer == 0 else num_hiddens
        kw = keys[1 + 4 * layer: 1 + 4 * (layer + 1)]
        w_ih = jax.random.uniform(kw[0], (in_dim, 3 * num_hiddens), jnp.float32, -k, k)
        w_hh = jax.random.uniform(kw[1], (num_hiddens, 3 * num_hiddens), jnp.float32, -k, k)
        b_ih = jax.random.uniform(kw[2], (1, 3 * num_hiddens), jnp.float32, -k, k)
        b_hh = jax.random.uniform(kw[3], (1, 3 * num_hiddens), jnp.float32, -k, k)
        params.append((w_ih, w_hh, b_ih, b_hh))
    return embedding, params


if __name__ == "__main__":
    # Small but lane/sublane-dense shapes (B mult of 8, H mult of 128).
    vocab_size, embed_size, num_hiddens, num_layers = 50, 64, 128, 2
    batch, seq_len, time_block = 8, 16, 8

    key = jax.random.PRNGKey(0)
    k_tok, k_par = jax.random.split(key)
    tokens = jax.random.randint(k_tok, (batch, seq_len), 0, vocab_size, dtype=jnp.int32)
    embedding, params = init_params(k_par, vocab_size, embed_size, num_hiddens, num_layers)

    output, state = seq2seq_encoder_forward(
        tokens, embedding, tuple(params),
        num_layers=num_layers, time_block=time_block)
    jax.block_until_ready((output, state))

    assert output.shape == (batch, seq_len, num_hiddens)
    assert state.shape == (num_layers, batch, num_hiddens)
    # top-layer last time step must equal top-layer final state
    assert jnp.allclose(output[:, -1, :], state[-1])

    # numerical check vs pure-JAX reference GRU
    ref_out, ref_state = gru_reference(tokens, embedding, params)
    assert jnp.allclose(output, ref_out, atol=2e-3, rtol=2e-3)
    assert jnp.allclose(state, ref_state, atol=2e-3, rtol=2e-3)

    print("KERNEL_OK")
</pallas_src>

<mosaic_0001>
module attributes {stable_mosaic.version = 11 : i64} {
  func.func @gru_fused_layer_kernel(%arg0: i32, %arg1: i32, %arg2: memref<8x8x64xf32, #tpu.memory_space<vmem>>, %arg3: memref<64x384xf32, #tpu.memory_space<vmem>>, %arg4: memref<1x384xf32, #tpu.memory_space<vmem>>, %arg5: memref<128x384xf32, #tpu.memory_space<vmem>>, %arg6: memref<1x384xf32, #tpu.memory_space<vmem>>, %arg7: memref<8x8x128xf32, #tpu.memory_space<vmem>>, %arg8: memref<8x128xf32, #tpu.memory_space<vmem>>) attributes {dimension_semantics = [#tpu.dimension_semantics<parallel>, #tpu.dimension_semantics<arbitrary>], iteration_bounds = array<i64: 1, 2>, scalar_prefetch = 0 : i64, scratch_operands = 1 : i64, tpu.core_type = #tpu.core_type<tc>, window_params = [{transform_indices = @transform_0, window_bounds = array<i64: 8, 8, 64>}, {pipeline_mode = #tpu.pipeline_mode<synchronous>, transform_indices = @transform_1, window_bounds = array<i64: 64, 384>}, {pipeline_mode = #tpu.pipeline_mode<synchronous>, transform_indices = @transform_2, window_bounds = array<i64: 1, 384>}, {pipeline_mode = #tpu.pipeline_mode<synchronous>, transform_indices = @transform_3, window_bounds = array<i64: 128, 384>}, {pipeline_mode = #tpu.pipeline_mode<synchronous>, transform_indices = @transform_4, window_bounds = array<i64: 1, 384>}, {transform_indices = @transform_5, window_bounds = array<i64: 8, 8, 128>}]} {
    %c0_i32 = arith.constant 0 : i32
    %0 = arith.cmpi eq, %arg1, %c0_i32 : i32
    %1 = arith.extui %0 : i1 to i32
    %c0_i32_0 = arith.constant 0 : i32
    %2 = arith.cmpi ne, %1, %c0_i32_0 : i32
    scf.if %2 {
      %cst_112 = arith.constant 0.000000e+00 : f32
      %259 = vector.broadcast %cst_112 : f32 to vector<8x128xf32>
      %c0_113 = arith.constant 0 : index
      %c0_114 = arith.constant 0 : index
      %260 = vector.load %arg8[%c0_113, %c0_114] : memref<8x128xf32, #tpu.memory_space<vmem>>, vector<8x128xf32>
      tpu.vector_store %arg8[%c0_113, %c0_114], %259 {strides = array<i32>} : memref<8x128xf32, #tpu.memory_space<vmem>>, vector<8x128xf32>,
    } else {
    }
    %c0 = arith.constant 0 : index
    %c0_1 = arith.constant 0 : index
    %3 = vector.load %arg4[%c0, %c0_1] : memref<1x384xf32, #tpu.memory_space<vmem>>, vector<1x384xf32>
    %4 = vector.shape_cast %3 : vector<1x384xf32> to vector<1x384xf32>
    %5 = vector.broadcast %4 : vector<1x384xf32> to vector<8x384xf32>
    %c0_2 = arith.constant 0 : index
    %c0_3 = arith.constant 0 : index
    %6 = vector.load %arg6[%c0_2, %c0_3] : memref<1x384xf32, #tpu.memory_space<vmem>>, vector<1x384xf32>
    %7 = vector.shape_cast %6 : vector<1x384xf32> to vector<1x384xf32>
    %8 = vector.broadcast %7 : vector<1x384xf32> to vector<8x384xf32>
    %c0_4 = arith.constant 0 : index
    %c0_5 = arith.constant 0 : index
    %9 = vector.load %arg8[%c0_4, %c0_5] : memref<8x128xf32, #tpu.memory_space<vmem>>, vector<8x128xf32>
    %c0_6 = arith.constant 0 : index
    %c0_7 = arith.constant 0 : index
    %c0_8 = arith.constant 0 : index
    %10 = vector.load %arg2[%c0_6, %c0_7, %c0_8] : memref<8x8x64xf32, #tpu.memory_space<vmem>>, vector<8x1x64xf32>
    %11 = vector.shape_cast %10 : vector<8x1x64xf32> to vector<8x64xf32>
    %c0_9 = arith.constant 0 : index
    %c0_10 = arith.constant 0 : index
    %12 = vector.load %arg3[%c0_9, %c0_10] : memref<64x384xf32, #tpu.memory_space<vmem>>, vector<64x384xf32>
    %cst = arith.constant dense<0.000000e+00> : vector<8x384xf32>
    %13 = tpu.matmul %11, %12, %cst {dimension_numbers = #tpu.dot_dimension_numbers<[1], [0], [0], [1], [0, 0, 1, 1], [], []>} : vector<8x64xf32>, vector<64x384xf32>, vector<8x384xf32> -> vector<8x384xf32>
    %14 = arith.addf %13, %5 : vector<8x384xf32>
    %c0_11 = arith.constant 0 : index
    %c0_12 = arith.constant 0 : index
    %15 = vector.load %arg5[%c0_11, %c0_12] : memref<128x384xf32, #tpu.memory_space<vmem>>, vector<128x384xf32>
    %cst_13 = arith.constant dense<0.000000e+00> : vector<8x384xf32>
    %16 = tpu.matmul %9, %15, %cst_13 {dimension_numbers = #tpu.dot_dimension_numbers<[1], [0], [0], [1], [0, 0, 1, 1], [], []>} : vector<8x128xf32>, vector<128x384xf32>, vector<8x384xf32> -> vector<8x384xf32>
    %17 = arith.addf %16, %8 : vector<8x384xf32>
    %18 = vector.extract_strided_slice %14 {offsets = [0, 0], sizes = [8, 256], strides = [1, 1]} : vector<8x384xf32> to vector<8x256xf32>
    %19 = vector.extract_strided_slice %17 {offsets = [0, 0], sizes = [8, 256], strides = [1, 1]} : vector<8x384xf32> to vector<8x256xf32>
    %20 = arith.addf %18, %19 : vector<8x256xf32>
    %21 = arith.negf %20 : vector<8x256xf32>
    %22 = math.exp %21 : vector<8x256xf32>
    %cst_14 = arith.constant 1.000000e+00 : f32
    %23 = vector.broadcast %cst_14 : f32 to vector<8x256xf32>
    %24 = arith.addf %23, %22 : vector<8x256xf32>
    %25 = arith.divf %23, %24 : vector<8x256xf32>
    %26 = vector.extract_strided_slice %25 {offsets = [0, 0], sizes = [8, 128], strides = [1, 1]} : vector<8x256xf32> to vector<8x128xf32>
    %27 = vector.extract_strided_slice %25 {offsets = [0, 128], sizes = [8, 128], strides = [1, 1]} : vector<8x256xf32> to vector<8x128xf32>
    %28 = vector.extract_strided_slice %14 {offsets = [0, 256], sizes = [8, 128], strides = [1, 1]} : vector<8x384xf32> to vector<8x128xf32>
    %29 = vector.extract_strided_slice %17 {offsets = [0, 256], sizes = [8, 128], strides = [1, 1]} : vector<8x384xf32> to vector<8x128xf32>
    %30 = arith.mulf %26, %29 : vector<8x128xf32>
    %31 = arith.addf %28, %30 : vector<8x128xf32>
    %32 = math.tanh %31 : vector<8x128xf32>
    %cst_15 = arith.constant 1.000000e+00 : f32
    %33 = vector.broadcast %cst_15 : f32 to vector<8x128xf32>
    %34 = arith.subf %33, %27 : vector<8x128xf32>
    %35 = arith.mulf %34, %32 : vector<8x128xf32>
    %36 = arith.mulf %27, %9 : vector<8x128xf32>
    %37 = arith.addf %35, %36 : vector<8x128xf32>
    %c0_16 = arith.constant 0 : index
    %c0_17 = arith.constant 0 : index
    %c0_18 = arith.constant 0 : index
    %38 = vector.load %arg7[%c0_16, %c0_17, %c0_18] : memref<8x8x128xf32, #tpu.memory_space<vmem>>, vector<8x1x128xf32>
    %39 = vector.shape_cast %38 : vector<8x1x128xf32> to vector<8x128xf32>
    %40 = vector.shape_cast %37 : vector<8x128xf32> to vector<8x1x128xf32>
    tpu.vector_store %arg7[%c0_16, %c0_17, %c0_18], %40 {strides = array<i32>} : memref<8x8x128xf32, #tpu.memory_space<vmem>>, vector<8x1x128xf32>,
    %c0_19 = arith.constant 0 : index
    %c1 = arith.constant 1 : index
    %c0_20 = arith.constant 0 : index
    %41 = vector.load %arg2[%c0_19, %c1, %c0_20] : memref<8x8x64xf32, #tpu.memory_space<vmem>>, vector<8x1x64xf32>
    %42 = vector.shape_cast %41 : vector<8x1x64xf32> to vector<8x64xf32>
    %c0_21 = arith.constant 0 : index
    %c0_22 = arith.constant 0 : index
    %43 = vector.load %arg3[%c0_21, %c0_22] : memref<64x384xf32, #tpu.memory_space<vmem>>, vector<64x384xf32>
    %cst_23 = arith.constant dense<0.000000e+00> : vector<8x384xf32>
    %44 = tpu.matmul %42, %43, %cst_23 {dimension_numbers = #tpu.dot_dimension_numbers<[1], [0], [0], [1], [0, 0, 1, 1], [], []>} : vector<8x64xf32>, vector<64x384xf32>, vector<8x384xf32> -> vector<8x384xf32>
    %45 = arith.addf %44, %5 : vector<8x384xf32>
    %c0_24 = arith.constant 0 : index
    %c0_25 = arith.constant 0 : index
    %46 = vector.load %arg5[%c0_24, %c0_25] : memref<128x384xf32, #tpu.memory_space<vmem>>, vector<128x384xf32>
    %cst_26 = arith.constant dense<0.000000e+00> : vector<8x384xf32>
    %47 = tpu.matmul %37, %46, %cst_26 {dimension_numbers = #tpu.dot_dimension_numbers<[1], [0], [0], [1], [0, 0, 1, 1], [], []>} : vector<8x128xf32>, vector<128x384xf32>, vector<8x384xf32> -> vector<8x384xf32>
    %48 = arith.addf %47, %8 : vector<8x384xf32>
    %49 = vector.extract_strided_slice %45 {offsets = [0, 0], sizes = [8, 256], strides = [1, 1]} : vector<8x384xf32> to vector<8x256xf32>
    %50 = vector.extract_strided_slice %48 {offsets = [0, 0], sizes = [8, 256], strides = [1, 1]} : vector<8x384xf32> to vector<8x256xf32>
    %51 = arith.addf %49, %50 : vector<8x256xf32>
    %52 = arith.negf %51 : vector<8x256xf32>
    %53 = math.exp %52 : vector<8x256xf32>
    %cst_27 = arith.constant 1.000000e+00 : f32
    %54 = vector.broadcast %cst_27 : f32 to vector<8x256xf32>
    %55 = arith.addf %54, %53 : vector<8x256xf32>
    %56 = arith.divf %54, %55 : vector<8x256xf32>
    %57 = vector.extract_strided_slice %56 {offsets = [0, 0], sizes = [8, 128], strides = [1, 1]} : vector<8x256xf32> to vector<8x128xf32>
    %58 = vector.extract_strided_slice %56 {offsets = [0, 128], sizes = [8, 128], strides = [1, 1]} : vector<8x256xf32> to vector<8x128xf32>
    %59 = vector.extract_strided_slice %45 {offsets = [0, 256], sizes = [8, 128], strides = [1, 1]} : vector<8x384xf32> to vector<8x128xf32>
    %60 = vector.extract_strided_slice %48 {offsets = [0, 256], sizes = [8, 128], strides = [1, 1]} : vector<8x384xf32> to vector<8x128xf32>
    %61 = arith.mulf %57, %60 : vector<8x128xf32>
    %62 = arith.addf %59, %61 : vector<8x128xf32>
    %63 = math.tanh %62 : vector<8x128xf32>
    %cst_28 = arith.constant 1.000000e+00 : f32
    %64 = vector.broadcast %cst_28 : f32 to vector<8x128xf32>
    %65 = arith.subf %64, %58 : vector<8x128xf32>
    %66 = arith.mulf %65, %63 : vector<8x128xf32>
    %67 = arith.mulf %58, %37 : vector<8x128xf32>
    %68 = arith.addf %66, %67 : vector<8x128xf32>
    %c0_29 = arith.constant 0 : index
    %c1_30 = arith.constant 1 : index
    %c0_31 = arith.constant 0 : index
    %69 = vector.load %arg7[%c0_29, %c1_30, %c0_31] : memref<8x8x128xf32, #tpu.memory_space<vmem>>, vector<8x1x128xf32>
    %70 = vector.shape_cast %69 : vector<8x1x128xf32> to vector<8x128xf32>
    %71 = vector.shape_cast %68 : vector<8x128xf32> to vector<8x1x128xf32>
    tpu.vector_store %arg7[%c0_29, %c1_30, %c0_31], %71 {strides = array<i32>} : memref<8x8x128xf32, #tpu.memory_space<vmem>>, vector<8x1x128xf32>,
    %c0_32 = arith.constant 0 : index
    %c2 = arith.constant 2 : index
    %c0_33 = arith.constant 0 : index
    %72 = vector.load %arg2[%c0_32, %c2, %c0_33] : memref<8x8x64xf32, #tpu.memory_space<vmem>>, vector<8x1x64xf32>
    %73 = vector.shape_cast %72 : vector<8x1x64xf32> to vector<8x64xf32>
    %c0_34 = arith.constant 0 : index
    %c0_35 = arith.constant 0 : index
    %74 = vector.load %arg3[%c0_34, %c0_35] : memref<64x384xf32, #tpu.memory_space<vmem>>, vector<64x384xf32>
    %cst_36 = arith.constant dense<0.000000e+00> : vector<8x384xf32>
    %75 = tpu.matmul %73, %74, %cst_36 {dimension_numbers = #tpu.dot_dimension_numbers<[1], [0], [0], [1], [0, 0, 1, 1], [], []>} : vector<8x64xf32>, vector<64x384xf32>, vector<8x384xf32> -> vector<8x384xf32>
    %76 = arith.addf %75, %5 : vector<8x384xf32>
    %c0_37 = arith.constant 0 : index
    %c0_38 = arith.constant 0 : index
    %77 = vector.load %arg5[%c0_37, %c0_38] : memref<128x384xf32, #tpu.memory_space<vmem>>, vector<128x384xf32>
    %cst_39 = arith.constant dense<0.000000e+00> : vector<8x384xf32>
    %78 = tpu.matmul %68, %77, %cst_39 {dimension_numbers = #tpu.dot_dimension_numbers<[1], [0], [0], [1], [0, 0, 1, 1], [], []>} : vector<8x128xf32>, vector<128x384xf32>, vector<8x384xf32> -> vector<8x384xf32>
    %79 = arith.addf %78, %8 : vector<8x384xf32>
    %80 = vector.extract_strided_slice %76 {offsets = [0, 0], sizes = [8, 256], strides = [1, 1]} : vector<8x384xf32> to vector<8x256xf32>
    %81 = vector.extract_strided_slice %79 {offsets = [0, 0], sizes = [8, 256], strides = [1, 1]} : vector<8x384xf32> to vector<8x256xf32>
    %82 = arith.addf %80, %81 : vector<8x256xf32>
    %83 = arith.negf %82 : vector<8x256xf32>
    %84 = math.exp %83 : vector<8x256xf32>
    %cst_40 = arith.constant 1.000000e+00 : f32
    %85 = vector.broadcast %cst_40 : f32 to vector<8x256xf32>
    %86 = arith.addf %85, %84 : vector<8x256xf32>
    %87 = arith.divf %85, %86 : vector<8x256xf32>
    %88 = vector.extract_strided_slice %87 {offsets = [0, 0], sizes = [8, 128], strides = [1, 1]} : vector<8x256xf32> to vector<8x128xf32>
    %89 = vector.extract_strided_slice %87 {offsets = [0, 128], sizes = [8, 128], strides = [1, 1]} : vector<8x256xf32> to vector<8x128xf32>
    %90 = vector.extract_strided_slice %76 {offsets = [0, 256], sizes = [8, 128], strides = [1, 1]} : vector<8x384xf32> to vector<8x128xf32>
    %91 = vector.extract_strided_slice %79 {offsets = [0, 256], sizes = [8, 128], strides = [1, 1]} : vector<8x384xf32> to vector<8x128xf32>
    %92 = arith.mulf %88, %91 : vector<8x128xf32>
    %93 = arith.addf %90, %92 : vector<8x128xf32>
    %94 = math.tanh %93 : vector<8x128xf32>
    %cst_41 = arith.constant 1.000000e+00 : f32
    %95 = vector.broadcast %cst_41 : f32 to vector<8x128xf32>
    %96 = arith.subf %95, %89 : vector<8x128xf32>
    %97 = arith.mulf %96, %94 : vector<8x128xf32>
    %98 = arith.mulf %89, %68 : vector<8x128xf32>
    %99 = arith.addf %97, %98 : vector<8x128xf32>
    %c0_42 = arith.constant 0 : index
    %c2_43 = arith.constant 2 : index
    %c0_44 = arith.constant 0 : index
    %100 = vector.load %arg7[%c0_42, %c2_43, %c0_44] : memref<8x8x128xf32, #tpu.memory_space<vmem>>, vector<8x1x128xf32>
    %101 = vector.shape_cast %100 : vector<8x1x128xf32> to vector<8x128xf32>
    %102 = vector.shape_cast %99 : vector<8x128xf32> to vector<8x1x128xf32>
    tpu.vector_store %arg7[%c0_42, %c2_43, %c0_44], %102 {strides = array<i32>} : memref<8x8x128xf32, #tpu.memory_space<vmem>>, vector<8x1x128xf32>,
    %c0_45 = arith.constant 0 : index
    %c3 = arith.constant 3 : index
    %c0_46 = arith.constant 0 : index
    %103 = vector.load %arg2[%c0_45, %c3, %c0_46] : memref<8x8x64xf32, #tpu.memory_space<vmem>>, vector<8x1x64xf32>
    %104 = vector.shape_cast %103 : vector<8x1x64xf32> to vector<8x64xf32>
    %c0_47 = arith.constant 0 : index
    %c0_48 = arith.constant 0 : index
    %105 = vector.load %arg3[%c0_47, %c0_48] : memref<64x384xf32, #tpu.memory_space<vmem>>, vector<64x384xf32>
    %cst_49 = arith.constant dense<0.000000e+00> : vector<8x384xf32>
    %106 = tpu.matmul %104, %105, %cst_49 {dimension_numbers = #tpu.dot_dimension_numbers<[1], [0], [0], [1], [0, 0, 1, 1], [], []>} : vector<8x64xf32>, vector<64x384xf32>, vector<8x384xf32> -> vector<8x384xf32>
    %107 = arith.addf %106, %5 : vector<8x384xf32>
    %c0_50 = arith.constant 0 : index
    %c0_51 = arith.constant 0 : index
    %108 = vector.load %arg5[%c0_50, %c0_51] : memref<128x384xf32, #tpu.memory_space<vmem>>, vector<128x384xf32>
    %cst_52 = arith.constant dense<0.000000e+00> : vector<8x384xf32>
    %109 = tpu.matmul %99, %108, %cst_52 {dimension_numbers = #tpu.dot_dimension_numbers<[1], [0], [0], [1], [0, 0, 1, 1], [], []>} : vector<8x128xf32>, vector<128x384xf32>, vector<8x384xf32> -> vector<8x384xf32>
    %110 = arith.addf %109, %8 : vector<8x384xf32>
    %111 = vector.extract_strided_slice %107 {offsets = [0, 0], sizes = [8, 256], strides = [1, 1]} : vector<8x384xf32> to vector<8x256xf32>
    %112 = vector.extract_strided_slice %110 {offsets = [0, 0], sizes = [8, 256], strides = [1, 1]} : vector<8x384xf32> to vector<8x256xf32>
    %113 = arith.addf %111, %112 : vector<8x256xf32>
    %114 = arith.negf %113 : vector<8x256xf32>
    %115 = math.exp %114 : vector<8x256xf32>
    %cst_53 = arith.constant 1.000000e+00 : f32
    %116 = vector.broadcast %cst_53 : f32 to vector<8x256xf32>
    %117 = arith.addf %116, %115 : vector<8x256xf32>
    %118 = arith.divf %116, %117 : vector<8x256xf32>
    %119 = vector.extract_strided_slice %118 {offsets = [0, 0], sizes = [8, 128], strides = [1, 1]} : vector<8x256xf32> to vector<8x128xf32>
    %120 = vector.extract_strided_slice %118 {offsets = [0, 128], sizes = [8, 128], strides = [1, 1]} : vector<8x256xf32> to vector<8x128xf32>
    %121 = vector.extract_strided_slice %107 {offsets = [0, 256], sizes = [8, 128], strides = [1, 1]} : vector<8x384xf32> to vector<8x128xf32>
    %122 = vector.extract_strided_slice %110 {offsets = [0, 256], sizes = [8, 128], strides = [1, 1]} : vector<8x384xf32> to vector<8x128xf32>
    %123 = arith.mulf %119, %122 : vector<8x128xf32>
    %124 = arith.addf %121, %123 : vector<8x128xf32>
    %125 = math.tanh %124 : vector<8x128xf32>
    %cst_54 = arith.constant 1.000000e+00 : f32
    %126 = vector.broadcast %cst_54 : f32 to vector<8x128xf32>
    %127 = arith.subf %126, %120 : vector<8x128xf32>
    %128 = arith.mulf %127, %125 : vector<8x128xf32>
    %129 = arith.mulf %120, %99 : vector<8x128xf32>
    %130 = arith.addf %128, %129 : vector<8x128xf32>
    %c0_55 = arith.constant 0 : index
    %c3_56 = arith.constant 3 : index
    %c0_57 = arith.constant 0 : index
    %131 = vector.load %arg7[%c0_55, %c3_56, %c0_57] : memref<8x8x128xf32, #tpu.memory_space<vmem>>, vector<8x1x128xf32>
    %132 = vector.shape_cast %131 : vector<8x1x128xf32> to vector<8x128xf32>
    %133 = vector.shape_cast %130 : vector<8x128xf32> to vector<8x1x128xf32>
    tpu.vector_store %arg7[%c0_55, %c3_56, %c0_57], %133 {strides = array<i32>} : memref<8x8x128xf32, #tpu.memory_space<vmem>>, vector<8x1x128xf32>,
    %c0_58 = arith.constant 0 : index
    %c4 = arith.constant 4 : index
    %c0_59 = arith.constant 0 : index
    %134 = vector.load %arg2[%c0_58, %c4, %c0_59] : memref<8x8x64xf32, #tpu.memory_space<vmem>>, vector<8x1x64xf32>
    %135 = vector.shape_cast %134 : vector<8x1x64xf32> to vector<8x64xf32>
    %c0_60 = arith.constant 0 : index
    %c0_61 = arith.constant 0 : index
    %136 = vector.load %arg3[%c0_60, %c0_61] : memref<64x384xf32, #tpu.memory_space<vmem>>, vector<64x384xf32>
    %cst_62 = arith.constant dense<0.000000e+00> : vector<8x384xf32>
    %137 = tpu.matmul %135, %136, %cst_62 {dimension_numbers = #tpu.dot_dimension_numbers<[1], [0], [0], [1], [0, 0, 1, 1], [], []>} : vector<8x64xf32>, vector<64x384xf32>, vector<8x384xf32> -> vector<8x384xf32>
    %138 = arith.addf %137, %5 : vector<8x384xf32>
    %c0_63 = arith.constant 0 : index
    %c0_64 = arith.constant 0 : index
    %139 = vector.load %arg5[%c0_63, %c0_64] : memref<128x384xf32, #tpu.memory_space<vmem>>, vector<128x384xf32>
    %cst_65 = arith.constant dense<0.000000e+00> : vector<8x384xf32>
    %140 = tpu.matmul %130, %139, %cst_65 {dimension_numbers = #tpu.dot_dimension_numbers<[1], [0], [0], [1], [0, 0, 1, 1], [], []>} : vector<8x128xf32>, vector<128x384xf32>, vector<8x384xf32> -> vector<8x384xf32>
    %141 = arith.addf %140, %8 : vector<8x384xf32>
    %142 = vector.extract_strided_slice %138 {offsets = [0, 0], sizes = [8, 256], strides = [1, 1]} : vector<8x384xf32> to vector<8x256xf32>
    %143 = vector.extract_strided_slice %141 {offsets = [0, 0], sizes = [8, 256], strides = [1, 1]} : vector<8x384xf32> to vector<8x256xf32>
    %144 = arith.addf %142, %143 : vector<8x256xf32>
    %145 = arith.negf %144 : vector<8x256xf32>
    %146 = math.exp %145 : vector<8x256xf32>
    %cst_66 = arith.constant 1.000000e+00 : f32
    %147 = vector.broadcast %cst_66 : f32 to vector<8x256xf32>
    %148 = arith.addf %147, %146 : vector<8x256xf32>
    %149 = arith.divf %147, %148 : vector<8x256xf32>
    %150 = vector.extract_strided_slice %149 {offsets = [0, 0], sizes = [8, 128], strides = [1, 1]} : vector<8x256xf32> to vector<8x128xf32>
    %151 = vector.extract_strided_slice %149 {offsets = [0, 128], sizes = [8, 128], strides = [1, 1]} : vector<8x256xf32> to vector<8x128xf32>
    %152 = vector.extract_strided_slice %138 {offsets = [0, 256], sizes = [8, 128], strides = [1, 1]} : vector<8x384xf32> to vector<8x128xf32>
    %153 = vector.extract_strided_slice %141 {offsets = [0, 256], sizes = [8, 128], strides = [1, 1]} : vector<8x384xf32> to vector<8x128xf32>
    %154 = arith.mulf %150, %153 : vector<8x128xf32>
    %155 = arith.addf %152, %154 : vector<8x128xf32>
    %156 = math.tanh %155 : vector<8x128xf32>
    %cst_67 = arith.constant 1.000000e+00 : f32
    %157 = vector.broadcast %cst_67 : f32 to vector<8x128xf32>
    %158 = arith.subf %157, %151 : vector<8x128xf32>
    %159 = arith.mulf %158, %156 : vector<8x128xf32>
    %160 = arith.mulf %151, %130 : vector<8x128xf32>
    %161 = arith.addf %159, %160 : vector<8x128xf32>
    %c0_68 = arith.constant 0 : index
    %c4_69 = arith.constant 4 : index
    %c0_70 = arith.constant 0 : index
    %162 = vector.load %arg7[%c0_68, %c4_69, %c0_70] : memref<8x8x128xf32, #tpu.memory_space<vmem>>, vector<8x1x128xf32>
    %163 = vector.shape_cast %162 : vector<8x1x128xf32> to vector<8x128xf32>
    %164 = vector.shape_cast %161 : vector<8x128xf32> to vector<8x1x128xf32>
    tpu.vector_store %arg7[%c0_68, %c4_69, %c0_70], %164 {strides = array<i32>} : memref<8x8x128xf32, #tpu.memory_space<vmem>>, vector<8x1x128xf32>,
    %c0_71 = arith.constant 0 : index
    %c5 = arith.constant 5 : index
    %c0_72 = arith.constant 0 : index
    %165 = vector.load %arg2[%c0_71, %c5, %c0_72] : memref<8x8x64xf32, #tpu.memory_space<vmem>>, vector<8x1x64xf32>
    %166 = vector.shape_cast %165 : vector<8x1x64xf32> to vector<8x64xf32>
    %c0_73 = arith.constant 0 : index
    %c0_74 = arith.constant 0 : index
    %167 = vector.load %arg3[%c0_73, %c0_74] : memref<64x384xf32, #tpu.memory_space<vmem>>, vector<64x384xf32>
    %cst_75 = arith.constant dense<0.000000e+00> : vector<8x384xf32>
    %168 = tpu.matmul %166, %167, %cst_75 {dimension_numbers = #tpu.dot_dimension_numbers<[1], [0], [0], [1], [0, 0, 1, 1], [], []>} : vector<8x64xf32>, vector<64x384xf32>, vector<8x384xf32> -> vector<8x384xf32>
    %169 = arith.addf %168, %5 : vector<8x384xf32>
    %c0_76 = arith.constant 0 : index
    %c0_77 = arith.constant 0 : index
    %170 = vector.load %arg5[%c0_76, %c0_77] : memref<128x384xf32, #tpu.memory_space<vmem>>, vector<128x384xf32>
    %cst_78 = arith.constant dense<0.000000e+00> : vector<8x384xf32>
    %171 = tpu.matmul %161, %170, %cst_78 {dimension_numbers = #tpu.dot_dimension_numbers<[1], [0], [0], [1], [0, 0, 1, 1], [], []>} : vector<8x128xf32>, vector<128x384xf32>, vector<8x384xf32> -> vector<8x384xf32>
    %172 = arith.addf %171, %8 : vector<8x384xf32>
    %173 = vector.extract_strided_slice %169 {offsets = [0, 0], sizes = [8, 256], strides = [1, 1]} : vector<8x384xf32> to vector<8x256xf32>
    %174 = vector.extract_strided_slice %172 {offsets = [0, 0], sizes = [8, 256], strides = [1, 1]} : vector<8x384xf32> to vector<8x256xf32>
    %175 = arith.addf %173, %174 : vector<8x256xf32>
    %176 = arith.negf %175 : vector<8x256xf32>
    %177 = math.exp %176 : vector<8x256xf32>
    %cst_79 = arith.constant 1.000000e+00 : f32
    %178 = vector.broadcast %cst_79 : f32 to vector<8x256xf32>
    %179 = arith.addf %178, %177 : vector<8x256xf32>
    %180 = arith.divf %178, %179 : vector<8x256xf32>
    %181 = vector.extract_strided_slice %180 {offsets = [0, 0], sizes = [8, 128], strides = [1, 1]} : vector<8x256xf32> to vector<8x128xf32>
    %182 = vector.extract_strided_slice %180 {offsets = [0, 128], sizes = [8, 128], strides = [1, 1]} : vector<8x256xf32> to vector<8x128xf32>
    %183 = vector.extract_strided_slice %169 {offsets = [0, 256], sizes = [8, 128], strides = [1, 1]} : vector<8x384xf32> to vector<8x128xf32>
    %184 = vector.extract_strided_slice %172 {offsets = [0, 256], sizes = [8, 128], strides = [1, 1]} : vector<8x384xf32> to vector<8x128xf32>
    %185 = arith.mulf %181, %184 : vector<8x128xf32>
    %186 = arith.addf %183, %185 : vector<8x128xf32>
    %187 = math.tanh %186 : vector<8x128xf32>
    %cst_80 = arith.constant 1.000000e+00 : f32
    %188 = vector.broadcast %cst_80 : f32 to vector<8x128xf32>
    %189 = arith.subf %188, %182 : vector<8x128xf32>
    %190 = arith.mulf %189, %187 : vector<8x128xf32>
    %191 = arith.mulf %182, %161 : vector<8x128xf32>
    %192 = arith.addf %190, %191 : vector<8x128xf32>
    %c0_81 = arith.constant 0 : index
    %c5_82 = arith.constant 5 : index
    %c0_83 = arith.constant 0 : index
    %193 = vector.load %arg7[%c0_81, %c5_82, %c0_83] : memref<8x8x128xf32, #tpu.memory_space<vmem>>, vector<8x1x128xf32>
    %194 = vector.shape_cast %193 : vector<8x1x128xf32> to vector<8x128xf32>
    %195 = vector.shape_cast %192 : vector<8x128xf32> to vector<8x1x128xf32>
    tpu.vector_store %arg7[%c0_81, %c5_82, %c0_83], %195 {strides = array<i32>} : memref<8x8x128xf32, #tpu.memory_space<vmem>>, vector<8x1x128xf32>,
    %c0_84 = arith.constant 0 : index
    %c6 = arith.constant 6 : index
    %c0_85 = arith.constant 0 : index
    %196 = vector.load %arg2[%c0_84, %c6, %c0_85] : memref<8x8x64xf32, #tpu.memory_space<vmem>>, vector<8x1x64xf32>
    %197 = vector.shape_cast %196 : vector<8x1x64xf32> to vector<8x64xf32>
    %c0_86 = arith.constant 0 : index
    %c0_87 = arith.constant 0 : index
    %198 = vector.load %arg3[%c0_86, %c0_87] : memref<64x384xf32, #tpu.memory_space<vmem>>, vector<64x384xf32>
    %cst_88 = arith.constant dense<0.000000e+00> : vector<8x384xf32>
    %199 = tpu.matmul %197, %198, %cst_88 {dimension_numbers = #tpu.dot_dimension_numbers<[1], [0], [0], [1], [0, 0, 1, 1], [], []>} : vector<8x64xf32>, vector<64x384xf32>, vector<8x384xf32> -> vector<8x384xf32>
    %200 = arith.addf %199, %5 : vector<8x384xf32>
    %c0_89 = arith.constant 0 : index
    %c0_90 = arith.constant 0 : index
    %201 = vector.load %arg5[%c0_89, %c0_90] : memref<128x384xf32, #tpu.memory_space<vmem>>, vector<128x384xf32>
    %cst_91 = arith.constant dense<0.000000e+00> : vector<8x384xf32>
    %202 = tpu.matmul %192, %201, %cst_91 {dimension_numbers = #tpu.dot_dimension_numbers<[1], [0], [0], [1], [0, 0, 1, 1], [], []>} : vector<8x128xf32>, vector<128x384xf32>, vector<8x384xf32> -> vector<8x384xf32>
    %203 = arith.addf %202, %8 : vector<8x384xf32>
    %204 = vector.extract_strided_slice %200 {offsets = [0, 0], sizes = [8, 256], strides = [1, 1]} : vector<8x384xf32> to vector<8x256xf32>
    %205 = vector.extract_strided_slice %203 {offsets = [0, 0], sizes = [8, 256], strides = [1, 1]} : vector<8x384xf32> to vector<8x256xf32>
    %206 = arith.addf %204, %205 : vector<8x256xf32>
    %207 = arith.negf %206 : vector<8x256xf32>
    %208 = math.exp %207 : vector<8x256xf32>
    %cst_92 = arith.constant 1.000000e+00 : f32
    %209 = vector.broadcast %cst_92 : f32 to vector<8x256xf32>
    %210 = arith.addf %209, %208 : vector<8x256xf32>
    %211 = arith.divf %209, %210 : vector<8x256xf32>
    %212 = vector.extract_strided_slice %211 {offsets = [0, 0], sizes = [8, 128], strides = [1, 1]} : vector<8x256xf32> to vector<8x128xf32>
    %213 = vector.extract_strided_slice %211 {offsets = [0, 128], sizes = [8, 128], strides = [1, 1]} : vector<8x256xf32> to vector<8x128xf32>
    %214 = vector.extract_strided_slice %200 {offsets = [0, 256], sizes = [8, 128], strides = [1, 1]} : vector<8x384xf32> to vector<8x128xf32>
    %215 = vector.extract_strided_slice %203 {offsets = [0, 256], sizes = [8, 128], strides = [1, 1]} : vector<8x384xf32> to vector<8x128xf32>
    %216 = arith.mulf %212, %215 : vector<8x128xf32>
    %217 = arith.addf %214, %216 : vector<8x128xf32>
    %218 = math.tanh %217 : vector<8x128xf32>
    %cst_93 = arith.constant 1.000000e+00 : f32
    %219 = vector.broadcast %cst_93 : f32 to vector<8x128xf32>
    %220 = arith.subf %219, %213 : vector<8x128xf32>
    %221 = arith.mulf %220, %218 : vector<8x128xf32>
    %222 = arith.mulf %213, %192 : vector<8x128xf32>
    %223 = arith.addf %221, %222 : vector<8x128xf32>
    %c0_94 = arith.constant 0 : index
    %c6_95 = arith.constant 6 : index
    %c0_96 = arith.constant 0 : index
    %224 = vector.load %arg7[%c0_94, %c6_95, %c0_96] : memref<8x8x128xf32, #tpu.memory_space<vmem>>, vector<8x1x128xf32>
    %225 = vector.shape_cast %224 : vector<8x1x128xf32> to vector<8x128xf32>
    %226 = vector.shape_cast %223 : vector<8x128xf32> to vector<8x1x128xf32>
    tpu.vector_store %arg7[%c0_94, %c6_95, %c0_96], %226 {strides = array<i32>} : memref<8x8x128xf32, #tpu.memory_space<vmem>>, vector<8x1x128xf32>,
    %c0_97 = arith.constant 0 : index
    %c7 = arith.constant 7 : index
    %c0_98 = arith.constant 0 : index
    %227 = vector.load %arg2[%c0_97, %c7, %c0_98] : memref<8x8x64xf32, #tpu.memory_space<vmem>>, vector<8x1x64xf32>
    %228 = vector.shape_cast %227 : vector<8x1x64xf32> to vector<8x64xf32>
    %c0_99 = arith.constant 0 : index
    %c0_100 = arith.constant 0 : index
    %229 = vector.load %arg3[%c0_99, %c0_100] : memref<64x384xf32, #tpu.memory_space<vmem>>, vector<64x384xf32>
    %cst_101 = arith.constant dense<0.000000e+00> : vector<8x384xf32>
    %230 = tpu.matmul %228, %229, %cst_101 {dimension_numbers = #tpu.dot_dimension_numbers<[1], [0], [0], [1], [0, 0, 1, 1], [], []>} : vector<8x64xf32>, vector<64x384xf32>, vector<8x384xf32> -> vector<8x384xf32>
    %231 = arith.addf %230, %5 : vector<8x384xf32>
    %c0_102 = arith.constant 0 : index
    %c0_103 = arith.constant 0 : index
    %232 = vector.load %arg5[%c0_102, %c0_103] : memref<128x384xf32, #tpu.memory_space<vmem>>, vector<128x384xf32>
    %cst_104 = arith.constant dense<0.000000e+00> : vector<8x384xf32>
    %233 = tpu.matmul %223, %232, %cst_104 {dimension_numbers = #tpu.dot_dimension_numbers<[1], [0], [0], [1], [0, 0, 1, 1], [], []>} : vector<8x128xf32>, vector<128x384xf32>, vector<8x384xf32> -> vector<8x384xf32>
    %234 = arith.addf %233, %8 : vector<8x384xf32>
    %235 = vector.extract_strided_slice %231 {offsets = [0, 0], sizes = [8, 256], strides = [1, 1]} : vector<8x384xf32> to vector<8x256xf32>
    %236 = vector.extract_strided_slice %234 {offsets = [0, 0], sizes = [8, 256], strides = [1, 1]} : vector<8x384xf32> to vector<8x256xf32>
    %237 = arith.addf %235, %236 : vector<8x256xf32>
    %238 = arith.negf %237 : vector<8x256xf32>
    %239 = math.exp %238 : vector<8x256xf32>
    %cst_105 = arith.constant 1.000000e+00 : f32
    %240 = vector.broadcast %cst_105 : f32 to vector<8x256xf32>
    %241 = arith.addf %240, %239 : vector<8x256xf32>
    %242 = arith.divf %240, %241 : vector<8x256xf32>
    %243 = vector.extract_strided_slice %242 {offsets = [0, 0], sizes = [8, 128], strides = [1, 1]} : vector<8x256xf32> to vector<8x128xf32>
    %244 = vector.extract_strided_slice %242 {offsets = [0, 128], sizes = [8, 128], strides = [1, 1]} : vector<8x256xf32> to vector<8x128xf32>
    %245 = vector.extract_strided_slice %231 {offsets = [0, 256], sizes = [8, 128], strides = [1, 1]} : vector<8x384xf32> to vector<8x128xf32>
    %246 = vector.extract_strided_slice %234 {offsets = [0, 256], sizes = [8, 128], strides = [1, 1]} : vector<8x384xf32> to vector<8x128xf32>
    %247 = arith.mulf %243, %246 : vector<8x128xf32>
    %248 = arith.addf %245, %247 : vector<8x128xf32>
    %249 = math.tanh %248 : vector<8x128xf32>
    %cst_106 = arith.constant 1.000000e+00 : f32
    %250 = vector.broadcast %cst_106 : f32 to vector<8x128xf32>
    %251 = arith.subf %250, %244 : vector<8x128xf32>
    %252 = arith.mulf %251, %249 : vector<8x128xf32>
    %253 = arith.mulf %244, %223 : vector<8x128xf32>
    %254 = arith.addf %252, %253 : vector<8x128xf32>
    %c0_107 = arith.constant 0 : index
    %c7_108 = arith.constant 7 : index
    %c0_109 = arith.constant 0 : index
    %255 = vector.load %arg7[%c0_107, %c7_108, %c0_109] : memref<8x8x128xf32, #tpu.memory_space<vmem>>, vector<8x1x128xf32>
    %256 = vector.shape_cast %255 : vector<8x1x128xf32> to vector<8x128xf32>
    %257 = vector.shape_cast %254 : vector<8x128xf32> to vector<8x1x128xf32>
    tpu.vector_store %arg7[%c0_107, %c7_108, %c0_109], %257 {strides = array<i32>} : memref<8x8x128xf32, #tpu.memory_space<vmem>>, vector<8x1x128xf32>,
    %c0_110 = arith.constant 0 : index
    %c0_111 = arith.constant 0 : index
    %258 = vector.load %arg8[%c0_110, %c0_111] : memref<8x128xf32, #tpu.memory_space<vmem>>, vector<8x128xf32>
    tpu.vector_store %arg8[%c0_110, %c0_111], %254 {strides = array<i32>} : memref<8x128xf32, #tpu.memory_space<vmem>>, vector<8x128xf32>,
    return
  }
  func.func @transform_0(%arg0: i32, %arg1: i32) -> (i32, i32, i32) {
    %c0_i32 = arith.constant 0 : i32
    %c0_i32_0 = arith.constant 0 : i32
    return %arg0, %arg1, %c0_i32 : i32, i32, i32
  }
  func.func @transform_1(%arg0: i32, %arg1: i32) -> (i32, i32) {
    %c0_i32 = arith.constant 0 : i32
    %c0_i32_0 = arith.constant 0 : i32
    %c0_i32_1 = arith.constant 0 : i32
    return %c0_i32, %c0_i32_0 : i32, i32
  }
  func.func @transform_2(%arg0: i32, %arg1: i32) -> (i32, i32) {
    %c0_i32 = arith.constant 0 : i32
    %c0_i32_0 = arith.constant 0 : i32
    %c0_i32_1 = arith.constant 0 : i32
    return %c0_i32, %c0_i32_0 : i32, i32
  }
  func.func @transform_3(%arg0: i32, %arg1: i32) -> (i32, i32) {
    %c0_i32 = arith.constant 0 : i32
    %c0_i32_0 = arith.constant 0 : i32
    %c0_i32_1 = arith.constant 0 : i32
    return %c0_i32, %c0_i32_0 : i32, i32
  }
  func.func @transform_4(%arg0: i32, %arg1: i32) -> (i32, i32) {
    %c0_i32 = arith.constant 0 : i32
    %c0_i32_0 = arith.constant 0 : i32
    %c0_i32_1 = arith.constant 0 : i32
    return %c0_i32, %c0_i32_0 : i32, i32
  }
  func.func @transform_5(%arg0: i32, %arg1: i32) -> (i32, i32, i32) {
    %c0_i32 = arith.constant 0 : i32
    %c0_i32_0 = arith.constant 0 : i32
    return %arg0, %arg1, %c0_i32 : i32, i32, i32
  }
}

module attributes {stable_mosaic.version = 11 : i64} {
  func.func @gru_fused_layer_kernel(%arg0: i32, %arg1: i32, %arg2: memref<8x8x128xf32, #tpu.memory_space<vmem>>, %arg3: memref<128x384xf32, #tpu.memory_space<vmem>>, %arg4: memref<1x384xf32, #tpu.memory_space<vmem>>, %arg5: memref<128x384xf32, #tpu.memory_space<vmem>>, %arg6: memref<1x384xf32, #tpu.memory_space<vmem>>, %arg7: memref<8x8x128xf32, #tpu.memory_space<vmem>>, %arg8: memref<8x128xf32, #tpu.memory_space<vmem>>) attributes {dimension_semantics = [#tpu.dimension_semantics<parallel>, #tpu.dimension_semantics<arbitrary>], iteration_bounds = array<i64: 1, 2>, scalar_prefetch = 0 : i64, scratch_operands = 1 : i64, tpu.core_type = #tpu.core_type<tc>, window_params = [{transform_indices = @transform_0, window_bounds = array<i64: 8, 8, 128>}, {pipeline_mode = #tpu.pipeline_mode<synchronous>, transform_indices = @transform_1, window_bounds = array<i64: 128, 384>}, {pipeline_mode = #tpu.pipeline_mode<synchronous>, transform_indices = @transform_2, window_bounds = array<i64: 1, 384>}, {pipeline_mode = #tpu.pipeline_mode<synchronous>, transform_indices = @transform_3, window_bounds = array<i64: 128, 384>}, {pipeline_mode = #tpu.pipeline_mode<synchronous>, transform_indices = @transform_4, window_bounds = array<i64: 1, 384>}, {transform_indices = @transform_5, window_bounds = array<i64: 8, 8, 128>}]} {
    %c0_i32 = arith.constant 0 : i32
    %0 = arith.cmpi eq, %arg1, %c0_i32 : i32
    %1 = arith.extui %0 : i1 to i32
    %c0_i32_0 = arith.constant 0 : i32
    %2 = arith.cmpi ne, %1, %c0_i32_0 : i32
    scf.if %2 {
      %cst_112 = arith.constant 0.000000e+00 : f32
      %259 = vector.broadcast %cst_112 : f32 to vector<8x128xf32>
      %c0_113 = arith.constant 0 : index
      %c0_114 = arith.constant 0 : index
      %260 = vector.load %arg8[%c0_113, %c0_114] : memref<8x128xf32, #tpu.memory_space<vmem>>, vector<8x128xf32>
      tpu.vector_store %arg8[%c0_113, %c0_114], %259 {strides = array<i32>} : memref<8x128xf32, #tpu.memory_space<vmem>>, vector<8x128xf32>,
    } else {
    }
    %c0 = arith.constant 0 : index
    %c0_1 = arith.constant 0 : index
    %3 = vector.load %arg4[%c0, %c0_1] : memref<1x384xf32, #tpu.memory_space<vmem>>, vector<1x384xf32>
    %4 = vector.shape_cast %3 : vector<1x384xf32> to vector<1x384xf32>
    %5 = vector.broadcast %4 : vector<1x384xf32> to vector<8x384xf32>
    %c0_2 = arith.constant 0 : index
    %c0_3 = arith.constant 0 : index
    %6 = vector.load %arg6[%c0_2, %c0_3] : memref<1x384xf32, #tpu.memory_space<vmem>>, vector<1x384xf32>
    %7 = vector.shape_cast %6 : vector<1x384xf32> to vector<1x384xf32>
    %8 = vector.broadcast %7 : vector<1x384xf32> to vector<8x384xf32>
    %c0_4 = arith.constant 0 : index
    %c0_5 = arith.constant 0 : index
    %9 = vector.load %arg8[%c0_4, %c0_5] : memref<8x128xf32, #tpu.memory_space<vmem>>, vector<8x128xf32>
    %c0_6 = arith.constant 0 : index
    %c0_7 = arith.constant 0 : index
    %c0_8 = arith.constant 0 : index
    %10 = vector.load %arg2[%c0_6, %c0_7, %c0_8] : memref<8x8x128xf32, #tpu.memory_space<vmem>>, vector<8x1x128xf32>
    %11 = vector.shape_cast %10 : vector<8x1x128xf32> to vector<8x128xf32>
    %c0_9 = arith.constant 0 : index
    %c0_10 = arith.constant 0 : index
    %12 = vector.load %arg3[%c0_9, %c0_10] : memref<128x384xf32, #tpu.memory_space<vmem>>, vector<128x384xf32>
    %cst = arith.constant dense<0.000000e+00> : vector<8x384xf32>
    %13 = tpu.matmul %11, %12, %cst {dimension_numbers = #tpu.dot_dimension_numbers<[1], [0], [0], [1], [0, 0, 1, 1], [], []>} : vector<8x128xf32>, vector<128x384xf32>, vector<8x384xf32> -> vector<8x384xf32>
    %14 = arith.addf %13, %5 : vector<8x384xf32>
    %c0_11 = arith.constant 0 : index
    %c0_12 = arith.constant 0 : index
    %15 = vector.load %arg5[%c0_11, %c0_12] : memref<128x384xf32, #tpu.memory_space<vmem>>, vector<128x384xf32>
    %cst_13 = arith.constant dense<0.000000e+00> : vector<8x384xf32>
    %16 = tpu.matmul %9, %15, %cst_13 {dimension_numbers = #tpu.dot_dimension_numbers<[1], [0], [0], [1], [0, 0, 1, 1], [], []>} : vector<8x128xf32>, vector<128x384xf32>, vector<8x384xf32> -> vector<8x384xf32>
    %17 = arith.addf %16, %8 : vector<8x384xf32>
    %18 = vector.extract_strided_slice %14 {offsets = [0, 0], sizes = [8, 256], strides = [1, 1]} : vector<8x384xf32> to vector<8x256xf32>
    %19 = vector.extract_strided_slice %17 {offsets = [0, 0], sizes = [8, 256], strides = [1, 1]} : vector<8x384xf32> to vector<8x256xf32>
    %20 = arith.addf %18, %19 : vector<8x256xf32>
    %21 = arith.negf %20 : vector<8x256xf32>
    %22 = math.exp %21 : vector<8x256xf32>
    %cst_14 = arith.constant 1.000000e+00 : f32
    %23 = vector.broadcast %cst_14 : f32 to vector<8x256xf32>
    %24 = arith.addf %23, %22 : vector<8x256xf32>
    %25 = arith.divf %23, %24 : vector<8x256xf32>
    %26 = vector.extract_strided_slice %25 {offsets = [0, 0], sizes = [8, 128], strides = [1, 1]} : vector<8x256xf32> to vector<8x128xf32>
    %27 = vector.extract_strided_slice %25 {offsets = [0, 128], sizes = [8, 128], strides = [1, 1]} : vector<8x256xf32> to vector<8x128xf32>
    %28 = vector.extract_strided_slice %14 {offsets = [0, 256], sizes = [8, 128], strides = [1, 1]} : vector<8x384xf32> to vector<8x128xf32>
    %29 = vector.extract_strided_slice %17 {offsets = [0, 256], sizes = [8, 128], strides = [1, 1]} : vector<8x384xf32> to vector<8x128xf32>
    %30 = arith.mulf %26, %29 : vector<8x128xf32>
    %31 = arith.addf %28, %30 : vector<8x128xf32>
    %32 = math.tanh %31 : vector<8x128xf32>
    %cst_15 = arith.constant 1.000000e+00 : f32
    %33 = vector.broadcast %cst_15 : f32 to vector<8x128xf32>
    %34 = arith.subf %33, %27 : vector<8x128xf32>
    %35 = arith.mulf %34, %32 : vector<8x128xf32>
    %36 = arith.mulf %27, %9 : vector<8x128xf32>
    %37 = arith.addf %35, %36 : vector<8x128xf32>
    %c0_16 = arith.constant 0 : index
    %c0_17 = arith.constant 0 : index
    %c0_18 = arith.constant 0 : index
    %38 = vector.load %arg7[%c0_16, %c0_17, %c0_18] : memref<8x8x128xf32, #tpu.memory_space<vmem>>, vector<8x1x128xf32>
    %39 = vector.shape_cast %38 : vector<8x1x128xf32> to vector<8x128xf32>
    %40 = vector.shape_cast %37 : vector<8x128xf32> to vector<8x1x128xf32>
    tpu.vector_store %arg7[%c0_16, %c0_17, %c0_18], %40 {strides = array<i32>} : memref<8x8x128xf32, #tpu.memory_space<vmem>>, vector<8x1x128xf32>,
    %c0_19 = arith.constant 0 : index
    %c1 = arith.constant 1 : index
    %c0_20 = arith.constant 0 : index
    %41 = vector.load %arg2[%c0_19, %c1, %c0_20] : memref<8x8x128xf32, #tpu.memory_space<vmem>>, vector<8x1x128xf32>
    %42 = vector.shape_cast %41 : vector<8x1x128xf32> to vector<8x128xf32>
    %c0_21 = arith.constant 0 : index
    %c0_22 = arith.constant 0 : index
    %43 = vector.load %arg3[%c0_21, %c0_22] : memref<128x384xf32, #tpu.memory_space<vmem>>, vector<128x384xf32>
    %cst_23 = arith.constant dense<0.000000e+00> : vector<8x384xf32>
    %44 = tpu.matmul %42, %43, %cst_23 {dimension_numbers = #tpu.dot_dimension_numbers<[1], [0], [0], [1], [0, 0, 1, 1], [], []>} : vector<8x128xf32>, vector<128x384xf32>, vector<8x384xf32> -> vector<8x384xf32>
    %45 = arith.addf %44, %5 : vector<8x384xf32>
    %c0_24 = arith.constant 0 : index
    %c0_25 = arith.constant 0 : index
    %46 = vector.load %arg5[%c0_24, %c0_25] : memref<128x384xf32, #tpu.memory_space<vmem>>, vector<128x384xf32>
    %cst_26 = arith.constant dense<0.000000e+00> : vector<8x384xf32>
    %47 = tpu.matmul %37, %46, %cst_26 {dimension_numbers = #tpu.dot_dimension_numbers<[1], [0], [0], [1], [0, 0, 1, 1], [], []>} : vector<8x128xf32>, vector<128x384xf32>, vector<8x384xf32> -> vector<8x384xf32>
    %48 = arith.addf %47, %8 : vector<8x384xf32>
    %49 = vector.extract_strided_slice %45 {offsets = [0, 0], sizes = [8, 256], strides = [1, 1]} : vector<8x384xf32> to vector<8x256xf32>
    %50 = vector.extract_strided_slice %48 {offsets = [0, 0], sizes = [8, 256], strides = [1, 1]} : vector<8x384xf32> to vector<8x256xf32>
    %51 = arith.addf %49, %50 : vector<8x256xf32>
    %52 = arith.negf %51 : vector<8x256xf32>
    %53 = math.exp %52 : vector<8x256xf32>
    %cst_27 = arith.constant 1.000000e+00 : f32
    %54 = vector.broadcast %cst_27 : f32 to vector<8x256xf32>
    %55 = arith.addf %54, %53 : vector<8x256xf32>
    %56 = arith.divf %54, %55 : vector<8x256xf32>
    %57 = vector.extract_strided_slice %56 {offsets = [0, 0], sizes = [8, 128], strides = [1, 1]} : vector<8x256xf32> to vector<8x128xf32>
    %58 = vector.extract_strided_slice %56 {offsets = [0, 128], sizes = [8, 128], strides = [1, 1]} : vector<8x256xf32> to vector<8x128xf32>
    %59 = vector.extract_strided_slice %45 {offsets = [0, 256], sizes = [8, 128], strides = [1, 1]} : vector<8x384xf32> to vector<8x128xf32>
    %60 = vector.extract_strided_slice %48 {offsets = [0, 256], sizes = [8, 128], strides = [1, 1]} : vector<8x384xf32> to vector<8x128xf32>
    %61 = arith.mulf %57, %60 : vector<8x128xf32>
    %62 = arith.addf %59, %61 : vector<8x128xf32>
    %63 = math.tanh %62 : vector<8x128xf32>
    %cst_28 = arith.constant 1.000000e+00 : f32
    %64 = vector.broadcast %cst_28 : f32 to vector<8x128xf32>
    %65 = arith.subf %64, %58 : vector<8x128xf32>
    %66 = arith.mulf %65, %63 : vector<8x128xf32>
    %67 = arith.mulf %58, %37 : vector<8x128xf32>
    %68 = arith.addf %66, %67 : vector<8x128xf32>
    %c0_29 = arith.constant 0 : index
    %c1_30 = arith.constant 1 : index
    %c0_31 = arith.constant 0 : index
    %69 = vector.load %arg7[%c0_29, %c1_30, %c0_31] : memref<8x8x128xf32, #tpu.memory_space<vmem>>, vector<8x1x128xf32>
    %70 = vector.shape_cast %69 : vector<8x1x128xf32> to vector<8x128xf32>
    %71 = vector.shape_cast %68 : vector<8x128xf32> to vector<8x1x128xf32>
    tpu.vector_store %arg7[%c0_29, %c1_30, %c0_31], %71 {strides = array<i32>} : memref<8x8x128xf32, #tpu.memory_space<vmem>>, vector<8x1x128xf32>,
    %c0_32 = arith.constant 0 : index
    %c2 = arith.constant 2 : index
    %c0_33 = arith.constant 0 : index
    %72 = vector.load %arg2[%c0_32, %c2, %c0_33] : memref<8x8x128xf32, #tpu.memory_space<vmem>>, vector<8x1x128xf32>
    %73 = vector.shape_cast %72 : vector<8x1x128xf32> to vector<8x128xf32>
    %c0_34 = arith.constant 0 : index
    %c0_35 = arith.constant 0 : index
    %74 = vector.load %arg3[%c0_34, %c0_35] : memref<128x384xf32, #tpu.memory_space<vmem>>, vector<128x384xf32>
    %cst_36 = arith.constant dense<0.000000e+00> : vector<8x384xf32>
    %75 = tpu.matmul %73, %74, %cst_36 {dimension_numbers = #tpu.dot_dimension_numbers<[1], [0], [0], [1], [0, 0, 1, 1], [], []>} : vector<8x128xf32>, vector<128x384xf32>, vector<8x384xf32> -> vector<8x384xf32>
    %76 = arith.addf %75, %5 : vector<8x384xf32>
    %c0_37 = arith.constant 0 : index
    %c0_38 = arith.constant 0 : index
    %77 = vector.load %arg5[%c0_37, %c0_38] : memref<128x384xf32, #tpu.memory_space<vmem>>, vector<128x384xf32>
    %cst_39 = arith.constant dense<0.000000e+00> : vector<8x384xf32>
    %78 = tpu.matmul %68, %77, %cst_39 {dimension_numbers = #tpu.dot_dimension_numbers<[1], [0], [0], [1], [0, 0, 1, 1], [], []>} : vector<8x128xf32>, vector<128x384xf32>, vector<8x384xf32> -> vector<8x384xf32>
    %79 = arith.addf %78, %8 : vector<8x384xf32>
    %80 = vector.extract_strided_slice %76 {offsets = [0, 0], sizes = [8, 256], strides = [1, 1]} : vector<8x384xf32> to vector<8x256xf32>
    %81 = vector.extract_strided_slice %79 {offsets = [0, 0], sizes = [8, 256], strides = [1, 1]} : vector<8x384xf32> to vector<8x256xf32>
    %82 = arith.addf %80, %81 : vector<8x256xf32>
    %83 = arith.negf %82 : vector<8x256xf32>
    %84 = math.exp %83 : vector<8x256xf32>
    %cst_40 = arith.constant 1.000000e+00 : f32
    %85 = vector.broadcast %cst_40 : f32 to vector<8x256xf32>
    %86 = arith.addf %85, %84 : vector<8x256xf32>
    %87 = arith.divf %85, %86 : vector<8x256xf32>
    %88 = vector.extract_strided_slice %87 {offsets = [0, 0], sizes = [8, 128], strides = [1, 1]} : vector<8x256xf32> to vector<8x128xf32>
    %89 = vector.extract_strided_slice %87 {offsets = [0, 128], sizes = [8, 128], strides = [1, 1]} : vector<8x256xf32> to vector<8x128xf32>
    %90 = vector.extract_strided_slice %76 {offsets = [0, 256], sizes = [8, 128], strides = [1, 1]} : vector<8x384xf32> to vector<8x128xf32>
    %91 = vector.extract_strided_slice %79 {offsets = [0, 256], sizes = [8, 128], strides = [1, 1]} : vector<8x384xf32> to vector<8x128xf32>
    %92 = arith.mulf %88, %91 : vector<8x128xf32>
    %93 = arith.addf %90, %92 : vector<8x128xf32>
    %94 = math.tanh %93 : vector<8x128xf32>
    %cst_41 = arith.constant 1.000000e+00 : f32
    %95 = vector.broadcast %cst_41 : f32 to vector<8x128xf32>
    %96 = arith.subf %95, %89 : vector<8x128xf32>
    %97 = arith.mulf %96, %94 : vector<8x128xf32>
    %98 = arith.mulf %89, %68 : vector<8x128xf32>
    %99 = arith.addf %97, %98 : vector<8x128xf32>
    %c0_42 = arith.constant 0 : index
    %c2_43 = arith.constant 2 : index
    %c0_44 = arith.constant 0 : index
    %100 = vector.load %arg7[%c0_42, %c2_43, %c0_44] : memref<8x8x128xf32, #tpu.memory_space<vmem>>, vector<8x1x128xf32>
    %101 = vector.shape_cast %100 : vector<8x1x128xf32> to vector<8x128xf32>
    %102 = vector.shape_cast %99 : vector<8x128xf32> to vector<8x1x128xf32>
    tpu.vector_store %arg7[%c0_42, %c2_43, %c0_44], %102 {strides = array<i32>} : memref<8x8x128xf32, #tpu.memory_space<vmem>>, vector<8x1x128xf32>,
    %c0_45 = arith.constant 0 : index
    %c3 = arith.constant 3 : index
    %c0_46 = arith.constant 0 : index
    %103 = vector.load %arg2[%c0_45, %c3, %c0_46] : memref<8x8x128xf32, #tpu.memory_space<vmem>>, vector<8x1x128xf32>
    %104 = vector.shape_cast %103 : vector<8x1x128xf32> to vector<8x128xf32>
    %c0_47 = arith.constant 0 : index
    %c0_48 = arith.constant 0 : index
    %105 = vector.load %arg3[%c0_47, %c0_48] : memref<128x384xf32, #tpu.memory_space<vmem>>, vector<128x384xf32>
    %cst_49 = arith.constant dense<0.000000e+00> : vector<8x384xf32>
    %106 = tpu.matmul %104, %105, %cst_49 {dimension_numbers = #tpu.dot_dimension_numbers<[1], [0], [0], [1], [0, 0, 1, 1], [], []>} : vector<8x128xf32>, vector<128x384xf32>, vector<8x384xf32> -> vector<8x384xf32>
    %107 = arith.addf %106, %5 : vector<8x384xf32>
    %c0_50 = arith.constant 0 : index
    %c0_51 = arith.constant 0 : index
    %108 = vector.load %arg5[%c0_50, %c0_51] : memref<128x384xf32, #tpu.memory_space<vmem>>, vector<128x384xf32>
    %cst_52 = arith.constant dense<0.000000e+00> : vector<8x384xf32>
    %109 = tpu.matmul %99, %108, %cst_52 {dimension_numbers = #tpu.dot_dimension_numbers<[1], [0], [0], [1], [0, 0, 1, 1], [], []>} : vector<8x128xf32>, vector<128x384xf32>, vector<8x384xf32> -> vector<8x384xf32>
    %110 = arith.addf %109, %8 : vector<8x384xf32>
    %111 = vector.extract_strided_slice %107 {offsets = [0, 0], sizes = [8, 256], strides = [1, 1]} : vector<8x384xf32> to vector<8x256xf32>
    %112 = vector.extract_strided_slice %110 {offsets = [0, 0], sizes = [8, 256], strides = [1, 1]} : vector<8x384xf32> to vector<8x256xf32>
    %113 = arith.addf %111, %112 : vector<8x256xf32>
    %114 = arith.negf %113 : vector<8x256xf32>
    %115 = math.exp %114 : vector<8x256xf32>
    %cst_53 = arith.constant 1.000000e+00 : f32
    %116 = vector.broadcast %cst_53 : f32 to vector<8x256xf32>
    %117 = arith.addf %116, %115 : vector<8x256xf32>
    %118 = arith.divf %116, %117 : vector<8x256xf32>
    %119 = vector.extract_strided_slice %118 {offsets = [0, 0], sizes = [8, 128], strides = [1, 1]} : vector<8x256xf32> to vector<8x128xf32>
    %120 = vector.extract_strided_slice %118 {offsets = [0, 128], sizes = [8, 128], strides = [1, 1]} : vector<8x256xf32> to vector<8x128xf32>
    %121 = vector.extract_strided_slice %107 {offsets = [0, 256], sizes = [8, 128], strides = [1, 1]} : vector<8x384xf32> to vector<8x128xf32>
    %122 = vector.extract_strided_slice %110 {offsets = [0, 256], sizes = [8, 128], strides = [1, 1]} : vector<8x384xf32> to vector<8x128xf32>
    %123 = arith.mulf %119, %122 : vector<8x128xf32>
    %124 = arith.addf %121, %123 : vector<8x128xf32>
    %125 = math.tanh %124 : vector<8x128xf32>
    %cst_54 = arith.constant 1.000000e+00 : f32
    %126 = vector.broadcast %cst_54 : f32 to vector<8x128xf32>
    %127 = arith.subf %126, %120 : vector<8x128xf32>
    %128 = arith.mulf %127, %125 : vector<8x128xf32>
    %129 = arith.mulf %120, %99 : vector<8x128xf32>
    %130 = arith.addf %128, %129 : vector<8x128xf32>
    %c0_55 = arith.constant 0 : index
    %c3_56 = arith.constant 3 : index
    %c0_57 = arith.constant 0 : index
    %131 = vector.load %arg7[%c0_55, %c3_56, %c0_57] : memref<8x8x128xf32, #tpu.memory_space<vmem>>, vector<8x1x128xf32>
    %132 = vector.shape_cast %131 : vector<8x1x128xf32> to vector<8x128xf32>
    %133 = vector.shape_cast %130 : vector<8x128xf32> to vector<8x1x128xf32>
    tpu.vector_store %arg7[%c0_55, %c3_56, %c0_57], %133 {strides = array<i32>} : memref<8x8x128xf32, #tpu.memory_space<vmem>>, vector<8x1x128xf32>,
    %c0_58 = arith.constant 0 : index
    %c4 = arith.constant 4 : index
    %c0_59 = arith.constant 0 : index
    %134 = vector.load %arg2[%c0_58, %c4, %c0_59] : memref<8x8x128xf32, #tpu.memory_space<vmem>>, vector<8x1x128xf32>
    %135 = vector.shape_cast %134 : vector<8x1x128xf32> to vector<8x128xf32>
    %c0_60 = arith.constant 0 : index
    %c0_61 = arith.constant 0 : index
    %136 = vector.load %arg3[%c0_60, %c0_61] : memref<128x384xf32, #tpu.memory_space<vmem>>, vector<128x384xf32>
    %cst_62 = arith.constant dense<0.000000e+00> : vector<8x384xf32>
    %137 = tpu.matmul %135, %136, %cst_62 {dimension_numbers = #tpu.dot_dimension_numbers<[1], [0], [0], [1], [0, 0, 1, 1], [], []>} : vector<8x128xf32>, vector<128x384xf32>, vector<8x384xf32> -> vector<8x384xf32>
    %138 = arith.addf %137, %5 : vector<8x384xf32>
    %c0_63 = arith.constant 0 : index
    %c0_64 = arith.constant 0 : index
    %139 = vector.load %arg5[%c0_63, %c0_64] : memref<128x384xf32, #tpu.memory_space<vmem>>, vector<128x384xf32>
    %cst_65 = arith.constant dense<0.000000e+00> : vector<8x384xf32>
    %140 = tpu.matmul %130, %139, %cst_65 {dimension_numbers = #tpu.dot_dimension_numbers<[1], [0], [0], [1], [0, 0, 1, 1], [], []>} : vector<8x128xf32>, vector<128x384xf32>, vector<8x384xf32> -> vector<8x384xf32>
    %141 = arith.addf %140, %8 : vector<8x384xf32>
    %142 = vector.extract_strided_slice %138 {offsets = [0, 0], sizes = [8, 256], strides = [1, 1]} : vector<8x384xf32> to vector<8x256xf32>
    %143 = vector.extract_strided_slice %141 {offsets = [0, 0], sizes = [8, 256], strides = [1, 1]} : vector<8x384xf32> to vector<8x256xf32>
    %144 = arith.addf %142, %143 : vector<8x256xf32>
    %145 = arith.negf %144 : vector<8x256xf32>
    %146 = math.exp %145 : vector<8x256xf32>
    %cst_66 = arith.constant 1.000000e+00 : f32
    %147 = vector.broadcast %cst_66 : f32 to vector<8x256xf32>
    %148 = arith.addf %147, %146 : vector<8x256xf32>
    %149 = arith.divf %147, %148 : vector<8x256xf32>
    %150 = vector.extract_strided_slice %149 {offsets = [0, 0], sizes = [8, 128], strides = [1, 1]} : vector<8x256xf32> to vector<8x128xf32>
    %151 = vector.extract_strided_slice %149 {offsets = [0, 128], sizes = [8, 128], strides = [1, 1]} : vector<8x256xf32> to vector<8x128xf32>
    %152 = vector.extract_strided_slice %138 {offsets = [0, 256], sizes = [8, 128], strides = [1, 1]} : vector<8x384xf32> to vector<8x128xf32>
    %153 = vector.extract_strided_slice %141 {offsets = [0, 256], sizes = [8, 128], strides = [1, 1]} : vector<8x384xf32> to vector<8x128xf32>
    %154 = arith.mulf %150, %153 : vector<8x128xf32>
    %155 = arith.addf %152, %154 : vector<8x128xf32>
    %156 = math.tanh %155 : vector<8x128xf32>
    %cst_67 = arith.constant 1.000000e+00 : f32
    %157 = vector.broadcast %cst_67 : f32 to vector<8x128xf32>
    %158 = arith.subf %157, %151 : vector<8x128xf32>
    %159 = arith.mulf %158, %156 : vector<8x128xf32>
    %160 = arith.mulf %151, %130 : vector<8x128xf32>
    %161 = arith.addf %159, %160 : vector<8x128xf32>
    %c0_68 = arith.constant 0 : index
    %c4_69 = arith.constant 4 : index
    %c0_70 = arith.constant 0 : index
    %162 = vector.load %arg7[%c0_68, %c4_69, %c0_70] : memref<8x8x128xf32, #tpu.memory_space<vmem>>, vector<8x1x128xf32>
    %163 = vector.shape_cast %162 : vector<8x1x128xf32> to vector<8x128xf32>
    %164 = vector.shape_cast %161 : vector<8x128xf32> to vector<8x1x128xf32>
    tpu.vector_store %arg7[%c0_68, %c4_69, %c0_70], %164 {strides = array<i32>} : memref<8x8x128xf32, #tpu.memory_space<vmem>>, vector<8x1x128xf32>,
    %c0_71 = arith.constant 0 : index
    %c5 = arith.constant 5 : index
    %c0_72 = arith.constant 0 : index
    %165 = vector.load %arg2[%c0_71, %c5, %c0_72] : memref<8x8x128xf32, #tpu.memory_space<vmem>>, vector<8x1x128xf32>
    %166 = vector.shape_cast %165 : vector<8x1x128xf32> to vector<8x128xf32>
    %c0_73 = arith.constant 0 : index
    %c0_74 = arith.constant 0 : index
    %167 = vector.load %arg3[%c0_73, %c0_74] : memref<128x384xf32, #tpu.memory_space<vmem>>, vector<128x384xf32>
    %cst_75 = arith.constant dense<0.000000e+00> : vector<8x384xf32>
    %168 = tpu.matmul %166, %167, %cst_75 {dimension_numbers = #tpu.dot_dimension_numbers<[1], [0], [0], [1], [0, 0, 1, 1], [], []>} : vector<8x128xf32>, vector<128x384xf32>, vector<8x384xf32> -> vector<8x384xf32>
    %169 = arith.addf %168, %5 : vector<8x384xf32>
    %c0_76 = arith.constant 0 : index
    %c0_77 = arith.constant 0 : index
    %170 = vector.load %arg5[%c0_76, %c0_77] : memref<128x384xf32, #tpu.memory_space<vmem>>, vector<128x384xf32>
    %cst_78 = arith.constant dense<0.000000e+00> : vector<8x384xf32>
    %171 = tpu.matmul %161, %170, %cst_78 {dimension_numbers = #tpu.dot_dimension_numbers<[1], [0], [0], [1], [0, 0, 1, 1], [], []>} : vector<8x128xf32>, vector<128x384xf32>, vector<8x384xf32> -> vector<8x384xf32>
    %172 = arith.addf %171, %8 : vector<8x384xf32>
    %173 = vector.extract_strided_slice %169 {offsets = [0, 0], sizes = [8, 256], strides = [1, 1]} : vector<8x384xf32> to vector<8x256xf32>
    %174 = vector.extract_strided_slice %172 {offsets = [0, 0], sizes = [8, 256], strides = [1, 1]} : vector<8x384xf32> to vector<8x256xf32>
    %175 = arith.addf %173, %174 : vector<8x256xf32>
    %176 = arith.negf %175 : vector<8x256xf32>
    %177 = math.exp %176 : vector<8x256xf32>
    %cst_79 = arith.constant 1.000000e+00 : f32
    %178 = vector.broadcast %cst_79 : f32 to vector<8x256xf32>
    %179 = arith.addf %178, %177 : vector<8x256xf32>
    %180 = arith.divf %178, %179 : vector<8x256xf32>
    %181 = vector.extract_strided_slice %180 {offsets = [0, 0], sizes = [8, 128], strides = [1, 1]} : vector<8x256xf32> to vector<8x128xf32>
    %182 = vector.extract_strided_slice %180 {offsets = [0, 128], sizes = [8, 128], strides = [1, 1]} : vector<8x256xf32> to vector<8x128xf32>
    %183 = vector.extract_strided_slice %169 {offsets = [0, 256], sizes = [8, 128], strides = [1, 1]} : vector<8x384xf32> to vector<8x128xf32>
    %184 = vector.extract_strided_slice %172 {offsets = [0, 256], sizes = [8, 128], strides = [1, 1]} : vector<8x384xf32> to vector<8x128xf32>
    %185 = arith.mulf %181, %184 : vector<8x128xf32>
    %186 = arith.addf %183, %185 : vector<8x128xf32>
    %187 = math.tanh %186 : vector<8x128xf32>
    %cst_80 = arith.constant 1.000000e+00 : f32
    %188 = vector.broadcast %cst_80 : f32 to vector<8x128xf32>
    %189 = arith.subf %188, %182 : vector<8x128xf32>
    %190 = arith.mulf %189, %187 : vector<8x128xf32>
    %191 = arith.mulf %182, %161 : vector<8x128xf32>
    %192 = arith.addf %190, %191 : vector<8x128xf32>
    %c0_81 = arith.constant 0 : index
    %c5_82 = arith.constant 5 : index
    %c0_83 = arith.constant 0 : index
    %193 = vector.load %arg7[%c0_81, %c5_82, %c0_83] : memref<8x8x128xf32, #tpu.memory_space<vmem>>, vector<8x1x128xf32>
    %194 = vector.shape_cast %193 : vector<8x1x128xf32> to vector<8x128xf32>
    %195 = vector.shape_cast %192 : vector<8x128xf32> to vector<8x1x128xf32>
    tpu.vector_store %arg7[%c0_81, %c5_82, %c0_83], %195 {strides = array<i32>} : memref<8x8x128xf32, #tpu.memory_space<vmem>>, vector<8x1x128xf32>,
    %c0_84 = arith.constant 0 : index
    %c6 = arith.constant 6 : index
    %c0_85 = arith.constant 0 : index
    %196 = vector.load %arg2[%c0_84, %c6, %c0_85] : memref<8x8x128xf32, #tpu.memory_space<vmem>>, vector<8x1x128xf32>
    %197 = vector.shape_cast %196 : vector<8x1x128xf32> to vector<8x128xf32>
    %c0_86 = arith.constant 0 : index
    %c0_87 = arith.constant 0 : index
    %198 = vector.load %arg3[%c0_86, %c0_87] : memref<128x384xf32, #tpu.memory_space<vmem>>, vector<128x384xf32>
    %cst_88 = arith.constant dense<0.000000e+00> : vector<8x384xf32>
    %199 = tpu.matmul %197, %198, %cst_88 {dimension_numbers = #tpu.dot_dimension_numbers<[1], [0], [0], [1], [0, 0, 1, 1], [], []>} : vector<8x128xf32>, vector<128x384xf32>, vector<8x384xf32> -> vector<8x384xf32>
    %200 = arith.addf %199, %5 : vector<8x384xf32>
    %c0_89 = arith.constant 0 : index
    %c0_90 = arith.constant 0 : index
    %201 = vector.load %arg5[%c0_89, %c0_90] : memref<128x384xf32, #tpu.memory_space<vmem>>, vector<128x384xf32>
    %cst_91 = arith.constant dense<0.000000e+00> : vector<8x384xf32>
    %202 = tpu.matmul %192, %201, %cst_91 {dimension_numbers = #tpu.dot_dimension_numbers<[1], [0], [0], [1], [0, 0, 1, 1], [], []>} : vector<8x128xf32>, vector<128x384xf32>, vector<8x384xf32> -> vector<8x384xf32>
    %203 = arith.addf %202, %8 : vector<8x384xf32>
    %204 = vector.extract_strided_slice %200 {offsets = [0, 0], sizes = [8, 256], strides = [1, 1]} : vector<8x384xf32> to vector<8x256xf32>
    %205 = vector.extract_strided_slice %203 {offsets = [0, 0], sizes = [8, 256], strides = [1, 1]} : vector<8x384xf32> to vector<8x256xf32>
    %206 = arith.addf %204, %205 : vector<8x256xf32>
    %207 = arith.negf %206 : vector<8x256xf32>
    %208 = math.exp %207 : vector<8x256xf32>
    %cst_92 = arith.constant 1.000000e+00 : f32
    %209 = vector.broadcast %cst_92 : f32 to vector<8x256xf32>
    %210 = arith.addf %209, %208 : vector<8x256xf32>
    %211 = arith.divf %209, %210 : vector<8x256xf32>
    %212 = vector.extract_strided_slice %211 {offsets = [0, 0], sizes = [8, 128], strides = [1, 1]} : vector<8x256xf32> to vector<8x128xf32>
    %213 = vector.extract_strided_slice %211 {offsets = [0, 128], sizes = [8, 128], strides = [1, 1]} : vector<8x256xf32> to vector<8x128xf32>
    %214 = vector.extract_strided_slice %200 {offsets = [0, 256], sizes = [8, 128], strides = [1, 1]} : vector<8x384xf32> to vector<8x128xf32>
    %215 = vector.extract_strided_slice %203 {offsets = [0, 256], sizes = [8, 128], strides = [1, 1]} : vector<8x384xf32> to vector<8x128xf32>
    %216 = arith.mulf %212, %215 : vector<8x128xf32>
    %217 = arith.addf %214, %216 : vector<8x128xf32>
    %218 = math.tanh %217 : vector<8x128xf32>
    %cst_93 = arith.constant 1.000000e+00 : f32
    %219 = vector.broadcast %cst_93 : f32 to vector<8x128xf32>
    %220 = arith.subf %219, %213 : vector<8x128xf32>
    %221 = arith.mulf %220, %218 : vector<8x128xf32>
    %222 = arith.mulf %213, %192 : vector<8x128xf32>
    %223 = arith.addf %221, %222 : vector<8x128xf32>
    %c0_94 = arith.constant 0 : index
    %c6_95 = arith.constant 6 : index
    %c0_96 = arith.constant 0 : index
    %224 = vector.load %arg7[%c0_94, %c6_95, %c0_96] : memref<8x8x128xf32, #tpu.memory_space<vmem>>, vector<8x1x128xf32>
    %225 = vector.shape_cast %224 : vector<8x1x128xf32> to vector<8x128xf32>
    %226 = vector.shape_cast %223 : vector<8x128xf32> to vector<8x1x128xf32>
    tpu.vector_store %arg7[%c0_94, %c6_95, %c0_96], %226 {strides = array<i32>} : memref<8x8x128xf32, #tpu.memory_space<vmem>>, vector<8x1x128xf32>,
    %c0_97 = arith.constant 0 : index
    %c7 = arith.constant 7 : index
    %c0_98 = arith.constant 0 : index
    %227 = vector.load %arg2[%c0_97, %c7, %c0_98] : memref<8x8x128xf32, #tpu.memory_space<vmem>>, vector<8x1x128xf32>
    %228 = vector.shape_cast %227 : vector<8x1x128xf32> to vector<8x128xf32>
    %c0_99 = arith.constant 0 : index
    %c0_100 = arith.constant 0 : index
    %229 = vector.load %arg3[%c0_99, %c0_100] : memref<128x384xf32, #tpu.memory_space<vmem>>, vector<128x384xf32>
    %cst_101 = arith.constant dense<0.000000e+00> : vector<8x384xf32>
    %230 = tpu.matmul %228, %229, %cst_101 {dimension_numbers = #tpu.dot_dimension_numbers<[1], [0], [0], [1], [0, 0, 1, 1], [], []>} : vector<8x128xf32>, vector<128x384xf32>, vector<8x384xf32> -> vector<8x384xf32>
    %231 = arith.addf %230, %5 : vector<8x384xf32>
    %c0_102 = arith.constant 0 : index
    %c0_103 = arith.constant 0 : index
    %232 = vector.load %arg5[%c0_102, %c0_103] : memref<128x384xf32, #tpu.memory_space<vmem>>, vector<128x384xf32>
    %cst_104 = arith.constant dense<0.000000e+00> : vector<8x384xf32>
    %233 = tpu.matmul %223, %232, %cst_104 {dimension_numbers = #tpu.dot_dimension_numbers<[1], [0], [0], [1], [0, 0, 1, 1], [], []>} : vector<8x128xf32>, vector<128x384xf32>, vector<8x384xf32> -> vector<8x384xf32>
    %234 = arith.addf %233, %8 : vector<8x384xf32>
    %235 = vector.extract_strided_slice %231 {offsets = [0, 0], sizes = [8, 256], strides = [1, 1]} : vector<8x384xf32> to vector<8x256xf32>
    %236 = vector.extract_strided_slice %234 {offsets = [0, 0], sizes = [8, 256], strides = [1, 1]} : vector<8x384xf32> to vector<8x256xf32>
    %237 = arith.addf %235, %236 : vector<8x256xf32>
    %238 = arith.negf %237 : vector<8x256xf32>
    %239 = math.exp %238 : vector<8x256xf32>
    %cst_105 = arith.constant 1.000000e+00 : f32
    %240 = vector.broadcast %cst_105 : f32 to vector<8x256xf32>
    %241 = arith.addf %240, %239 : vector<8x256xf32>
    %242 = arith.divf %240, %241 : vector<8x256xf32>
    %243 = vector.extract_strided_slice %242 {offsets = [0, 0], sizes = [8, 128], strides = [1, 1]} : vector<8x256xf32> to vector<8x128xf32>
    %244 = vector.extract_strided_slice %242 {offsets = [0, 128], sizes = [8, 128], strides = [1, 1]} : vector<8x256xf32> to vector<8x128xf32>
    %245 = vector.extract_strided_slice %231 {offsets = [0, 256], sizes = [8, 128], strides = [1, 1]} : vector<8x384xf32> to vector<8x128xf32>
    %246 = vector.extract_strided_slice %234 {offsets = [0, 256], sizes = [8, 128], strides = [1, 1]} : vector<8x384xf32> to vector<8x128xf32>
    %247 = arith.mulf %243, %246 : vector<8x128xf32>
    %248 = arith.addf %245, %247 : vector<8x128xf32>
    %249 = math.tanh %248 : vector<8x128xf32>
    %cst_106 = arith.constant 1.000000e+00 : f32
    %250 = vector.broadcast %cst_106 : f32 to vector<8x128xf32>
    %251 = arith.subf %250, %244 : vector<8x128xf32>
    %252 = arith.mulf %251, %249 : vector<8x128xf32>
    %253 = arith.mulf %244, %223 : vector<8x128xf32>
    %254 = arith.addf %252, %253 : vector<8x128xf32>
    %c0_107 = arith.constant 0 : index
    %c7_108 = arith.constant 7 : index
    %c0_109 = arith.constant 0 : index
    %255 = vector.load %arg7[%c0_107, %c7_108, %c0_109] : memref<8x8x128xf32, #tpu.memory_space<vmem>>, vector<8x1x128xf32>
    %256 = vector.shape_cast %255 : vector<8x1x128xf32> to vector<8x128xf32>
    %257 = vector.shape_cast %254 : vector<8x128xf32> to vector<8x1x128xf32>
    tpu.vector_store %arg7[%c0_107, %c7_108, %c0_109], %257 {strides = array<i32>} : memref<8x8x128xf32, #tpu.memory_space<vmem>>, vector<8x1x128xf32>,
    %c0_110 = arith.constant 0 : index
    %c0_111 = arith.constant 0 : index
    %258 = vector.load %arg8[%c0_110, %c0_111] : memref<8x128xf32, #tpu.memory_space<vmem>>, vector<8x128xf32>
    tpu.vector_store %arg8[%c0_110, %c0_111], %254 {strides = array<i32>} : memref<8x128xf32, #tpu.memory_space<vmem>>, vector<8x128xf32>,
    return
  }
  func.func @transform_0(%arg0: i32, %arg1: i32) -> (i32, i32, i32) {
    %c0_i32 = arith.constant 0 : i32
    %c0_i32_0 = arith.constant 0 : i32
    return %arg0, %arg1, %c0_i32 : i32, i32, i32
  }
  func.func @transform_1(%arg0: i32, %arg1: i32) -> (i32, i32) {
    %c0_i32 = arith.constant 0 : i32
    %c0_i32_0 = arith.constant 0 : i32
    %c0_i32_1 = arith.constant 0 : i32
    return %c0_i32, %c0_i32_0 : i32, i32
  }
  func.func @transform_2(%arg0: i32, %arg1: i32) -> (i32, i32) {
    %c0_i32 = arith.constant 0 : i32
    %c0_i32_0 = arith.constant 0 : i32
    %c0_i32_1 = arith.constant 0 : i32
    return %c0_i32, %c0_i32_0 : i32, i32
  }
  func.func @transform_3(%arg0: i32, %arg1: i32) -> (i32, i32) {
    %c0_i32 = arith.constant 0 : i32
    %c0_i32_0 = arith.constant 0 : i32
    %c0_i32_1 = arith.constant 0 : i32
    return %c0_i32, %c0_i32_0 : i32, i32
  }
  func.func @transform_4(%arg0: i32, %arg1: i32) -> (i32, i32) {
    %c0_i32 = arith.constant 0 : i32
    %c0_i32_0 = arith.constant 0 : i32
    %c0_i32_1 = arith.constant 0 : i32
    return %c0_i32, %c0_i32_0 : i32, i32
  }
  func.func @transform_5(%arg0: i32, %arg1: i32) -> (i32, i32, i32) {
    %c0_i32 = arith.constant 0 : i32
    %c0_i32_0 = arith.constant 0 : i32
    return %arg0, %arg1, %c0_i32 : i32, i32, i32
  }
}

</mosaic_0001>

<bundles_post_ra>
// kernel: seq2seq_encoder_forward.2
= control target key start
LH: loop header
LB: loop body
LE: loop exit
PB: predicated region body
PF: predicated region fallthrough
CT: control target
= control target key end

     0   :  { %10 = vsyncpa [#allocation5], 0  ;;  %s3155_s18 = smov 0   ;;  %s3157_s19 = smov 0   ;;  %s5115_s0 = inlined_call_operand.vmem [shape: f32[8,16,64], index: 0, kind: input, shape index: {}]   ;;  %s5116_s1 = inlined_call_operand.hbm [shape: f32[64,384], index: 1, kind: input, shape index: {}]   ;;  %s5117_s2 = inlined_call_operand.vmem [shape: f32[1,384], index: 2, kind: input, shape index: {}]   ;;  %s5118_s3 = inlined_call_operand.vmem [shape: f32[128,384], index: 3, kind: input, shape index: {}]   ;;  %s5119_s4 = inlined_call_operand.vmem [shape: f32[1,384], index: 4, kind: input, shape index: {}]   ;;  %s5120_s5 = inlined_call_operand.vmem [shape: f32[8,16,128], index: 5, kind: output, shape index: {}]  }
   0x1   :  { %s3159_s20 = smov 0   ;;  %s3161_s21 = smov 0  }
   0x2   :  { %s3163_s22 = smov 0  }
   0x3 LB: > { %s2857_s23 = sadd.s32 4294967295, %s3119_s22   ;;  %s25_s24 = sadd.s32 1, %s3115_s21  ;;  %s3119_s22 = sphi %s3163_s22, %s16_s22   ;;  %s3115_s21 = sphi %s3161_s21, %s5194_s21   ;;  %s3111_s20 = sphi %s3159_s20, %s5193_s20   ;;  %s3107_s19 = sphi %s3157_s19, %s5192_s19   ;;  %s3103_s18 = sphi %s3155_s18, %s5191_s18  }
   0x4   : > { %p26_p0 = scmp.ge.s32.totalorder %s25_s24, 2  ;;  %s37_s25 = sadd.s32 1, %s3107_s19 }
   0x5   : > { %p44_p1 = scmp.ne.s32.totalorder %s3107_s19, %s3103_s18  ;;  %p45_p2 = scmp.eq.s32.totalorder %s3119_s22, 0 }
   0x6   : > { %s5196_s24 = smov (%p26_p0, %s25_s24), 0  ;;  %p160_p4 = scmp.eq.s32.totalorder %s2857_s23, 1 }
   0x7   : > { %p3188_p3 = por %p45_p2, %p44_p1  ;;  %s33_s27 = ssub.s32 %s3115_s21, %s5196_s24 }
   0x8   : > { %p2859_p5 = scmp.ge.s32.totalorder %s3119_s22, 1  ;;  %p35_p6 = scmp.eq.s32.totalorder %s33_s27, 0 }
   0x9   : > { %p3195_p7 = por %p160_p4, %p44_p1  ;;  %p173_p8 = scmp.lt.s32.totalorder %s3119_s22, 3 }
   0xa   : > { %s3201_s29 = scalar_select %p35_p6, %s3107_s19, %s37_s25  }
   0xb   : > { %p3203_p9 = pnand %p2859_p5, %p173_p8  ;;  %p3207_p10 = scmp.eq.s32.totalorder %s2857_s23, 0 }
   0xc   : > { %s184_s9 = sshll.u32 %s5116_s1, 4  ;;  %s3121_s10 = smov [#allocation4]   ;;  %s185_s9 = int_to_ptr.hbm [resolvable:$true] %s184_s9 }
   0xd   : > { %p2917_p11 = pneg %p3203_p9  ;;  %s186_s11 = sshll.u32 %s3121_s10, 4  ;;  %s187_s11 = int_to_ptr.vmem [resolvable:$true] %s186_s11 }
   0xe   : > { %s3122_s12 = smov 384   ;;  %s3123_s13 = smov 24  }
   0xf   : > { %p2918_p12 = pnand %p3207_p10, %p2917_p11  ;;  %p2861_p13 = scmp.ge.s32.totalorder %s3119_s22, 2 }
  0x11   : > { %2920 = dma.hbm_to_vmem [thread:$0]  (!%p2918_p12), %s185_s9, 3072, %s187_s11, [#allocation5], %s3122_s12, %s3122_s12, %s3123_s13  }
  0x12   : > { %205 = sbr.rel (%p2861_p13) target bundleno = 35 (0x23), region = 32 }
  0x17   : > { %208 = sbr.rel (!%p3188_p3) target bundleno = 35 (0x23), region = 36  ;;  %s210_s14 = sand.u32 (%p3188_p3), 1, %s3107_s19  }
  0x18   : > { %s2863_s15 = sshll.u32 (%p3188_p3), %s3115_s21, 3  ;;  %s2862_s16 = sshll.u32 (%p3188_p3), %s210_s14, 6 }
  0x19   : > { %s217_s25 = scalar_lea.vmem (%p3188_p3), %s5115_s0, %s2863_s15  ;;  %s212_s27 = scalar_lea.vmem (%p3188_p3), [#allocation3], %s2862_s16 }
  0x1a   : > { %v260_v0 = vld [vmem:[%s217_s25] sm:$0xff] (%p3188_p3)  ;;  %v262_v1 = vld [vmem:[%s217_s25 + $0x10] sm:$0xff] (%p3188_p3) }
  0x1b   : > { %v264_v2 = vld [vmem:[%s217_s25 + $0x20] sm:$0xff] (%p3188_p3)  ;;  %261 = vst [vmem:[%s212_s27] sm:$0xff] (%p3188_p3), %v260_v0  ;;  %v266_v3 = vld [vmem:[%s217_s25 + $0x30] sm:$0xff] (%p3188_p3) }
  0x1c   : > { %263 = vst [vmem:[%s212_s27 + $0x8] sm:$0xff] %v262_v1  ;;  %v268_v4 = vld [vmem:[%s217_s25 + $0x40] sm:$0xff]  ;;  %v270_v5 = vld [vmem:[%s217_s25 + $0x50] sm:$0xff] }
  0x1d   : > { %265 = vst [vmem:[%s212_s27 + $0x10] sm:$0xff] %v264_v2  ;;  %v272_v6 = vld [vmem:[%s217_s25 + $0x60] sm:$0xff]  ;;  %v274_v7 = vld [vmem:[%s217_s25 + $0x70] sm:$0xff] }
  0x1e   : > { %267 = vst [vmem:[%s212_s27 + $0x18] sm:$0xff] %v266_v3 }
  0x1f   : > { %269 = vst [vmem:[%s212_s27 + $0x20] sm:$0xff] %v268_v4 }
  0x20   : > { %271 = vst [vmem:[%s212_s27 + $0x28] sm:$0xff] %v270_v5 }
  0x21   : > { %273 = vst [vmem:[%s212_s27 + $0x30] sm:$0xff] %v272_v6 }
  0x22   : > { %275 = vst [vmem:[%s212_s27 + $0x38] sm:$0xff] %v274_v7 }
  0x23 PF: > { %284 = sbr.rel (%p3203_p9) target bundleno = 1510 (0x5e6), region = 74 }
  0x28   : > { %s287_s26 = sand.u32 1, %s3103_s18  }
  0x29   : > { %s2865_s7 = sshll.u32 %s287_s26, 6 }
  0x2a   : > { %s3229_s8 = scalar_lea.vmem [#allocation3], %s2865_s7 }
  0x2b   : > { %3098 = dma.done.wait (%p3207_p10), [#allocation5], 3072  }
  0x2c   : > { %3100 = vsyncadd (%p3207_p10), [#allocation5], 4294964224  ;;  %s3235_s9 = scalar_lea.vmem [#allocation6], %s2865_s7  ;;  %p2868_p0 = scmp.ne.s32.totalorder %s3111_s20, 0 }
  0x2e   : > { %323 = sbr.rel (%p2868_p0) target bundleno = 53 (0x35), region = 86 }
  0x33   : > { %v3124_v8 = vmov 0.0  }
  0x34   : > { %324 = vst [vmem:[#allocation2] sm:$0xff] %v3124_v8 }
  0x35 PF: > { %v3241_v9 = vld [vmem:[%s5118_s3 + $0x168] sm:$0xff]  ;;  %v3246_v10 = vld [vmem:[%s5118_s3 + $0x150] sm:$0xff]  ;;  %v3260_v13 = vld [vmem:[%s5118_s3 + $0x158] sm:$0xff]  ;;  %vm383_vm0 = vcmask 1041409   ;;  %vm386_vm1 = vcmask 1042434   ;;  %vm389_vm2 = vcmask 1043459  }
  0x36   : > { %v3251_v11 = vld [vmem:[%s5118_s3 + $0x170] sm:$0xff]  ;;  %514 = vmatpush.msra.mxu3 %v3241_v9  ;;  %v3255_v12 = vld [vmem:[#allocation4 + $0xa8] sm:$0xff]  ;;  %v3266_v14 = vld [vmem:[%s5118_s3 + $0x138] sm:$0xff]  ;;  %vm392_vm3 = vcmask 1044484   ;;  %vm395_vm4 = vcmask 1045509   ;;  %vm398_vm5 = vcmask 1046534  }
  0x37   : > { %534 = vmatpush.msra.mxu0 %v3251_v11  ;;  %414 = vmatpush.msra.mxu1 %v3255_v12  ;;  %v3268_v15 = vld [vmem:[#allocation4 + $0x90] sm:$0xff]  ;;  %v3273_v16 = vld [vmem:[%s5118_s3 + $0x140] sm:$0xff]  ;;  %v3277_v17 = vld [vmem:[#allocation4 + $0x78] sm:$0xff]  ;;  %vm401_vm6 = vcmask 1047559   ;;  %vm403_vm7 = vcmask 523264  }
  0x38   : > { %515 = vmatpush.msra.mxu3 %v3246_v10  ;;  %v3283_v18 = vld [vmem:[%s5118_s3 + $0x120] sm:$0xff]  ;;  %v3288_v19 = vld [vmem:[%s5118_s3 + $0x128] sm:$0xff]  ;;  %v3303_v22 = vld [vmem:[%s5118_s3 + $0x110] sm:$0xff] }
  0x39   : > { %535 = vmatpush.msra.mxu0 %v3260_v13  ;;  %415 = vmatpush.msra.mxu1 %v3268_v15  ;;  %v3292_v20 = vld [vmem:[#allocation4 + $0x60] sm:$0xff]  ;;  %v3298_v21 = vld [vmem:[%s5118_s3 + $0x108] sm:$0xff]  ;;  %v3313_v24 = vld [vmem:[%s5118_s3 + $0xf0] sm:$0xff] }
  0x3a   : > { %516 = vmatpush.msra.mxu3 %v3266_v14  ;;  %v3307_v23 = vld [vmem:[#allocation4 + $0x48] sm:$0xff]  ;;  %v3318_v25 = vld [vmem:[%s5118_s3 + $0xf8] sm:$0xff]  ;;  %v3322_v26 = vld [vmem:[#allocation4 + $0x30] sm:$0xff] }
  0x3b   : > { %536 = vmatpush.msra.mxu0 %v3273_v16  ;;  %416 = vmatpush.msra.mxu1 %v3277_v17  ;;  %v3328_v27 = vld [vmem:[%s5118_s3 + $0xd8] sm:$0xff]  ;;  %v3333_v28 = vld [vmem:[%s5118_s3 + $0xe0] sm:$0xff]  ;;  %v3348_v31 = vld [vmem:[%s5118_s3 + $0xa8] sm:$0xff] }
  0x3c   : > { %517 = vmatpush.msra.mxu3 %v3283_v18  ;;  %v3340_v29 = vld [vmem:[%s5118_s3 + $0xc0] sm:$0xff]  ;;  %v3342_v30 = vld [vmem:[#allocation4 + $0x18] sm:$0xff]  ;;  %v3353_v32 = vld [vmem:[%s5118_s3 + $0xc8] sm:$0xff] }
  0x3d   : > { %537 = vmatpush.msra.mxu0 %v3288_v19  ;;  %417 = vmatpush.msra.mxu1 %v3292_v20  ;;  %v3355_v33 = vld [vmem:[#allocation4] sm:$0xff]  ;;  %v343_v34 = vld [vmem:[%s3229_s8 + $0x8] sm:$0x1]  ;;  %v344_v35 = vld [vmem:[%s3229_s8 + $0x10] sm:$0x1] }
  0x3e   : > { %518 = vmatpush.msra.mxu3 %v3298_v21  ;;  %v345_v36 = vld [vmem:[%s3229_s8 + $0x18] sm:$0x1]  ;;  %v346_v37 = vld [vmem:[%s3229_s8 + $0x20] sm:$0x1]  ;;  %v3364_v38 = vld [vmem:[#allocation4 + $0xb0] sm:$0xff]  ;;  %v382_v43 = vrot.slane %v343_v34, 7 }
  0x3f   : > { %538 = vmatpush.msra.mxu0 %v3303_v22  ;;  %418 = vmatpush.msra.mxu1 %v3307_v23  ;;  %v342_v39 = vld [vmem:[%s3229_s8] sm:$0x1]  ;;  %v347_v40 = vld [vmem:[%s3229_s8 + $0x28] sm:$0x1]  ;;  %v3373_v41 = vld [vmem:[%s5118_s3 + $0xb0] sm:$0xff]  ;;  %v385_v44 = vrot.slane %v344_v35, 6 }
  0x40   : > { %519 = vmatpush.msra.mxu3 %v3313_v24  ;;  %v348_v42 = vld [vmem:[%s3229_s8 + $0x30] sm:$0x1]  ;;  %v388_v45 = vrot.slane %v345_v36, 5  ;;  %v3382_v47 = vld [vmem:[#allocation4 + $0x98] sm:$0xff]  ;;  %v391_v49 = vrot.slane %v346_v37, 4  ;;  %v384_v51 = vsel %vm383_vm0, %v382_v43, %v342_v39  ;;  %v394_v52 = vrot.slane %v347_v40, 3 }
  0x41   : > { %539 = vmatpush.msra.mxu0 %v3318_v25  ;;  %419 = vmatpush.msra.mxu1 %v3322_v26  ;;  %v3380_v46 = vld [vmem:[%s5118_s3 + $0x90] sm:$0xff]  ;;  %v349_v48 = vld [vmem:[%s3229_s8 + $0x38] sm:$0x1]  ;;  %v3399_v54 = vld [vmem:[#allocation4 + $0x80] sm:$0xff]  ;;  %v387_v55 = vsel %vm386_vm1, %v385_v44, %v384_v51  ;;  %v397_v56 = vrot.slane %v348_v42, 2 }
  0x42   : > { %520 = vmatpush.msra.mxu3 %v3328_v27  ;;  %v3390_v50 = vld [vmem:[%s5118_s3 + $0x98] sm:$0xff]  ;;  %v3407_v57 = vld [vmem:[%s5118_s3 + $0x80] sm:$0xff]  ;;  %v390_v58 = vsel %vm389_vm2, %v388_v45, %v387_v55  ;;  %v400_v59 = vrot.slane %v349_v48, 1  ;;  %v3416_v61 = vld [vmem:[#allocation4 + $0x68] sm:$0xff] }
  0x43   : > { %540 = vmatpush.msra.mxu0 %v3333_v28  ;;  %420 = vmatpush.msra.mxu1 %v3342_v30  ;;  %v3397_v53 = vld [vmem:[%s5118_s3 + $0x78] sm:$0xff]  ;;  %v3414_v60 = vld [vmem:[%s5118_s3 + $0x60] sm:$0xff]  ;;  %v393_v62 = vsel %vm392_vm3, %v391_v49, %v390_v58  ;;  %v3424_v63 = vld [vmem:[%s5118_s3 + $0x68] sm:$0xff] }
  0x44   : > { %521 = vmatpush.msra.mxu3 %v3340_v29  ;;  %v396_v0 = vsel %vm395_vm4, %v394_v52, %v393_v62  ;;  %v373_v1 = vld [vmem:[#allocation4 + $0xb8] sm:$0xff]  ;;  %v3431_v2 = vld [vmem:[%s5118_s3 + $0x48] sm:$0xff]  ;;  %v3434_v4 = vld [vmem:[#allocation4 + $0x50] sm:$0xff] }
  0x45   : > { %541 = vmatpush.msra.mxu0 %v3353_v32  ;;  %421 = vmatpush.msra.mxu1 %v3355_v33  ;;  %v399_v3 = vsel %vm398_vm5, %v397_v56, %v396_v0  ;;  %v3442_v6 = vld [vmem:[%s5118_s3 + $0x50] sm:$0xff]  ;;  %v3444_v7 = vld [vmem:[#allocation4 + $0xa0] sm:$0xff]  ;;  %v3453_v34 = vld [vmem:[#allocation4 + $0x38] sm:$0xff] }
  0x46   : > { %522 = vmatpush.msra.mxu3 %v3348_v31  ;;  %454 = vmatpush.msra.mxu2 %v373_v1  ;;  %v402_v5 = vsel %vm401_vm6, %v400_v59, %v399_v3  ;;  %v3451_v8 = vld [vmem:[%s5118_s3 + $0x30] sm:$0xff]  ;;  %v3460_v35 = vld [vmem:[%s5118_s3 + $0x38] sm:$0xff]  ;;  %v3462_v36 = vld [vmem:[#allocation4 + $0x88] sm:$0xff] }
  0x47   : > { %434 = vmatpush.msrb.mxu1 %v3364_v38  ;;  %542 = vmatpush.msra.mxu0 %v3373_v41  ;;  %v3468_v37 = vld [vmem:[%s5118_s3 + $0x18] sm:$0xff]  ;;  %v3470_v39 = vld [vmem:[#allocation4 + $0x20] sm:$0xff]  ;;  %v3480_v42 = vld [vmem:[#allocation4 + $0x70] sm:$0xff] }
  0x48   : > { %523 = vmatpush.msra.mxu3 %v3380_v46  ;;  %2869 = vmatmul.msk.f32.vlgmr.msra.gmra.mxu1 %vm403_vm7, %v402_v5  ;;  %v3478_v40 = vld [vmem:[%s5118_s3 + $0x20] sm:$0xff]  ;;  %v3488_v44 = vld [vmem:[#allocation4 + $0x8] sm:$0xff]  ;;  %v3493_v45 = vld [vmem:[#allocation2] sm:$0xff] }
  0x49   : > { %435 = vmatpush.msrb.mxu1 %v3382_v47  ;;  %543 = vmatpush.msra.mxu0 %v3390_v50  ;;  %v3486_v43 = vld [vmem:[%s5118_s3] sm:$0xff]  ;;  %v3498_v48 = vld [vmem:[%s5118_s3 + $0x8] sm:$0xff]  ;;  %v3507_v49 = vld [vmem:[%s5118_s3 + $0x178] sm:$0xff] }
  0x4a   : > { %524 = vmatpush.msra.mxu3 %v3397_v53  ;;  %455 = vmatpush.msra.mxu2 %v3444_v7  ;;  %v3509_v51 = vld [vmem:[#allocation4 + $0x58] sm:$0xff]  ;;  %v3518_v52 = vld [vmem:[%s5118_s3 + $0x160] sm:$0xff]  ;;  %v3527_v56 = vld [vmem:[%s5118_s3 + $0x148] sm:$0xff] }
  0x4b   : > { %436 = vmatpush.msrb.mxu1 %v3399_v54  ;;  %544 = vmatpush.msra.mxu0 %v3407_v57  ;;  %v3520_v55 = vld [vmem:[#allocation4 + $0x40] sm:$0xff]  ;;  %v3529_v58 = vld [vmem:[#allocation4 + $0x28] sm:$0xff]  ;;  %v3537_v59 = vld [vmem:[%s5118_s3 + $0x130] sm:$0xff] }
  0x4c   : > { %525 = vmatpush.msra.mxu3 %v3414_v60  ;;  %456 = vmatpush.msra.mxu2 %v3462_v36  ;;  %v3539_v62 = vld [vmem:[#allocation4 + $0x10] sm:$0xff]  ;;  %v325_v3 = vld [vmem:[%s5117_s2] sm:$0x7] }
  0x4d   : > { %437 = vmatpush.msrb.mxu1 %v3416_v61  ;;  %545 = vmatpush.msra.mxu0 %v3424_v63 }
  0x4e   : > { %526 = vmatpush.msra.mxu3 %v3431_v2  ;;  %457 = vmatpush.msra.mxu2 %v3480_v42 }
  0x4f   : > { %438 = vmatpush.msrb.mxu1 %v3434_v4  ;;  %546 = vmatpush.msra.mxu0 %v3442_v6 }
  0x50   : > { %527 = vmatpush.msra.mxu3 %v3451_v8  ;;  %458 = vmatpush.msra.mxu2 %v3509_v51 }
  0x51   : > { %439 = vmatpush.msrb.mxu1 %v3453_v34  ;;  %547 = vmatpush.msra.mxu0 %v3460_v35 }
  0x52   : > { %528 = vmatpush.msra.mxu3 %v3468_v37  ;;  %459 = vmatpush.msra.mxu2 %v3520_v55 }
  0x53   : > { %440 = vmatpush.msrb.mxu1 %v3470_v39  ;;  %548 = vmatpush.msra.mxu0 %v3478_v40 }
  0x54   : > { %529 = vmatpush.msra.mxu3 %v3486_v43  ;;  %460 = vmatpush.msra.mxu2 %v3529_v58 }
  0x55   : > { %441 = vmatpush.msrb.mxu1 %v3488_v44  ;;  %530 = vmatmul.f32.vlgmr.msra.gmra.mxu3 %v3493_v45 }
  0x56   : > { %549 = vmatpush.msra.mxu0 %v3498_v48  ;;  %2870 = vmatmul.msk.f32.vlgmr.msrb.gmra.mxu1 %vm403_vm7, %v402_v5 }
  0x57   : > { %550 = vmatmul.f32.vlgmr.msra.gmra.mxu0 %v3493_v45  ;;  %554 = vmatpush.msra.mxu1 %v3507_v49 }
  0x58   : > { %808 = vmatpush.msrb.mxu0 %v3241_v9  ;;  %748 = vmatpush.msrb.mxu3 %v373_v1  ;;  %v3548_v9 = vld [vmem:[%s5118_s3 + $0x118] sm:$0xff] }
  0x59   : > { %555 = vmatpush.msra.mxu1 %v3518_v52  ;;  %461 = vmatpush.msra.mxu2 %v3539_v62 }
  0x5a   : > { %809 = vmatpush.msrb.mxu0 %v3246_v10  ;;  %749 = vmatpush.msrb.mxu3 %v3444_v7  ;;  %v3557_v10 = vld [vmem:[%s5118_s3 + $0x100] sm:$0xff] }
  0x5b   : > { %556 = vmatpush.msra.mxu1 %v3527_v56  ;;  %2871 = vmatmul.msk.f32.vlgmr.msra.gmra.mxu2 %vm403_vm7, %v402_v5  ;;  %v333_v5 = vld [vmem:[%s5119_s4] sm:$0x7] }
  0x5c   : > { %810 = vmatpush.msrb.mxu0 %v3266_v14  ;;  %750 = vmatpush.msrb.mxu3 %v3462_v36  ;;  %v3566_v14 = vld [vmem:[%s5118_s3 + $0xe8] sm:$0xff] }
  0x5d   : > { %557 = vmatpush.msra.mxu1 %v3537_v59  ;;  %708 = vmatpush.msrb.mxu2 %v3255_v12 }
  0x5e   : > { %811 = vmatpush.msrb.mxu0 %v3283_v18  ;;  %751 = vmatpush.msrb.mxu3 %v3480_v42  ;;  %v3575_v18 = vld [vmem:[%s5118_s3 + $0xd0] sm:$0xff] }
  0x5f   : > { %558 = vmatpush.msra.mxu1 %v3548_v9  ;;  %709 = vmatpush.msrb.mxu2 %v3268_v15 }
  0x60   : > { %812 = vmatpush.msrb.mxu0 %v3298_v21  ;;  %752 = vmatpush.msrb.mxu3 %v3509_v51  ;;  %v3584_v21 = vld [vmem:[%s5118_s3 + $0xb8] sm:$0xff] }
  0x61   : > { %559 = vmatpush.msra.mxu1 %v3557_v10  ;;  %710 = vmatpush.msrb.mxu2 %v3277_v17 }
  0x62   : > { %813 = vmatpush.msrb.mxu0 %v3313_v24  ;;  %753 = vmatpush.msrb.mxu3 %v3520_v55  ;;  %v3593_v24 = vld [vmem:[%s5118_s3 + $0xa0] sm:$0xff] }
  0x63   : > { %560 = vmatpush.msra.mxu1 %v3566_v14  ;;  %711 = vmatpush.msrb.mxu2 %v3292_v20 }
  0x64   : > { %814 = vmatpush.msrb.mxu0 %v3328_v27  ;;  %754 = vmatpush.msrb.mxu3 %v3529_v58  ;;  %v3602_v27 = vld [vmem:[%s5118_s3 + $0x88] sm:$0xff] }
  0x65   : > { %561 = vmatpush.msra.mxu1 %v3575_v18  ;;  %712 = vmatpush.msrb.mxu2 %v3307_v23 }
  0x66   : > { %815 = vmatpush.msrb.mxu0 %v3340_v29  ;;  %755 = vmatpush.msrb.mxu3 %v3539_v62  ;;  %v3611_v29 = vld [vmem:[%s5118_s3 + $0x70] sm:$0xff] }
  0x67   : > { %562 = vmatpush.msra.mxu1 %v3584_v21  ;;  %713 = vmatpush.msrb.mxu2 %v3322_v26 }
  0x68   : > { %816 = vmatpush.msrb.mxu0 %v3348_v31  ;;  %1002 = vmatpush.msra.mxu3 %v3255_v12  ;;  %v3620_v31 = vld [vmem:[%s5118_s3 + $0x58] sm:$0xff]  ;;  %v3629_v12 = vld [vmem:[%s5118_s3 + $0x40] sm:$0xff] }
  0x69   : > { %563 = vmatpush.msra.mxu1 %v3593_v24  ;;  %714 = vmatpush.msrb.mxu2 %v3342_v30 }
  0x6a   : > { %817 = vmatpush.msrb.mxu0 %v3380_v46  ;;  %1003 = vmatpush.msra.mxu3 %v3268_v15  ;;  %v3638_v15 = vld [vmem:[%s5118_s3 + $0x28] sm:$0xff]  ;;  %v3647_v46 = vld [vmem:[%s5118_s3 + $0x10] sm:$0xff] }
  0x6b   : > { %564 = vmatpush.msra.mxu1 %v3602_v27  ;;  %715 = vmatpush.msrb.mxu2 %v3355_v33 }
  0x6c   : > { %818 = vmatpush.msrb.mxu0 %v3397_v53  ;;  %1004 = vmatpush.msra.mxu3 %v3277_v17  ;;  %v644_v17 = vld [vmem:[%s3229_s8 + $0x1] sm:$0x1] }
  0x6d   : > { %565 = vmatpush.msra.mxu1 %v3611_v29  ;;  %728 = vmatpush.msra.mxu2 %v3364_v38 }
  0x6e   : > { %819 = vmatpush.msrb.mxu0 %v3414_v60  ;;  %1005 = vmatpush.msra.mxu3 %v3292_v20 }
  0x6f   : > { %566 = vmatpush.msra.mxu1 %v3620_v31  ;;  %729 = vmatpush.msra.mxu2 %v3382_v47 }
  0x70   : > { %820 = vmatpush.msrb.mxu0 %v3431_v2  ;;  %1006 = vmatpush.msra.mxu3 %v3307_v23 }
  0x71   : > { %567 = vmatpush.msra.mxu1 %v3629_v12  ;;  %730 = vmatpush.msra.mxu2 %v3399_v54 }
  0x72   : > { %821 = vmatpush.msrb.mxu0 %v3451_v8  ;;  %1007 = vmatpush.msra.mxu3 %v3322_v26  ;;  %v649_v26 = vld [vmem:[%s3229_s8 + $0x29] sm:$0x1]  ;;  %v3712_v8 = vperm.slane %v333_v5, 1 }
  0x73   : > { %568 = vmatpush.msra.mxu1 %v3638_v15  ;;  %731 = vmatpush.msra.mxu2 %v3416_v61 }
  0x74   : > { %822 = vmatpush.msrb.mxu0 %v3468_v37  ;;  %1008 = vmatpush.msra.mxu3 %v3342_v30  ;;  %5153 = vst [vmem:[#allocation8_spill] sm:$0xff] %v3712_v8 }
  0x75   : > { %569 = vmatpush.msra.mxu1 %v3647_v46  ;;  %732 = vmatpush.msra.mxu2 %v3434_v4 }
  0x76   : > { %570 = vmatmul.f32.vlgmr.msra.gmra.mxu1 %v3493_v45  ;;  %823 = vmatpush.msrb.mxu0 %v3486_v43 }
  0x77   : > { %828 = vmatpush.msrb.mxu1 %v3251_v11  ;;  %733 = vmatpush.msra.mxu2 %v3453_v34  ;;  %v645_v11 = vld [vmem:[%s3229_s8 + $0x9] sm:$0x1] }
  0x78   : > { %1009 = vmatpush.msra.mxu3 %v3355_v33 }
  0x79   : > { %829 = vmatpush.msrb.mxu1 %v3260_v13  ;;  %734 = vmatpush.msra.mxu2 %v3470_v39  ;;  %v646_v13 = vld [vmem:[%s3229_s8 + $0x11] sm:$0x1] }
  0x7a   : > { %v686_v20 = vrot.slane %v646_v13, 6 }
  0x7b   : > { %830 = vmatpush.msrb.mxu1 %v3273_v16  ;;  %735 = vmatpush.msra.mxu2 %v3488_v44  ;;  %v684_v16 = vrot.slane %v645_v11, 7 }
  0x7d   : > { %831 = vmatpush.msrb.mxu1 %v3288_v19  ;;  %v647_v19 = vld [vmem:[%s3229_s8 + $0x19] sm:$0x1]  ;;  %v685_v23 = vsel %vm383_vm0, %v684_v16, %v644_v17 }
  0x7f   : > { %832 = vmatpush.msrb.mxu1 %v3303_v22  ;;  %v648_v22 = vld [vmem:[%s3229_s8 + $0x21] sm:$0x1] }
  0x80   : > { %v690_v30 = vrot.slane %v648_v22, 4 }
  0x81   : > { %833 = vmatpush.msrb.mxu1 %v3318_v25  ;;  %v688_v25 = vrot.slane %v647_v19, 5 }
  0x83   : > { %834 = vmatpush.msrb.mxu1 %v3333_v28  ;;  %v687_v28 = vsel %vm386_vm1, %v686_v20, %v685_v23 }
  0x84   : > { %v689_v33 = vsel %vm389_vm2, %v688_v25, %v687_v28 }
  0x85   : > { %835 = vmatpush.msrb.mxu1 %v3353_v32  ;;  %v650_v32 = vld [vmem:[%s3229_s8 + $0x31] sm:$0x1]  ;;  %v691_v53 = vsel %vm392_vm3, %v690_v30, %v689_v33 }
  0x87   : > { %836 = vmatpush.msrb.mxu1 %v3373_v41  ;;  %v692_v41 = vrot.slane %v649_v26, 3  ;;  %v3741_v26 = vperm.slane %v333_v5, 2 }
  0x89   : > { %837 = vmatpush.msrb.mxu1 %v3390_v50  ;;  %v651_v50 = vld [vmem:[%s3229_s8 + $0x39] sm:$0x1]  ;;  %v693_v60 = vsel %vm395_vm4, %v692_v41, %v691_v53 }
  0x8b   : > { %838 = vmatpush.msrb.mxu1 %v3407_v57  ;;  %v694_v57 = vrot.slane %v650_v32, 2 }
  0x8d   : > { %839 = vmatpush.msrb.mxu1 %v3424_v63  ;;  %v696_v63 = vrot.slane %v651_v50, 1  ;;  %v695_v0 = vsel %vm398_vm5, %v694_v57, %v693_v60  ;;  %v3743_v50 = vperm.slane %v325_v3, 2 }
  0x8f   : > { %840 = vmatpush.msrb.mxu1 %v3442_v6  ;;  %v697_v1 = vsel %vm401_vm6, %v696_v63, %v695_v0  ;;  %v3710_v6 = vperm.slane %v325_v3, 1 }
  0x90   : > { %2874 = vmatmul.msk.f32.vlgmr.msrb.gmra.mxu2 %vm403_vm7, %v697_v1  ;;  %2876 = vmatmul.msk.f32.vlgmr.msrb.gmra.mxu3 %vm403_vm7, %v697_v1 }
  0x91   : > { %841 = vmatpush.msrb.mxu1 %v3460_v35  ;;  %848 = vmatpush.msrb.mxu2 %v3507_v49 }
  0x92   : > { %1022 = vmatpush.msrb.mxu3 %v3364_v38  ;;  %v3719_v38 = vperm.slane %v325_v3, 0 }
  0x93   : > { %842 = vmatpush.msrb.mxu1 %v3478_v40  ;;  %849 = vmatpush.msrb.mxu2 %v3518_v52  ;;  %v3725_v40 = vperm.slane %v333_v5, 0 }
  0x94   : > { %1023 = vmatpush.msrb.mxu3 %v3382_v47 }
  0x95   : > { %843 = vmatpush.msrb.mxu1 %v3498_v48  ;;  %850 = vmatpush.msrb.mxu2 %v3527_v56 }
  0x96   : > { %1024 = vmatpush.msrb.mxu3 %v3399_v54 }
  0x97   : > { %851 = vmatpush.msrb.mxu2 %v3537_v59 }
  0x98   : > { %1025 = vmatpush.msrb.mxu3 %v3416_v61  ;;  %2875 = vmatmul.msk.f32.vlgmr.msra.gmra.mxu2 %vm403_vm7, %v697_v1 }
  0x99   : > { %852 = vmatpush.msrb.mxu2 %v3548_v9 }
  0x9a   : > { %1026 = vmatpush.msrb.mxu3 %v3434_v4 }
  0x9b   : > { %853 = vmatpush.msrb.mxu2 %v3557_v10 }
  0x9c   : > { %1027 = vmatpush.msrb.mxu3 %v3453_v34 }
  0x9d   : > { %854 = vmatpush.msrb.mxu2 %v3566_v14 }
  0x9e   : > { %1028 = vmatpush.msrb.mxu3 %v3470_v39 }
  0x9f   : > { %855 = vmatpush.msrb.mxu2 %v3575_v18 }
  0xa0   : > { %1029 = vmatpush.msrb.mxu3 %v3488_v44 }
  0xa1   : > { %856 = vmatpush.msrb.mxu2 %v3584_v21 }
  0xa3   : > { %857 = vmatpush.msrb.mxu2 %v3593_v24 }
  0xa5   : > { %858 = vmatpush.msrb.mxu2 %v3602_v27 }
  0xa7   : > { %859 = vmatpush.msrb.mxu2 %v3611_v29 }
  0xa9   : > { %860 = vmatpush.msrb.mxu2 %v3620_v31 }
  0xab   : > { %861 = vmatpush.msrb.mxu2 %v3629_v12 }
  0xad   : > { %862 = vmatpush.msrb.mxu2 %v3638_v15 }
  0xaf   : > { %863 = vmatpush.msrb.mxu2 %v3647_v46 }
  0xc5   : > { %v423_v2 = vpop.f32.mrf.mxu1 }
  0xc6   : > { %v424_v4 = vadd.f32 %v423_v2, %v3719_v38 }
  0xd3   : > { %v443_v47 = vpop.f32.mrf.mxu1 }
  0xd4   : > { %v551_v35 = vpop.f32.mrf.mxu0  ;;  %v444_v54 = vadd.f32 %v443_v47, %v3710_v6 }
  0xd5   : > { %v552_v37 = vadd.f32 %v551_v35, %v3712_v8 }
  0xd7   : > { %v575_v61 = vadd.f32 %v552_v37, %v444_v54 }
  0xd8   : > { %v531_v48 = vpop.f32.mrf.mxu3 }
  0xd9   : > { %v2873_v43 = vmul.f32 -1.442695, %v575_v61  ;;  %v532_v11 = vadd.f32 %v531_v48, %v3725_v40 }
  0xdb   : > { %2967 = vpow2.f32 %v2873_v43  ;;  %v574_v34 = vadd.f32 %v532_v11, %v424_v4 }
  0xdd   : > { %v2872_v13 = vmul.f32 -1.442695, %v574_v34 }
  0xde   : > { %v463_v57 = vpop.f32.mrf.mxu2 }
  0xdf   : > { %2969 = vpow2.f32 %v2872_v13  ;;  %v464_v5 = vadd.f32 %v463_v57, %v3743_v50 }
  0xe1   : > { %v2968_v39 = vpop.eup %2967 }
  0xe2   : > { %v583_v16 = vadd.f32 1.0, %v2968_v39 }
  0xe4   : > { %2971 = vrcp.f32 %v583_v16  ;;  %vm604_vm10 = vweird.f32 %v583_v16  ;;  %v610_v1 = vand.u32 2147483648, %v583_v16  ;;  %v608_v54 = vand.u32 2147483647, %v583_v16 }
  0xe5   : > { %v2970_v44 = vpop.eup %2969 }
  0xe6   : > { %v582_v17 = vadd.f32 1.0, %v2970_v44  ;;  %v611_v37 = vor.u32 1.1754944e-38, %v610_v1  ;;  %vm609_vm15 = vcmp.eq.f32.partialorder %v608_v54, 8.507059e+37  ;;  %v944_v1 = vld [vmem:[%s3229_s8 + $0x32] sm:$0x1] }
  0xe7   : > { %v988_v54 = vrot.slane %v944_v1, 2  ;;  %v3932_v1 = vld [vmem:[%s5118_s3 + $0x80] sm:$0xff] }
  0xe8   : > { %2973 = vrcp.f32 %v582_v17  ;;  %v595_v30 = vand.u32 2147483648, %v582_v17  ;;  %v593_v41 = vand.u32 2147483647, %v582_v17  ;;  %vm589_vm9 = vweird.f32 %v582_v17 }
  0xea   : > { %v2972_v19 = vpop.eup %2971  ;;  %v596_v0 = vor.u32 1.1754944e-38, %v595_v30  ;;  %vm594_vm13 = vcmp.eq.f32.partialorder %v593_v41, 8.507059e+37  ;;  %v938_v30 = vld [vmem:[%s3229_s8 + $0x2] sm:$0x1] }
  0xeb   : > { %v600_v20 = vmul.f32 %v2972_v19, %v583_v16  ;;  %vm605_vm12 = vweird.f32 %v2972_v19  ;;  %v942_v41 = vld [vmem:[%s3229_s8 + $0x22] sm:$0x1] }
  0xec   : > { %vm606_vm14 = vmor %vm604_vm10, %vm605_vm12 }
  0xed   : > { %v601_v25 = vsub.f32 1.0, %v600_v20 }
  0xee   : > { %v2974_v22 = vpop.eup %2973 }
  0xef   : > { %v585_v23 = vmul.f32 %v2974_v22, %v582_v17  ;;  %vm590_vm8 = vweird.f32 %v2974_v22  ;;  %v602_v53 = vmul.f32 %v2972_v19, %v601_v25  ;;  %v940_v25 = vld [vmem:[%s3229_s8 + $0x12] sm:$0x1] }
  0xf0   : > { %vm591_vm11 = vmor %vm589_vm9, %vm590_vm8 }
  0xf1   : > { %v586_v28 = vsub.f32 1.0, %v585_v23  ;;  %v603_v35 = vadd.f32 %v2972_v19, %v602_v53  ;;  %v939_v23 = vld [vmem:[%s3229_s8 + $0xa] sm:$0x1] }
  0xf3   : > { %v571_v32 = vpop.f32.mrf.mxu1  ;;  %v587_v33 = vmul.f32 %v2974_v22, %v586_v28  ;;  %v607_v4 = vsel %vm606_vm14, %v2972_v19, %v603_v35  ;;  %v978_v28 = vrot.slane %v939_v23, 7  ;;  %v3860_v23 = vld [vmem:[%s5118_s3 + $0xf0] sm:$0xff] }
  0xf4   : > { %v572_v60 = vadd.f32 %v571_v32, %v3741_v26  ;;  %v612_v43 = vsel %vm609_vm15, %v611_v37, %v607_v4  ;;  %v941_v32 = vld [vmem:[%s3229_s8 + $0x1a] sm:$0x1] }
  0xf5   : > { %v588_v63 = vadd.f32 %v2974_v22, %v587_v33  ;;  %v617_v48 = vsub.f32 1.0, %v612_v43  ;;  %v619_v13 = vmul.f32 %v612_v43, %v3493_v45  ;;  %v980_v33 = vrot.slane %v940_v25, 6  ;;  %v3865_v25 = vld [vmem:[%s5118_s3 + $0xf8] sm:$0xff] }
  0xf6   : > { %v979_v53 = vsel %vm383_vm0, %v978_v28, %v938_v30  ;;  %v982_v57 = vrot.slane %v941_v32, 5  ;;  %v3878_v32 = vld [vmem:[%s5118_s3 + $0xe0] sm:$0xff] }
  0xf7   : > { %v592_v2 = vsel %vm591_vm11, %v2974_v22, %v588_v63  ;;  %v981_v63 = vsel %vm386_vm1, %v980_v33, %v979_v53  ;;  %v3885_v33 = vld [vmem:[%s5118_s3 + $0xc0] sm:$0xff] }
  0xf8   : > { %v597_v47 = vsel %vm594_vm13, %v596_v0, %v592_v2  ;;  %v984_v0 = vrot.slane %v942_v41, 4  ;;  %v983_v2 = vsel %vm389_vm2, %v982_v57, %v981_v63  ;;  %v3891_v57 = vld [vmem:[%s5118_s3 + $0xc8] sm:$0xff] }
  0xf9   : > { %v614_v3 = vmul.f32 %v597_v47, %v572_v60  ;;  %v943_v60 = vld [vmem:[%s3229_s8 + $0x2a] sm:$0x1]  ;;  %v945_v47 = vld [vmem:[%s3229_s8 + $0x3a] sm:$0x1] }
  0xfa   : > { %v985_v35 = vsel %vm392_vm3, %v984_v0, %v983_v2  ;;  %v3901_v63 = vld [vmem:[%s5118_s3 + $0xa8] sm:$0xff]  ;;  %v3906_v0 = vld [vmem:[%s5118_s3 + $0xb0] sm:$0xff] }
  0xfb   : > { %v615_v61 = vadd.f32 %v614_v3, %v464_v5  ;;  %v986_v5 = vrot.slane %v943_v60, 3  ;;  %v3945_v2 = vld [vmem:[%s5118_s3 + $0x68] sm:$0xff] }
  0xfd   : > { %2975 = vtanh.f32 %v615_v61  ;;  %v987_v37 = vsel %vm395_vm4, %v986_v5, %v985_v35  ;;  %v990_v61 = vrot.slane %v945_v47, 1 }
  0xfe   : > { %v989_v4 = vsel %vm398_vm5, %v988_v54, %v987_v37  ;;  %v3958_v54 = vld [vmem:[%s5118_s3 + $0x50] sm:$0xff]  ;;  %v3973_v37 = vld [vmem:[%s5118_s3 + $0x38] sm:$0xff] }
  0xff   : > { %v3784_v43 = vsel %vm401_vm6, %v990_v61, %v989_v4  ;;  %v3987_v61 = vld [vmem:[%s5118_s3 + $0x20] sm:$0xff]  ;;  %v4000_v4 = vld [vmem:[%s5118_s3 + $0x8] sm:$0xff] }
 0x100   : > { %2879 = vmatmul.msk.f32.vlgmr.msra.gmra.mxu3 %vm403_vm7, %v3784_v43 }
 0x101   : > { %1142 = vmatpush.msra.mxu3 %v3507_v49  ;;  %v3817_v49 = vld [vmem:[%s5118_s3 + $0x138] sm:$0xff] }
 0x103   : > { %v2976_v11 = vpop.eup %2975  ;;  %1143 = vmatpush.msra.mxu3 %v3518_v52  ;;  %v3830_v52 = vld [vmem:[%s5118_s3 + $0x120] sm:$0xff] }
 0x104   : > { %v618_v34 = vmul.f32 %v2976_v11, %v617_v48  ;;  %v3789_v48 = vld [vmem:[%s5118_s3 + $0x168] sm:$0xff]  ;;  %v3794_v11 = vld [vmem:[%s5118_s3 + $0x170] sm:$0xff] }
 0x105   : > { %1102 = vmatpush.msra.mxu1 %v3789_v48  ;;  %1122 = vmatpush.msra.mxu2 %v3794_v11 }
 0x106   : > { %v3748_v39 = vadd.f32 %v619_v13, %v618_v34  ;;  %v3804_v34 = vld [vmem:[%s5118_s3 + $0x150] sm:$0xff]  ;;  %v3809_v13 = vld [vmem:[%s5118_s3 + $0x158] sm:$0xff]  ;;  %1144 = vmatpush.msra.mxu3 %v3527_v56  ;;  %v3843_v56 = vld [vmem:[%s5118_s3 + $0x108] sm:$0xff] }
 0x107   : > { %1103 = vmatpush.msra.mxu1 %v3804_v34  ;;  %1123 = vmatpush.msra.mxu2 %v3809_v13 }
 0x108   : > { %v622_v16 = vrot.slane %v3748_v39, 1  ;;  %v623_v44 = vrot.slane %v3748_v39, 2  ;;  %v624_v17 = vrot.slane %v3748_v39, 3  ;;  %636 = vst [vmem:[%s3235_s9] sm:$0x1] %v3748_v39  ;;  %824 = vmatmul.f32.vlgmr.msrb.gmra.mxu0 %v3748_v39  ;;  %844 = vmatmul.f32.vlgmr.msrb.gmra.mxu1 %v3748_v39  ;;  %v625_v45 = vrot.slane %v3748_v39, 4 }
 0x109   : > { %864 = vmatmul.f32.vlgmr.msrb.gmra.mxu2 %v3748_v39  ;;  %v626_v19 = vrot.slane %v3748_v39, 5  ;;  %v627_v20 = vrot.slane %v3748_v39, 6  ;;  %v628_v22 = vrot.slane %v3748_v39, 7  ;;  %1104 = vmatpush.msra.mxu1 %v3817_v49 }
 0x10a   : > { %637 = vst [vmem:[%s3235_s9 + $0x8] sm:$0x1] %v622_v16  ;;  %v3822_v16 = vld [vmem:[%s5118_s3 + $0x140] sm:$0xff]  ;;  %1145 = vmatpush.msra.mxu3 %v3537_v59 }
 0x10b   : > { %638 = vst [vmem:[%s3235_s9 + $0x10] sm:$0x1] %v623_v44  ;;  %1124 = vmatpush.msra.mxu2 %v3822_v16  ;;  %v3835_v44 = vld [vmem:[%s5118_s3 + $0x128] sm:$0xff]  ;;  %1105 = vmatpush.msra.mxu1 %v3830_v52 }
 0x10c   : > { %639 = vst [vmem:[%s3235_s9 + $0x18] sm:$0x1] %v624_v17  ;;  %2880 = vmatmul.msk.f32.vlgmr.msrb.gmra.mxu3 %vm403_vm7, %v3784_v43 }
 0x10d   : > { %640 = vst [vmem:[%s3235_s9 + $0x20] sm:$0x1] %v625_v45  ;;  %1125 = vmatpush.msra.mxu2 %v3835_v44  ;;  %v3848_v45 = vld [vmem:[%s5118_s3 + $0x110] sm:$0xff]  ;;  %1106 = vmatpush.msra.mxu1 %v3843_v56 }
 0x10e   : > { %641 = vst [vmem:[%s3235_s9 + $0x28] sm:$0x1] %v626_v19  ;;  %1146 = vmatpush.msra.mxu3 %v3548_v9  ;;  %v3873_v9 = vld [vmem:[%s5118_s3 + $0xd8] sm:$0xff] }
 0x10f   : > { %642 = vst [vmem:[%s3235_s9 + $0x30] sm:$0x1] %v627_v20  ;;  %1126 = vmatpush.msra.mxu2 %v3848_v45  ;;  %1107 = vmatpush.msra.mxu1 %v3860_v23 }
 0x110   : > { %643 = vst [vmem:[%s3235_s9 + $0x38] sm:$0x1] %v628_v22  ;;  %1147 = vmatpush.msra.mxu3 %v3557_v10 }
 0x111   : > { %1127 = vmatpush.msra.mxu2 %v3865_v25  ;;  %1108 = vmatpush.msra.mxu1 %v3873_v9 }
 0x112   : > { %1148 = vmatpush.msra.mxu3 %v3566_v14  ;;  %v3914_v14 = vld [vmem:[%s5118_s3 + $0x90] sm:$0xff] }
 0x113   : > { %v717_v3 = vpop.f32.mrf.mxu2  ;;  %1128 = vmatpush.msra.mxu2 %v3878_v32  ;;  %1109 = vmatpush.msra.mxu1 %v3885_v33 }
 0x114   : > { %v718_v19 = vadd.f32 %v717_v3, %v3719_v38  ;;  %1149 = vmatpush.msra.mxu3 %v3575_v18  ;;  %v3919_v18 = vld [vmem:[%s5118_s3 + $0x98] sm:$0xff] }
 0x115   : > { %1129 = vmatpush.msra.mxu2 %v3891_v57  ;;  %1110 = vmatpush.msra.mxu1 %v3901_v63 }
 0x116   : > { %1150 = vmatpush.msra.mxu3 %v3584_v21  ;;  %v3927_v21 = vld [vmem:[%s5118_s3 + $0x78] sm:$0xff] }
 0x117   : > { %1130 = vmatpush.msra.mxu2 %v3906_v0  ;;  %1111 = vmatpush.msra.mxu1 %v3914_v14 }
 0x118   : > { %1151 = vmatpush.msra.mxu3 %v3593_v24  ;;  %v3940_v24 = vld [vmem:[%s5118_s3 + $0x60] sm:$0xff] }
 0x119   : > { %1131 = vmatpush.msra.mxu2 %v3919_v18  ;;  %1112 = vmatpush.msra.mxu1 %v3927_v21 }
 0x11a   : > { %1152 = vmatpush.msra.mxu3 %v3602_v27  ;;  %v3953_v27 = vld [vmem:[%s5118_s3 + $0x48] sm:$0xff] }
 0x11b   : > { %v737_v17 = vpop.f32.mrf.mxu2  ;;  %1132 = vmatpush.msra.mxu2 %v3932_v1  ;;  %1113 = vmatpush.msra.mxu1 %v3940_v24 }
 0x11c   : > { %v738_v20 = vadd.f32 %v737_v17, %v3710_v6  ;;  %1153 = vmatpush.msra.mxu3 %v3611_v29  ;;  %v3968_v29 = vld [vmem:[%s5118_s3 + $0x30] sm:$0xff] }
 0x11d   : > { %1133 = vmatpush.msra.mxu2 %v3945_v2  ;;  %1114 = vmatpush.msra.mxu1 %v3953_v27 }
 0x11e   : > { %1154 = vmatpush.msra.mxu3 %v3620_v31  ;;  %v3982_v31 = vld [vmem:[%s5118_s3 + $0x18] sm:$0xff] }
 0x11f   : > { %1134 = vmatpush.msra.mxu2 %v3958_v54  ;;  %1115 = vmatpush.msra.mxu1 %v3968_v29 }
 0x120   : > { %1155 = vmatpush.msra.mxu3 %v3629_v12  ;;  %v3995_v12 = vld [vmem:[%s5118_s3] sm:$0xff] }
 0x121   : > { %1135 = vmatpush.msra.mxu2 %v3973_v37  ;;  %1116 = vmatpush.msra.mxu1 %v3982_v31 }
 0x122   : > { %1156 = vmatpush.msra.mxu3 %v3638_v15 }
 0x123   : > { %1136 = vmatpush.msra.mxu2 %v3987_v61  ;;  %1117 = vmatpush.msra.mxu1 %v3995_v12 }
 0x124   : > { %1157 = vmatpush.msra.mxu3 %v3647_v46 }
 0x125   : > { %1137 = vmatpush.msra.mxu2 %v4000_v4 }
 0x126   : > { %1416 = vmatpush.msrb.mxu3 %v3794_v11 }
 0x127   : > { %1396 = vmatpush.msrb.mxu2 %v3789_v48 }
 0x128   : > { %1417 = vmatpush.msrb.mxu3 %v3809_v13 }
 0x129   : > { %1397 = vmatpush.msrb.mxu2 %v3804_v34 }
 0x12a   : > { %1418 = vmatpush.msrb.mxu3 %v3822_v16 }
 0x12b   : > { %1398 = vmatpush.msrb.mxu2 %v3817_v49 }
 0x12c   : > { %1419 = vmatpush.msrb.mxu3 %v3835_v44 }
 0x12d   : > { %1399 = vmatpush.msrb.mxu2 %v3830_v52 }
 0x12e   : > { %1420 = vmatpush.msrb.mxu3 %v3848_v45 }
 0x12f   : > { %1400 = vmatpush.msrb.mxu2 %v3843_v56 }
 0x130   : > { %1421 = vmatpush.msrb.mxu3 %v3865_v25 }
 0x131   : > { %1401 = vmatpush.msrb.mxu2 %v3860_v23 }
 0x132   : > { %1422 = vmatpush.msrb.mxu3 %v3878_v32 }
 0x133   : > { %1402 = vmatpush.msrb.mxu2 %v3873_v9 }
 0x134   : > { %1423 = vmatpush.msrb.mxu3 %v3891_v57 }
 0x135   : > { %1403 = vmatpush.msrb.mxu2 %v3885_v33 }
 0x136   : > { %1424 = vmatpush.msrb.mxu3 %v3906_v0 }
 0x137   : > { %1404 = vmatpush.msrb.mxu2 %v3901_v63 }
 0x138   : > { %1425 = vmatpush.msrb.mxu3 %v3919_v18 }
 0x139   : > { %1405 = vmatpush.msrb.mxu2 %v3914_v14 }
 0x13a   : > { %1426 = vmatpush.msrb.mxu3 %v3932_v1 }
 0x13b   : > { %1406 = vmatpush.msrb.mxu2 %v3927_v21 }
 0x13c   : > { %1427 = vmatpush.msrb.mxu3 %v3945_v2 }
 0x13d   : > { %1407 = vmatpush.msrb.mxu2 %v3940_v24 }
 0x13e   : > { %1428 = vmatpush.msrb.mxu3 %v3958_v54 }
 0x13f   : > { %1408 = vmatpush.msrb.mxu2 %v3953_v27 }
 0x140   : > { %1429 = vmatpush.msrb.mxu3 %v3973_v37 }
 0x141   : > { %1409 = vmatpush.msrb.mxu2 %v3968_v29 }
 0x142   : > { %1430 = vmatpush.msrb.mxu3 %v3987_v61 }
 0x143   : > { %1410 = vmatpush.msrb.mxu2 %v3982_v31 }
 0x144   : > { %1431 = vmatpush.msrb.mxu3 %v4000_v4 }
 0x145   : > { %1411 = vmatpush.msrb.mxu2 %v3995_v12 }
 0x185   : > { %v825_v59 = vpop.f32.mrf.mxu0  ;;  %v845_v22 = vpop.f32.mrf.mxu1 }
 0x186   : > { %v826_v28 = vadd.f32 %v825_v59, %v3725_v40  ;;  %v846_v30 = vadd.f32 %v845_v22, %v3712_v8  ;;  %v4008_v59 = vld [vmem:[#allocation4 + $0xb8] sm:$0xff] }
 0x187   : > { %1042 = vmatpush.msra.mxu0 %v4008_v59  ;;  %1336 = vmatpush.msrb.mxu1 %v4008_v59 }
 0x188   : > { %v868_v41 = vadd.f32 %v826_v28, %v718_v19  ;;  %v869_v53 = vadd.f32 %v846_v30, %v738_v20 }
 0x189   : > { %1043 = vmatpush.msra.mxu0 %v3444_v7 }
 0x18a   : > { %v2877_v60 = vmul.f32 -1.442695, %v868_v41  ;;  %v2878_v10 = vmul.f32 -1.442695, %v869_v53 }
 0x18b   : > { %1044 = vmatpush.msra.mxu0 %v3462_v36 }
 0x18c   : > { %2977 = vpow2.f32 %v2877_v60  ;;  %v865_v60 = vpop.f32.mrf.mxu2 }
 0x18d   : > { %2979 = vpow2.f32 %v2878_v10  ;;  %v757_v10 = vpop.f32.mrf.mxu3  ;;  %1045 = vmatpush.msra.mxu0 %v3480_v42 }
 0x18f   : > { %1046 = vmatpush.msra.mxu0 %v3509_v51  ;;  %v4036_v51 = vld [vmem:[#allocation4 + $0xa8] sm:$0xff] }
 0x191   : > { %1047 = vmatpush.msra.mxu0 %v3520_v55  ;;  %v4043_v55 = vld [vmem:[#allocation4 + $0x90] sm:$0xff] }
 0x192   : > { %v2978_v5 = vpop.eup %2977 }
 0x193   : > { %v2980_v47 = vpop.eup %2979  ;;  %v876_v35 = vadd.f32 1.0, %v2978_v5  ;;  %1048 = vmatpush.msra.mxu0 %v3529_v58 }
 0x194   : > { %v3960_v3 = vadd.f32 1.0, %v2980_v47 }
 0x195   : > { %2981 = vrcp.f32 %v876_v35  ;;  %v889_v30 = vand.u32 2147483648, %v876_v35  ;;  %v887_v41 = vand.u32 2147483647, %v876_v35  ;;  %vm883_vm9 = vweird.f32 %v876_v35  ;;  %1049 = vmatpush.msra.mxu0 %v3539_v62 }
 0x196   : > { %2983 = vrcp.f32 %v3960_v3  ;;  %v904_v36 = vand.u32 2147483648, %v3960_v3  ;;  %vm898_vm13 = vweird.f32 %v3960_v3  ;;  %2881 = vmatmul.msk.f32.vlgmr.msra.gmra.mxu0 %vm403_vm7, %v3784_v43 }
 0x197   : > { %v890_v47 = vor.u32 1.1754944e-38, %v889_v30  ;;  %vm888_vm11 = vcmp.eq.f32.partialorder %v887_v41, 8.507059e+37  ;;  %1296 = vmatpush.msrb.mxu0 %v4036_v51 }
 0x199   : > { %1297 = vmatpush.msrb.mxu0 %v4043_v55 }
 0x19b   : > { %v2982_v17 = vpop.eup %2981 }
 0x19c   : > { %v2984_v19 = vpop.eup %2983  ;;  %v879_v20 = vmul.f32 %v2982_v17, %v876_v35  ;;  %vm884_vm8 = vweird.f32 %v2982_v17 }
 0x19d   : > { %v894_v15 = vmul.f32 %v2984_v19, %v3960_v3  ;;  %vm885_vm10 = vmor %vm883_vm9, %vm884_vm8  ;;  %vm899_vm12 = vweird.f32 %v2984_v19 }
 0x19e   : > { %v880_v22 = vsub.f32 1.0, %v879_v20  ;;  %v866_v20 = vadd.f32 %v865_v60, %v3741_v26  ;;  %vm900_vm14 = vmor %vm898_vm13, %vm899_vm12 }
 0x19f   : > { %v895_v28 = vsub.f32 1.0, %v894_v15  ;;  %v758_v15 = vadd.f32 %v757_v10, %v3743_v50 }
 0x1a0   : > { %v881_v46 = vmul.f32 %v2982_v17, %v880_v22 }
 0x1a1   : > { %v896_v53 = vmul.f32 %v2984_v19, %v895_v28 }
 0x1a2   : > { %v882_v5 = vadd.f32 %v2982_v17, %v881_v46  ;;  %v905_v46 = vor.u32 1.1754944e-38, %v904_v36  ;;  %v1237_v36 = vld [vmem:[%s3229_s8 + $0x2b] sm:$0x1] }
 0x1a3   : > { %v897_v35 = vadd.f32 %v2984_v19, %v896_v53 }
 0x1a4   : > { %v886_v7 = vsel %vm885_vm10, %v2982_v17, %v882_v5  ;;  %v902_v17 = vand.u32 2147483647, %v3960_v3 }
 0x1a5   : > { %v891_v22 = vsel %vm888_vm11, %v890_v47, %v886_v7  ;;  %v901_v30 = vsel %vm900_vm14, %v2984_v19, %v897_v35  ;;  %v1236_v7 = vld [vmem:[%s3229_s8 + $0x23] sm:$0x1]  ;;  %v4140_v35 = vld [vmem:[#allocation4 + $0x38] sm:$0xff] }
 0x1a6   : > { %v908_v28 = vmul.f32 %v891_v22, %v866_v20  ;;  %vm903_vm15 = vcmp.eq.f32.partialorder %v902_v17, 8.507059e+37  ;;  %v1278_v17 = vrot.slane %v1236_v7, 4 }
 0x1a7   : > { %v906_v3 = vsel %vm903_vm15, %v905_v46, %v901_v30  ;;  %v1280_v46 = vrot.slane %v1237_v36, 3  ;;  %v4210_v36 = vld [vmem:[%s5118_s3 + $0xd0] sm:$0xff] }
 0x1a8   : > { %v909_v42 = vadd.f32 %v908_v28, %v758_v15  ;;  %v911_v58 = vsub.f32 1.0, %v906_v3  ;;  %v913_v43 = vmul.f32 %v906_v3, %v3748_v39  ;;  %v4147_v3 = vld [vmem:[#allocation4 + $0x20] sm:$0xff] }
 0x1aa   : > { %2985 = vtanh.f32 %v909_v42  ;;  %v1238_v42 = vld [vmem:[%s3229_s8 + $0x33] sm:$0x1] }
 0x1b0   : > { %v2986_v19 = vpop.eup %2985 }
 0x1b1   : > { %v912_v62 = vmul.f32 %v2986_v19, %v911_v58  ;;  %v1239_v58 = vld [vmem:[%s3229_s8 + $0x3b] sm:$0x1] }
 0x1b3   : > { %v4054_v41 = vadd.f32 %v913_v43, %v912_v62  ;;  %v1282_v62 = vrot.slane %v1238_v42, 2 }
 0x1b5   : > { %v916_v53 = vrot.slane %v4054_v41, 1  ;;  %v917_v60 = vrot.slane %v4054_v41, 2  ;;  %v918_v10 = vrot.slane %v4054_v41, 3  ;;  %930 = vst [vmem:[%s3235_s9 + $0x1] sm:$0x1] %v4054_v41  ;;  %1118 = vmatmul.f32.vlgmr.msra.gmra.mxu1 %v4054_v41  ;;  %1138 = vmatmul.f32.vlgmr.msra.gmra.mxu2 %v4054_v41  ;;  %v919_v39 = vrot.slane %v4054_v41, 4 }
 0x1b6   : > { %1158 = vmatmul.f32.vlgmr.msra.gmra.mxu3 %v4054_v41  ;;  %v920_v5 = vrot.slane %v4054_v41, 5  ;;  %v921_v47 = vrot.slane %v4054_v41, 6  ;;  %v922_v20 = vrot.slane %v4054_v41, 7  ;;  %1630 = vmatpush.msra.mxu2 %v4008_v59 }
 0x1b7   : > { %931 = vst [vmem:[%s3235_s9 + $0x9] sm:$0x1] %v916_v53  ;;  %1690 = vmatpush.msra.mxu3 %v3789_v48  ;;  %v4101_v48 = vld [vmem:[#allocation4 + $0x78] sm:$0xff]  ;;  %v1284_v53 = vrot.slane %v1239_v58, 1 }
 0x1b8   : > { %932 = vst [vmem:[%s3235_s9 + $0x11] sm:$0x1] %v917_v60  ;;  %1298 = vmatpush.msrb.mxu0 %v4101_v48  ;;  %v4153_v60 = vld [vmem:[#allocation4 + $0x8] sm:$0xff] }
 0x1b9   : > { %933 = vst [vmem:[%s3235_s9 + $0x19] sm:$0x1] %v918_v10  ;;  %1691 = vmatpush.msra.mxu3 %v3804_v34  ;;  %v4103_v34 = vld [vmem:[#allocation4 + $0x60] sm:$0xff] }
 0x1ba   : > { %934 = vst [vmem:[%s3235_s9 + $0x21] sm:$0x1] %v919_v39  ;;  %1299 = vmatpush.msrb.mxu0 %v4103_v34 }
 0x1bb   : > { %935 = vst [vmem:[%s3235_s9 + $0x29] sm:$0x1] %v920_v5  ;;  %1692 = vmatpush.msra.mxu3 %v3817_v49  ;;  %v4106_v49 = vld [vmem:[#allocation4 + $0x48] sm:$0xff]  ;;  %v4163_v5 = vld [vmem:[%s5118_s3 + $0x178] sm:$0xff] }
 0x1bc   : > { %936 = vst [vmem:[%s3235_s9 + $0x31] sm:$0x1] %v921_v47  ;;  %1300 = vmatpush.msrb.mxu0 %v4106_v49  ;;  %v4171_v47 = vld [vmem:[%s5118_s3 + $0x160] sm:$0xff] }
 0x1bd   : > { %937 = vst [vmem:[%s3235_s9 + $0x39] sm:$0x1] %v922_v20  ;;  %1693 = vmatpush.msra.mxu3 %v3830_v52  ;;  %v4109_v52 = vld [vmem:[#allocation4 + $0x30] sm:$0xff]  ;;  %v1011_v20 = vpop.f32.mrf.mxu3 }
 0x1be   : > { %1301 = vmatpush.msrb.mxu0 %v4109_v52 }
 0x1bf   : > { %1694 = vmatpush.msra.mxu3 %v3843_v56  ;;  %v4113_v56 = vld [vmem:[#allocation4 + $0x18] sm:$0xff] }
 0x1c0   : > { %1302 = vmatpush.msrb.mxu0 %v4113_v56 }
 0x1c1   : > { %1695 = vmatpush.msra.mxu3 %v3860_v23  ;;  %v4116_v23 = vld [vmem:[#allocation4] sm:$0xff] }
 0x1c2   : > { %1303 = vmatpush.msrb.mxu0 %v4116_v23 }
 0x1c3   : > { %1696 = vmatpush.msra.mxu3 %v3873_v9  ;;  %v4119_v9 = vld [vmem:[#allocation4 + $0xb0] sm:$0xff] }
 0x1c4   : > { %1316 = vmatpush.msra.mxu0 %v4119_v9 }
 0x1c5   : > { %1697 = vmatpush.msra.mxu3 %v3885_v33  ;;  %v4122_v33 = vld [vmem:[#allocation4 + $0x98] sm:$0xff] }
 0x1c6   : > { %1317 = vmatpush.msra.mxu0 %v4122_v33 }
 0x1c7   : > { %1698 = vmatpush.msra.mxu3 %v3901_v63  ;;  %v4125_v63 = vld [vmem:[#allocation4 + $0x80] sm:$0xff] }
 0x1c8   : > { %1318 = vmatpush.msra.mxu0 %v4125_v63 }
 0x1c9   : > { %1699 = vmatpush.msra.mxu3 %v3914_v14  ;;  %v4128_v14 = vld [vmem:[#allocation4 + $0x68] sm:$0xff] }
 0x1ca   : > { %1319 = vmatpush.msra.mxu0 %v4128_v14 }
 0x1cb   : > { %1700 = vmatpush.msra.mxu3 %v3927_v21  ;;  %v1233_v21 = vld [vmem:[%s3229_s8 + $0xb] sm:$0x1] }
 0x1cd   : > { %1701 = vmatpush.msra.mxu3 %v3940_v24  ;;  %v1234_v24 = vld [vmem:[%s3229_s8 + $0x13] sm:$0x1] }
 0x1ce   : > { %v1274_v59 = vrot.slane %v1234_v24, 6  ;;  %v4183_v24 = vld [vmem:[%s5118_s3 + $0x130] sm:$0xff] }
 0x1cf   : > { %1702 = vmatpush.msra.mxu3 %v3953_v27  ;;  %v1272_v27 = vrot.slane %v1233_v21, 7  ;;  %v4177_v21 = vld [vmem:[%s5118_s3 + $0x148] sm:$0xff] }
 0x1d1   : > { %1703 = vmatpush.msra.mxu3 %v3968_v29  ;;  %v4133_v29 = vld [vmem:[#allocation4 + $0x50] sm:$0xff] }
 0x1d2   : > { %1320 = vmatpush.msra.mxu0 %v4133_v29 }
 0x1d3   : > { %1704 = vmatpush.msra.mxu3 %v3982_v31  ;;  %v1232_v31 = vld [vmem:[%s3229_s8 + $0x3] sm:$0x1] }
 0x1d4   : > { %v1273_v15 = vsel %vm383_vm0, %v1272_v27, %v1232_v31  ;;  %1321 = vmatpush.msra.mxu0 %v4140_v35  ;;  %v4189_v27 = vld [vmem:[%s5118_s3 + $0x118] sm:$0xff]  ;;  %v1012_v31 = vadd.f32 %v1011_v20, %v3719_v38 }
 0x1d5   : > { %1705 = vmatpush.msra.mxu3 %v3995_v12  ;;  %v1235_v12 = vld [vmem:[%s3229_s8 + $0x1b] sm:$0x1]  ;;  %v1275_v28 = vsel %vm386_vm1, %v1274_v59, %v1273_v15  ;;  %v4198_v59 = vld [vmem:[%s5118_s3 + $0x100] sm:$0xff]  ;;  %v4204_v15 = vld [vmem:[%s5118_s3 + $0xe8] sm:$0xff] }
 0x1d6   : > { %v1276_v22 = vrot.slane %v1235_v12, 5  ;;  %1322 = vmatpush.msra.mxu0 %v4147_v3 }
 0x1d8   : > { %v1277_v30 = vsel %vm389_vm2, %v1276_v22, %v1275_v28  ;;  %1323 = vmatpush.msra.mxu0 %v4153_v60  ;;  %v1031_v28 = vpop.f32.mrf.mxu3 }
 0x1d9   : > { %v1279_v19 = vsel %vm392_vm3, %v1278_v17, %v1277_v30  ;;  %v1032_v17 = vadd.f32 %v1031_v28, %v3710_v6 }
 0x1da   : > { %v1281_v43 = vsel %vm395_vm4, %v1280_v46, %v1279_v19  ;;  %v4218_v46 = vld [vmem:[%s5118_s3 + $0xb8] sm:$0xff]  ;;  %v4225_v19 = vld [vmem:[%s5118_s3 + $0xa0] sm:$0xff] }
 0x1db   : > { %v1283_v10 = vsel %vm398_vm5, %v1282_v62, %v1281_v43  ;;  %5154 = vst [vmem:[#allocation9_spill] sm:$0xff] %v4218_v46  ;;  %v4231_v43 = vld [vmem:[%s5118_s3 + $0x88] sm:$0xff] }
 0x1dc   : > { %v4158_v39 = vsel %vm401_vm6, %v1284_v53, %v1283_v10  ;;  %5155 = vst [vmem:[#allocation10_spill] sm:$0xff] %v4225_v19  ;;  %v4237_v10 = vld [vmem:[%s5118_s3 + $0x70] sm:$0xff] }
 0x1dd   : > { %2884 = vmatmul.msk.f32.vlgmr.msrb.gmra.mxu0 %vm403_vm7, %v4158_v39  ;;  %5156 = vst [vmem:[#allocation11_spill] sm:$0xff] %v4231_v43 }
 0x1de   : > { %1436 = vmatpush.msrb.mxu0 %v4163_v5  ;;  %5157 = vst [vmem:[#allocation12_spill] sm:$0xff] %v4237_v10 }
 0x1e0   : > { %1437 = vmatpush.msrb.mxu0 %v4171_v47 }
 0x1e2   : > { %1438 = vmatpush.msrb.mxu0 %v4177_v21 }
 0x1e4   : > { %1439 = vmatpush.msrb.mxu0 %v4183_v24 }
 0x1e5   : > { %2885 = vmatmul.msk.f32.vlgmr.msra.gmra.mxu0 %vm403_vm7, %v4158_v39 }
 0x1e6   : > { %1440 = vmatpush.msrb.mxu0 %v4189_v27 }
 0x1e8   : > { %1441 = vmatpush.msrb.mxu0 %v4198_v59 }
 0x1ea   : > { %1442 = vmatpush.msrb.mxu0 %v4204_v15 }
 0x1ec   : > { %1443 = vmatpush.msrb.mxu0 %v4210_v36 }
 0x1ee   : > { %1444 = vmatpush.msrb.mxu0 %v4218_v46 }
 0x1f0   : > { %1445 = vmatpush.msrb.mxu0 %v4225_v19  ;;  %v4286_v19 = vld [vmem:[#allocation4 + $0x40] sm:$0xff] }
 0x1f2   : > { %1446 = vmatpush.msrb.mxu0 %v4231_v43 }
 0x1f4   : > { %1447 = vmatpush.msrb.mxu0 %v4237_v10 }
 0x232   : > { %v1119_v12 = vpop.f32.mrf.mxu1 }
 0x233   : > { %v1120_v7 = vadd.f32 %v1119_v12, %v3725_v40  ;;  %v4243_v12 = vld [vmem:[%s5118_s3 + $0x58] sm:$0xff] }
 0x234   : > { %5158 = vst [vmem:[#allocation13_spill] sm:$0xff] %v4243_v12  ;;  %1448 = vmatpush.msrb.mxu0 %v4243_v12  ;;  %v1051_v12 = vpop.f32.mrf.mxu0 }
 0x235   : > { %v1162_v22 = vadd.f32 %v1120_v7, %v1012_v31  ;;  %v4249_v7 = vld [vmem:[%s5118_s3 + $0x40] sm:$0xff] }
 0x236   : > { %5159 = vst [vmem:[#allocation14_spill] sm:$0xff] %v4249_v7  ;;  %1449 = vmatpush.msrb.mxu0 %v4249_v7 }
 0x237   : > { %v2882_v42 = vmul.f32 -1.442695, %v1162_v22  ;;  %v4255_v22 = vld [vmem:[%s5118_s3 + $0x28] sm:$0xff] }
 0x238   : > { %v1139_v30 = vpop.f32.mrf.mxu2  ;;  %5160 = vst [vmem:[#allocation15_spill] sm:$0xff] %v4255_v22  ;;  %1450 = vmatpush.msrb.mxu0 %v4255_v22  ;;  %v4274_v22 = vld [vmem:[#allocation4 + $0x70] sm:$0xff] }
 0x239   : > { %2987 = vpow2.f32 %v2882_v42  ;;  %v1140_v58 = vadd.f32 %v1139_v30, %v3712_v8  ;;  %v4263_v42 = vld [vmem:[%s5118_s3 + $0x10] sm:$0xff]  ;;  %v1159_v10 = vpop.f32.mrf.mxu3 }
 0x23a   : > { %5161 = vst [vmem:[#allocation16_spill] sm:$0xff] %v4263_v42  ;;  %1451 = vmatpush.msrb.mxu0 %v4263_v42  ;;  %v1160_v46 = vadd.f32 %v1159_v10, %v3741_v26  ;;  %v4299_v10 = vld [vmem:[#allocation4 + $0x10] sm:$0xff] }
 0x23b   : > { %v1163_v62 = vadd.f32 %v1140_v58, %v1032_v17 }
 0x23c   : > { %1710 = vmatpush.msra.mxu0 %v3794_v11 }
 0x23d   : > { %v2883_v53 = vmul.f32 -1.442695, %v1163_v62  ;;  %v4268_v62 = vld [vmem:[#allocation4 + $0xa0] sm:$0xff] }
 0x23e   : > { %5162 = vst [vmem:[#allocation17_spill] sm:$0xff] %v4268_v62  ;;  %1337 = vmatpush.msrb.mxu1 %v4268_v62  ;;  %1711 = vmatpush.msra.mxu0 %v3809_v13 }
 0x23f   : > { %v2988_v20 = vpop.eup %2987  ;;  %2989 = vpow2.f32 %v2883_v53  ;;  %v4270_v53 = vld [vmem:[#allocation4 + $0x88] sm:$0xff]  ;;  %1631 = vmatpush.msra.mxu2 %v4268_v62  ;;  %v1052_v62 = vadd.f32 %v1051_v12, %v3743_v50 }
 0x240   : > { %v1170_v31 = vadd.f32 1.0, %v2988_v20  ;;  %5163 = vst [vmem:[#allocation18_spill] sm:$0xff] %v4270_v53  ;;  %1338 = vmatpush.msrb.mxu1 %v4270_v53  ;;  %1712 = vmatpush.msra.mxu0 %v3822_v16 }
 0x241   : > { %1632 = vmatpush.msra.mxu2 %v4270_v53 }
 0x242   : > { %2991 = vrcp.f32 %v1170_v31  ;;  %v1181_v42 = vand.u32 2147483647, %v1170_v31  ;;  %vm1177_vm9 = vweird.f32 %v1170_v31  ;;  %1339 = vmatpush.msrb.mxu1 %v4274_v22  ;;  %1713 = vmatpush.msra.mxu0 %v3835_v44 }
 0x243   : > { %1633 = vmatpush.msra.mxu2 %v4274_v22 }
 0x244   : > { %vm1182_vm11 = vcmp.eq.f32.partialorder %v1181_v42, 8.507059e+37  ;;  %1714 = vmatpush.msra.mxu0 %v3848_v45 }
 0x245   : > { %v2990_v28 = vpop.eup %2989 }
 0x246   : > { %v4257_v17 = vadd.f32 1.0, %v2990_v28  ;;  %v1183_v28 = vand.u32 2147483648, %v1170_v31  ;;  %1715 = vmatpush.msra.mxu0 %v3865_v25 }
 0x248   : > { %v2992_v30 = vpop.eup %2991  ;;  %2993 = vrcp.f32 %v4257_v17  ;;  %v1198_v12 = vand.u32 2147483648, %v4257_v17  ;;  %vm1192_vm13 = vweird.f32 %v4257_v17  ;;  %1716 = vmatpush.msra.mxu0 %v3878_v32 }
 0x249   : > { %v1173_v58 = vmul.f32 %v2992_v30, %v1170_v31  ;;  %vm1178_vm8 = vweird.f32 %v2992_v30 }
 0x24a   : > { %vm1179_vm10 = vmor %vm1177_vm9, %vm1178_vm8  ;;  %1717 = vmatpush.msra.mxu0 %v3891_v57 }
 0x24b   : > { %v1174_v20 = vsub.f32 1.0, %v1173_v58  ;;  %v4279_v58 = vld [vmem:[#allocation4 + $0x58] sm:$0xff] }
 0x24c   : > { %1340 = vmatpush.msrb.mxu1 %v4279_v58  ;;  %1634 = vmatpush.msra.mxu2 %v4279_v58 }
 0x24d   : > { %v1175_v7 = vmul.f32 %v2992_v30, %v1174_v20  ;;  %v1184_v20 = vor.u32 1.1754944e-38, %v1183_v28  ;;  %1718 = vmatpush.msra.mxu0 %v3906_v0 }
 0x24e   : > { %v2994_v11 = vpop.eup %2993  ;;  %1341 = vmatpush.msrb.mxu1 %v4286_v19  ;;  %1635 = vmatpush.msra.mxu2 %v4286_v19 }
 0x24f   : > { %v1188_v13 = vmul.f32 %v2994_v11, %v4257_v17  ;;  %v1176_v43 = vadd.f32 %v2992_v30, %v1175_v7  ;;  %v4292_v7 = vld [vmem:[#allocation4 + $0x28] sm:$0xff]  ;;  %vm1193_vm12 = vweird.f32 %v2994_v11  ;;  %1719 = vmatpush.msra.mxu0 %v3919_v18 }
 0x250   : > { %1342 = vmatpush.msrb.mxu1 %v4292_v7  ;;  %vm1194_vm14 = vmor %vm1192_vm13, %vm1193_vm12  ;;  %1636 = vmatpush.msra.mxu2 %v4292_v7 }
 0x251   : > { %v1189_v16 = vsub.f32 1.0, %v1188_v13  ;;  %v1180_v53 = vsel %vm1179_vm10, %v2992_v30, %v1176_v43  ;;  %v1196_v43 = vand.u32 2147483647, %v4257_v17  ;;  %v1199_v30 = vor.u32 1.1754944e-38, %v1198_v12  ;;  %1720 = vmatpush.msra.mxu0 %v3932_v1 }
 0x252   : > { %v1185_v31 = vsel %vm1182_vm11, %v1184_v20, %v1180_v53  ;;  %1343 = vmatpush.msrb.mxu1 %v4299_v10  ;;  %1637 = vmatpush.msra.mxu2 %v4299_v10 }
 0x253   : > { %v1190_v44 = vmul.f32 %v2994_v11, %v1189_v16  ;;  %v1202_v28 = vmul.f32 %v1185_v31, %v1160_v46  ;;  %vm1197_vm15 = vcmp.eq.f32.partialorder %v1196_v43, 8.507059e+37  ;;  %2886 = vmatmul.msk.f32.vlgmr.msrb.gmra.mxu1 %vm403_vm7, %v4158_v39  ;;  %1721 = vmatpush.msra.mxu0 %v3945_v2  ;;  %v1533_v31 = vld [vmem:[%s3229_s8 + $0x3c] sm:$0x1] }
 0x254   : > { %1590 = vmatpush.msra.mxu1 %v4036_v51 }
 0x255   : > { %v1191_v45 = vadd.f32 %v2994_v11, %v1190_v44  ;;  %v1203_v42 = vadd.f32 %v1202_v28, %v1052_v62  ;;  %1722 = vmatpush.msra.mxu0 %v3958_v54 }
 0x256   : > { %1591 = vmatpush.msra.mxu1 %v4043_v55 }
 0x257   : > { %v1195_v46 = vsel %vm1194_vm14, %v2994_v11, %v1191_v45  ;;  %2995 = vtanh.f32 %v1203_v42  ;;  %1723 = vmatpush.msra.mxu0 %v3973_v37  ;;  %v1527_v37 = vld [vmem:[%s3229_s8 + $0xc] sm:$0x1]  ;;  %v1578_v45 = vrot.slane %v1533_v31, 1 }
 0x258   : > { %v1200_v25 = vsel %vm1197_vm15, %v1199_v30, %v1195_v46  ;;  %1592 = vmatpush.msra.mxu1 %v4101_v48 }
 0x259   : > { %v1205_v32 = vsub.f32 1.0, %v1200_v25  ;;  %v1207_v39 = vmul.f32 %v1200_v25, %v4054_v41  ;;  %1724 = vmatpush.msra.mxu0 %v3987_v61  ;;  %v1528_v61 = vld [vmem:[%s3229_s8 + $0x14] sm:$0x1] }
 0x25a   : > { %1593 = vmatpush.msra.mxu1 %v4103_v34  ;;  %v1305_v28 = vpop.f32.mrf.mxu0 }
 0x25b   : > { %1725 = vmatpush.msra.mxu0 %v4000_v4  ;;  %v1566_v4 = vrot.slane %v1527_v37, 7  ;;  %v1306_v25 = vadd.f32 %v1305_v28, %v3719_v38  ;;  %v5169_v37 = vld [vmem:[#allocation14_spill] sm:$0xff] }
 0x25c   : > { %1594 = vmatpush.msra.mxu1 %v4106_v49 }
 0x25d   : > { %v2996_v17 = vpop.eup %2995 }
 0x25e   : > { %v1206_v57 = vmul.f32 %v2996_v17, %v1205_v32  ;;  %1595 = vmatpush.msra.mxu1 %v4109_v52 }
 0x260   : > { %v4320_v0 = vadd.f32 %v1207_v39, %v1206_v57  ;;  %1596 = vmatpush.msra.mxu1 %v4113_v56 }
 0x262   : > { %v1210_v18 = vrot.slane %v4320_v0, 1  ;;  %v1211_v62 = vrot.slane %v4320_v0, 2  ;;  %v1212_v1 = vrot.slane %v4320_v0, 3  ;;  %1224 = vst [vmem:[%s3235_s9 + $0x2] sm:$0x1] %v4320_v0  ;;  %1412 = vmatmul.f32.vlgmr.msrb.gmra.mxu2 %v4320_v0  ;;  %1432 = vmatmul.f32.vlgmr.msrb.gmra.mxu3 %v4320_v0  ;;  %v1213_v2 = vrot.slane %v4320_v0, 4  ;;  %v1325_v30 = vpop.f32.mrf.mxu0 }
 0x263   : > { %1452 = vmatmul.f32.vlgmr.msrb.gmra.mxu0 %v4320_v0  ;;  %v1214_v54 = vrot.slane %v4320_v0, 5  ;;  %1884 = vmatpush.msrb.mxu2 %v4036_v51  ;;  %v1215_v41 = vrot.slane %v4320_v0, 6  ;;  %v1216_v53 = vrot.slane %v4320_v0, 7  ;;  %v1526_v51 = vld [vmem:[%s3229_s8 + $0x4] sm:$0x1]  ;;  %v1326_v32 = vadd.f32 %v1325_v30, %v3710_v6 }
 0x264   : > { %1225 = vst [vmem:[%s3235_s9 + $0xa] sm:$0x1] %v1210_v18  ;;  %1597 = vmatpush.msra.mxu1 %v4116_v23 }
 0x265   : > { %1226 = vst [vmem:[%s3235_s9 + $0x12] sm:$0x1] %v1211_v62  ;;  %1885 = vmatpush.msrb.mxu2 %v4043_v55  ;;  %v1529_v55 = vld [vmem:[%s3229_s8 + $0x1c] sm:$0x1]  ;;  %v5165_v62 = vld [vmem:[#allocation10_spill] sm:$0xff] }
 0x266   : > { %1227 = vst [vmem:[%s3235_s9 + $0x1a] sm:$0x1] %v1212_v1  ;;  %1610 = vmatpush.msrb.mxu1 %v4119_v9  ;;  %v5166_v1 = vld [vmem:[#allocation11_spill] sm:$0xff] }
 0x267   : > { %1228 = vst [vmem:[%s3235_s9 + $0x22] sm:$0x1] %v1213_v2  ;;  %1886 = vmatpush.msrb.mxu2 %v4101_v48  ;;  %v1568_v48 = vrot.slane %v1528_v61, 6 }
 0x268   : > { %1229 = vst [vmem:[%s3235_s9 + $0x2a] sm:$0x1] %v1214_v54  ;;  %1611 = vmatpush.msrb.mxu1 %v4122_v33 }
 0x269   : > { %1230 = vst [vmem:[%s3235_s9 + $0x32] sm:$0x1] %v1215_v41  ;;  %1887 = vmatpush.msrb.mxu2 %v4103_v34  ;;  %v1530_v34 = vld [vmem:[%s3229_s8 + $0x24] sm:$0x1] }
 0x26a   : > { %1231 = vst [vmem:[%s3235_s9 + $0x3a] sm:$0x1] %v1216_v53  ;;  %1612 = vmatpush.msrb.mxu1 %v4125_v63  ;;  %v1572_v13 = vrot.slane %v1530_v34, 4  ;;  %v5167_v41 = vld [vmem:[#allocation12_spill] sm:$0xff]  ;;  %v5168_v53 = vld [vmem:[#allocation13_spill] sm:$0xff] }
 0x26b   : > { %1888 = vmatpush.msrb.mxu2 %v4106_v49  ;;  %v1567_v49 = vsel %vm383_vm0, %v1566_v4, %v1526_v51  ;;  %v5171_v4 = vld [vmem:[#allocation16_spill] sm:$0xff] }
 0x26c   : > { %1613 = vmatpush.msrb.mxu1 %v4128_v14  ;;  %v1569_v11 = vsel %vm386_vm1, %v1568_v48, %v1567_v49 }
 0x26d   : > { %1889 = vmatpush.msrb.mxu2 %v4109_v52  ;;  %v1570_v52 = vrot.slane %v1529_v55, 5 }
 0x26e   : > { %1614 = vmatpush.msrb.mxu1 %v4133_v29 }
 0x26f   : > { %1890 = vmatpush.msrb.mxu2 %v4113_v56  ;;  %v1531_v56 = vld [vmem:[%s3229_s8 + $0x2c] sm:$0x1]  ;;  %v1571_v20 = vsel %vm389_vm2, %v1570_v52, %v1569_v11 }
 0x270   : > { %1615 = vmatpush.msrb.mxu1 %v4140_v35  ;;  %v1574_v16 = vrot.slane %v1531_v56, 3  ;;  %v1573_v44 = vsel %vm392_vm3, %v1572_v13, %v1571_v20 }
 0x271   : > { %1891 = vmatpush.msrb.mxu2 %v4116_v23  ;;  %v1532_v23 = vld [vmem:[%s3229_s8 + $0x34] sm:$0x1] }
 0x272   : > { %1616 = vmatpush.msrb.mxu1 %v4147_v3  ;;  %v1576_v12 = vrot.slane %v1532_v23, 2  ;;  %v1575_v43 = vsel %vm395_vm4, %v1574_v16, %v1573_v44 }
 0x274   : > { %1617 = vmatpush.msrb.mxu1 %v4153_v60  ;;  %v1577_v42 = vsel %vm398_vm5, %v1576_v12, %v1575_v43 }
 0x275   : > { %v1579_v46 = vsel %vm401_vm6, %v1578_v45, %v1577_v42 }
 0x276   : > { %2889 = vmatmul.msk.f32.vlgmr.msra.gmra.mxu1 %vm403_vm7, %v1579_v46  ;;  %2891 = vmatmul.msk.f32.vlgmr.msra.gmra.mxu2 %vm403_vm7, %v1579_v46 }
 0x277   : > { %1730 = vmatpush.msra.mxu1 %v4163_v5  ;;  %1904 = vmatpush.msra.mxu2 %v4119_v9 }
 0x279   : > { %1731 = vmatpush.msra.mxu1 %v4171_v47  ;;  %1905 = vmatpush.msra.mxu2 %v4122_v33 }
 0x27b   : > { %1732 = vmatpush.msra.mxu1 %v4177_v21  ;;  %1906 = vmatpush.msra.mxu2 %v4125_v63 }
 0x27d   : > { %1733 = vmatpush.msra.mxu1 %v4183_v24  ;;  %1907 = vmatpush.msra.mxu2 %v4128_v14 }
 0x27e   : > { %2890 = vmatmul.msk.f32.vlgmr.msrb.gmra.mxu1 %vm403_vm7, %v1579_v46 }
 0x27f   : > { %1734 = vmatpush.msra.mxu1 %v4189_v27  ;;  %1908 = vmatpush.msra.mxu2 %v4133_v29  ;;  %v5164_v29 = vld [vmem:[#allocation9_spill] sm:$0xff] }
 0x281   : > { %1735 = vmatpush.msra.mxu1 %v4198_v59  ;;  %1909 = vmatpush.msra.mxu2 %v4140_v35 }
 0x283   : > { %1736 = vmatpush.msra.mxu1 %v4204_v15  ;;  %1910 = vmatpush.msra.mxu2 %v4147_v3 }
 0x285   : > { %1737 = vmatpush.msra.mxu1 %v4210_v36  ;;  %1911 = vmatpush.msra.mxu2 %v4153_v60  ;;  %v5170_v60 = vld [vmem:[#allocation15_spill] sm:$0xff] }
 0x287   : > { %1738 = vmatpush.msra.mxu1 %v5164_v29 }
 0x289   : > { %1739 = vmatpush.msra.mxu1 %v5165_v62 }
 0x28b   : > { %1740 = vmatpush.msra.mxu1 %v5166_v1 }
 0x28d   : > { %1741 = vmatpush.msra.mxu1 %v5167_v41 }
 0x28f   : > { %1742 = vmatpush.msra.mxu1 %v5168_v53 }
 0x291   : > { %1743 = vmatpush.msra.mxu1 %v5169_v37 }
 0x293   : > { %1744 = vmatpush.msra.mxu1 %v5170_v60 }
 0x295   : > { %1745 = vmatpush.msra.mxu1 %v5171_v4 }
 0x2d0   : > { %v1345_v20 = vpop.f32.mrf.mxu1 }
 0x2d1   : > { %v1346_v12 = vadd.f32 %v1345_v20, %v3743_v50  ;;  %v1825_v20 = vld [vmem:[%s3229_s8 + $0x2d] sm:$0x1] }
 0x2e0   : > { %v1453_v13 = vpop.f32.mrf.mxu0 }
 0x2e1   : > { %v1454_v44 = vadd.f32 %v1453_v13, %v3741_v26 }
 0x2e5   : > { %v1413_v9 = vpop.f32.mrf.mxu2  ;;  %v1433_v17 = vpop.f32.mrf.mxu3 }
 0x2e6   : > { %v1414_v33 = vadd.f32 %v1413_v9, %v3725_v40  ;;  %v1434_v63 = vadd.f32 %v1433_v17, %v3712_v8 }
 0x2e8   : > { %v1456_v14 = vadd.f32 %v1414_v33, %v1306_v25  ;;  %v1457_v57 = vadd.f32 %v1434_v63, %v1326_v32 }
 0x2ea   : > { %v2887_v39 = vmul.f32 -1.442695, %v1456_v14  ;;  %v2888_v18 = vmul.f32 -1.442695, %v1457_v57 }
 0x2ec   : > { %2997 = vpow2.f32 %v2887_v39 }
 0x2ed   : > { %2999 = vpow2.f32 %v2888_v18 }
 0x2f2   : > { %v2998_v35 = vpop.eup %2997 }
 0x2f3   : > { %v3000_v2 = vpop.eup %2999  ;;  %v1464_v54 = vadd.f32 1.0, %v2998_v35 }
 0x2f4   : > { %v1465_v3 = vadd.f32 1.0, %v3000_v2 }
 0x2f5   : > { %3001 = vrcp.f32 %v1464_v54  ;;  %v1477_v52 = vand.u32 2147483648, %v1464_v54  ;;  %v1475_v11 = vand.u32 2147483647, %v1464_v54  ;;  %vm1471_vm9 = vweird.f32 %v1464_v54 }
 0x2f6   : > { %3003 = vrcp.f32 %v1465_v3  ;;  %v1492_v42 = vand.u32 2147483648, %v1465_v3  ;;  %vm1486_vm13 = vweird.f32 %v1465_v3  ;;  %v1490_v30 = vand.u32 2147483647, %v1465_v3 }
 0x2f7   : > { %v1478_v31 = vor.u32 1.1754944e-38, %v1477_v52  ;;  %vm1476_vm11 = vcmp.eq.f32.partialorder %v1475_v11, 8.507059e+37  ;;  %v1823_v52 = vld [vmem:[%s3229_s8 + $0x1d] sm:$0x1]  ;;  %v1824_v11 = vld [vmem:[%s3229_s8 + $0x25] sm:$0x1] }
 0x2f8   : > { %v1493_v9 = vor.u32 1.1754944e-38, %v1492_v42  ;;  %vm1491_vm15 = vcmp.eq.f32.partialorder %v1490_v30, 8.507059e+37 }
 0x2fb   : > { %v3002_v61 = vpop.eup %3001 }
 0x2fc   : > { %v3004_v51 = vpop.eup %3003  ;;  %v1467_v55 = vmul.f32 %v3002_v61, %v1464_v54  ;;  %vm1472_vm8 = vweird.f32 %v3002_v61 }
 0x2fd   : > { %v1482_v48 = vmul.f32 %v3004_v51, %v1465_v3  ;;  %vm1473_vm10 = vmor %vm1471_vm9, %vm1472_vm8  ;;  %vm1487_vm12 = vweird.f32 %v3004_v51 }
 0x2fe   : > { %v1468_v34 = vsub.f32 1.0, %v1467_v55  ;;  %vm1488_vm14 = vmor %vm1486_vm13, %vm1487_vm12  ;;  %v1599_v55 = vpop.f32.mrf.mxu1 }
 0x2ff   : > { %v1483_v49 = vsub.f32 1.0, %v1482_v48  ;;  %v1822_v48 = vld [vmem:[%s3229_s8 + $0x15] sm:$0x1] }
 0x300   : > { %v1469_v56 = vmul.f32 %v3002_v61, %v1468_v34 }
 0x301   : > { %v1484_v23 = vmul.f32 %v3004_v51, %v1483_v49  ;;  %v1820_v49 = vld [vmem:[%s3229_s8 + $0x5] sm:$0x1] }
 0x302   : > { %v1470_v16 = vadd.f32 %v3002_v61, %v1469_v56  ;;  %v1862_v56 = vrot.slane %v1822_v48, 6  ;;  %v1600_v48 = vadd.f32 %v1599_v55, %v3719_v38  ;;  %v4543_v55 = vld [vmem:[%s5118_s3 + $0xe0] sm:$0xff] }
 0x303   : > { %v1485_v45 = vadd.f32 %v3004_v51, %v1484_v23  ;;  %v1864_v23 = vrot.slane %v1823_v52, 5 }
 0x304   : > { %v1474_v28 = vsel %vm1473_vm10, %v3002_v61, %v1470_v16 }
 0x305   : > { %v1479_v43 = vsel %vm1476_vm11, %v1478_v31, %v1474_v28  ;;  %v1489_v32 = vsel %vm1488_vm14, %v3004_v51, %v1485_v45  ;;  %v1821_v51 = vld [vmem:[%s3229_s8 + $0xd] sm:$0x1]  ;;  %v1866_v31 = vrot.slane %v1824_v11, 4  ;;  %v1868_v28 = vrot.slane %v1825_v20, 3 }
 0x306   : > { %v1496_v46 = vmul.f32 %v1479_v43, %v1454_v44  ;;  %v1494_v17 = vsel %vm1491_vm15, %v1493_v9, %v1489_v32  ;;  %v1860_v34 = vrot.slane %v1821_v51, 7  ;;  %v1826_v44 = vld [vmem:[%s3229_s8 + $0x35] sm:$0x1]  ;;  %v1827_v43 = vld [vmem:[%s3229_s8 + $0x3d] sm:$0x1]  ;;  %v4452_v32 = vld [vmem:[%s5118_s3 + $0x168] sm:$0xff] }
 0x307   : > { %v1499_v33 = vsub.f32 1.0, %v1494_v17  ;;  %v1501_v57 = vmul.f32 %v1494_v17, %v4320_v0  ;;  %v1870_v42 = vrot.slane %v1826_v44, 2  ;;  %v1872_v30 = vrot.slane %v1827_v43, 1  ;;  %v4457_v9 = vld [vmem:[%s5118_s3 + $0x170] sm:$0xff]  ;;  %1984 = vmatpush.msrb.mxu0 %v4452_v32  ;;  %v4614_v44 = vld [vmem:[%s5118_s3 + $0x68] sm:$0xff] }
 0x308   : > { %v1497_v25 = vadd.f32 %v1496_v46, %v1346_v12  ;;  %v1861_v13 = vsel %vm383_vm0, %v1860_v34, %v1820_v49  ;;  %v4462_v17 = vld [vmem:[%s5118_s3 + $0x150] sm:$0xff]  ;;  %2004 = vmatpush.msrb.mxu1 %v4457_v9  ;;  %v4534_v49 = vld [vmem:[%s5118_s3 + $0xd8] sm:$0xff] }
 0x309   : > { %v1863_v16 = vsel %vm386_vm1, %v1862_v56, %v1861_v13  ;;  %1985 = vmatpush.msrb.mxu0 %v4462_v17  ;;  %v4520_v51 = vld [vmem:[%s5118_s3 + $0xf0] sm:$0xff]  ;;  %v4550_v56 = vld [vmem:[%s5118_s3 + $0xc0] sm:$0xff] }
 0x30a   : > { %3005 = vtanh.f32 %v1497_v25  ;;  %v1865_v12 = vsel %vm389_vm2, %v1864_v23, %v1863_v16  ;;  %v4572_v23 = vld [vmem:[%s5118_s3 + $0xb0] sm:$0xff]  ;;  %v4587_v16 = vld [vmem:[%s5118_s3 + $0x98] sm:$0xff] }
 0x30b   : > { %v1867_v45 = vsel %vm392_vm3, %v1866_v31, %v1865_v12  ;;  %v4600_v31 = vld [vmem:[%s5118_s3 + $0x80] sm:$0xff]  ;;  %v4627_v43 = vld [vmem:[%s5118_s3 + $0x50] sm:$0xff] }
 0x30c   : > { %v1869_v46 = vsel %vm395_vm4, %v1868_v28, %v1867_v45  ;;  %v4640_v45 = vld [vmem:[%s5118_s3 + $0x38] sm:$0xff] }
 0x30d   : > { %v1871_v25 = vsel %vm398_vm5, %v1870_v42, %v1869_v46  ;;  %v4655_v46 = vld [vmem:[%s5118_s3 + $0x20] sm:$0xff] }
 0x310   : > { %v3006_v63 = vpop.eup %3005 }
 0x311   : > { %v1500_v14 = vmul.f32 %v3006_v63, %v1499_v33  ;;  %v4465_v33 = vsel %vm401_vm6, %v1872_v30, %v1871_v25  ;;  %v4472_v63 = vld [vmem:[%s5118_s3 + $0x158] sm:$0xff]  ;;  %v4670_v25 = vld [vmem:[%s5118_s3 + $0x8] sm:$0xff] }
 0x312   : > { %2894 = vmatmul.msk.f32.vlgmr.msrb.gmra.mxu2 %vm403_vm7, %v4465_v33  ;;  %2005 = vmatpush.msrb.mxu1 %v4472_v63 }
 0x313   : > { %v4414_v39 = vadd.f32 %v1501_v57, %v1500_v14  ;;  %v4479_v14 = vld [vmem:[%s5118_s3 + $0x138] sm:$0xff]  ;;  %v1619_v57 = vpop.f32.mrf.mxu1  ;;  %2024 = vmatpush.msrb.mxu2 %v4163_v5  ;;  %v4500_v5 = vld [vmem:[%s5118_s3 + $0x128] sm:$0xff] }
 0x314   : > { %1986 = vmatpush.msrb.mxu0 %v4479_v14 }
 0x315   : > { %v1504_v18 = vrot.slane %v4414_v39, 1  ;;  %v1505_v35 = vrot.slane %v4414_v39, 2  ;;  %v1506_v2 = vrot.slane %v4414_v39, 3  ;;  %1518 = vst [vmem:[%s3235_s9 + $0x3] sm:$0x1] %v4414_v39  ;;  %1706 = vmatmul.f32.vlgmr.msra.gmra.mxu3 %v4414_v39  ;;  %1726 = vmatmul.f32.vlgmr.msra.gmra.mxu0 %v4414_v39  ;;  %v1507_v0 = vrot.slane %v4414_v39, 4 }
 0x316   : > { %1746 = vmatmul.f32.vlgmr.msra.gmra.mxu1 %v4414_v39  ;;  %v1508_v54 = vrot.slane %v4414_v39, 5  ;;  %v1509_v3 = vrot.slane %v4414_v39, 6  ;;  %v1510_v61 = vrot.slane %v4414_v39, 7  ;;  %2025 = vmatpush.msrb.mxu2 %v4171_v47  ;;  %v4514_v47 = vld [vmem:[%s5118_s3 + $0x110] sm:$0xff] }
 0x317   : > { %1519 = vst [vmem:[%s3235_s9 + $0xb] sm:$0x1] %v1504_v18  ;;  %v4486_v18 = vld [vmem:[%s5118_s3 + $0x140] sm:$0xff] }
 0x318   : > { %1520 = vst [vmem:[%s3235_s9 + $0x13] sm:$0x1] %v1505_v35  ;;  %v1620_v35 = vadd.f32 %v1619_v57, %v3710_v6  ;;  %2006 = vmatpush.msrb.mxu1 %v4486_v18  ;;  %2026 = vmatpush.msrb.mxu2 %v4177_v21  ;;  %v4527_v21 = vld [vmem:[%s5118_s3 + $0xf8] sm:$0xff] }
 0x319   : > { %1521 = vst [vmem:[%s3235_s9 + $0x1b] sm:$0x1] %v1506_v2  ;;  %v4493_v2 = vld [vmem:[%s5118_s3 + $0x120] sm:$0xff] }
 0x31a   : > { %1522 = vst [vmem:[%s3235_s9 + $0x23] sm:$0x1] %v1507_v0  ;;  %1987 = vmatpush.msrb.mxu0 %v4493_v2  ;;  %2007 = vmatpush.msrb.mxu1 %v4500_v5 }
 0x31b   : > { %1523 = vst [vmem:[%s3235_s9 + $0x2b] sm:$0x1] %v1508_v54  ;;  %2027 = vmatpush.msrb.mxu2 %v4183_v24 }
 0x31c   : > { %1524 = vst [vmem:[%s3235_s9 + $0x33] sm:$0x1] %v1509_v3  ;;  %v4507_v3 = vld [vmem:[%s5118_s3 + $0x108] sm:$0xff]  ;;  %2008 = vmatpush.msrb.mxu1 %v4514_v47  ;;  %2895 = vmatmul.msk.f32.vlgmr.msra.gmra.mxu2 %vm403_vm7, %v4465_v33 }
 0x31d   : > { %1525 = vst [vmem:[%s3235_s9 + $0x3b] sm:$0x1] %v1510_v61  ;;  %1988 = vmatpush.msrb.mxu0 %v4507_v3  ;;  %2028 = vmatpush.msrb.mxu2 %v4189_v27  ;;  %v4557_v27 = vld [vmem:[%s5118_s3 + $0xc8] sm:$0xff] }
 0x31e   : > { %2009 = vmatpush.msrb.mxu1 %v4527_v21 }
 0x31f   : > { %1989 = vmatpush.msrb.mxu0 %v4520_v51  ;;  %2029 = vmatpush.msrb.mxu2 %v4198_v59  ;;  %v4567_v59 = vld [vmem:[%s5118_s3 + $0xa8] sm:$0xff] }
 0x320   : > { %2010 = vmatpush.msrb.mxu1 %v4543_v55 }
 0x321   : > { %1990 = vmatpush.msrb.mxu0 %v4534_v49  ;;  %2030 = vmatpush.msrb.mxu2 %v4204_v15 }
 0x322   : > { %2011 = vmatpush.msrb.mxu1 %v4557_v27 }
 0x323   : > { %1991 = vmatpush.msrb.mxu0 %v4550_v56  ;;  %2031 = vmatpush.msrb.mxu2 %v4210_v36  ;;  %v4582_v36 = vld [vmem:[%s5118_s3 + $0x90] sm:$0xff] }
 0x324   : > { %2012 = vmatpush.msrb.mxu1 %v4572_v23 }
 0x325   : > { %1992 = vmatpush.msrb.mxu0 %v4567_v59  ;;  %2032 = vmatpush.msrb.mxu2 %v5164_v29  ;;  %v4595_v29 = vld [vmem:[%s5118_s3 + $0x78] sm:$0xff] }
 0x326   : > { %2013 = vmatpush.msrb.mxu1 %v4587_v16 }
 0x327   : > { %1993 = vmatpush.msrb.mxu0 %v4582_v36  ;;  %2033 = vmatpush.msrb.mxu2 %v5165_v62  ;;  %v4609_v62 = vld [vmem:[%s5118_s3 + $0x60] sm:$0xff] }
 0x328   : > { %2014 = vmatpush.msrb.mxu1 %v4600_v31 }
 0x329   : > { %1994 = vmatpush.msrb.mxu0 %v4595_v29  ;;  %2034 = vmatpush.msrb.mxu2 %v5166_v1  ;;  %v4622_v1 = vld [vmem:[%s5118_s3 + $0x48] sm:$0xff] }
 0x32a   : > { %2015 = vmatpush.msrb.mxu1 %v4614_v44 }
 0x32b   : > { %1995 = vmatpush.msrb.mxu0 %v4609_v62  ;;  %2035 = vmatpush.msrb.mxu2 %v5167_v41  ;;  %v4635_v41 = vld [vmem:[%s5118_s3 + $0x30] sm:$0xff] }
 0x32c   : > { %2016 = vmatpush.msrb.mxu1 %v4627_v43 }
 0x32d   : > { %1996 = vmatpush.msrb.mxu0 %v4622_v1  ;;  %2036 = vmatpush.msrb.mxu2 %v5168_v53  ;;  %v4650_v53 = vld [vmem:[%s5118_s3 + $0x18] sm:$0xff] }
 0x32e   : > { %2017 = vmatpush.msrb.mxu1 %v4640_v45 }
 0x32f   : > { %1997 = vmatpush.msrb.mxu0 %v4635_v41  ;;  %2037 = vmatpush.msrb.mxu2 %v5169_v37  ;;  %v4665_v37 = vld [vmem:[%s5118_s3] sm:$0xff] }
 0x330   : > { %2018 = vmatpush.msrb.mxu1 %v4655_v46 }
 0x331   : > { %1998 = vmatpush.msrb.mxu0 %v4650_v53  ;;  %2038 = vmatpush.msrb.mxu2 %v5170_v60 }
 0x332   : > { %2019 = vmatpush.msrb.mxu1 %v4670_v25 }
 0x333   : > { %1999 = vmatpush.msrb.mxu0 %v4665_v37  ;;  %2039 = vmatpush.msrb.mxu2 %v5171_v4 }
 0x334   : > { %2278 = vmatpush.msra.mxu1 %v4452_v32 }
 0x335   : > { %2298 = vmatpush.msra.mxu2 %v4457_v9 }
 0x336   : > { %2279 = vmatpush.msra.mxu1 %v4462_v17 }
 0x337   : > { %2299 = vmatpush.msra.mxu2 %v4472_v63 }
 0x338   : > { %2280 = vmatpush.msra.mxu1 %v4479_v14 }
 0x339   : > { %2300 = vmatpush.msra.mxu2 %v4486_v18 }
 0x33a   : > { %2281 = vmatpush.msra.mxu1 %v4493_v2 }
 0x33b   : > { %2301 = vmatpush.msra.mxu2 %v4500_v5 }
 0x33c   : > { %2282 = vmatpush.msra.mxu1 %v4507_v3 }
 0x33d   : > { %2302 = vmatpush.msra.mxu2 %v4514_v47 }
 0x33e   : > { %2283 = vmatpush.msra.mxu1 %v4520_v51 }
 0x33f   : > { %2303 = vmatpush.msra.mxu2 %v4527_v21 }
 0x340   : > { %2284 = vmatpush.msra.mxu1 %v4534_v49 }
 0x341   : > { %2304 = vmatpush.msra.mxu2 %v4543_v55 }
 0x342   : > { %2285 = vmatpush.msra.mxu1 %v4550_v56 }
 0x343   : > { %2305 = vmatpush.msra.mxu2 %v4557_v27 }
 0x344   : > { %2286 = vmatpush.msra.mxu1 %v4567_v59 }
 0x345   : > { %2306 = vmatpush.msra.mxu2 %v4572_v23 }
 0x346   : > { %2287 = vmatpush.msra.mxu1 %v4582_v36 }
 0x347   : > { %2307 = vmatpush.msra.mxu2 %v4587_v16 }
 0x348   : > { %2288 = vmatpush.msra.mxu1 %v4595_v29 }
 0x349   : > { %2308 = vmatpush.msra.mxu2 %v4600_v31 }
 0x34a   : > { %2289 = vmatpush.msra.mxu1 %v4609_v62 }
 0x34b   : > { %2309 = vmatpush.msra.mxu2 %v4614_v44 }
 0x34c   : > { %2290 = vmatpush.msra.mxu1 %v4622_v1 }
 0x34d   : > { %2310 = vmatpush.msra.mxu2 %v4627_v43 }
 0x34e   : > { %2291 = vmatpush.msra.mxu1 %v4635_v41 }
 0x34f   : > { %2311 = vmatpush.msra.mxu2 %v4640_v45 }
 0x350   : > { %2292 = vmatpush.msra.mxu1 %v4650_v53 }
 0x351   : > { %2312 = vmatpush.msra.mxu2 %v4655_v46 }
 0x352   : > { %2293 = vmatpush.msra.mxu1 %v4665_v37 }
 0x353   : > { %2313 = vmatpush.msra.mxu2 %v4670_v25 }
 0x392   : > { %v1727_v0 = vpop.f32.mrf.mxu0 }
 0x393   : > { %v1728_v54 = vadd.f32 %v1727_v0, %v3712_v8  ;;  %v4677_v0 = vld [vmem:[#allocation4 + $0xb8] sm:$0xff] }
 0x394   : > { %1924 = vmatpush.msrb.mxu3 %v4677_v0  ;;  %2218 = vmatpush.msra.mxu0 %v4677_v0 }
 0x395   : > { %v1751_v61 = vadd.f32 %v1728_v54, %v1620_v35 }
 0x397   : > { %v2893_v34 = vmul.f32 -1.442695, %v1751_v61 }
 0x398   : > { %v1707_v24 = vpop.f32.mrf.mxu3 }
 0x399   : > { %3007 = vpow2.f32 %v2893_v34  ;;  %v1708_v52 = vadd.f32 %v1707_v24, %v3725_v40  ;;  %v5172_v34 = vld [vmem:[#allocation17_spill] sm:$0xff] }
 0x39a   : > { %1925 = vmatpush.msrb.mxu3 %v5172_v34 }
 0x39b   : > { %v1750_v11 = vadd.f32 %v1708_v52, %v1600_v48  ;;  %v1747_v52 = vpop.f32.mrf.mxu1 }
 0x39d   : > { %v2892_v13 = vmul.f32 -1.442695, %v1750_v11  ;;  %v1639_v11 = vpop.f32.mrf.mxu2 }
 0x39f   : > { %v3008_v20 = vpop.eup %3007  ;;  %3009 = vpow2.f32 %v2892_v13 }
 0x3a0   : > { %v4576_v15 = vadd.f32 1.0, %v3008_v20  ;;  %v5173_v20 = vld [vmem:[#allocation18_spill] sm:$0xff] }
 0x3a1   : > { %1926 = vmatpush.msrb.mxu3 %v5173_v20 }
 0x3a2   : > { %3011 = vrcp.f32 %v4576_v15  ;;  %vm1780_vm13 = vweird.f32 %v4576_v15 }
 0x3a3   : > { %1927 = vmatpush.msrb.mxu3 %v4274_v22  ;;  %v1784_v22 = vand.u32 2147483647, %v4576_v15 }
 0x3a5   : > { %v3010_v12 = vpop.eup %3009  ;;  %1928 = vmatpush.msrb.mxu3 %v4279_v58  ;;  %vm1785_vm15 = vcmp.eq.f32.partialorder %v1784_v22, 8.507059e+37  ;;  %v4710_v58 = vld [vmem:[#allocation4 + $0xa8] sm:$0xff] }
 0x3a6   : > { %v1758_v28 = vadd.f32 1.0, %v3010_v12 }
 0x3a7   : > { %1929 = vmatpush.msrb.mxu3 %v4286_v19  ;;  %v4717_v19 = vld [vmem:[#allocation4 + $0x90] sm:$0xff] }
 0x3a8   : > { %3013 = vrcp.f32 %v1758_v28  ;;  %v4642_v42 = vpop.eup %3011  ;;  %v1771_v61 = vand.u32 2147483648, %v1758_v28  ;;  %v1769_v48 = vand.u32 2147483647, %v1758_v28  ;;  %vm1765_vm9 = vweird.f32 %v1758_v28 }
 0x3a9   : > { %v1776_v30 = vmul.f32 %v4642_v42, %v4576_v15  ;;  %vm1781_vm12 = vweird.f32 %v4642_v42  ;;  %1930 = vmatpush.msrb.mxu3 %v4292_v7 }
 0x3aa   : > { %v1772_v12 = vor.u32 1.1754944e-38, %v1771_v61  ;;  %vm1770_vm11 = vcmp.eq.f32.partialorder %v1769_v48, 8.507059e+37  ;;  %v1786_v61 = vand.u32 2147483648, %v4576_v15  ;;  %vm1782_vm14 = vmor %vm1780_vm13, %vm1781_vm12 }
 0x3ab   : > { %v1777_v35 = vsub.f32 1.0, %v1776_v30  ;;  %v1748_v30 = vadd.f32 %v1747_v52, %v3741_v26  ;;  %1931 = vmatpush.msrb.mxu3 %v4299_v10 }
 0x3ac   : > { %v1787_v34 = vor.u32 1.1754944e-38, %v1786_v61  ;;  %2896 = vmatmul.msk.f32.vlgmr.msrb.gmra.mxu3 %vm403_vm7, %v4465_v33  ;;  %v2119_v61 = vld [vmem:[%s3229_s8 + $0x2e] sm:$0x1] }
 0x3ad   : > { %v1778_v24 = vmul.f32 %v4642_v42, %v1777_v35  ;;  %2178 = vmatpush.msra.mxu3 %v4710_v58 }
 0x3ae   : > { %v3014_v57 = vpop.eup %3013 }
 0x3af   : > { %v1761_v60 = vmul.f32 %v3014_v57, %v1758_v28  ;;  %vm1766_vm8 = vweird.f32 %v3014_v57  ;;  %v1779_v28 = vadd.f32 %v4642_v42, %v1778_v24  ;;  %2179 = vmatpush.msra.mxu3 %v4717_v19 }
 0x3b0   : > { %vm1767_vm10 = vmor %vm1765_vm9, %vm1766_vm8 }
 0x3b1   : > { %v1762_v54 = vsub.f32 1.0, %v1761_v60  ;;  %v1640_v60 = vadd.f32 %v1639_v11, %v3743_v50  ;;  %v1783_v48 = vsel %vm1782_vm14, %v4642_v42, %v1779_v28  ;;  %v4813_v28 = vld [vmem:[#allocation4 + $0x38] sm:$0xff] }
 0x3b2   : > { %v1788_v15 = vsel %vm1785_vm15, %v1787_v34, %v1783_v48  ;;  %v2162_v34 = vrot.slane %v2119_v61, 3 }
 0x3b3   : > { %v1763_v4 = vmul.f32 %v3014_v57, %v1762_v54  ;;  %v1793_v7 = vsub.f32 1.0, %v1788_v15  ;;  %v1795_v33 = vmul.f32 %v1788_v15, %v4414_v39  ;;  %v4820_v15 = vld [vmem:[#allocation4 + $0x20] sm:$0xff] }
 0x3b5   : > { %v1764_v13 = vadd.f32 %v3014_v57, %v1763_v4 }
 0x3b7   : > { %v1768_v54 = vsel %vm1767_vm10, %v3014_v57, %v1764_v13 }
 0x3b8   : > { %v1773_v35 = vsel %vm1770_vm11, %v1772_v12, %v1768_v54 }
 0x3b9   : > { %v1790_v4 = vmul.f32 %v1773_v35, %v1748_v30 }
 0x3bb   : > { %v1791_v57 = vadd.f32 %v1790_v4, %v1640_v60  ;;  %v2118_v60 = vld [vmem:[%s3229_s8 + $0x26] sm:$0x1] }
 0x3bc   : > { %v2160_v22 = vrot.slane %v2118_v60, 4 }
 0x3bd   : > { %3015 = vtanh.f32 %v1791_v57  ;;  %v2120_v57 = vld [vmem:[%s3229_s8 + $0x36] sm:$0x1] }
 0x3c3   : > { %v3016_v42 = vpop.eup %3015 }
 0x3c4   : > { %v1794_v10 = vmul.f32 %v3016_v42, %v1793_v7  ;;  %v2121_v7 = vld [vmem:[%s3229_s8 + $0x3e] sm:$0x1] }
 0x3c6   : > { %v4728_v24 = vadd.f32 %v1795_v33, %v1794_v10  ;;  %v2164_v10 = vrot.slane %v2120_v57, 2  ;;  %v1893_v33 = vpop.f32.mrf.mxu2 }
 0x3c8   : > { %v1798_v52 = vrot.slane %v4728_v24, 1  ;;  %v1799_v11 = vrot.slane %v4728_v24, 2  ;;  %v1800_v13 = vrot.slane %v4728_v24, 3  ;;  %1812 = vst [vmem:[%s3235_s9 + $0x4] sm:$0x1] %v4728_v24  ;;  %2000 = vmatmul.f32.vlgmr.msrb.gmra.mxu0 %v4728_v24  ;;  %2020 = vmatmul.f32.vlgmr.msrb.gmra.mxu1 %v4728_v24  ;;  %v1801_v39 = vrot.slane %v4728_v24, 4 }
 0x3c9   : > { %2040 = vmatmul.f32.vlgmr.msrb.gmra.mxu2 %v4728_v24  ;;  %v1802_v20 = vrot.slane %v4728_v24, 5  ;;  %v1803_v12 = vrot.slane %v4728_v24, 6  ;;  %v1804_v30 = vrot.slane %v4728_v24, 7  ;;  %2512 = vmatpush.msrb.mxu1 %v4677_v0 }
 0x3ca   : > { %1813 = vst [vmem:[%s3235_s9 + $0xc] sm:$0x1] %v1798_v52  ;;  %2572 = vmatpush.msrb.mxu2 %v4452_v32  ;;  %v4774_v32 = vld [vmem:[#allocation4 + $0x78] sm:$0xff] }
 0x3cb   : > { %1814 = vst [vmem:[%s3235_s9 + $0x14] sm:$0x1] %v1799_v11  ;;  %2180 = vmatpush.msra.mxu3 %v4774_v32  ;;  %v2166_v11 = vrot.slane %v2121_v7, 1 }
 0x3cc   : > { %1815 = vst [vmem:[%s3235_s9 + $0x1c] sm:$0x1] %v1800_v13  ;;  %2573 = vmatpush.msrb.mxu2 %v4462_v17  ;;  %v4776_v17 = vld [vmem:[#allocation4 + $0x60] sm:$0xff]  ;;  %v4826_v13 = vld [vmem:[#allocation4 + $0x8] sm:$0xff] }
 0x3cd   : > { %1816 = vst [vmem:[%s3235_s9 + $0x24] sm:$0x1] %v1801_v39  ;;  %2181 = vmatpush.msra.mxu3 %v4776_v17 }
 0x3ce   : > { %1817 = vst [vmem:[%s3235_s9 + $0x2c] sm:$0x1] %v1802_v20  ;;  %2574 = vmatpush.msrb.mxu2 %v4479_v14  ;;  %v4779_v14 = vld [vmem:[#allocation4 + $0x48] sm:$0xff] }
 0x3cf   : > { %1818 = vst [vmem:[%s3235_s9 + $0x34] sm:$0x1] %v1803_v12  ;;  %2182 = vmatpush.msra.mxu3 %v4779_v14  ;;  %v4836_v12 = vld [vmem:[%s5118_s3 + $0x178] sm:$0xff] }
 0x3d0   : > { %1819 = vst [vmem:[%s3235_s9 + $0x3c] sm:$0x1] %v1804_v30  ;;  %2575 = vmatpush.msrb.mxu2 %v4493_v2  ;;  %v4782_v2 = vld [vmem:[#allocation4 + $0x30] sm:$0xff]  ;;  %v4844_v30 = vld [vmem:[%s5118_s3 + $0x160] sm:$0xff] }
 0x3d1   : > { %2183 = vmatpush.msra.mxu3 %v4782_v2 }
 0x3d2   : > { %2576 = vmatpush.msrb.mxu2 %v4507_v3  ;;  %v4786_v3 = vld [vmem:[#allocation4 + $0x18] sm:$0xff] }
 0x3d3   : > { %2184 = vmatpush.msra.mxu3 %v4786_v3 }
 0x3d4   : > { %2577 = vmatpush.msrb.mxu2 %v4520_v51  ;;  %v4789_v51 = vld [vmem:[#allocation4] sm:$0xff] }
 0x3d5   : > { %2185 = vmatpush.msra.mxu3 %v4789_v51 }
 0x3d6   : > { %2578 = vmatpush.msrb.mxu2 %v4534_v49  ;;  %v4792_v49 = vld [vmem:[#allocation4 + $0xb0] sm:$0xff] }
 0x3d7   : > { %2198 = vmatpush.msrb.mxu3 %v4792_v49 }
 0x3d8   : > { %2579 = vmatpush.msrb.mxu2 %v4550_v56  ;;  %v4795_v56 = vld [vmem:[#allocation4 + $0x98] sm:$0xff] }
 0x3d9   : > { %2199 = vmatpush.msrb.mxu3 %v4795_v56 }
 0x3da   : > { %2580 = vmatpush.msrb.mxu2 %v4567_v59  ;;  %v4798_v59 = vld [vmem:[#allocation4 + $0x80] sm:$0xff] }
 0x3db   : > { %2200 = vmatpush.msrb.mxu3 %v4798_v59 }
 0x3dc   : > { %2581 = vmatpush.msrb.mxu2 %v4582_v36  ;;  %v4801_v36 = vld [vmem:[#allocation4 + $0x68] sm:$0xff] }
 0x3dd   : > { %2201 = vmatpush.msrb.mxu3 %v4801_v36 }
 0x3de   : > { %2582 = vmatpush.msrb.mxu2 %v4595_v29  ;;  %v2115_v29 = vld [vmem:[%s3229_s8 + $0xe] sm:$0x1] }
 0x3e0   : > { %2583 = vmatpush.msrb.mxu2 %v4609_v62  ;;  %v2116_v62 = vld [vmem:[%s3229_s8 + $0x16] sm:$0x1] }
 0x3e1   : > { %v2156_v0 = vrot.slane %v2116_v62, 6  ;;  %v4856_v62 = vld [vmem:[%s5118_s3 + $0x130] sm:$0xff] }
 0x3e2   : > { %2584 = vmatpush.msrb.mxu2 %v4622_v1  ;;  %v2154_v1 = vrot.slane %v2115_v29, 7  ;;  %v4850_v29 = vld [vmem:[%s5118_s3 + $0x148] sm:$0xff] }
 0x3e4   : > { %2585 = vmatpush.msrb.mxu2 %v4635_v41  ;;  %v4806_v41 = vld [vmem:[#allocation4 + $0x50] sm:$0xff] }
 0x3e5   : > { %2202 = vmatpush.msrb.mxu3 %v4806_v41 }
 0x3e6   : > { %2586 = vmatpush.msrb.mxu2 %v4650_v53  ;;  %v2114_v53 = vld [vmem:[%s3229_s8 + $0x6] sm:$0x1] }
 0x3e7   : > { %v2155_v54 = vsel %vm383_vm0, %v2154_v1, %v2114_v53  ;;  %2203 = vmatpush.msrb.mxu3 %v4813_v28  ;;  %v1913_v1 = vpop.f32.mrf.mxu2  ;;  %v4862_v53 = vld [vmem:[%s5118_s3 + $0x118] sm:$0xff] }
 0x3e8   : > { %2587 = vmatpush.msrb.mxu2 %v4665_v37  ;;  %v2117_v37 = vld [vmem:[%s3229_s8 + $0x1e] sm:$0x1]  ;;  %v2157_v4 = vsel %vm386_vm1, %v2156_v0, %v2155_v54  ;;  %v1914_v0 = vadd.f32 %v1913_v1, %v3710_v6 }
 0x3e9   : > { %v2158_v35 = vrot.slane %v2117_v37, 5  ;;  %2204 = vmatpush.msrb.mxu3 %v4820_v15  ;;  %v1894_v37 = vadd.f32 %v1893_v33, %v3719_v38  ;;  %v4898_v33 = vld [vmem:[%s5118_s3 + $0xa0] sm:$0xff] }
 0x3ea   : > { %5175 = vst [vmem:[#allocation10_spill] sm:$0xff] %v4898_v33 }
 0x3eb   : > { %v2159_v48 = vsel %vm389_vm2, %v2158_v35, %v2157_v4  ;;  %2205 = vmatpush.msrb.mxu3 %v4826_v13  ;;  %v4872_v35 = vld [vmem:[%s5118_s3 + $0x100] sm:$0xff] }
 0x3ec   : > { %v2161_v42 = vsel %vm392_vm3, %v2160_v22, %v2159_v48  ;;  %v4879_v22 = vld [vmem:[%s5118_s3 + $0xe8] sm:$0xff] }
 0x3ed   : > { %v2163_v52 = vsel %vm395_vm4, %v2162_v34, %v2161_v42  ;;  %v4885_v34 = vld [vmem:[%s5118_s3 + $0xd0] sm:$0xff] }
 0x3ee   : > { %v2165_v39 = vsel %vm398_vm5, %v2164_v10, %v2163_v52  ;;  %v4892_v10 = vld [vmem:[%s5118_s3 + $0xb8] sm:$0xff]  ;;  %v4904_v52 = vld [vmem:[%s5118_s3 + $0x88] sm:$0xff] }
 0x3ef   : > { %v4831_v20 = vsel %vm401_vm6, %v2166_v11, %v2165_v39  ;;  %5174 = vst [vmem:[#allocation9_spill] sm:$0xff] %v4892_v10  ;;  %v4910_v11 = vld [vmem:[%s5118_s3 + $0x70] sm:$0xff] }
 0x3f0   : > { %2899 = vmatmul.msk.f32.vlgmr.msra.gmra.mxu3 %vm403_vm7, %v4831_v20  ;;  %5176 = vst [vmem:[#allocation11_spill] sm:$0xff] %v4904_v52 }
 0x3f1   : > { %2318 = vmatpush.msra.mxu3 %v4836_v12  ;;  %5177 = vst [vmem:[#allocation12_spill] sm:$0xff] %v4910_v11 }
 0x3f3   : > { %2319 = vmatpush.msra.mxu3 %v4844_v30 }
 0x3f5   : > { %2320 = vmatpush.msra.mxu3 %v4850_v29 }
 0x3f7   : > { %2321 = vmatpush.msra.mxu3 %v4856_v62 }
 0x3f8   : > { %2900 = vmatmul.msk.f32.vlgmr.msrb.gmra.mxu3 %vm403_vm7, %v4831_v20 }
 0x3f9   : > { %2322 = vmatpush.msra.mxu3 %v4862_v53 }
 0x3fb   : > { %2323 = vmatpush.msra.mxu3 %v4872_v35 }
 0x3fd   : > { %2324 = vmatpush.msra.mxu3 %v4879_v22 }
 0x3ff   : > { %2325 = vmatpush.msra.mxu3 %v4885_v34 }
 0x401   : > { %2326 = vmatpush.msra.mxu3 %v4892_v10 }
 0x403   : > { %2327 = vmatpush.msra.mxu3 %v4898_v33 }
 0x405   : > { %2328 = vmatpush.msra.mxu3 %v4904_v52 }
 0x407   : > { %2329 = vmatpush.msra.mxu3 %v4910_v11  ;;  %v2136_v11 = vld [vmem:[#allocation4 + $0x70] sm:$0xff] }
 0x42f   : > { %v1933_v10 = vpop.f32.mrf.mxu3 }
 0x445   : > { %v2001_v60 = vpop.f32.mrf.mxu0  ;;  %v2021_v54 = vpop.f32.mrf.mxu1 }
 0x446   : > { %v2002_v61 = vadd.f32 %v2001_v60, %v3725_v40  ;;  %v2022_v4 = vadd.f32 %v2021_v54, %v3712_v8  ;;  %v4924_v54 = vld [vmem:[%s5118_s3 + $0x40] sm:$0xff]  ;;  %v2133_v8 = vld [vmem:[#allocation4 + $0x58] sm:$0xff] }
 0x447   : > { %5179 = vst [vmem:[#allocation14_spill] sm:$0xff] %v4924_v54 }
 0x448   : > { %v2044_v57 = vadd.f32 %v2002_v61, %v1894_v37  ;;  %v2045_v48 = vadd.f32 %v2022_v4, %v1914_v0  ;;  %v4916_v0 = vld [vmem:[%s5118_s3 + $0x58] sm:$0xff]  ;;  %v4931_v61 = vld [vmem:[%s5118_s3 + $0x28] sm:$0xff]  ;;  %v4937_v4 = vld [vmem:[%s5118_s3 + $0x10] sm:$0xff] }
 0x449   : > { %5178 = vst [vmem:[#allocation13_spill] sm:$0xff] %v4916_v0  ;;  %2330 = vmatpush.msra.mxu3 %v4916_v0 }
 0x44a   : > { %v2897_v7 = vmul.f32 -1.442695, %v2044_v57  ;;  %v2898_v42 = vmul.f32 -1.442695, %v2045_v48  ;;  %5180 = vst [vmem:[#allocation15_spill] sm:$0xff] %v4931_v61 }
 0x44b   : > { %2331 = vmatpush.msra.mxu3 %v4924_v54  ;;  %5181 = vst [vmem:[#allocation16_spill] sm:$0xff] %v4937_v4 }
 0x44c   : > { %3017 = vpow2.f32 %v2897_v7  ;;  %v2041_v33 = vpop.f32.mrf.mxu2 }
 0x44d   : > { %3019 = vpow2.f32 %v2898_v42  ;;  %2332 = vmatpush.msra.mxu3 %v4931_v61 }
 0x44f   : > { %2333 = vmatpush.msra.mxu3 %v4937_v4 }
 0x451   : > { %2592 = vmatpush.msrb.mxu3 %v4457_v9 }
 0x452   : > { %v3018_v39 = vpop.eup %3017 }
 0x453   : > { %v3020_v1 = vpop.eup %3019  ;;  %v2052_v37 = vadd.f32 1.0, %v3018_v39  ;;  %v2142_v39 = vld [vmem:[#allocation4 + $0xa0] sm:$0xff]  ;;  %2593 = vmatpush.msrb.mxu3 %v4472_v63 }
 0x454   : > { %v4918_v60 = vadd.f32 1.0, %v3020_v1  ;;  %v2139_v1 = vld [vmem:[#allocation4 + $0x88] sm:$0xff]  ;;  %2219 = vmatpush.msra.mxu0 %v2142_v39  ;;  %2513 = vmatpush.msrb.mxu1 %v2142_v39 }
 0x455   : > { %3021 = vrcp.f32 %v2052_v37  ;;  %v2065_v0 = vand.u32 2147483648, %v2052_v37  ;;  %v2063_v4 = vand.u32 2147483647, %v2052_v37  ;;  %2594 = vmatpush.msrb.mxu3 %v4486_v18  ;;  %vm2059_vm9 = vweird.f32 %v2052_v37 }
 0x456   : > { %3023 = vrcp.f32 %v4918_v60  ;;  %2220 = vmatpush.msra.mxu0 %v2139_v1  ;;  %2514 = vmatpush.msrb.mxu1 %v2139_v1  ;;  %v1934_v18 = vadd.f32 %v1933_v10, %v3743_v50  ;;  %vm2074_vm13 = vweird.f32 %v4918_v60  ;;  %v2078_v10 = vand.u32 2147483647, %v4918_v60 }
 0x457   : > { %2595 = vmatpush.msrb.mxu3 %v4500_v5  ;;  %v2066_v63 = vor.u32 1.1754944e-38, %v2065_v0  ;;  %vm2064_vm11 = vcmp.eq.f32.partialorder %v2063_v4, 8.507059e+37  ;;  %v2080_v5 = vand.u32 2147483648, %v4918_v60 }
 0x458   : > { %2221 = vmatpush.msra.mxu0 %v2136_v11  ;;  %2515 = vmatpush.msrb.mxu1 %v2136_v11  ;;  %vm2079_vm15 = vcmp.eq.f32.partialorder %v2078_v10, 8.507059e+37  ;;  %v5186_v10 = vld [vmem:[#allocation12_spill] sm:$0xff] }
 0x459   : > { %2596 = vmatpush.msrb.mxu3 %v4514_v47 }
 0x45a   : > { %2222 = vmatpush.msra.mxu0 %v2133_v8  ;;  %2516 = vmatpush.msrb.mxu1 %v2133_v8  ;;  %v2081_v8 = vor.u32 1.1754944e-38, %v2080_v5 }
 0x45b   : > { %v3022_v57 = vpop.eup %3021  ;;  %2597 = vmatpush.msrb.mxu3 %v4527_v21 }
 0x45c   : > { %v4940_v48 = vpop.eup %3023  ;;  %v2055_v7 = vmul.f32 %v3022_v57, %v2052_v37  ;;  %vm2060_vm8 = vweird.f32 %v3022_v57  ;;  %v2127_v37 = vld [vmem:[#allocation4 + $0x28] sm:$0xff] }
 0x45d   : > { %v2070_v42 = vmul.f32 %v4940_v48, %v4918_v60  ;;  %vm2061_vm10 = vmor %vm2059_vm9, %vm2060_vm8  ;;  %vm2075_vm12 = vweird.f32 %v4940_v48  ;;  %2598 = vmatpush.msrb.mxu3 %v4543_v55 }
 0x45e   : > { %v2056_v54 = vsub.f32 1.0, %v2055_v7  ;;  %vm2076_vm14 = vmor %vm2074_vm13, %vm2075_vm12 }
 0x45f   : > { %v2071_v61 = vsub.f32 1.0, %v2070_v42  ;;  %v2130_v42 = vld [vmem:[#allocation4 + $0x40] sm:$0xff]  ;;  %2599 = vmatpush.msrb.mxu3 %v4557_v27 }
 0x460   : > { %v2057_v52 = vmul.f32 %v3022_v57, %v2056_v54  ;;  %v2042_v54 = vadd.f32 %v2041_v33, %v3741_v26  ;;  %2223 = vmatpush.msra.mxu0 %v2130_v42  ;;  %v2124_v33 = vld [vmem:[#allocation4 + $0x10] sm:$0xff]  ;;  %2517 = vmatpush.msrb.mxu1 %v2130_v42 }
 0x461   : > { %v2072_v9 = vmul.f32 %v4940_v48, %v2071_v61  ;;  %2600 = vmatpush.msrb.mxu3 %v4572_v23 }
 0x462   : > { %v2058_v7 = vadd.f32 %v3022_v57, %v2057_v52  ;;  %2224 = vmatpush.msra.mxu0 %v2127_v37  ;;  %2518 = vmatpush.msrb.mxu1 %v2127_v37  ;;  %v5184_v37 = vld [vmem:[#allocation10_spill] sm:$0xff] }
 0x463   : > { %v2073_v52 = vadd.f32 %v4940_v48, %v2072_v9  ;;  %2601 = vmatpush.msrb.mxu3 %v4587_v16 }
 0x464   : > { %v2062_v39 = vsel %vm2061_vm10, %v3022_v57, %v2058_v7  ;;  %2225 = vmatpush.msra.mxu0 %v2124_v33  ;;  %2519 = vmatpush.msrb.mxu1 %v2124_v33  ;;  %v5187_v33 = vld [vmem:[#allocation13_spill] sm:$0xff] }
 0x465   : > { %v2067_v61 = vsel %vm2064_vm11, %v2066_v63, %v2062_v39  ;;  %v2077_v11 = vsel %vm2076_vm14, %v4940_v48, %v2073_v52  ;;  %2901 = vmatmul.msk.f32.vlgmr.msra.gmra.mxu0 %vm403_vm7, %v4831_v20  ;;  %2602 = vmatpush.msrb.mxu3 %v4600_v31  ;;  %v5183_v52 = vld [vmem:[#allocation9_spill] sm:$0xff] }
 0x466   : > { %v2084_v0 = vmul.f32 %v2067_v61, %v2042_v54  ;;  %v2082_v21 = vsel %vm2079_vm15, %v2081_v8, %v2077_v11  ;;  %2472 = vmatpush.msrb.mxu0 %v4710_v58  ;;  %v5189_v8 = vld [vmem:[#allocation15_spill] sm:$0xff] }
 0x467   : > { %v2087_v55 = vsub.f32 1.0, %v2082_v21  ;;  %v2089_v20 = vmul.f32 %v2082_v21, %v4728_v24  ;;  %2603 = vmatpush.msrb.mxu3 %v4614_v44 }
 0x468   : > { %v2085_v47 = vadd.f32 %v2084_v0, %v1934_v18  ;;  %2473 = vmatpush.msrb.mxu0 %v4717_v19 }
 0x469   : > { %2604 = vmatpush.msrb.mxu3 %v4627_v43 }
 0x46a   : > { %3025 = vtanh.f32 %v2085_v47  ;;  %2474 = vmatpush.msrb.mxu0 %v4774_v32  ;;  %v2408_v32 = vld [vmem:[%s3229_s8 + $0x7] sm:$0x1] }
 0x46b   : > { %2605 = vmatpush.msrb.mxu3 %v4640_v45  ;;  %v2409_v45 = vld [vmem:[%s3229_s8 + $0xf] sm:$0x1] }
 0x46c   : > { %2475 = vmatpush.msrb.mxu0 %v4776_v17  ;;  %v2411_v17 = vld [vmem:[%s3229_s8 + $0x1f] sm:$0x1] }
 0x46d   : > { %2606 = vmatpush.msrb.mxu3 %v4655_v46  ;;  %v2410_v46 = vld [vmem:[%s3229_s8 + $0x17] sm:$0x1] }
 0x46e   : > { %2476 = vmatpush.msrb.mxu0 %v4779_v14  ;;  %v2450_v14 = vrot.slane %v2410_v46, 6 }
 0x46f   : > { %2607 = vmatpush.msrb.mxu3 %v4670_v25  ;;  %v2448_v25 = vrot.slane %v2409_v45, 7 }
 0x470   : > { %v3026_v60 = vpop.eup %3025  ;;  %2477 = vmatpush.msrb.mxu0 %v4782_v2  ;;  %v2412_v2 = vld [vmem:[%s3229_s8 + $0x27] sm:$0x1] }
 0x471   : > { %v2088_v27 = vmul.f32 %v3026_v60, %v2087_v55  ;;  %v5190_v55 = vld [vmem:[#allocation16_spill] sm:$0xff] }
 0x472   : > { %2478 = vmatpush.msrb.mxu0 %v4786_v3  ;;  %v2449_v3 = vsel %vm383_vm0, %v2448_v25, %v2408_v32 }
 0x473   : > { %v4972_v23 = vadd.f32 %v2089_v20, %v2088_v27  ;;  %v2187_v7 = vpop.f32.mrf.mxu3 }
 0x474   : > { %2479 = vmatpush.msrb.mxu0 %v4789_v51  ;;  %v2452_v51 = vrot.slane %v2411_v17, 5  ;;  %v2188_v63 = vadd.f32 %v2187_v7, %v3719_v38 }
 0x475   : > { %v2092_v16 = vrot.slane %v4972_v23, 1  ;;  %v2093_v31 = vrot.slane %v4972_v23, 2  ;;  %v2094_v58 = vrot.slane %v4972_v23, 3  ;;  %2106 = vst [vmem:[%s3235_s9 + $0x5] sm:$0x1] %v4972_v23  ;;  %2294 = vmatmul.f32.vlgmr.msra.gmra.mxu1 %v4972_v23  ;;  %2314 = vmatmul.f32.vlgmr.msra.gmra.mxu2 %v4972_v23  ;;  %v2095_v44 = vrot.slane %v4972_v23, 4 }
 0x476   : > { %2334 = vmatmul.f32.vlgmr.msra.gmra.mxu3 %v4972_v23  ;;  %v2096_v43 = vrot.slane %v4972_v23, 5  ;;  %v2097_v19 = vrot.slane %v4972_v23, 6  ;;  %v2098_v24 = vrot.slane %v4972_v23, 7  ;;  %2492 = vmatpush.msra.mxu0 %v4792_v49  ;;  %v2413_v49 = vld [vmem:[%s3229_s8 + $0x2f] sm:$0x1] }
 0x477   : > { %2107 = vst [vmem:[%s3235_s9 + $0xd] sm:$0x1] %v2092_v16 }
 0x478   : > { %2108 = vst [vmem:[%s3235_s9 + $0x15] sm:$0x1] %v2093_v31  ;;  %2493 = vmatpush.msra.mxu0 %v4795_v56  ;;  %v2451_v56 = vsel %vm386_vm1, %v2450_v14, %v2449_v3 }
 0x479   : > { %2109 = vst [vmem:[%s3235_s9 + $0x1d] sm:$0x1] %v2094_v58 }
 0x47a   : > { %2110 = vst [vmem:[%s3235_s9 + $0x25] sm:$0x1] %v2095_v44  ;;  %2494 = vmatpush.msra.mxu0 %v4798_v59  ;;  %v2454_v59 = vrot.slane %v2412_v2, 4 }
 0x47b   : > { %2111 = vst [vmem:[%s3235_s9 + $0x2d] sm:$0x1] %v2096_v43 }
 0x47c   : > { %2112 = vst [vmem:[%s3235_s9 + $0x35] sm:$0x1] %v2097_v19  ;;  %2495 = vmatpush.msra.mxu0 %v4801_v36  ;;  %v2414_v36 = vld [vmem:[%s3229_s8 + $0x37] sm:$0x1] }
 0x47d   : > { %2113 = vst [vmem:[%s3235_s9 + $0x3d] sm:$0x1] %v2098_v24  ;;  %v2458_v4 = vrot.slane %v2414_v36, 2 }
 0x47e   : > { %2496 = vmatpush.msra.mxu0 %v4806_v41  ;;  %v2453_v41 = vsel %vm389_vm2, %v2452_v51, %v2451_v56 }
 0x480   : > { %2497 = vmatpush.msra.mxu0 %v4813_v28  ;;  %v2456_v28 = vrot.slane %v2413_v49, 3 }
 0x482   : > { %2498 = vmatpush.msra.mxu0 %v4820_v15  ;;  %v2415_v15 = vld [vmem:[%s3229_s8 + $0x3f] sm:$0x1]  ;;  %s2910_s8 = sshll.u32 (%p3195_p7), %s3111_s20, 3 }
 0x483   : > { %v2460_v48 = vrot.slane %v2415_v15, 1  ;;  %s2714_s13 = scalar_lea.vmem (%p3195_p7), %s5120_s5, %s2910_s8 }
 0x484   : > { %2499 = vmatpush.msra.mxu0 %v4826_v13  ;;  %v2455_v13 = vsel %vm392_vm3, %v2454_v59, %v2453_v41 }
 0x485   : > { %v2457_v57 = vsel %vm395_vm4, %v2456_v28, %v2455_v13 }
 0x486   : > { %v2459_v1 = vsel %vm398_vm5, %v2458_v4, %v2457_v57 }
 0x487   : > { %v2461_v9 = vsel %vm401_vm6, %v2460_v48, %v2459_v1 }
 0x488   : > { %2904 = vmatmul.msk.f32.vlgmr.msrb.gmra.mxu0 %vm403_vm7, %v2461_v9  ;;  %2906 = vmatmul.msk.f32.vlgmr.msrb.gmra.mxu1 %vm403_vm7, %v2461_v9 }
 0x489   : > { %2612 = vmatpush.msrb.mxu0 %v4836_v12  ;;  %v2207_v12 = vpop.f32.mrf.mxu3 }
 0x48b   : > { %2613 = vmatpush.msrb.mxu0 %v4844_v30  ;;  %v2208_v30 = vadd.f32 %v2207_v12, %v3710_v6 }
 0x48d   : > { %2614 = vmatpush.msrb.mxu0 %v4850_v29 }
 0x48f   : > { %2615 = vmatpush.msrb.mxu0 %v4856_v62  ;;  %v5182_v62 = vld [vmem:[#allocation8_spill] sm:$0xff] }
 0x490   : > { %2905 = vmatmul.msk.f32.vlgmr.msra.gmra.mxu0 %vm403_vm7, %v2461_v9 }
 0x491   : > { %2616 = vmatpush.msrb.mxu0 %v4862_v53 }
 0x493   : > { %2617 = vmatpush.msrb.mxu0 %v4872_v35  ;;  %v5185_v35 = vld [vmem:[#allocation11_spill] sm:$0xff] }
 0x495   : > { %2618 = vmatpush.msrb.mxu0 %v4879_v22 }
 0x497   : > { %2619 = vmatpush.msrb.mxu0 %v4885_v34  ;;  %v5188_v34 = vld [vmem:[#allocation14_spill] sm:$0xff] }
 0x499   : > { %2620 = vmatpush.msrb.mxu0 %v5183_v52 }
 0x49b   : > { %2621 = vmatpush.msrb.mxu0 %v5184_v37 }
 0x49d   : > { %2622 = vmatpush.msrb.mxu0 %v5185_v35 }
 0x49f   : > { %2623 = vmatpush.msrb.mxu0 %v5186_v10 }
 0x4a1   : > { %2624 = vmatpush.msrb.mxu0 %v5187_v33 }
 0x4a3   : > { %2625 = vmatpush.msrb.mxu0 %v5188_v34 }
 0x4a5   : > { %2626 = vmatpush.msrb.mxu0 %v5189_v8 }
 0x4a7   : > { %2627 = vmatpush.msrb.mxu0 %v5190_v55 }
 0x4e2   : > { %v2227_v58 = vpop.f32.mrf.mxu0 }
 0x4e3   : > { %v2228_v46 = vadd.f32 %v2227_v58, %v3743_v50 }
 0x4f2   : > { %v2295_v42 = vpop.f32.mrf.mxu1 }
 0x4f3   : > { %v2296_v54 = vadd.f32 %v2295_v42, %v3725_v40 }
 0x4f5   : > { %v2338_v39 = vadd.f32 %v2296_v54, %v2188_v63 }
 0x4f7   : > { %v2902_v29 = vmul.f32 -1.442695, %v2338_v39 }
 0x4f8   : > { %v2315_v18 = vpop.f32.mrf.mxu2 }
 0x4f9   : > { %3027 = vpow2.f32 %v2902_v29  ;;  %v2316_v61 = vadd.f32 %v2315_v18, %v5182_v62  ;;  %v2335_v43 = vpop.f32.mrf.mxu3 }
 0x4fa   : > { %v2336_v32 = vadd.f32 %v2335_v43, %v3741_v26 }
 0x4fb   : > { %v2339_v53 = vadd.f32 %v2316_v61, %v2208_v30 }
 0x4fd   : > { %v2903_v5 = vmul.f32 -1.442695, %v2339_v53 }
 0x4ff   : > { %v3028_v0 = vpop.eup %3027  ;;  %3029 = vpow2.f32 %v2903_v5 }
 0x500   : > { %v2346_v22 = vadd.f32 1.0, %v3028_v0 }
 0x502   : > { %3031 = vrcp.f32 %v2346_v22  ;;  %v2359_v20 = vand.u32 2147483648, %v2346_v22  ;;  %v2357_v31 = vand.u32 2147483647, %v2346_v22  ;;  %vm2353_vm1 = vweird.f32 %v2346_v22 }
 0x504   : > { %v2360_v45 = vor.u32 1.1754944e-38, %v2359_v20  ;;  %vm2358_vm3 = vcmp.eq.f32.partialorder %v2357_v31, 8.507059e+37 }
 0x505   : > { %v3030_v47 = vpop.eup %3029  ;;  %v2481_v39 = vpop.f32.mrf.mxu0 }
 0x506   : > { %v2347_v11 = vadd.f32 1.0, %v3030_v47  ;;  %v2482_v30 = vadd.f32 %v2481_v39, %v3719_v38  ;;  %v2521_v20 = vpop.f32.mrf.mxu1 }
 0x508   : > { %v3032_v21 = vpop.eup %3031  ;;  %3033 = vrcp.f32 %v2347_v11  ;;  %v2374_v3 = vand.u32 2147483648, %v2347_v11  ;;  %v2372_v49 = vand.u32 2147483647, %v2347_v11  ;;  %vm2368_vm5 = vweird.f32 %v2347_v11 }
 0x509   : > { %v2349_v60 = vmul.f32 %v3032_v21, %v2346_v22  ;;  %vm2354_vm0 = vweird.f32 %v3032_v21 }
 0x50a   : > { %vm2355_vm2 = vmor %vm2353_vm1, %vm2354_vm0  ;;  %v2375_v41 = vor.u32 1.1754944e-38, %v2374_v3  ;;  %vm2373_vm7 = vcmp.eq.f32.partialorder %v2372_v49, 8.507059e+37 }
 0x50b   : > { %v2350_v27 = vsub.f32 1.0, %v2349_v60 }
 0x50d   : > { %v2351_v16 = vmul.f32 %v3032_v21, %v2350_v27  ;;  %v2501_v12 = vpop.f32.mrf.mxu0 }
 0x50e   : > { %v3034_v44 = vpop.eup %3033  ;;  %v2502_v29 = vadd.f32 %v2501_v12, %v3710_v6 }
 0x50f   : > { %v2364_v19 = vmul.f32 %v3034_v44, %v2347_v11  ;;  %v2352_v24 = vadd.f32 %v3032_v21, %v2351_v16  ;;  %vm2369_vm4 = vweird.f32 %v3034_v44 }
 0x510   : > { %vm2370_vm6 = vmor %vm2368_vm5, %vm2369_vm4 }
 0x511   : > { %v2365_v25 = vsub.f32 1.0, %v2364_v19  ;;  %v2356_v17 = vsel %vm2355_vm2, %v3032_v21, %v2352_v24 }
 0x512   : > { %v2361_v14 = vsel %vm2358_vm3, %v2360_v45, %v2356_v17 }
 0x513   : > { %v2366_v2 = vmul.f32 %v3034_v44, %v2365_v25  ;;  %v2378_v51 = vmul.f32 %v2361_v14, %v2336_v32 }
 0x515   : > { %v2367_v56 = vadd.f32 %v3034_v44, %v2366_v2  ;;  %v2379_v59 = vadd.f32 %v2378_v51, %v2228_v46 }
 0x517   : > { %v2371_v36 = vsel %vm2370_vm6, %v3034_v44, %v2367_v56  ;;  %3035 = vtanh.f32 %v2379_v59  ;;  %v2522_v44 = vadd.f32 %v2521_v20, %v3743_v50 }
 0x518   : > { %v2376_v28 = vsel %vm2373_vm7, %v2375_v41, %v2371_v36 }
 0x519   : > { %v2381_v15 = vsub.f32 1.0, %v2376_v28  ;;  %v2383_v57 = vmul.f32 %v2376_v28, %v4972_v23 }
 0x51d   : > { %v3036_v13 = vpop.eup %3035 }
 0x51e   : > { %v2382_v4 = vmul.f32 %v3036_v13, %v2381_v15 }
 0x520   : > { %v5050_v48 = vadd.f32 %v2383_v57, %v2382_v4 }
 0x522   : > { %v2386_v1 = vrot.slane %v5050_v48, 1  ;;  %v2387_v9 = vrot.slane %v5050_v48, 2  ;;  %v2388_v7 = vrot.slane %v5050_v48, 3  ;;  %2400 = vst [vmem:[%s3235_s9 + $0x6] sm:$0x1] %v5050_v48  ;;  %2588 = vmatmul.f32.vlgmr.msrb.gmra.mxu2 %v5050_v48  ;;  %2608 = vmatmul.f32.vlgmr.msrb.gmra.mxu3 %v5050_v48  ;;  %v2389_v23 = vrot.slane %v5050_v48, 4 }
 0x523   : > { %2628 = vmatmul.f32.vlgmr.msrb.gmra.mxu0 %v5050_v48  ;;  %v2390_v63 = vrot.slane %v5050_v48, 5  ;;  %v2391_v42 = vrot.slane %v5050_v48, 6  ;;  %v2392_v54 = vrot.slane %v5050_v48, 7 }
 0x524   : > { %2401 = vst [vmem:[%s3235_s9 + $0xe] sm:$0x1] %v2386_v1 }
 0x525   : > { %2402 = vst [vmem:[%s3235_s9 + $0x16] sm:$0x1] %v2387_v9 }
 0x526   : > { %2403 = vst [vmem:[%s3235_s9 + $0x1e] sm:$0x1] %v2388_v7 }
 0x527   : > { %2404 = vst [vmem:[%s3235_s9 + $0x26] sm:$0x1] %v2389_v23 }
 0x528   : > { %2405 = vst [vmem:[%s3235_s9 + $0x2e] sm:$0x1] %v2390_v63 }
 0x529   : > { %2406 = vst [vmem:[%s3235_s9 + $0x36] sm:$0x1] %v2391_v42 }
 0x52a   : > { %2407 = vst [vmem:[%s3235_s9 + $0x3e] sm:$0x1] %v2392_v54 }
 0x5a0   : > { %v2629_v60 = vpop.f32.mrf.mxu0 }
 0x5a1   : > { %v2630_v58 = vadd.f32 %v2629_v60, %v3741_v26 }
 0x5a5   : > { %v2589_v18 = vpop.f32.mrf.mxu2  ;;  %v2609_v61 = vpop.f32.mrf.mxu3 }
 0x5a6   : > { %v2590_v52 = vadd.f32 %v2589_v18, %v3725_v40  ;;  %v2610_v53 = vadd.f32 %v2609_v61, %v5182_v62 }
 0x5a8   : > { %v2632_v37 = vadd.f32 %v2590_v52, %v2482_v30  ;;  %v2633_v5 = vadd.f32 %v2610_v53, %v2502_v29 }
 0x5aa   : > { %v2907_v35 = vmul.f32 -1.442695, %v2632_v37  ;;  %v2908_v0 = vmul.f32 -1.442695, %v2633_v5 }
 0x5ac   : > { %3037 = vpow2.f32 %v2907_v35 }
 0x5ad   : > { %3039 = vpow2.f32 %v2908_v0 }
 0x5b2   : > { %v3038_v22 = vpop.eup %3037 }
 0x5b3   : > { %v3040_v10 = vpop.eup %3039  ;;  %v2640_v33 = vadd.f32 1.0, %v3038_v22 }
 0x5b4   : > { %v2641_v34 = vadd.f32 1.0, %v3040_v10 }
 0x5b5   : > { %3041 = vrcp.f32 %v2640_v33  ;;  %v2653_v21 = vand.u32 2147483648, %v2640_v33  ;;  %v2651_v55 = vand.u32 2147483647, %v2640_v33  ;;  %vm2647_vm9 = vweird.f32 %v2640_v33 }
 0x5b6   : > { %3043 = vrcp.f32 %v2641_v34  ;;  %v2668_v45 = vand.u32 2147483648, %v2641_v34  ;;  %vm2662_vm13 = vweird.f32 %v2641_v34  ;;  %v2666_v25 = vand.u32 2147483647, %v2641_v34 }
 0x5b7   : > { %v2654_v31 = vor.u32 1.1754944e-38, %v2653_v21  ;;  %vm2652_vm11 = vcmp.eq.f32.partialorder %v2651_v55, 8.507059e+37 }
 0x5b8   : > { %v2669_v14 = vor.u32 1.1754944e-38, %v2668_v45  ;;  %vm2667_vm15 = vcmp.eq.f32.partialorder %v2666_v25, 8.507059e+37 }
 0x5bb   : > { %v3042_v38 = vpop.eup %3041 }
 0x5bc   : > { %v3044_v6 = vpop.eup %3043  ;;  %v2643_v47 = vmul.f32 %v3042_v38, %v2640_v33  ;;  %vm2648_vm8 = vweird.f32 %v3042_v38 }
 0x5bd   : > { %v2658_v11 = vmul.f32 %v3044_v6, %v2641_v34  ;;  %vm2649_vm10 = vmor %vm2647_vm9, %vm2648_vm8  ;;  %vm2663_vm12 = vweird.f32 %v3044_v6 }
 0x5be   : > { %v2644_v8 = vsub.f32 1.0, %v2643_v47  ;;  %vm2664_vm14 = vmor %vm2662_vm13, %vm2663_vm12 }
 0x5bf   : > { %v2659_v40 = vsub.f32 1.0, %v2658_v11 }
 0x5c0   : > { %v2645_v62 = vmul.f32 %v3042_v38, %v2644_v8 }
 0x5c1   : > { %v2660_v27 = vmul.f32 %v3044_v6, %v2659_v40 }
 0x5c2   : > { %v2646_v16 = vadd.f32 %v3042_v38, %v2645_v62 }
 0x5c3   : > { %v2661_v24 = vadd.f32 %v3044_v6, %v2660_v27 }
 0x5c4   : > { %v2650_v43 = vsel %vm2649_vm10, %v3042_v38, %v2646_v16 }
 0x5c5   : > { %v2655_v19 = vsel %vm2652_vm11, %v2654_v31, %v2650_v43  ;;  %v2665_v17 = vsel %vm2664_vm14, %v3044_v6, %v2661_v24 }
 0x5c6   : > { %v2672_v46 = vmul.f32 %v2655_v19, %v2630_v58  ;;  %v2670_v26 = vsel %vm2667_vm15, %v2669_v14, %v2665_v17 }
 0x5c7   : > { %v2675_v50 = vsub.f32 1.0, %v2670_v26  ;;  %v2677_v51 = vmul.f32 %v2670_v26, %v5050_v48 }
 0x5c8   : > { %v2673_v32 = vadd.f32 %v2672_v46, %v2522_v44 }
 0x5ca   : > { %3045 = vtanh.f32 %v2673_v32 }
 0x5d0   : > { %v3046_v2 = vpop.eup %3045 }
 0x5d1   : > { %v2676_v3 = vmul.f32 %v3046_v2, %v2675_v50 }
 0x5d3   : > { %v2678_v49 = vadd.f32 %v2677_v51, %v2676_v3 }
 0x5d5   : > { %v2680_v56 = vrot.slane %v2678_v49, 1  ;;  %v2681_v59 = vrot.slane %v2678_v49, 2  ;;  %v2682_v36 = vrot.slane %v2678_v49, 3  ;;  %2694 = vst [vmem:[%s3235_s9 + $0x7] sm:$0x1] %v2678_v49  ;;  %v2683_v41 = vrot.slane %v2678_v49, 4 }
 0x5d6   : > { %2702 = vst [vmem:[#allocation2] sm:$0xff] %v2678_v49  ;;  %v2684_v28 = vrot.slane %v2678_v49, 5  ;;  %v2685_v15 = vrot.slane %v2678_v49, 6  ;;  %v2686_v13 = vrot.slane %v2678_v49, 7 }
 0x5d7   : > { %2695 = vst [vmem:[%s3235_s9 + $0xf] sm:$0x1] %v2680_v56 }
 0x5d8   : > { %2696 = vst [vmem:[%s3235_s9 + $0x17] sm:$0x1] %v2681_v59 }
 0x5d9   : > { %2697 = vst [vmem:[%s3235_s9 + $0x1f] sm:$0x1] %v2682_v36  ;;  %2709 = sbr.rel (!%p3195_p7) target bundleno = 1510 (0x5e6), region = 90 }
 0x5da   : > { %2698 = vst [vmem:[%s3235_s9 + $0x27] sm:$0x1] %v2683_v41 }
 0x5db   : > { %2699 = vst [vmem:[%s3235_s9 + $0x2f] sm:$0x1] %v2684_v28 }
 0x5dc   : > { %2700 = vst [vmem:[%s3235_s9 + $0x37] sm:$0x1] %v2685_v15  ;;  %v2757_v4 = vld [vmem:[%s3235_s9] sm:$0xff] (%p3195_p7) }
 0x5dd   : > { %2701 = vst [vmem:[%s3235_s9 + $0x3f] sm:$0x1] %v2686_v13 }
 0x5de   : > { %v2759_v57 = vld [vmem:[%s3235_s9 + $0x8] sm:$0xff]  ;;  %2758 = vst [vmem:[%s2714_s13] sm:$0xff] %v2757_v4 }
 0x5df   : > { %v2761_v48 = vld [vmem:[%s3235_s9 + $0x10] sm:$0xff]  ;;  %2760 = vst [vmem:[%s2714_s13 + $0x10] sm:$0xff] %v2759_v57 }
 0x5e0   : > { %v2763_v1 = vld [vmem:[%s3235_s9 + $0x18] sm:$0xff]  ;;  %2762 = vst [vmem:[%s2714_s13 + $0x20] sm:$0xff] %v2761_v48 }
 0x5e1   : > { %v2765_v9 = vld [vmem:[%s3235_s9 + $0x20] sm:$0xff]  ;;  %2764 = vst [vmem:[%s2714_s13 + $0x30] sm:$0xff] %v2763_v1 }
 0x5e2   : > { %v2767_v7 = vld [vmem:[%s3235_s9 + $0x28] sm:$0xff]  ;;  %2766 = vst [vmem:[%s2714_s13 + $0x40] sm:$0xff] %v2765_v9 }
 0x5e3   : > { %v2769_v23 = vld [vmem:[%s3235_s9 + $0x30] sm:$0xff]  ;;  %2768 = vst [vmem:[%s2714_s13 + $0x50] sm:$0xff] %v2767_v7 }
 0x5e4   : > { %v2771_v63 = vld [vmem:[%s3235_s9 + $0x38] sm:$0xff]  ;;  %2770 = vst [vmem:[%s2714_s13 + $0x60] sm:$0xff] %v2769_v23 }
 0x5e5   : > { %2772 = vst [vmem:[%s2714_s13 + $0x70] sm:$0xff] %v2771_v63 }
 0x5e6 PF: > { %s16_s22 = sadd.s32 1, %s3119_s22   ;;  %s5191_s18 = smov %s3107_s19 }
 0x5e7   : > { %p13_p1 = scmp.ge.s32.totalorder %s16_s22, 4   ;;  %s5192_s19 = smov %s3201_s29 }
 0x5e8   : > { %s5193_s20 = smov %s3115_s21  ;;  %s5194_s21 = smov %s5196_s24 }
 0x5e9   :  { %15 = sbr.rel (!%p13_p1) target bundleno = 3 (0x3), region = 160 }
 0x5ee   :  { %2788 = vsyncpa [#allocation5], 1 }
 0x5ef   :  { %2790 = vsyncpa [#allocation5 + $0x1], 1 }

// kernel: seq2seq_encoder_forward.3
= control target key start
LH: loop header
LB: loop body
LE: loop exit
PB: predicated region body
PF: predicated region fallthrough
CT: control target
= control target key end

     0   :  { %s3233_s18 = smov 0   ;;  %s3235_s19 = smov 0   ;;  %s6118_s0 = inlined_call_operand.vmem [shape: f32[8,16,128], index: 0, kind: input, shape index: {}]   ;;  %s6119_s1 = inlined_call_operand.vmem [shape: f32[128,384], index: 1, kind: input, shape index: {}]   ;;  %s6120_s2 = inlined_call_operand.vmem [shape: f32[1,384], index: 2, kind: input, shape index: {}]   ;;  %s6121_s3 = inlined_call_operand.vmem [shape: f32[128,384], index: 3, kind: input, shape index: {}]   ;;  %s6122_s4 = inlined_call_operand.vmem [shape: f32[1,384], index: 4, kind: input, shape index: {}]   ;;  %s6123_s5 = inlined_call_operand.vmem [shape: f32[8,16,128], index: 5, kind: output, shape index: {}]  }
   0x1   :  { %s3237_s20 = smov 0   ;;  %s3239_s21 = smov 0  }
   0x2   :  { %s3241_s22 = smov 0  }
   0x3 LB: > { %s24_s23 = sadd.s32 1, %s3196_s21  ;;  %s3011_s24 = sadd.s32 4294967295, %s3200_s22   ;;  %s3200_s22 = sphi %s3241_s22, %s15_s22   ;;  %s3196_s21 = sphi %s3239_s21, %s6429_s21   ;;  %s3192_s20 = sphi %s3237_s20, %s6428_s20   ;;  %s3188_s19 = sphi %s3235_s19, %s6427_s19   ;;  %s3184_s18 = sphi %s3233_s18, %s6426_s18  }
   0x4   : > { %p25_p0 = scmp.ge.s32.totalorder %s24_s23, 2  ;;  %p43_p1 = scmp.ne.s32.totalorder %s3188_s19, %s3184_s18 }
   0x5   : > { %p44_p2 = scmp.eq.s32.totalorder %s3200_s22, 0  ;;  %p159_p4 = scmp.eq.s32.totalorder %s3011_s24, 1 }
   0x6   : > { %s6431_s23 = smov (%p25_p0, %s24_s23), 0  ;;  %s36_s26 = sadd.s32 1, %s3188_s19 }
   0x7   : > { %p45_p3 = por %p44_p2, %p43_p1  ;;  %s32_s25 = ssub.s32 %s3196_s21, %s6431_s23 }
   0x8   : > { %p34_p5 = scmp.eq.s32.totalorder %s32_s25, 0  ;;  %p3268_p6 = por %p159_p4, %p43_p1 }
   0x9   : > { %p3014_p7 = scmp.ge.s32.totalorder %s3200_s22, 2 }
   0xa   : > { %s3273_s28 = scalar_select %p34_p5, %s3188_s19, %s36_s26  }
   0xb   : > { %193 = sbr.rel (%p3014_p7) target bundleno = 28 (0x1c), region = 32 }
  0x10   : > { %196 = sbr.rel (!%p45_p3) target bundleno = 28 (0x1c), region = 36  ;;  %s198_s29 = sand.u32 (%p45_p3), 1, %s3188_s19  }
  0x11   : > { %s3016_s30 = sshll.u32 (%p45_p3), %s3196_s21, 3  ;;  %s3015_s6 = sshll.u32 (%p45_p3), %s198_s29, 6 }
  0x12   : > { %s205_s9 = scalar_lea.vmem (%p45_p3), %s6118_s0, %s3016_s30  ;;  %s200_s10 = scalar_lea.vmem (%p45_p3), [#allocation3], %s3015_s6 }
  0x13   : > { %v248_v0 = vld [vmem:[%s205_s9] sm:$0xff] (%p45_p3)  ;;  %v250_v1 = vld [vmem:[%s205_s9 + $0x10] sm:$0xff] (%p45_p3) }
  0x14   : > { %v252_v2 = vld [vmem:[%s205_s9 + $0x20] sm:$0xff] (%p45_p3)  ;;  %249 = vst [vmem:[%s200_s10] sm:$0xff] (%p45_p3), %v248_v0  ;;  %v254_v3 = vld [vmem:[%s205_s9 + $0x30] sm:$0xff] (%p45_p3) }
  0x15   : > { %251 = vst [vmem:[%s200_s10 + $0x8] sm:$0xff] %v250_v1  ;;  %v256_v4 = vld [vmem:[%s205_s9 + $0x40] sm:$0xff]  ;;  %v258_v5 = vld [vmem:[%s205_s9 + $0x50] sm:$0xff] }
  0x16   : > { %253 = vst [vmem:[%s200_s10 + $0x10] sm:$0xff] %v252_v2  ;;  %v260_v6 = vld [vmem:[%s205_s9 + $0x60] sm:$0xff]  ;;  %v262_v7 = vld [vmem:[%s205_s9 + $0x70] sm:$0xff] }
  0x17   : > { %255 = vst [vmem:[%s200_s10 + $0x18] sm:$0xff] %v254_v3 }
  0x18   : > { %257 = vst [vmem:[%s200_s10 + $0x20] sm:$0xff] %v256_v4 }
  0x19   : > { %259 = vst [vmem:[%s200_s10 + $0x28] sm:$0xff] %v258_v5 }
  0x1a   : > { %261 = vst [vmem:[%s200_s10 + $0x30] sm:$0xff] %v260_v6 }
  0x1b   : > { %263 = vst [vmem:[%s200_s10 + $0x38] sm:$0xff] %v262_v7 }
  0x1c PF: > { %p3017_p8 = scmp.ge.s32.totalorder %s3200_s22, 1  ;;  %p268_p9 = scmp.lt.s32.totalorder %s3200_s22, 3 }
  0x1e   : > { %p269_p10 = pnand %p3017_p8, %p268_p9 }
  0x20   : > { %272 = sbr.rel (%p269_p10) target bundleno = 1521 (0x5f1), region = 74 }
  0x25   : > { %s275_s11 = sand.u32 1, %s3184_s18   ;;  %p3020_p11 = scmp.ne.s32.totalorder %s3192_s20, 0 }
  0x26   : > { %s3018_s12 = sshll.u32 %s275_s11, 6 }
  0x27   : > { %s3284_s13 = scalar_lea.vmem [#allocation3], %s3018_s12  ;;  %s3286_s14 = scalar_lea.vmem [#allocation4], %s3018_s12 }
  0x28   : > { %306 = sbr.rel (%p3020_p11) target bundleno = 47 (0x2f), region = 82 }
  0x2d   : > { %v3202_v8 = vmov 0.0  }
  0x2e   : > { %307 = vst [vmem:[#allocation2] sm:$0xff] %v3202_v8 }
  0x2f PF: > { %v3292_v9 = vld [vmem:[%s6119_s1 + $0x168] sm:$0xff]  ;;  %v3297_v10 = vld [vmem:[%s6119_s1 + $0x150] sm:$0xff]  ;;  %v3314_v13 = vld [vmem:[%s6119_s1 + $0x138] sm:$0xff]  ;;  %vm390_vm0 = vcmask 1041409   ;;  %vm393_vm1 = vcmask 1042434   ;;  %vm396_vm2 = vcmask 1043459  }
  0x30   : > { %v3302_v11 = vld [vmem:[%s6121_s3 + $0x168] sm:$0xff]  ;;  %411 = vmatpush.msra.mxu0 %v3292_v9  ;;  %v3309_v12 = vld [vmem:[%s6121_s3 + $0x150] sm:$0xff]  ;;  %v3319_v14 = vld [vmem:[%s6121_s3 + $0x138] sm:$0xff]  ;;  %vm399_vm3 = vcmask 1044484   ;;  %vm402_vm4 = vcmask 1045509   ;;  %vm405_vm5 = vcmask 1046534  }
  0x31   : > { %519 = vmatpush.msra.mxu3 %v3302_v11  ;;  %v3324_v15 = vld [vmem:[%s6119_s1 + $0x170] sm:$0xff]  ;;  %v3331_v16 = vld [vmem:[%s6119_s1 + $0x158] sm:$0xff]  ;;  %v3336_v17 = vld [vmem:[%s6119_s1 + $0x120] sm:$0xff]  ;;  %vm408_vm6 = vcmask 1047559  }
  0x32   : > { %6232 = vst [vmem:[#allocation5_spill] sm:$0xff] %v3324_v15  ;;  %412 = vmatpush.msra.mxu0 %v3297_v10  ;;  %431 = vmatpush.msra.mxu1 %v3324_v15  ;;  %v3342_v18 = vld [vmem:[%s6121_s3 + $0x120] sm:$0xff]  ;;  %v3354_v20 = vld [vmem:[%s6119_s1 + $0x108] sm:$0xff]  ;;  %v3372_v23 = vld [vmem:[%s6119_s1 + $0xf0] sm:$0xff] }
  0x33   : > { %520 = vmatpush.msra.mxu3 %v3309_v12  ;;  %6233 = vst [vmem:[#allocation6_spill] sm:$0xff] %v3331_v16  ;;  %v3349_v19 = vld [vmem:[%s6119_s1 + $0x140] sm:$0xff]  ;;  %v3360_v21 = vld [vmem:[%s6121_s3 + $0x108] sm:$0xff]  ;;  %v3378_v24 = vld [vmem:[%s6121_s3 + $0xf0] sm:$0xff] }
  0x34   : > { %413 = vmatpush.msra.mxu0 %v3314_v13  ;;  %6234 = vst [vmem:[#allocation7_spill] sm:$0xff] %v3349_v19  ;;  %432 = vmatpush.msra.mxu1 %v3331_v16  ;;  %v3367_v22 = vld [vmem:[%s6119_s1 + $0x128] sm:$0xff]  ;;  %v3385_v25 = vld [vmem:[%s6119_s1 + $0x110] sm:$0xff]  ;;  %v3390_v26 = vld [vmem:[%s6119_s1 + $0xd8] sm:$0xff] }
  0x35   : > { %521 = vmatpush.msra.mxu3 %v3319_v14  ;;  %6235 = vst [vmem:[#allocation8_spill] sm:$0xff] %v3367_v22  ;;  %v3396_v27 = vld [vmem:[%s6121_s3 + $0xd8] sm:$0xff]  ;;  %v3408_v29 = vld [vmem:[%s6119_s1 + $0xc0] sm:$0xff]  ;;  %v3426_v32 = vld [vmem:[%s6119_s1 + $0xa8] sm:$0xff] }
  0x36   : > { %414 = vmatpush.msra.mxu0 %v3336_v17  ;;  %433 = vmatpush.msra.mxu1 %v3349_v19  ;;  %6236 = vst [vmem:[#allocation9_spill] sm:$0xff] %v3385_v25  ;;  %v3403_v28 = vld [vmem:[%s6119_s1 + $0xf8] sm:$0xff]  ;;  %v3414_v30 = vld [vmem:[%s6121_s3 + $0xc0] sm:$0xff]  ;;  %v3432_v33 = vld [vmem:[%s6121_s3 + $0xa8] sm:$0xff] }
  0x37   : > { %522 = vmatpush.msra.mxu3 %v3342_v18  ;;  %6237 = vst [vmem:[#allocation10_spill] sm:$0xff] %v3403_v28  ;;  %v3421_v31 = vld [vmem:[%s6119_s1 + $0xe0] sm:$0xff]  ;;  %v3439_v34 = vld [vmem:[%s6119_s1 + $0xc8] sm:$0xff]  ;;  %v3444_v35 = vld [vmem:[%s6119_s1 + $0x90] sm:$0xff] }
  0x38   : > { %415 = vmatpush.msra.mxu0 %v3354_v20  ;;  %434 = vmatpush.msra.mxu1 %v3367_v22  ;;  %6238 = vst [vmem:[#allocation11_spill] sm:$0xff] %v3421_v31  ;;  %v3450_v36 = vld [vmem:[%s6121_s3 + $0x90] sm:$0xff]  ;;  %v3455_v37 = vld [vmem:[%s6119_s1 + $0x178] sm:$0xff]  ;;  %v3472_v40 = vld [vmem:[%s6119_s1 + $0x160] sm:$0xff] }
  0x39   : > { %523 = vmatpush.msra.mxu3 %v3360_v21  ;;  %6239 = vst [vmem:[#allocation12_spill] sm:$0xff] %v3439_v34  ;;  %v3462_v38 = vld [vmem:[%s6119_s1 + $0x78] sm:$0xff]  ;;  %v3467_v39 = vld [vmem:[%s6119_s1 + $0xb0] sm:$0xff]  ;;  %v3477_v41 = vld [vmem:[%s6119_s1 + $0x60] sm:$0xff]  ;;  %451 = vmatpush.msra.mxu2 %v3455_v37 }
  0x3a   : > { %416 = vmatpush.msra.mxu0 %v3372_v23  ;;  %435 = vmatpush.msra.mxu1 %v3385_v25  ;;  %6240 = vst [vmem:[#allocation13_spill] sm:$0xff] %v3467_v39  ;;  %v3483_v42 = vld [vmem:[%s6121_s3 + $0x78] sm:$0xff]  ;;  %v3488_v43 = vld [vmem:[%s6121_s3 + $0x60] sm:$0xff]  ;;  %v3501_v45 = vld [vmem:[%s6119_s1 + $0x148] sm:$0xff] }
  0x3b   : > { %524 = vmatpush.msra.mxu3 %v3378_v24  ;;  %6241 = vst [vmem:[#allocation14_spill] sm:$0xff] %v3483_v42  ;;  %v3496_v44 = vld [vmem:[%s6119_s1 + $0x98] sm:$0xff]  ;;  %v326_v46 = vld [vmem:[%s3284_s13 + $0x8] sm:$0x1]  ;;  %452 = vmatpush.msra.mxu2 %v3472_v40  ;;  %v327_v49 = vld [vmem:[%s3284_s13 + $0x10] sm:$0x1] }
  0x3c   : > { %417 = vmatpush.msra.mxu0 %v3390_v26  ;;  %436 = vmatpush.msra.mxu1 %v3403_v28  ;;  %6242 = vst [vmem:[#allocation15_spill] sm:$0xff] %v3488_v43  ;;  %v3507_v47 = vld [vmem:[%s6119_s1 + $0x48] sm:$0xff]  ;;  %v328_v50 = vld [vmem:[%s3284_s13 + $0x18] sm:$0x1]  ;;  %v329_v51 = vld [vmem:[%s3284_s13 + $0x20] sm:$0x1] }
  0x3d   : > { %525 = vmatpush.msra.mxu3 %v3396_v27  ;;  %6243 = vst [vmem:[#allocation16_spill] sm:$0xff] %v3496_v44  ;;  %v3513_v48 = vld [vmem:[%s6121_s3 + $0x48] sm:$0xff]  ;;  %v3524_v52 = vld [vmem:[%s6119_s1 + $0x80] sm:$0xff]  ;;  %453 = vmatpush.msra.mxu2 %v3501_v45  ;;  %v331_v55 = vld [vmem:[%s3284_s13 + $0x30] sm:$0x1]  ;;  %v389_v56 = vrot.slane %v326_v46, 7 }
  0x3e   : > { %418 = vmatpush.msra.mxu0 %v3408_v29  ;;  %437 = vmatpush.msra.mxu1 %v3421_v31  ;;  %6244 = vst [vmem:[#allocation17_spill] sm:$0xff] %v3513_v48  ;;  %v325_v53 = vld [vmem:[%s3284_s13] sm:$0x1]  ;;  %v330_v54 = vld [vmem:[%s3284_s13 + $0x28] sm:$0x1]  ;;  %v392_v57 = vrot.slane %v327_v49, 6 }
  0x3f   : > { %526 = vmatpush.msra.mxu3 %v3414_v30  ;;  %v395_v58 = vrot.slane %v328_v50, 5  ;;  %v3534_v59 = vld [vmem:[%s6119_s1 + $0x130] sm:$0xff]  ;;  %v3541_v60 = vld [vmem:[%s6119_s1 + $0x68] sm:$0xff]  ;;  %v332_v61 = vld [vmem:[%s3284_s13 + $0x38] sm:$0x1]  ;;  %v398_v62 = vrot.slane %v329_v51, 4  ;;  %v391_v2 = vsel %vm390_vm0, %v389_v56, %v325_v53 }
  0x40   : > { %419 = vmatpush.msra.mxu0 %v3426_v32  ;;  %438 = vmatpush.msra.mxu1 %v3439_v34  ;;  %v3547_v63 = vld [vmem:[%s6119_s1 + $0x118] sm:$0xff]  ;;  %v3552_v0 = vld [vmem:[%s6119_s1 + $0x30] sm:$0xff]  ;;  %v401_v3 = vrot.slane %v330_v54, 3  ;;  %v394_v5 = vsel %vm393_vm1, %v392_v57, %v391_v2  ;;  %v404_v6 = vrot.slane %v331_v55, 2  ;;  %v3573_v7 = vld [vmem:[%s6119_s1 + $0x100] sm:$0xff]  ;;  %v407_v50 = vrot.slane %v332_v61, 1 }
  0x41   : > { %527 = vmatpush.msra.mxu3 %v3432_v33  ;;  %v3558_v1 = vld [vmem:[%s6121_s3 + $0x30] sm:$0xff]  ;;  %454 = vmatpush.msra.mxu2 %v3534_v59  ;;  %v3578_v8 = vld [vmem:[%s6119_s1 + $0x18] sm:$0xff]  ;;  %v397_v49 = vsel %vm396_vm2, %v395_v58, %v394_v5  ;;  %v3599_v54 = vld [vmem:[%s6119_s1 + $0xe8] sm:$0xff] }
  0x42   : > { %420 = vmatpush.msra.mxu0 %v3444_v35  ;;  %439 = vmatpush.msra.mxu1 %v3467_v39  ;;  %6245 = vst [vmem:[#allocation18_spill] sm:$0xff] %v3558_v1  ;;  %v3567_v4 = vld [vmem:[%s6119_s1 + $0x50] sm:$0xff]  ;;  %v3584_v46 = vld [vmem:[%s6121_s3 + $0x18] sm:$0xff]  ;;  %v400_v53 = vsel %vm399_vm3, %v398_v62, %v397_v49  ;;  %v3604_v55 = vld [vmem:[%s6119_s1] sm:$0xff] }
  0x43   : > { %528 = vmatpush.msra.mxu3 %v3450_v36  ;;  %6246 = vst [vmem:[#allocation19_spill] sm:$0xff] %v3584_v46  ;;  %455 = vmatpush.msra.mxu2 %v3547_v63  ;;  %v3593_v51 = vld [vmem:[%s6119_s1 + $0x38] sm:$0xff]  ;;  %v3610_v56 = vld [vmem:[%s6121_s3] sm:$0xff]  ;;  %v403_v57 = vsel %vm402_vm4, %v401_v3, %v400_v53  ;;  %v3619_v58 = vld [vmem:[%s6121_s3 + $0x170] sm:$0xff] }
  0x44   : > { %421 = vmatpush.msra.mxu0 %v3462_v38  ;;  %440 = vmatpush.msra.mxu1 %v3496_v44  ;;  %6247 = vst [vmem:[#allocation20_spill] sm:$0xff] %v3610_v56  ;;  %v3621_v61 = vld [vmem:[#allocation2] sm:$0xff]  ;;  %v406_v62 = vsel %vm405_vm5, %v404_v6, %v403_v57  ;;  %v3628_v2 = vld [vmem:[%s6119_s1 + $0x20] sm:$0xff]  ;;  %v3644_v6 = vld [vmem:[%s6119_s1 + $0xd0] sm:$0xff] }
  0x45   : > { %529 = vmatpush.msra.mxu3 %v3483_v42  ;;  %456 = vmatpush.msra.mxu2 %v3573_v7  ;;  %v3631_v3 = vsel %vm408_vm6, %v407_v50, %v406_v62  ;;  %v3639_v5 = vld [vmem:[%s6121_s3 + $0x158] sm:$0xff]  ;;  %v3651_v49 = vld [vmem:[%s6119_s1 + $0x8] sm:$0xff]  ;;  %v3656_v50 = vld [vmem:[%s6121_s3 + $0x140] sm:$0xff] }
  0x46   : > { %422 = vmatpush.msra.mxu0 %v3477_v41  ;;  %441 = vmatpush.msra.mxu1 %v3524_v52  ;;  %6248 = vst [vmem:[#allocation21_spill] sm:$0xff] %v3639_v5  ;;  %v3662_v53 = vld [vmem:[%s6121_s3 + $0x178] sm:$0xff]  ;;  %v3675_v62 = vld [vmem:[%s6121_s3 + $0x128] sm:$0xff]  ;;  %v3732_v42 = vld [vmem:[%s6121_s3 + $0xe0] sm:$0xff] }
  0x47   : > { %530 = vmatpush.msra.mxu3 %v3488_v43  ;;  %457 = vmatpush.msra.mxu2 %v3599_v54  ;;  %6249 = vst [vmem:[#allocation22_spill] sm:$0xff] %v3656_v50  ;;  %v3670_v57 = vld [vmem:[%s6119_s1 + $0xb8] sm:$0xff] }
  0x48   : > { %423 = vmatpush.msra.mxu0 %v3507_v47  ;;  %442 = vmatpush.msra.mxu1 %v3541_v60  ;;  %6250 = vst [vmem:[#allocation23_spill] sm:$0xff] %v3675_v62  ;;  %v3713_v43 = vld [vmem:[%s6121_s3 + $0xf8] sm:$0xff] }
  0x49   : > { %531 = vmatpush.msra.mxu3 %v3513_v48  ;;  %458 = vmatpush.msra.mxu2 %v3644_v6  ;;  %v3699_v48 = vld [vmem:[%s6121_s3 + $0x148] sm:$0xff]  ;;  %6253 = vst [vmem:[#allocation26_spill] sm:$0xff] %v3713_v43 }
  0x4a   : > { %424 = vmatpush.msra.mxu0 %v3552_v0  ;;  %443 = vmatpush.msra.mxu1 %v3567_v4  ;;  %6255 = vst [vmem:[#allocation28_spill] sm:$0xff] %v3732_v42 }
  0x4b   : > { %532 = vmatpush.msra.mxu3 %v3558_v1  ;;  %v3694_v1 = vld [vmem:[%s6121_s3 + $0x110] sm:$0xff]  ;;  %459 = vmatpush.msra.mxu2 %v3670_v57 }
  0x4c   : > { %425 = vmatpush.msra.mxu0 %v3578_v8  ;;  %444 = vmatpush.msra.mxu1 %v3593_v51  ;;  %6251 = vst [vmem:[#allocation24_spill] sm:$0xff] %v3694_v1 }
  0x4d   : > { %533 = vmatpush.msra.mxu3 %v3584_v46  ;;  %v3689_v46 = vld [vmem:[%s6119_s1 + $0xa0] sm:$0xff] }
  0x4e   : > { %426 = vmatpush.msra.mxu0 %v3604_v55  ;;  %445 = vmatpush.msra.mxu1 %v3628_v2 }
  0x4f   : > { %534 = vmatpush.msra.mxu3 %v3610_v56  ;;  %427 = vmatmul.f32.vlgmr.msra.gmra.mxu0 %v3631_v3  ;;  %v3681_v56 = vld [vmem:[%s6121_s3 + $0x160] sm:$0xff] }
  0x50   : > { %539 = vmatpush.msrb.mxu0 %v3619_v58  ;;  %535 = vmatmul.f32.vlgmr.msra.gmra.mxu3 %v3621_v61 }
  0x51   : > { %446 = vmatpush.msra.mxu1 %v3651_v49  ;;  %748 = vmatpush.msrb.mxu3 %v3324_v15  ;;  %v3708_v15 = vld [vmem:[%s6119_s1 + $0x88] sm:$0xff] }
  0x52   : > { %540 = vmatpush.msrb.mxu0 %v3639_v5  ;;  %447 = vmatmul.f32.vlgmr.msra.gmra.mxu1 %v3631_v3  ;;  %6252 = vst [vmem:[#allocation25_spill] sm:$0xff] %v3708_v15  ;;  %v3737_v5 = vld [vmem:[%s6121_s3 + $0x118] sm:$0xff] }
  0x53   : > { %559 = vmatpush.msrb.mxu1 %v3662_v53  ;;  %460 = vmatpush.msra.mxu2 %v3689_v46 }
  0x54   : > { %541 = vmatpush.msrb.mxu0 %v3656_v50  ;;  %v3718_v50 = vld [vmem:[%s6121_s3 + $0x130] sm:$0xff]  ;;  %749 = vmatpush.msrb.mxu3 %v3331_v16  ;;  %v3746_v16 = vld [vmem:[%s6119_s1 + $0x58] sm:$0xff] }
  0x55   : > { %560 = vmatpush.msrb.mxu1 %v3681_v56  ;;  %461 = vmatpush.msra.mxu2 %v3708_v15  ;;  %6256 = vst [vmem:[#allocation29_spill] sm:$0xff] %v3746_v16  ;;  %v3756_v15 = vld [vmem:[%s6121_s3 + $0x100] sm:$0xff] }
  0x56   : > { %542 = vmatpush.msrb.mxu0 %v3675_v62  ;;  %v3727_v62 = vld [vmem:[%s6119_s1 + $0x70] sm:$0xff]  ;;  %750 = vmatpush.msrb.mxu3 %v3349_v19  ;;  %v3765_v19 = vld [vmem:[%s6119_s1 + $0x40] sm:$0xff] }
  0x57   : > { %561 = vmatpush.msrb.mxu1 %v3699_v48  ;;  %6254 = vst [vmem:[#allocation27_spill] sm:$0xff] %v3727_v62  ;;  %462 = vmatpush.msra.mxu2 %v3727_v62  ;;  %v3775_v62 = vld [vmem:[%s6121_s3 + $0xe8] sm:$0xff] }
  0x58   : > { %543 = vmatpush.msrb.mxu0 %v3694_v1  ;;  %v3751_v1 = vld [vmem:[%s6121_s3 + $0xc8] sm:$0xff]  ;;  %751 = vmatpush.msrb.mxu3 %v3367_v22  ;;  %6258 = vst [vmem:[#allocation31_spill] sm:$0xff] %v3765_v19 }
  0x59   : > { %562 = vmatpush.msrb.mxu1 %v3718_v50  ;;  %6257 = vst [vmem:[#allocation30_spill] sm:$0xff] %v3751_v1  ;;  %463 = vmatpush.msra.mxu2 %v3746_v16  ;;  %v3784_v22 = vld [vmem:[%s6119_s1 + $0x28] sm:$0xff]  ;;  %v3794_v16 = vld [vmem:[%s6121_s3 + $0xd0] sm:$0xff] }
  0x5a   : > { %544 = vmatpush.msrb.mxu0 %v3713_v43  ;;  %v3770_v43 = vld [vmem:[%s6121_s3 + $0xb0] sm:$0xff]  ;;  %752 = vmatpush.msrb.mxu3 %v3385_v25 }
  0x5b   : > { %563 = vmatpush.msrb.mxu1 %v3737_v5  ;;  %6259 = vst [vmem:[#allocation32_spill] sm:$0xff] %v3770_v43  ;;  %464 = vmatpush.msra.mxu2 %v3765_v19  ;;  %v3803_v25 = vld [vmem:[%s6119_s1 + $0x10] sm:$0xff]  ;;  %v3813_v19 = vld [vmem:[%s6121_s3 + $0xb8] sm:$0xff] }
  0x5c   : > { %545 = vmatpush.msrb.mxu0 %v3732_v42  ;;  %v3789_v42 = vld [vmem:[%s6121_s3 + $0x98] sm:$0xff]  ;;  %753 = vmatpush.msrb.mxu3 %v3403_v28  ;;  %v3822_v28 = vld [vmem:[%s6121_s3 + $0x68] sm:$0xff] }
  0x5d   : > { %564 = vmatpush.msrb.mxu1 %v3756_v15  ;;  %6260 = vst [vmem:[#allocation33_spill] sm:$0xff] %v3789_v42  ;;  %465 = vmatpush.msra.mxu2 %v3784_v22 }
  0x5e   : > { %546 = vmatpush.msrb.mxu0 %v3751_v1  ;;  %v3808_v1 = vld [vmem:[%s6121_s3 + $0x80] sm:$0xff]  ;;  %754 = vmatpush.msrb.mxu3 %v3421_v31  ;;  %v3836_v31 = vld [vmem:[%s6121_s3 + $0x50] sm:$0xff] }
  0x5f   : > { %565 = vmatpush.msrb.mxu1 %v3775_v62  ;;  %6261 = vst [vmem:[#allocation34_spill] sm:$0xff] %v3808_v1  ;;  %466 = vmatpush.msra.mxu2 %v3803_v25 }
  0x60   : > { %547 = vmatpush.msrb.mxu0 %v3770_v43  ;;  %v3827_v43 = vld [vmem:[%s6121_s3 + $0xa0] sm:$0xff]  ;;  %755 = vmatpush.msrb.mxu3 %v3439_v34  ;;  %v3850_v34 = vld [vmem:[%s6121_s3 + $0x38] sm:$0xff] }
  0x61   : > { %566 = vmatpush.msrb.mxu1 %v3794_v16  ;;  %467 = vmatmul.f32.vlgmr.msra.gmra.mxu2 %v3631_v3  ;;  %v3864_v3 = vld [vmem:[%s6121_s3 + $0x20] sm:$0xff] }
  0x62   : > { %548 = vmatpush.msrb.mxu0 %v3789_v42  ;;  %v3841_v42 = vld [vmem:[%s6121_s3 + $0x88] sm:$0xff]  ;;  %756 = vmatpush.msrb.mxu3 %v3467_v39  ;;  %v3869_v39 = vld [vmem:[%s6121_s3 + $0x58] sm:$0xff] }
  0x63   : > { %567 = vmatpush.msrb.mxu1 %v3813_v19  ;;  %728 = vmatpush.msrb.mxu2 %v3292_v9  ;;  %v3878_v9 = vld [vmem:[%s6121_s3 + $0x8] sm:$0xff] }
  0x64   : > { %549 = vmatpush.msrb.mxu0 %v3808_v1  ;;  %v3855_v1 = vld [vmem:[%s6121_s3 + $0x70] sm:$0xff]  ;;  %757 = vmatpush.msrb.mxu3 %v3496_v44  ;;  %v3883_v44 = vld [vmem:[%s6121_s3 + $0x40] sm:$0xff] }
  0x65   : > { %568 = vmatpush.msrb.mxu1 %v3827_v43  ;;  %729 = vmatpush.msrb.mxu2 %v3297_v10  ;;  %v3892_v10 = vld [vmem:[%s6121_s3 + $0x28] sm:$0xff] }
  0x66   : > { %550 = vmatpush.msrb.mxu0 %v3822_v28  ;;  %758 = vmatpush.msrb.mxu3 %v3524_v52 }
  0x67   : > { %569 = vmatpush.msrb.mxu1 %v3841_v42  ;;  %730 = vmatpush.msrb.mxu2 %v3314_v13  ;;  %v3902_v13 = vld [vmem:[%s6121_s3 + $0x10] sm:$0xff] }
  0x68   : > { %551 = vmatpush.msrb.mxu0 %v3836_v31  ;;  %759 = vmatpush.msrb.mxu3 %v3541_v60 }
  0x69   : > { %570 = vmatpush.msrb.mxu1 %v3855_v1  ;;  %731 = vmatpush.msrb.mxu2 %v3336_v17  ;;  %v6265_v17 = vld [vmem:[#allocation22_spill] sm:$0xff] }
  0x6a   : > { %552 = vmatpush.msrb.mxu0 %v3850_v34  ;;  %760 = vmatpush.msrb.mxu3 %v3567_v4 }
  0x6b   : > { %571 = vmatpush.msrb.mxu1 %v3869_v39  ;;  %732 = vmatpush.msrb.mxu2 %v3354_v20  ;;  %v6268_v20 = vld [vmem:[#allocation23_spill] sm:$0xff] }
  0x6c   : > { %553 = vmatpush.msrb.mxu0 %v3864_v3  ;;  %761 = vmatpush.msrb.mxu3 %v3593_v51  ;;  %v650_v51 = vld [vmem:[%s3284_s13 + $0x9] sm:$0x1] }
  0x6d   : > { %572 = vmatpush.msrb.mxu1 %v3883_v44  ;;  %733 = vmatpush.msrb.mxu2 %v3372_v23  ;;  %v6270_v23 = vld [vmem:[#allocation29_spill] sm:$0xff] }
  0x6e   : > { %554 = vmatpush.msrb.mxu0 %v3878_v9  ;;  %762 = vmatpush.msrb.mxu3 %v3628_v2 }
  0x6f   : > { %555 = vmatmul.f32.vlgmr.msrb.gmra.mxu0 %v3621_v61  ;;  %573 = vmatpush.msrb.mxu1 %v3892_v10 }
  0x70   : > { %768 = vmatpush.msra.mxu0 %v3455_v37  ;;  %734 = vmatpush.msrb.mxu2 %v3390_v26  ;;  %v6272_v26 = vld [vmem:[#allocation18_spill] sm:$0xff]  ;;  %v6280_v37 = vld [vmem:[#allocation32_spill] sm:$0xff] }
  0x71   : > { %574 = vmatpush.msrb.mxu1 %v3902_v13  ;;  %763 = vmatpush.msrb.mxu3 %v3651_v49  ;;  %v649_v49 = vld [vmem:[%s3284_s13 + $0x1] sm:$0x1] }
  0x72   : > { %575 = vmatmul.f32.vlgmr.msrb.gmra.mxu1 %v3621_v61  ;;  %735 = vmatpush.msrb.mxu2 %v3408_v29  ;;  %v6274_v29 = vld [vmem:[#allocation26_spill] sm:$0xff] }
  0x73   : > { %836 = vmatpush.msra.mxu1 %v3302_v11  ;;  %876 = vmatpush.msra.mxu3 %v3662_v53  ;;  %v6262_v11 = vld [vmem:[#allocation21_spill] sm:$0xff]  ;;  %v652_v53 = vld [vmem:[%s3284_s13 + $0x19] sm:$0x1] }
  0x74   : > { %769 = vmatpush.msra.mxu0 %v3472_v40  ;;  %736 = vmatpush.msrb.mxu2 %v3426_v32  ;;  %v6276_v32 = vld [vmem:[#allocation28_spill] sm:$0xff]  ;;  %v6283_v40 = vld [vmem:[#allocation7_spill] sm:$0xff] }
  0x75   : > { %837 = vmatpush.msra.mxu1 %v3309_v12  ;;  %877 = vmatpush.msra.mxu3 %v3681_v56  ;;  %v6263_v12 = vld [vmem:[#allocation14_spill] sm:$0xff] }
  0x76   : > { %770 = vmatpush.msra.mxu0 %v3501_v45  ;;  %737 = vmatpush.msrb.mxu2 %v3444_v35  ;;  %v6278_v35 = vld [vmem:[#allocation30_spill] sm:$0xff]  ;;  %v6290_v45 = vld [vmem:[#allocation13_spill] sm:$0xff] }
  0x77   : > { %838 = vmatpush.msra.mxu1 %v3319_v14  ;;  %878 = vmatpush.msra.mxu3 %v3699_v48  ;;  %v6264_v14 = vld [vmem:[#allocation25_spill] sm:$0xff] }
  0x78   : > { %771 = vmatpush.msra.mxu0 %v3534_v59  ;;  %738 = vmatpush.msrb.mxu2 %v3462_v38  ;;  %v6281_v38 = vld [vmem:[#allocation6_spill] sm:$0xff] }
  0x79   : > { %839 = vmatpush.msra.mxu1 %v3342_v18  ;;  %879 = vmatpush.msra.mxu3 %v3718_v50  ;;  %v6266_v18 = vld [vmem:[#allocation15_spill] sm:$0xff] }
  0x7a   : > { %772 = vmatpush.msra.mxu0 %v3547_v63  ;;  %739 = vmatpush.msrb.mxu2 %v3477_v41  ;;  %v6285_v41 = vld [vmem:[#allocation8_spill] sm:$0xff] }
  0x7b   : > { %840 = vmatpush.msra.mxu1 %v3360_v21  ;;  %880 = vmatpush.msra.mxu3 %v3737_v5  ;;  %v6269_v21 = vld [vmem:[#allocation17_spill] sm:$0xff] }
  0x7c   : > { %773 = vmatpush.msra.mxu0 %v3573_v7  ;;  %740 = vmatpush.msrb.mxu2 %v3507_v47  ;;  %v6291_v47 = vld [vmem:[#allocation16_spill] sm:$0xff] }
  0x7d   : > { %841 = vmatpush.msra.mxu1 %v3378_v24  ;;  %881 = vmatpush.msra.mxu3 %v3756_v15  ;;  %v6271_v24 = vld [vmem:[#allocation24_spill] sm:$0xff] }
  0x7e   : > { %774 = vmatpush.msra.mxu0 %v3599_v54  ;;  %741 = vmatpush.msrb.mxu2 %v3552_v0 }
  0x7f   : > { %842 = vmatpush.msra.mxu1 %v3396_v27  ;;  %882 = vmatpush.msra.mxu3 %v3775_v62  ;;  %v6273_v27 = vld [vmem:[#allocation31_spill] sm:$0xff] }
  0x80   : > { %775 = vmatpush.msra.mxu0 %v3644_v6  ;;  %742 = vmatpush.msrb.mxu2 %v3578_v8 }
  0x81   : > { %843 = vmatpush.msra.mxu1 %v3414_v30  ;;  %883 = vmatpush.msra.mxu3 %v3794_v16  ;;  %v6275_v30 = vld [vmem:[#allocation19_spill] sm:$0xff] }
  0x82   : > { %776 = vmatpush.msra.mxu0 %v3670_v57  ;;  %743 = vmatpush.msrb.mxu2 %v3604_v55  ;;  %v651_v55 = vld [vmem:[%s3284_s13 + $0x11] sm:$0x1] }
  0x83   : > { %844 = vmatpush.msra.mxu1 %v3432_v33  ;;  %884 = vmatpush.msra.mxu3 %v3813_v19  ;;  %v6267_v19 = vld [vmem:[#allocation27_spill] sm:$0xff]  ;;  %v6277_v33 = vld [vmem:[#allocation20_spill] sm:$0xff]  ;;  %v715_v57 = vrot.slane %v651_v55, 6 }
  0x84   : > { %856 = vmatpush.msra.mxu2 %v3619_v58  ;;  %777 = vmatpush.msra.mxu0 %v3689_v46  ;;  %v713_v58 = vrot.slane %v650_v51, 7  ;;  %v4072_v55 = vld [vmem:[%s6119_s1 + $0xf0] sm:$0xff] }
  0x85   : > { %845 = vmatpush.msra.mxu1 %v3450_v36  ;;  %885 = vmatpush.msra.mxu3 %v3827_v43  ;;  %v6279_v36 = vld [vmem:[#allocation5_spill] sm:$0xff]  ;;  %v6288_v43 = vld [vmem:[#allocation11_spill] sm:$0xff] }
  0x86   : > { %857 = vmatpush.msra.mxu2 %v6262_v11  ;;  %778 = vmatpush.msra.mxu0 %v6264_v14 }
  0x87   : > { %846 = vmatpush.msra.mxu1 %v6263_v12  ;;  %886 = vmatpush.msra.mxu3 %v3841_v42  ;;  %v6286_v42 = vld [vmem:[#allocation9_spill] sm:$0xff]  ;;  %v654_v12 = vld [vmem:[%s3284_s13 + $0x29] sm:$0x1] }
  0x88   : > { %858 = vmatpush.msra.mxu2 %v6265_v17  ;;  %779 = vmatpush.msra.mxu0 %v6267_v19  ;;  %v655_v19 = vld [vmem:[%s3284_s13 + $0x31] sm:$0x1] }
  0x89   : > { %847 = vmatpush.msra.mxu1 %v6266_v18  ;;  %887 = vmatpush.msra.mxu3 %v3855_v1 }
  0x8a   : > { %859 = vmatpush.msra.mxu2 %v6268_v20  ;;  %780 = vmatpush.msra.mxu0 %v6270_v23 }
  0x8b   : > { %848 = vmatpush.msra.mxu1 %v6269_v21  ;;  %888 = vmatpush.msra.mxu3 %v3869_v39  ;;  %v6282_v39 = vld [vmem:[#allocation33_spill] sm:$0xff]  ;;  %v721_v21 = vrot.slane %v654_v12, 3 }
  0x8c   : > { %860 = vmatpush.msra.mxu2 %v6271_v24  ;;  %781 = vmatpush.msra.mxu0 %v6273_v27  ;;  %v656_v24 = vld [vmem:[%s3284_s13 + $0x39] sm:$0x1]  ;;  %v723_v27 = vrot.slane %v655_v19, 2 }
  0x8d   : > { %849 = vmatpush.msra.mxu1 %v6272_v26  ;;  %889 = vmatpush.msra.mxu3 %v3883_v44  ;;  %v6289_v44 = vld [vmem:[#allocation12_spill] sm:$0xff] }
  0x8e   : > { %861 = vmatpush.msra.mxu2 %v6274_v29  ;;  %782 = vmatpush.msra.mxu0 %v3784_v22  ;;  %v6284_v22 = vld [vmem:[#allocation34_spill] sm:$0xff] }
  0x8f   : > { %850 = vmatpush.msra.mxu1 %v6275_v30  ;;  %890 = vmatpush.msra.mxu3 %v3892_v10  ;;  %v714_v10 = vsel %vm390_vm0, %v713_v58, %v649_v49 }
  0x90   : > { %862 = vmatpush.msra.mxu2 %v6276_v32  ;;  %783 = vmatpush.msra.mxu0 %v3803_v25  ;;  %v6287_v25 = vld [vmem:[#allocation10_spill] sm:$0xff]  ;;  %v716_v14 = vsel %vm393_vm1, %v715_v57, %v714_v10  ;;  %v725_v32 = vrot.slane %v656_v24, 1 }
  0x91   : > { %851 = vmatpush.msra.mxu1 %v6277_v33  ;;  %891 = vmatpush.msra.mxu3 %v3902_v13  ;;  %v717_v13 = vrot.slane %v652_v53, 5 }
  0x92   : > { %863 = vmatpush.msra.mxu2 %v6278_v35 }
  0x93   : > { %1065 = vmatpush.msrb.mxu1 %v6279_v36  ;;  %v718_v20 = vsel %vm396_vm2, %v717_v13, %v716_v14 }
  0x94   : > { %864 = vmatpush.msra.mxu2 %v6280_v37 }
  0x95   : > { %1066 = vmatpush.msrb.mxu1 %v6281_v38 }
  0x96   : > { %865 = vmatpush.msra.mxu2 %v6282_v39 }
  0x97   : > { %1067 = vmatpush.msrb.mxu1 %v6283_v40 }
  0x98   : > { %866 = vmatpush.msra.mxu2 %v6284_v22 }
  0x99   : > { %1068 = vmatpush.msrb.mxu1 %v6285_v41 }
  0x9a   : > { %867 = vmatpush.msra.mxu2 %v3822_v28  ;;  %v3999_v28 = vld [vmem:[%s6120_s2] sm:$0x7] }
  0x9b   : > { %1069 = vmatpush.msrb.mxu1 %v6286_v42  ;;  %v4012_v46 = vperm.slane %v3999_v28, 1 }
  0x9c   : > { %868 = vmatpush.msra.mxu2 %v3836_v31  ;;  %v316_v31 = vld [vmem:[%s6122_s4] sm:$0x7] }
  0x9d   : > { %1070 = vmatpush.msrb.mxu1 %v6287_v25  ;;  %v4007_v59 = vperm.slane %v316_v31, 0  ;;  %6294 = vst [vmem:[#allocation25_spill] sm:$0xff] %v4012_v46  ;;  %v4016_v6 = vperm.slane %v316_v31, 1  ;;  %v4033_v41 = vperm.slane %v316_v31, 2 }
  0x9e   : > { %869 = vmatpush.msra.mxu2 %v3850_v34  ;;  %v4005_v34 = vperm.slane %v3999_v28, 0 }
  0x9f   : > { %1071 = vmatpush.msrb.mxu1 %v6288_v43  ;;  %6293 = vst [vmem:[#allocation14_spill] sm:$0xff] %v4007_v59 }
  0xa0   : > { %870 = vmatpush.msra.mxu2 %v3864_v3  ;;  %6292 = vst [vmem:[#allocation21_spill] sm:$0xff] %v4005_v34 }
  0xa1   : > { %1072 = vmatpush.msrb.mxu1 %v6289_v44  ;;  %6295 = vst [vmem:[#allocation22_spill] sm:$0xff] %v4016_v6 }
  0xa2   : > { %871 = vmatpush.msra.mxu2 %v3878_v9  ;;  %v653_v9 = vld [vmem:[%s3284_s13 + $0x21] sm:$0x1] }
  0xa3   : > { %1073 = vmatpush.msrb.mxu1 %v6290_v45  ;;  %v719_v17 = vrot.slane %v653_v9, 4 }
  0xa5   : > { %1074 = vmatpush.msrb.mxu1 %v6291_v47  ;;  %v720_v26 = vsel %vm399_vm3, %v719_v17, %v718_v20  ;;  %v4038_v47 = vld [vmem:[%s6119_s1 + $0x168] sm:$0xff] }
  0xa6   : > { %v722_v30 = vsel %vm402_vm4, %v721_v21, %v720_v26  ;;  %1045 = vmatpush.msrb.mxu0 %v4038_v47 }
  0xa7   : > { %v724_v35 = vsel %vm405_vm5, %v723_v27, %v722_v30  ;;  %v4101_v27 = vld [vmem:[%s6119_s1 + $0xd8] sm:$0xff]  ;;  %v4113_v30 = vld [vmem:[%s6119_s1 + $0xa8] sm:$0xff] }
  0xa8   : > { %v726_v36 = vsel %vm408_vm6, %v725_v32, %v724_v35  ;;  %v4119_v32 = vld [vmem:[%s6119_s1 + $0x90] sm:$0xff]  ;;  %v4130_v35 = vld [vmem:[%s6119_s1 + $0x80] sm:$0xff] }
  0xa9   : > { %744 = vmatmul.f32.vlgmr.msrb.gmra.mxu2 %v726_v36  ;;  %764 = vmatmul.f32.vlgmr.msrb.gmra.mxu3 %v726_v36  ;;  %6297 = vst [vmem:[#allocation27_spill] sm:$0xff] %v4130_v35 }
  0xaa   : > { %784 = vmatmul.f32.vlgmr.msra.gmra.mxu0 %v726_v36  ;;  %1075 = vmatpush.msrb.mxu1 %v4130_v35  ;;  %v4137_v36 = vld [vmem:[%s6119_s1 + $0x60] sm:$0xff] }
  0xcc   : > { %v428_v52 = vpop.f32.mrf.mxu0 }
  0xcd   : > { %v429_v60 = vadd.f32 %v428_v52, %v4005_v34  ;;  %v4043_v52 = vld [vmem:[%s6119_s1 + $0x150] sm:$0xff] }
  0xce   : > { %1046 = vmatpush.msrb.mxu0 %v4043_v52 }
  0xcf   : > { %v448_v54 = vpop.f32.mrf.mxu1 }
  0xd0   : > { %v449_v11 = vadd.f32 %v448_v54, %v4012_v46 }
  0xd3   : > { %v536_v63 = vpop.f32.mrf.mxu3 }
  0xd4   : > { %v537_v0 = vadd.f32 %v536_v63, %v4007_v59 }
  0xd6   : > { %v579_v1 = vadd.f32 %v537_v0, %v429_v60  ;;  %v4047_v60 = vperm.slane %v3999_v28, 2 }
  0xd8   : > { %v3021_v4 = vmul.f32 -1.442695, %v579_v1  ;;  %6296 = vst [vmem:[#allocation15_spill] sm:$0xff] %v4047_v60  ;;  %v4053_v1 = vld [vmem:[%s6119_s1 + $0x138] sm:$0xff] }
  0xd9   : > { %1047 = vmatpush.msrb.mxu0 %v4053_v1 }
  0xda   : > { %3082 = vpow2.f32 %v3021_v4  ;;  %v4059_v4 = vld [vmem:[%s6119_s1 + $0x120] sm:$0xff] }
  0xdb   : > { %1048 = vmatpush.msrb.mxu0 %v4059_v4 }
  0xe0   : > { %v3083_v7 = vpop.eup %3082 }
  0xe1   : > { %v587_v8 = vadd.f32 1.0, %v3083_v7 }
  0xe3   : > { %3084 = vrcp.f32 %v587_v8  ;;  %vm594_vm7 = vweird.f32 %v587_v8  ;;  %v600_v39 = vand.u32 2147483648, %v587_v8  ;;  %v598_v22 = vand.u32 2147483647, %v587_v8 }
  0xe4   : > { %v468_v0 = vpop.f32.mrf.mxu2 }
  0xe5   : > { %v601_v43 = vor.u32 1.1754944e-38, %v600_v39  ;;  %vm599_vm10 = vcmp.eq.f32.partialorder %v598_v22, 8.507059e+37  ;;  %v469_v28 = vadd.f32 %v468_v0, %v4047_v60  ;;  %v4154_v39 = vld [vmem:[%s6119_s1 + $0x50] sm:$0xff]  ;;  %v4166_v22 = vld [vmem:[%s6119_s1 + $0x38] sm:$0xff] }
  0xe6   : > { %6299 = vst [vmem:[#allocation17_spill] sm:$0xff] %v4154_v39  ;;  %v4215_v0 = vld [vmem:[%s6121_s3 + $0x150] sm:$0xff] }
  0xe7   : > { %6300 = vst [vmem:[#allocation29_spill] sm:$0xff] %v4166_v22 }
  0xe9   : > { %v3085_v2 = vpop.eup %3084 }
  0xea   : > { %v590_v3 = vmul.f32 %v3085_v2, %v587_v8  ;;  %vm595_vm8 = vweird.f32 %v3085_v2  ;;  %v4066_v8 = vld [vmem:[%s6119_s1 + $0x108] sm:$0xff] }
  0xeb   : > { %vm596_vm9 = vmor %vm594_vm7, %vm595_vm8  ;;  %1049 = vmatpush.msrb.mxu0 %v4066_v8 }
  0xec   : > { %v556_v18 = vpop.f32.mrf.mxu0  ;;  %v591_v29 = vsub.f32 1.0, %v590_v3 }
  0xed   : > { %v557_v23 = vadd.f32 %v556_v18, %v4016_v6  ;;  %1050 = vmatpush.msrb.mxu0 %v4072_v55 }
  0xee   : > { %v592_v38 = vmul.f32 %v3085_v2, %v591_v29  ;;  %v4107_v29 = vld [vmem:[%s6119_s1 + $0xc0] sm:$0xff] }
  0xef   : > { %v580_v33 = vadd.f32 %v557_v23, %v449_v11  ;;  %v576_v25 = vpop.f32.mrf.mxu1  ;;  %1051 = vmatpush.msrb.mxu0 %v4101_v27 }
  0xf0   : > { %v593_v40 = vadd.f32 %v3085_v2, %v592_v38  ;;  %v577_v31 = vadd.f32 %v576_v25, %v4033_v41  ;;  %v4149_v38 = vld [vmem:[%s6119_s1 + $0x48] sm:$0xff]  ;;  %v4178_v25 = vld [vmem:[%s6119_s1 + $0x20] sm:$0xff] }
  0xf1   : > { %v3022_v37 = vmul.f32 -1.442695, %v580_v33  ;;  %1052 = vmatpush.msrb.mxu0 %v4107_v29  ;;  %v4125_v33 = vld [vmem:[%s6119_s1 + $0x78] sm:$0xff]  ;;  %6301 = vst [vmem:[#allocation24_spill] sm:$0xff] %v4178_v25 }
  0xf2   : > { %v597_v45 = vsel %vm596_vm9, %v3085_v2, %v593_v40  ;;  %v4161_v40 = vld [vmem:[%s6119_s1 + $0x30] sm:$0xff] }
  0xf3   : > { %3086 = vpow2.f32 %v3022_v37  ;;  %v602_v63 = vsel %vm599_vm10, %v601_v43, %v597_v45  ;;  %1053 = vmatpush.msrb.mxu0 %v4113_v30  ;;  %v4142_v37 = vld [vmem:[%s6119_s1 + $0x68] sm:$0xff]  ;;  %v4185_v43 = vld [vmem:[%s6119_s1] sm:$0xff] }
  0xf4   : > { %v619_v7 = vmul.f32 %v602_v63, %v577_v31  ;;  %6298 = vst [vmem:[#allocation23_spill] sm:$0xff] %v4142_v37  ;;  %1076 = vmatpush.msrb.mxu1 %v4142_v37  ;;  %v4197_v45 = vld [vmem:[%s6121_s3 + $0x168] sm:$0xff]  ;;  %v4202_v31 = vld [vmem:[%s6121_s3 + $0x170] sm:$0xff]  ;;  %v4207_v63 = vld [vmem:[%s6121_s3 + $0x178] sm:$0xff] }
  0xf5   : > { %1054 = vmatpush.msrb.mxu0 %v4119_v32  ;;  %6303 = vst [vmem:[#allocation31_spill] sm:$0xff] %v4207_v63  ;;  %1153 = vmatpush.msrb.mxu3 %v4197_v45 }
  0xf6   : > { %v620_v58 = vadd.f32 %v619_v7, %v469_v28  ;;  %1077 = vmatpush.msrb.mxu1 %v4154_v39  ;;  %v4220_v7 = vld [vmem:[%s6121_s3 + $0x158] sm:$0xff] }
  0xf7   : > { %1055 = vmatpush.msrb.mxu0 %v4125_v33  ;;  %1154 = vmatpush.msrb.mxu3 %v4215_v0  ;;  %v4228_v28 = vld [vmem:[%s6121_s3 + $0x138] sm:$0xff] }
  0xf8   : > { %1078 = vmatpush.msrb.mxu1 %v4166_v22 }
  0xf9   : > { %v3087_v42 = vpop.eup %3086  ;;  %1056 = vmatpush.msrb.mxu0 %v4137_v36  ;;  %1155 = vmatpush.msrb.mxu3 %v4228_v28 }
  0xfa   : > { %v588_v44 = vadd.f32 1.0, %v3087_v42  ;;  %v4173_v42 = vld [vmem:[%s6119_s1 + $0x18] sm:$0xff]  ;;  %1079 = vmatpush.msrb.mxu1 %v4178_v25  ;;  %v1015_v25 = vld [vmem:[%s6119_s1 + $0x148] sm:$0xff] }
  0xfb   : > { %1057 = vmatpush.msrb.mxu0 %v4149_v38 }
  0xfc   : > { %3088 = vrcp.f32 %v588_v44  ;;  %v615_v49 = vand.u32 2147483648, %v588_v44  ;;  %v613_v57 = vand.u32 2147483647, %v588_v44  ;;  %vm609_vm12 = vweird.f32 %v588_v44 }
  0xfd   : > { %3090 = vtanh.f32 %v620_v58  ;;  %1058 = vmatpush.msrb.mxu0 %v4161_v40  ;;  %v4246_v58 = vld [vmem:[%s6121_s3 + $0x128] sm:$0xff] }
  0xfe   : > { %v616_v9 = vor.u32 1.1754944e-38, %v615_v49  ;;  %vm614_vm14 = vcmp.eq.f32.partialorder %v613_v57, 8.507059e+37  ;;  %v4273_v57 = vld [vmem:[%s6121_s3 + $0xf8] sm:$0xff] }
  0xff   : > { %1059 = vmatpush.msrb.mxu0 %v4173_v42 }
 0x101   : > { %1060 = vmatpush.msrb.mxu0 %v4185_v43 }
 0x102   : > { %v3089_v51 = vpop.eup %3088 }
 0x103   : > { %v605_v54 = vmul.f32 %v3089_v51, %v588_v44  ;;  %vm610_vm11 = vweird.f32 %v3089_v51  ;;  %v3091_v12 = vpop.eup %3090  ;;  %v4190_v44 = vld [vmem:[%s6119_s1 + $0x8] sm:$0xff]  ;;  %1173 = vmatpush.msra.mxu0 %v4202_v31 }
 0x104   : > { %vm611_vm13 = vmor %vm609_vm12, %vm610_vm11  ;;  %6302 = vst [vmem:[#allocation18_spill] sm:$0xff] %v4190_v44  ;;  %1080 = vmatpush.msrb.mxu1 %v4190_v44 }
 0x105   : > { %v606_v2 = vsub.f32 1.0, %v605_v54  ;;  %1174 = vmatpush.msra.mxu0 %v4220_v7 }
 0x107   : > { %v607_v53 = vmul.f32 %v3089_v51, %v606_v2  ;;  %v4259_v2 = vld [vmem:[%s6121_s3 + $0x110] sm:$0xff] }
 0x109   : > { %v608_v3 = vadd.f32 %v3089_v51, %v607_v53 }
 0x10b   : > { %v612_v10 = vsel %vm611_vm13, %v3089_v51, %v608_v3  ;;  %v4233_v51 = vld [vmem:[%s6121_s3 + $0x140] sm:$0xff] }
 0x10c   : > { %v617_v13 = vsel %vm614_vm14, %v616_v9, %v612_v10  ;;  %1175 = vmatpush.msra.mxu0 %v4233_v51  ;;  %v4286_v9 = vld [vmem:[%s6121_s3 + $0xe0] sm:$0xff] }
 0x10d   : > { %v622_v11 = vsub.f32 1.0, %v617_v13  ;;  %v624_v17 = vmul.f32 %v617_v13, %v3621_v61  ;;  %v4292_v10 = vld [vmem:[%s6121_s3 + $0xc0] sm:$0xff]  ;;  %v4297_v13 = vld [vmem:[%s6121_s3 + $0xc8] sm:$0xff] }
 0x10e   : > { %1176 = vmatpush.msra.mxu0 %v4246_v58 }
 0x10f   : > { %v623_v14 = vmul.f32 %v3091_v12, %v622_v11 }
 0x110   : > { %1177 = vmatpush.msra.mxu0 %v4259_v2 }
 0x111   : > { %v4077_v18 = vadd.f32 %v624_v17, %v623_v14  ;;  %v967_v14 = vld [vmem:[%s3284_s13 + $0xa] sm:$0x1] }
 0x112   : > { %1178 = vmatpush.msra.mxu0 %v4273_v57 }
 0x113   : > { %v627_v19 = vrot.slane %v4077_v18, 1  ;;  %v628_v20 = vrot.slane %v4077_v18, 2  ;;  %v629_v21 = vrot.slane %v4077_v18, 3  ;;  %641 = vst [vmem:[%s3286_s14] sm:$0x1] %v4077_v18  ;;  %852 = vmatmul.f32.vlgmr.msra.gmra.mxu1 %v4077_v18  ;;  %872 = vmatmul.f32.vlgmr.msra.gmra.mxu2 %v4077_v18  ;;  %v630_v61 = vrot.slane %v4077_v18, 4 }
 0x114   : > { %892 = vmatmul.f32.vlgmr.msra.gmra.mxu3 %v4077_v18  ;;  %v631_v23 = vrot.slane %v4077_v18, 5  ;;  %v632_v24 = vrot.slane %v4077_v18, 6  ;;  %v633_v26 = vrot.slane %v4077_v18, 7  ;;  %1193 = vmatpush.msra.mxu1 %v4207_v63  ;;  %v1021_v63 = vld [vmem:[%s6119_s1 + $0x178] sm:$0xff] }
 0x115   : > { %642 = vst [vmem:[%s3286_s14 + $0x8] sm:$0x1] %v627_v19  ;;  %1179 = vmatpush.msra.mxu0 %v4286_v9  ;;  %v968_v19 = vld [vmem:[%s3284_s13 + $0x12] sm:$0x1]  ;;  %1085 = vmatpush.msrb.mxu2 %v1021_v63 }
 0x116   : > { %643 = vst [vmem:[%s3286_s14 + $0x10] sm:$0x1] %v628_v20  ;;  %1194 = vmatpush.msra.mxu1 %v3681_v56  ;;  %v4241_v56 = vld [vmem:[%s6121_s3 + $0x120] sm:$0xff]  ;;  %v1030_v20 = vrot.slane %v967_v14, 7 }
 0x117   : > { %644 = vst [vmem:[%s3286_s14 + $0x18] sm:$0x1] %v629_v21  ;;  %1156 = vmatpush.msrb.mxu3 %v4241_v56  ;;  %1180 = vmatpush.msra.mxu0 %v4297_v13 }
 0x118   : > { %645 = vst [vmem:[%s3286_s14 + $0x20] sm:$0x1] %v630_v61  ;;  %1195 = vmatpush.msra.mxu1 %v3699_v48  ;;  %v4254_v48 = vld [vmem:[%s6121_s3 + $0x108] sm:$0xff]  ;;  %v4316_v61 = vld [vmem:[%s6121_s3 + $0xb0] sm:$0xff] }
 0x119   : > { %646 = vst [vmem:[%s3286_s14 + $0x28] sm:$0x1] %v631_v23  ;;  %1157 = vmatpush.msrb.mxu3 %v4254_v48  ;;  %v4321_v23 = vld [vmem:[%s6121_s3 + $0xb8] sm:$0xff]  ;;  %1181 = vmatpush.msra.mxu0 %v4316_v61 }
 0x11a   : > { %647 = vst [vmem:[%s3286_s14 + $0x30] sm:$0x1] %v632_v24  ;;  %1196 = vmatpush.msra.mxu1 %v3718_v50  ;;  %v4268_v50 = vld [vmem:[%s6121_s3 + $0xf0] sm:$0xff]  ;;  %v1032_v24 = vrot.slane %v968_v19, 6 }
 0x11b   : > { %648 = vst [vmem:[%s3286_s14 + $0x38] sm:$0x1] %v633_v26  ;;  %1158 = vmatpush.msrb.mxu3 %v4268_v50 }
 0x11c   : > { %1197 = vmatpush.msra.mxu1 %v3737_v5  ;;  %v4281_v5 = vld [vmem:[%s6121_s3 + $0xd8] sm:$0xff]  ;;  %6304 = vst [vmem:[#allocation26_spill] sm:$0xff] %v4321_v23 }
 0x11d   : > { %1159 = vmatpush.msrb.mxu3 %v4281_v5 }
 0x11e   : > { %1198 = vmatpush.msra.mxu1 %v3756_v15 }
 0x11f   : > { %1160 = vmatpush.msrb.mxu3 %v4292_v10 }
 0x120   : > { %1199 = vmatpush.msra.mxu1 %v3775_v62  ;;  %v4311_v62 = vld [vmem:[%s6121_s3 + $0xa8] sm:$0xff] }
 0x121   : > { %1161 = vmatpush.msrb.mxu3 %v4311_v62 }
 0x122   : > { %1200 = vmatpush.msra.mxu1 %v3794_v16  ;;  %v966_v16 = vld [vmem:[%s3284_s13 + $0x2] sm:$0x1] }
 0x124   : > { %1201 = vmatpush.msra.mxu1 %v4321_v23  ;;  %v972_v23 = vld [vmem:[%s3284_s13 + $0x32] sm:$0x1] }
 0x12c   : > { %v745_v54 = vpop.f32.mrf.mxu2  ;;  %v765_v12 = vpop.f32.mrf.mxu3 }
 0x12d   : > { %v746_v49 = vadd.f32 %v745_v54, %v4005_v34  ;;  %v766_v15 = vadd.f32 %v765_v12, %v4012_v46  ;;  %v969_v54 = vld [vmem:[%s3284_s13 + $0x1a] sm:$0x1]  ;;  %v1031_v12 = vsel %vm390_vm0, %v1030_v20, %v966_v16  ;;  %v4365_v20 = vld [vmem:[%s6121_s3 + $0x88] sm:$0xff]  ;;  %v1040_v16 = vrot.slane %v972_v23, 2  ;;  %v4386_v23 = vld [vmem:[%s6121_s3 + $0x70] sm:$0xff] }
 0x12e   : > { %v1034_v14 = vrot.slane %v969_v54, 5  ;;  %v4355_v34 = vld [vmem:[%s6121_s3 + $0x78] sm:$0xff]  ;;  %6306 = vst [vmem:[#allocation28_spill] sm:$0xff] %v4365_v20  ;;  %v4464_v46 = vld [vmem:[%s6121_s3 + $0x8] sm:$0xff] }
 0x12f   : > { %6307 = vst [vmem:[#allocation20_spill] sm:$0xff] %v4386_v23 }
 0x130   : > { %6314 = vst [vmem:[#allocation34_spill] sm:$0xff] %v4464_v46 }
 0x190   : > { %v853_v53 = vpop.f32.mrf.mxu1 }
 0x191   : > { %v854_v3 = vadd.f32 %v853_v53, %v4007_v59  ;;  %v4333_v53 = vld [vmem:[%s6121_s3 + $0x90] sm:$0xff]  ;;  %v1033_v59 = vsel %vm393_vm1, %v1032_v24, %v1031_v12 }
 0x192   : > { %1162 = vmatpush.msrb.mxu3 %v4333_v53 }
 0x193   : > { %v896_v11 = vadd.f32 %v854_v3, %v746_v49  ;;  %v970_v49 = vld [vmem:[%s3284_s13 + $0x22] sm:$0x1]  ;;  %v4338_v3 = vld [vmem:[%s6121_s3 + $0x98] sm:$0xff] }
 0x194   : > { %1182 = vmatpush.msra.mxu0 %v4338_v3  ;;  %1163 = vmatpush.msrb.mxu3 %v4355_v34 }
 0x195   : > { %v3023_v17 = vmul.f32 -1.442695, %v896_v11  ;;  %v4343_v11 = vld [vmem:[%s6121_s3 + $0xa0] sm:$0xff] }
 0x196   : > { %v873_v21 = vpop.f32.mrf.mxu2  ;;  %6305 = vst [vmem:[#allocation19_spill] sm:$0xff] %v4343_v11  ;;  %1202 = vmatpush.msra.mxu1 %v4343_v11  ;;  %v4376_v11 = vld [vmem:[%s6121_s3 + $0x60] sm:$0xff] }
 0x197   : > { %3092 = vpow2.f32 %v3023_v17  ;;  %v874_v26 = vadd.f32 %v873_v21, %v4016_v6  ;;  %v1036_v17 = vrot.slane %v970_v49, 4  ;;  %v971_v21 = vld [vmem:[%s3284_s13 + $0x2a] sm:$0x1]  ;;  %v973_v49 = vld [vmem:[%s3284_s13 + $0x3a] sm:$0x1]  ;;  %1164 = vmatpush.msrb.mxu3 %v4376_v11  ;;  %v4459_v6 = vld [vmem:[%s6121_s3] sm:$0xff] }
 0x198   : > { %v1038_v24 = vrot.slane %v971_v21, 3  ;;  %1203 = vmatpush.msra.mxu1 %v4365_v20 }
 0x199   : > { %v897_v19 = vadd.f32 %v874_v26, %v766_v15  ;;  %v4360_v15 = vld [vmem:[%s6121_s3 + $0x80] sm:$0xff]  ;;  %v1035_v26 = vsel %vm396_vm2, %v1034_v14, %v1033_v59  ;;  %v4381_v59 = vld [vmem:[%s6121_s3 + $0x68] sm:$0xff] }
 0x19a   : > { %1183 = vmatpush.msra.mxu0 %v4360_v15  ;;  %v1037_v12 = vsel %vm399_vm3, %v1036_v17, %v1035_v26  ;;  %v1042_v17 = vrot.slane %v973_v49, 1  ;;  %1204 = vmatpush.msra.mxu1 %v4386_v23  ;;  %v4421_v49 = vld [vmem:[%s6121_s3 + $0x30] sm:$0xff] }
 0x19b   : > { %v3024_v54 = vmul.f32 -1.442695, %v897_v19  ;;  %v1039_v14 = vsel %vm402_vm4, %v1038_v24, %v1037_v12  ;;  %v4401_v24 = vld [vmem:[%s6121_s3 + $0x48] sm:$0xff]  ;;  %v4426_v12 = vld [vmem:[%s6121_s3 + $0x38] sm:$0xff] }
 0x19c   : > { %1184 = vmatpush.msra.mxu0 %v4381_v59  ;;  %v1041_v21 = vsel %vm405_vm5, %v1040_v16, %v1039_v14  ;;  %v4411_v16 = vld [vmem:[%s6121_s3 + $0x58] sm:$0xff]  ;;  %1165 = vmatpush.msrb.mxu3 %v4401_v24  ;;  %6310 = vst [vmem:[#allocation32_spill] sm:$0xff] %v4426_v12  ;;  %v4431_v14 = vld [vmem:[%s6121_s3 + $0x40] sm:$0xff] }
 0x19d   : > { %v3093_v19 = vpop.eup %3092  ;;  %3094 = vpow2.f32 %v3024_v54  ;;  %v4396_v20 = vsel %vm408_vm6, %v1042_v17, %v1041_v21  ;;  %v4406_v54 = vld [vmem:[%s6121_s3 + $0x50] sm:$0xff]  ;;  %6309 = vst [vmem:[#allocation5_spill] sm:$0xff] %v4411_v16  ;;  %1205 = vmatpush.msra.mxu1 %v4411_v16  ;;  %v4439_v17 = vld [vmem:[%s6121_s3 + $0x18] sm:$0xff]  ;;  %v4449_v21 = vld [vmem:[%s6121_s3 + $0x28] sm:$0xff] }
 0x19e   : > { %v4392_v26 = vadd.f32 1.0, %v3093_v19  ;;  %6308 = vst [vmem:[#allocation30_spill] sm:$0xff] %v4406_v54  ;;  %1061 = vmatmul.f32.vlgmr.msrb.gmra.mxu0 %v4396_v20  ;;  %1081 = vmatmul.f32.vlgmr.msrb.gmra.mxu1 %v4396_v20  ;;  %v4444_v19 = vld [vmem:[%s6121_s3 + $0x20] sm:$0xff] }
 0x19f   : > { %1185 = vmatpush.msra.mxu0 %v4406_v54  ;;  %6311 = vst [vmem:[#allocation6_spill] sm:$0xff] %v4431_v14  ;;  %1166 = vmatpush.msrb.mxu3 %v4421_v49 }
 0x1a0   : > { %3096 = vrcp.f32 %v4392_v26  ;;  %6312 = vst [vmem:[#allocation33_spill] sm:$0xff] %v4444_v19  ;;  %1206 = vmatpush.msra.mxu1 %v4431_v14  ;;  %v4469_v14 = vld [vmem:[%s6121_s3 + $0x10] sm:$0xff]  ;;  %v917_v39 = vand.u32 2147483648, %v4392_v26  ;;  %v915_v35 = vand.u32 2147483647, %v4392_v26  ;;  %vm911_vm7 = vweird.f32 %v4392_v26 }
 0x1a1   : > { %1186 = vmatpush.msra.mxu0 %v4426_v12  ;;  %6313 = vst [vmem:[#allocation7_spill] sm:$0xff] %v4449_v21  ;;  %1167 = vmatpush.msrb.mxu3 %v4439_v17 }
 0x1a2   : > { %6315 = vst [vmem:[#allocation8_spill] sm:$0xff] %v4469_v14  ;;  %1207 = vmatpush.msra.mxu1 %v4449_v21  ;;  %v1018_v21 = vld [vmem:[%s6119_s1 + $0x160] sm:$0xff]  ;;  %vm916_vm9 = vcmp.eq.f32.partialorder %v915_v35, 8.507059e+37  ;;  %v1000_v35 = vld [vmem:[%s6119_s1 + $0xd0] sm:$0xff] }
 0x1a3   : > { %v3095_v16 = vpop.eup %3094  ;;  %1187 = vmatpush.msra.mxu0 %v4444_v19  ;;  %1168 = vmatpush.msrb.mxu3 %v4459_v6 }
 0x1a4   : > { %v4452_v23 = vadd.f32 1.0, %v3095_v16  ;;  %1208 = vmatpush.msra.mxu1 %v4469_v14  ;;  %1086 = vmatpush.msrb.mxu2 %v1018_v21  ;;  %v1012_v14 = vld [vmem:[%s6119_s1 + $0x130] sm:$0xff] }
 0x1a5   : > { %1188 = vmatpush.msra.mxu0 %v4464_v46  ;;  %v785_v46 = vpop.f32.mrf.mxu0 }
 0x1a6   : > { %v3097_v16 = vpop.eup %3096  ;;  %3098 = vrcp.f32 %v4452_v23  ;;  %1470 = vmatpush.msrb.mxu1 %v4197_v45  ;;  %1087 = vmatpush.msrb.mxu2 %v1015_v25  ;;  %v893_v45 = vpop.f32.mrf.mxu3  ;;  %vm926_vm11 = vweird.f32 %v4452_v23 }
 0x1a7   : > { %v907_v44 = vmul.f32 %v3097_v16, %v4392_v26  ;;  %1402 = vmatpush.msrb.mxu0 %v1021_v63  ;;  %vm912_vm15 = vweird.f32 %v3097_v16  ;;  %v932_v26 = vand.u32 2147483648, %v4452_v23 }
 0x1a8   : > { %1471 = vmatpush.msrb.mxu1 %v4215_v0  ;;  %1088 = vmatpush.msrb.mxu2 %v1012_v14  ;;  %vm913_vm8 = vmor %vm911_vm7, %vm912_vm15  ;;  %v786_v0 = vadd.f32 %v785_v46, %v4047_v60 }
 0x1a9   : > { %v908_v22 = vsub.f32 1.0, %v907_v44  ;;  %1403 = vmatpush.msrb.mxu0 %v1018_v21  ;;  %v1009_v44 = vld [vmem:[%s6119_s1 + $0x118] sm:$0xff]  ;;  %v1006_v21 = vld [vmem:[%s6119_s1 + $0x100] sm:$0xff] }
 0x1aa   : > { %1472 = vmatpush.msrb.mxu1 %v4228_v28  ;;  %1089 = vmatpush.msrb.mxu2 %v1009_v44 }
 0x1ab   : > { %v909_v37 = vmul.f32 %v3097_v16, %v908_v22  ;;  %1404 = vmatpush.msrb.mxu0 %v1015_v25  ;;  %v918_v22 = vor.u32 1.1754944e-38, %v917_v39  ;;  %v894_v25 = vadd.f32 %v893_v45, %v4033_v41  ;;  %v1003_v39 = vld [vmem:[%s6119_s1 + $0xe8] sm:$0xff] }
 0x1ac   : > { %v3099_v19 = vpop.eup %3098  ;;  %1473 = vmatpush.msrb.mxu1 %v4241_v56  ;;  %1090 = vmatpush.msrb.mxu2 %v1006_v21  ;;  %v930_v56 = vand.u32 2147483647, %v4452_v23 }
 0x1ad   : > { %v922_v63 = vmul.f32 %v3099_v19, %v4452_v23  ;;  %v910_v12 = vadd.f32 %v3097_v16, %v909_v37  ;;  %1405 = vmatpush.msrb.mxu0 %v1012_v14  ;;  %vm927_vm10 = vweird.f32 %v3099_v19  ;;  %v991_v23 = vld [vmem:[%s6119_s1 + $0x88] sm:$0xff] }
 0x1ae   : > { %1474 = vmatpush.msrb.mxu1 %v4254_v48  ;;  %1091 = vmatpush.msrb.mxu2 %v1003_v39  ;;  %vm928_vm12 = vmor %vm926_vm11, %vm927_vm10  ;;  %vm931_vm13 = vcmp.eq.f32.partialorder %v930_v56, 8.507059e+37 }
 0x1af   : > { %v923_v54 = vsub.f32 1.0, %v922_v63  ;;  %v914_v28 = vsel %vm913_vm8, %v3097_v16, %v910_v12  ;;  %1406 = vmatpush.msrb.mxu0 %v1009_v44  ;;  %v933_v16 = vor.u32 1.1754944e-38, %v932_v26 }
 0x1b0   : > { %v919_v37 = vsel %vm916_vm9, %v918_v22, %v914_v28  ;;  %1475 = vmatpush.msrb.mxu1 %v4268_v50  ;;  %1092 = vmatpush.msrb.mxu2 %v1000_v35  ;;  %v994_v50 = vld [vmem:[%s6119_s1 + $0xa0] sm:$0xff] }
 0x1b1   : > { %v924_v46 = vmul.f32 %v3099_v19, %v923_v54  ;;  %v936_v60 = vmul.f32 %v919_v37, %v894_v25  ;;  %1407 = vmatpush.msrb.mxu0 %v1006_v21  ;;  %v997_v54 = vld [vmem:[%s6119_s1 + $0xb8] sm:$0xff]  ;;  %v976_v25 = vld [vmem:[%s6119_s1 + $0x10] sm:$0xff] }
 0x1b2   : > { %1476 = vmatpush.msrb.mxu1 %v4281_v5  ;;  %1093 = vmatpush.msrb.mxu2 %v997_v54 }
 0x1b3   : > { %v925_v12 = vadd.f32 %v3099_v19, %v924_v46  ;;  %v937_v48 = vadd.f32 %v936_v60, %v786_v0  ;;  %1408 = vmatpush.msrb.mxu0 %v1003_v39  ;;  %v4670_v39 = vld [vmem:[%s6121_s3 + $0x100] sm:$0xff] }
 0x1b4   : > { %1477 = vmatpush.msrb.mxu1 %v4292_v10  ;;  %1094 = vmatpush.msrb.mxu2 %v994_v50  ;;  %v6329_v46 = vld [vmem:[#allocation21_spill] sm:$0xff] }
 0x1b5   : > { %v929_v14 = vsel %vm928_vm12, %v3099_v19, %v925_v12  ;;  %3100 = vtanh.f32 %v937_v48  ;;  %1409 = vmatpush.msrb.mxu0 %v1000_v35  ;;  %v988_v19 = vld [vmem:[%s6119_s1 + $0x70] sm:$0xff]  ;;  %v4677_v12 = vld [vmem:[%s6121_s3 + $0xe8] sm:$0xff] }
 0x1b6   : > { %v934_v60 = vsel %vm931_vm13, %v933_v16, %v929_v14  ;;  %1478 = vmatpush.msrb.mxu1 %v4311_v62  ;;  %1095 = vmatpush.msrb.mxu2 %v991_v23  ;;  %v985_v62 = vld [vmem:[%s6119_s1 + $0x58] sm:$0xff]  ;;  %v6330_v48 = vld [vmem:[#allocation14_spill] sm:$0xff]  ;;  %v4684_v14 = vld [vmem:[%s6121_s3 + $0xd0] sm:$0xff] }
 0x1b7   : > { %1410 = vmatpush.msrb.mxu0 %v997_v54  ;;  %v939_v5 = vsub.f32 1.0, %v934_v60  ;;  %v941_v44 = vmul.f32 %v934_v60, %v4077_v18 }
 0x1b8   : > { %1479 = vmatpush.msrb.mxu1 %v4333_v53  ;;  %1096 = vmatpush.msrb.mxu2 %v988_v19  ;;  %v982_v53 = vld [vmem:[%s6119_s1 + $0x40] sm:$0xff] }
 0x1b9   : > { %1411 = vmatpush.msrb.mxu0 %v994_v50  ;;  %v1284_v50 = vld [vmem:[%s3284_s13 + $0xb] sm:$0x1] }
 0x1ba   : > { %1480 = vmatpush.msrb.mxu1 %v4355_v34  ;;  %1097 = vmatpush.msrb.mxu2 %v985_v62 }
 0x1bb   : > { %v3101_v10 = vpop.eup %3100  ;;  %1412 = vmatpush.msrb.mxu0 %v991_v23  ;;  %v1285_v23 = vld [vmem:[%s3284_s13 + $0x13] sm:$0x1] }
 0x1bc   : > { %v940_v45 = vmul.f32 %v3101_v10, %v939_v5  ;;  %1481 = vmatpush.msrb.mxu1 %v4376_v11  ;;  %v979_v11 = vld [vmem:[%s6119_s1 + $0x28] sm:$0xff]  ;;  %1098 = vmatpush.msrb.mxu2 %v982_v53  ;;  %v1347_v5 = vrot.slane %v1284_v50, 7  ;;  %v1286_v10 = vld [vmem:[%s3284_s13 + $0x1b] sm:$0x1] }
 0x1bd   : > { %1413 = vmatpush.msrb.mxu0 %v988_v19  ;;  %v1283_v19 = vld [vmem:[%s3284_s13 + $0x3] sm:$0x1] }
 0x1be   : > { %v4537_v63 = vadd.f32 %v941_v44, %v940_v45  ;;  %1482 = vmatpush.msrb.mxu1 %v4401_v24  ;;  %1099 = vmatpush.msrb.mxu2 %v979_v11  ;;  %v1349_v45 = vrot.slane %v1285_v23, 6  ;;  %v4741_v23 = vld [vmem:[%s6119_s1 + $0x108] sm:$0xff] }
 0x1bf   : > { %1414 = vmatpush.msrb.mxu0 %v985_v62  ;;  %v6331_v62 = vld [vmem:[#allocation26_spill] sm:$0xff] }
 0x1c0   : > { %v944_v18 = vrot.slane %v4537_v63, 1  ;;  %v945_v22 = vrot.slane %v4537_v63, 2  ;;  %v946_v34 = vrot.slane %v4537_v63, 3  ;;  %958 = vst [vmem:[%s3286_s14 + $0x1] sm:$0x1] %v4537_v63  ;;  %1169 = vmatmul.f32.vlgmr.msrb.gmra.mxu3 %v4537_v63  ;;  %1189 = vmatmul.f32.vlgmr.msra.gmra.mxu0 %v4537_v63  ;;  %v947_v0 = vrot.slane %v4537_v63, 4 }
 0x1c1   : > { %1209 = vmatmul.f32.vlgmr.msra.gmra.mxu1 %v4537_v63  ;;  %v948_v21 = vrot.slane %v4537_v63, 5  ;;  %v949_v28 = vrot.slane %v4537_v63, 6  ;;  %v950_v37 = vrot.slane %v4537_v63, 7  ;;  %1415 = vmatpush.msrb.mxu0 %v982_v53  ;;  %v1287_v53 = vld [vmem:[%s3284_s13 + $0x23] sm:$0x1] }
 0x1c2   : > { %959 = vst [vmem:[%s3286_s14 + $0x9] sm:$0x1] %v944_v18  ;;  %1483 = vmatpush.msrb.mxu1 %v4421_v49  ;;  %1100 = vmatpush.msrb.mxu2 %v976_v25  ;;  %v4664_v49 = vld [vmem:[%s6121_s3 + $0x118] sm:$0xff]  ;;  %v1348_v18 = vsel %vm390_vm0, %v1347_v5, %v1283_v19  ;;  %v6339_v19 = vld [vmem:[#allocation15_spill] sm:$0xff] }
 0x1c3   : > { %960 = vst [vmem:[%s3286_s14 + $0x11] sm:$0x1] %v945_v22  ;;  %1101 = vmatmul.f32.vlgmr.msrb.gmra.mxu2 %v4396_v20  ;;  %1416 = vmatpush.msrb.mxu0 %v979_v11  ;;  %v4657_v20 = vld [vmem:[%s6121_s3 + $0x130] sm:$0xff]  ;;  %v1351_v22 = vrot.slane %v1286_v10, 5  ;;  %v1288_v11 = vld [vmem:[%s3284_s13 + $0x2b] sm:$0x1] }
 0x1c4   : > { %961 = vst [vmem:[%s3286_s14 + $0x19] sm:$0x1] %v946_v34  ;;  %1484 = vmatpush.msrb.mxu1 %v4439_v17  ;;  %1362 = vmatpush.msra.mxu2 %v4038_v47  ;;  %v1334_v47 = vld [vmem:[%s6119_s1 + $0x158] sm:$0xff] }
 0x1c5   : > { %962 = vst [vmem:[%s3286_s14 + $0x21] sm:$0x1] %v947_v0  ;;  %1417 = vmatpush.msrb.mxu0 %v976_v25  ;;  %v1350_v0 = vsel %vm393_vm1, %v1349_v45, %v1348_v18  ;;  %v6332_v25 = vld [vmem:[#allocation19_spill] sm:$0xff] }
 0x1c6   : > { %963 = vst [vmem:[%s3286_s14 + $0x29] sm:$0x1] %v948_v21  ;;  %1485 = vmatpush.msrb.mxu1 %v4459_v6  ;;  %1363 = vmatpush.msra.mxu2 %v4043_v52  ;;  %v1337_v6 = vld [vmem:[%s6119_s1 + $0x170] sm:$0xff]  ;;  %v6316_v52 = vld [vmem:[#allocation30_spill] sm:$0xff]  ;;  %v1353_v21 = vrot.slane %v1287_v53, 4 }
 0x1c7   : > { %964 = vst [vmem:[%s3286_s14 + $0x31] sm:$0x1] %v949_v28  ;;  %1382 = vmatpush.msra.mxu3 %v1337_v6  ;;  %v1289_v28 = vld [vmem:[%s3284_s13 + $0x33] sm:$0x1] }
 0x1c8   : > { %965 = vst [vmem:[%s3286_s14 + $0x39] sm:$0x1] %v950_v37  ;;  %1364 = vmatpush.msra.mxu2 %v4053_v1  ;;  %v1331_v1 = vld [vmem:[%s6119_s1 + $0x140] sm:$0xff]  ;;  %1699 = vmatpush.msra.mxu1 %v1337_v6  ;;  %v1352_v37 = vsel %vm396_vm2, %v1351_v22, %v1350_v0  ;;  %v1355_v6 = vrot.slane %v1288_v11, 3  ;;  %v4749_v53 = vld [vmem:[%s6119_s1 + $0xf0] sm:$0xff] }
 0x1c9   : > { %1383 = vmatpush.msra.mxu3 %v1334_v47 }
 0x1ca   : > { %1365 = vmatpush.msra.mxu2 %v4059_v4  ;;  %v6317_v4 = vld [vmem:[#allocation32_spill] sm:$0xff]  ;;  %1700 = vmatpush.msra.mxu1 %v1334_v47 }
 0x1cb   : > { %1384 = vmatpush.msra.mxu3 %v1331_v1  ;;  %v1290_v47 = vld [vmem:[%s3284_s13 + $0x3b] sm:$0x1] }
 0x1cc   : > { %1366 = vmatpush.msra.mxu2 %v4066_v8  ;;  %v1328_v8 = vld [vmem:[%s6119_s1 + $0x128] sm:$0xff]  ;;  %1701 = vmatpush.msra.mxu1 %v1331_v1  ;;  %v1354_v1 = vsel %vm399_vm3, %v1353_v21, %v1352_v37 }
 0x1cd   : > { %1385 = vmatpush.msra.mxu3 %v1328_v8 }
 0x1ce   : > { %1367 = vmatpush.msra.mxu2 %v4072_v55  ;;  %v6318_v55 = vld [vmem:[#allocation33_spill] sm:$0xff]  ;;  %1702 = vmatpush.msra.mxu1 %v1328_v8  ;;  %v1359_v8 = vrot.slane %v1290_v47, 1 }
 0x1d0   : > { %1368 = vmatpush.msra.mxu2 %v4101_v27  ;;  %v6319_v27 = vld [vmem:[#allocation34_spill] sm:$0xff] }
 0x1d2   : > { %1369 = vmatpush.msra.mxu2 %v4107_v29  ;;  %v1325_v29 = vld [vmem:[%s6119_s1 + $0x110] sm:$0xff] }
 0x1d3   : > { %1386 = vmatpush.msra.mxu3 %v1325_v29  ;;  %1703 = vmatpush.msra.mxu1 %v1325_v29  ;;  %v6334_v29 = vld [vmem:[#allocation20_spill] sm:$0xff] }
 0x1d4   : > { %1370 = vmatpush.msra.mxu2 %v4113_v30  ;;  %v1322_v30 = vld [vmem:[%s6119_s1 + $0xf8] sm:$0xff] }
 0x1d5   : > { %1387 = vmatpush.msra.mxu3 %v1322_v30  ;;  %1704 = vmatpush.msra.mxu1 %v1322_v30 }
 0x1d6   : > { %1371 = vmatpush.msra.mxu2 %v4119_v32  ;;  %v1319_v32 = vld [vmem:[%s6119_s1 + $0xe0] sm:$0xff] }
 0x1d7   : > { %1388 = vmatpush.msra.mxu3 %v1319_v32  ;;  %1705 = vmatpush.msra.mxu1 %v1319_v32 }
 0x1d8   : > { %1372 = vmatpush.msra.mxu2 %v4125_v33  ;;  %v1316_v33 = vld [vmem:[%s6119_s1 + $0xc8] sm:$0xff] }
 0x1d9   : > { %1389 = vmatpush.msra.mxu3 %v1316_v33  ;;  %1706 = vmatpush.msra.mxu1 %v1316_v33 }
 0x1da   : > { %1373 = vmatpush.msra.mxu2 %v4137_v36  ;;  %v1313_v36 = vld [vmem:[%s6119_s1 + $0xb0] sm:$0xff] }
 0x1db   : > { %1390 = vmatpush.msra.mxu3 %v1313_v36  ;;  %1707 = vmatpush.msra.mxu1 %v1313_v36  ;;  %v6335_v36 = vld [vmem:[#allocation5_spill] sm:$0xff] }
 0x1dc   : > { %1374 = vmatpush.msra.mxu2 %v4149_v38  ;;  %v1310_v38 = vld [vmem:[%s6119_s1 + $0x98] sm:$0xff] }
 0x1dd   : > { %1391 = vmatpush.msra.mxu3 %v1310_v38  ;;  %1708 = vmatpush.msra.mxu1 %v1310_v38 }
 0x1de   : > { %1375 = vmatpush.msra.mxu2 %v4161_v40  ;;  %v6320_v40 = vld [vmem:[#allocation27_spill] sm:$0xff] }
 0x1df   : > { %1392 = vmatpush.msra.mxu3 %v6320_v40  ;;  %v6336_v40 = vld [vmem:[#allocation6_spill] sm:$0xff] }
 0x1e0   : > { %1376 = vmatpush.msra.mxu2 %v4173_v42  ;;  %v6321_v42 = vld [vmem:[#allocation23_spill] sm:$0xff] }
 0x1e1   : > { %1393 = vmatpush.msra.mxu3 %v6321_v42 }
 0x1e2   : > { %1377 = vmatpush.msra.mxu2 %v4185_v43 }
 0x1e4   : > { %1490 = vmatpush.msrb.mxu2 %v4202_v31  ;;  %v6322_v31 = vld [vmem:[#allocation17_spill] sm:$0xff] }
 0x1e5   : > { %1394 = vmatpush.msra.mxu3 %v6322_v31 }
 0x1e6   : > { %1491 = vmatpush.msrb.mxu2 %v4220_v7  ;;  %v6323_v7 = vld [vmem:[#allocation29_spill] sm:$0xff] }
 0x1e7   : > { %1395 = vmatpush.msra.mxu3 %v6323_v7  ;;  %v6338_v7 = vld [vmem:[#allocation8_spill] sm:$0xff] }
 0x1e8   : > { %1492 = vmatpush.msrb.mxu2 %v4233_v51  ;;  %v6324_v51 = vld [vmem:[#allocation24_spill] sm:$0xff] }
 0x1e9   : > { %1396 = vmatpush.msra.mxu3 %v6324_v51 }
 0x1ea   : > { %1493 = vmatpush.msrb.mxu2 %v4246_v58  ;;  %v6325_v58 = vld [vmem:[#allocation18_spill] sm:$0xff] }
 0x1eb   : > { %1397 = vmatpush.msra.mxu3 %v6325_v58 }
 0x1ec   : > { %1494 = vmatpush.msrb.mxu2 %v4259_v2  ;;  %v4644_v2 = vld [vmem:[%s6121_s3 + $0x160] sm:$0xff] }
 0x1ee   : > { %1495 = vmatpush.msrb.mxu2 %v4273_v57  ;;  %v6326_v57 = vld [vmem:[#allocation31_spill] sm:$0xff] }
 0x1ef   : > { %1510 = vmatpush.msrb.mxu3 %v6326_v57  ;;  %v4718_v57 = vld [vmem:[%s6119_s1 + $0x168] sm:$0xff] }
 0x1f0   : > { %1496 = vmatpush.msrb.mxu2 %v4286_v9  ;;  %1679 = vmatpush.msra.mxu0 %v4718_v57 }
 0x1f1   : > { %1511 = vmatpush.msrb.mxu3 %v4644_v2 }
 0x1f2   : > { %1497 = vmatpush.msrb.mxu2 %v4297_v13  ;;  %v4650_v13 = vld [vmem:[%s6121_s3 + $0x148] sm:$0xff] }
 0x1f3   : > { %1512 = vmatpush.msrb.mxu3 %v4650_v13 }
 0x1f4   : > { %1498 = vmatpush.msrb.mxu2 %v4316_v61  ;;  %v6327_v61 = vld [vmem:[#allocation25_spill] sm:$0xff] }
 0x1f5   : > { %1513 = vmatpush.msrb.mxu3 %v4657_v20 }
 0x1f6   : > { %1499 = vmatpush.msrb.mxu2 %v4338_v3 }
 0x1f7   : > { %1514 = vmatpush.msrb.mxu3 %v4664_v49 }
 0x1f8   : > { %1500 = vmatpush.msrb.mxu2 %v4360_v15 }
 0x1f9   : > { %1515 = vmatpush.msrb.mxu3 %v4670_v39 }
 0x1fa   : > { %1501 = vmatpush.msrb.mxu2 %v4381_v59  ;;  %v6328_v59 = vld [vmem:[#allocation22_spill] sm:$0xff] }
 0x1fb   : > { %1516 = vmatpush.msrb.mxu3 %v4677_v12 }
 0x1fc   : > { %1502 = vmatpush.msrb.mxu2 %v6316_v52  ;;  %v6333_v52 = vld [vmem:[#allocation28_spill] sm:$0xff] }
 0x1fd   : > { %1517 = vmatpush.msrb.mxu3 %v4684_v14 }
 0x1fe   : > { %1503 = vmatpush.msrb.mxu2 %v6317_v4  ;;  %v1357_v4 = vrot.slane %v1289_v28, 2 }
 0x1ff   : > { %1518 = vmatpush.msrb.mxu3 %v6331_v62 }
 0x200   : > { %1504 = vmatpush.msrb.mxu2 %v6318_v55  ;;  %v1356_v55 = vsel %vm402_vm4, %v1355_v6, %v1354_v1 }
 0x201   : > { %1519 = vmatpush.msrb.mxu3 %v6332_v25  ;;  %v1358_v30 = vsel %vm405_vm5, %v1357_v4, %v1356_v55 }
 0x202   : > { %1505 = vmatpush.msrb.mxu2 %v6319_v27  ;;  %v1360_v33 = vsel %vm408_vm6, %v1359_v8, %v1358_v30  ;;  %v4781_v30 = vld [vmem:[%s6119_s1 + $0xd8] sm:$0xff] }
 0x203   : > { %1520 = vmatpush.msrb.mxu3 %v6333_v52  ;;  %1378 = vmatmul.f32.vlgmr.msra.gmra.mxu2 %v1360_v33 }
 0x204   : > { %1398 = vmatmul.f32.vlgmr.msra.gmra.mxu3 %v1360_v33  ;;  %1418 = vmatmul.f32.vlgmr.msrb.gmra.mxu0 %v1360_v33  ;;  %v4793_v33 = vld [vmem:[%s6119_s1 + $0xa8] sm:$0xff] }
 0x205   : > { %1521 = vmatpush.msrb.mxu3 %v6334_v29 }
 0x207   : > { %1522 = vmatpush.msrb.mxu3 %v6335_v36  ;;  %v4799_v36 = vld [vmem:[%s6119_s1 + $0x90] sm:$0xff] }
 0x209   : > { %1523 = vmatpush.msrb.mxu3 %v6336_v40  ;;  %v4810_v40 = vld [vmem:[%s6119_s1 + $0x80] sm:$0xff] }
 0x20a   : > { %6340 = vst [vmem:[#allocation9_spill] sm:$0xff] %v4810_v40  ;;  %1709 = vmatpush.msra.mxu1 %v4810_v40 }
 0x21b   : > { %v1062_v43 = vpop.f32.mrf.mxu0  ;;  %v1082_v9 = vpop.f32.mrf.mxu1 }
 0x21c   : > { %v1083_v3 = vadd.f32 %v1082_v9, %v6327_v61  ;;  %v1063_v26 = vadd.f32 %v1062_v43, %v6329_v46  ;;  %v6337_v43 = vld [vmem:[#allocation7_spill] sm:$0xff] }
 0x21d   : > { %1524 = vmatpush.msrb.mxu3 %v6337_v43  ;;  %v4723_v9 = vld [vmem:[%s6119_s1 + $0x150] sm:$0xff]  ;;  %v4822_v43 = vld [vmem:[%s6119_s1 + $0x68] sm:$0xff] }
 0x21e   : > { %1680 = vmatpush.msra.mxu0 %v4723_v9  ;;  %6341 = vst [vmem:[#allocation10_spill] sm:$0xff] %v4822_v43  ;;  %1710 = vmatpush.msra.mxu1 %v4822_v43 }
 0x21f   : > { %1525 = vmatpush.msrb.mxu3 %v6338_v7  ;;  %v4834_v7 = vld [vmem:[%s6119_s1 + $0x50] sm:$0xff] }
 0x220   : > { %6342 = vst [vmem:[#allocation11_spill] sm:$0xff] %v4834_v7  ;;  %1711 = vmatpush.msra.mxu1 %v4834_v7 }
 0x23d   : > { %v1190_v15 = vpop.f32.mrf.mxu0 }
 0x23e   : > { %v1191_v24 = vadd.f32 %v1190_v15, %v6328_v59 }
 0x240   : > { %v1214_v17 = vadd.f32 %v1191_v24, %v1083_v3  ;;  %v4729_v24 = vld [vmem:[%s6119_s1 + $0x138] sm:$0xff] }
 0x241   : > { %1681 = vmatpush.msra.mxu0 %v4729_v24 }
 0x242   : > { %v3026_v56 = vmul.f32 -1.442695, %v1214_v17 }
 0x243   : > { %v1170_v35 = vpop.f32.mrf.mxu3 }
 0x244   : > { %3102 = vpow2.f32 %v3026_v56  ;;  %v1171_v54 = vadd.f32 %v1170_v35, %v6330_v48  ;;  %v1210_v35 = vpop.f32.mrf.mxu1 }
 0x245   : > { %v1211_v5 = vadd.f32 %v1210_v35, %v4033_v41  ;;  %v4882_v35 = vld [vmem:[%s6121_s3 + $0x170] sm:$0xff] }
 0x246   : > { %v1213_v16 = vadd.f32 %v1171_v54, %v1063_v26  ;;  %v1102_v54 = vpop.f32.mrf.mxu2 }
 0x247   : > { %v1103_v10 = vadd.f32 %v1102_v54, %v6339_v19  ;;  %v4887_v54 = vld [vmem:[%s6121_s3 + $0x178] sm:$0xff] }
 0x248   : > { %v3025_v60 = vmul.f32 -1.442695, %v1213_v16  ;;  %v4735_v16 = vld [vmem:[%s6119_s1 + $0x120] sm:$0xff]  ;;  %6346 = vst [vmem:[#allocation30_spill] sm:$0xff] %v4887_v54 }
 0x249   : > { %1682 = vmatpush.msra.mxu0 %v4735_v16 }
 0x24a   : > { %v3103_v44 = vpop.eup %3102  ;;  %3104 = vpow2.f32 %v3025_v60 }
 0x24b   : > { %v4695_v34 = vadd.f32 1.0, %v3103_v44  ;;  %1683 = vmatpush.msra.mxu0 %v4741_v23 }
 0x24d   : > { %3106 = vrcp.f32 %v4695_v34  ;;  %v1249_v18 = vand.u32 2147483648, %v4695_v34  ;;  %vm1243_vm10 = vweird.f32 %v4695_v34  ;;  %v1247_v11 = vand.u32 2147483647, %v4695_v34  ;;  %1684 = vmatpush.msra.mxu0 %v4749_v53 }
 0x24f   : > { %v1250_v25 = vor.u32 1.1754944e-38, %v1249_v18  ;;  %vm1248_vm12 = vcmp.eq.f32.partialorder %v1247_v11, 8.507059e+37  ;;  %1685 = vmatpush.msra.mxu0 %v4781_v30  ;;  %v4953_v11 = vld [vmem:[%s6121_s3 + $0xf8] sm:$0xff] }
 0x250   : > { %v3105_v27 = vpop.eup %3104 }
 0x251   : > { %v1221_v32 = vadd.f32 1.0, %v3105_v27 }
 0x253   : > { %3108 = vrcp.f32 %v1221_v32  ;;  %v3107_v38 = vpop.eup %3106  ;;  %v1234_v15 = vand.u32 2147483648, %v1221_v32  ;;  %v1232_v26 = vand.u32 2147483647, %v1221_v32  ;;  %vm1228_vm15 = vweird.f32 %v1221_v32 }
 0x254   : > { %v1239_v42 = vmul.f32 %v3107_v38, %v4695_v34  ;;  %vm1244_vm9 = vweird.f32 %v3107_v38 }
 0x255   : > { %v1235_v60 = vor.u32 1.1754944e-38, %v1234_v15  ;;  %vm1233_vm8 = vcmp.eq.f32.partialorder %v1232_v26, 8.507059e+37  ;;  %vm1245_vm11 = vmor %vm1243_vm10, %vm1244_vm9  ;;  %v4858_v15 = vld [vmem:[%s6119_s1 + $0x20] sm:$0xff]  ;;  %v4870_v26 = vld [vmem:[%s6119_s1 + $0x8] sm:$0xff] }
 0x256   : > { %v1240_v58 = vsub.f32 1.0, %v1239_v42  ;;  %v4817_v42 = vld [vmem:[%s6119_s1 + $0x60] sm:$0xff]  ;;  %6344 = vst [vmem:[#allocation13_spill] sm:$0xff] %v4858_v15 }
 0x257   : > { %6345 = vst [vmem:[#allocation16_spill] sm:$0xff] %v4870_v26 }
 0x258   : > { %v1241_v56 = vmul.f32 %v3107_v38, %v1240_v58  ;;  %v4846_v58 = vld [vmem:[%s6119_s1 + $0x38] sm:$0xff] }
 0x259   : > { %v3109_v31 = vpop.eup %3108  ;;  %6343 = vst [vmem:[#allocation12_spill] sm:$0xff] %v4846_v58  ;;  %1712 = vmatpush.msra.mxu1 %v4846_v58 }
 0x25a   : > { %v1224_v51 = vmul.f32 %v3109_v31, %v1221_v32  ;;  %vm1229_vm14 = vweird.f32 %v3109_v31  ;;  %v1242_v62 = vadd.f32 %v3107_v38, %v1241_v56  ;;  %v4787_v32 = vld [vmem:[%s6119_s1 + $0xc0] sm:$0xff]  ;;  %v4877_v56 = vld [vmem:[%s6121_s3 + $0x168] sm:$0xff] }
 0x25b   : > { %vm1230_vm7 = vmor %vm1228_vm15, %vm1229_vm14  ;;  %1686 = vmatpush.msra.mxu0 %v4787_v32  ;;  %1713 = vmatpush.msra.mxu1 %v4858_v15  ;;  %v1649_v15 = vld [vmem:[%s6119_s1 + $0x148] sm:$0xff] }
 0x25c   : > { %v1225_v3 = vsub.f32 1.0, %v1224_v51  ;;  %v1246_v21 = vsel %vm1245_vm11, %v3107_v38, %v1242_v62  ;;  %v4805_v38 = vld [vmem:[%s6119_s1 + $0x78] sm:$0xff]  ;;  %v4841_v51 = vld [vmem:[%s6119_s1 + $0x30] sm:$0xff]  ;;  %1787 = vmatpush.msra.mxu3 %v4877_v56 }
 0x25d   : > { %v1251_v28 = vsel %vm1248_vm12, %v1250_v25, %v1246_v21  ;;  %1687 = vmatpush.msra.mxu0 %v4793_v33  ;;  %1714 = vmatpush.msra.mxu1 %v4870_v26  ;;  %v4939_v62 = vld [vmem:[%s6121_s3 + $0x110] sm:$0xff]  ;;  %v4966_v21 = vld [vmem:[%s6121_s3 + $0xe0] sm:$0xff] }
 0x25e   : > { %v1226_v17 = vmul.f32 %v3109_v31, %v1225_v3  ;;  %v1256_v37 = vsub.f32 1.0, %v1251_v28  ;;  %v1258_v52 = vmul.f32 %v1251_v28, %v4537_v63  ;;  %v4853_v3 = vld [vmem:[%s6119_s1 + $0x18] sm:$0xff]  ;;  %v4972_v25 = vld [vmem:[%s6121_s3 + $0xc0] sm:$0xff]  ;;  %v4977_v28 = vld [vmem:[%s6121_s3 + $0xc8] sm:$0xff] }
 0x25f   : > { %1688 = vmatpush.msra.mxu0 %v4799_v36 }
 0x260   : > { %v1227_v50 = vadd.f32 %v3109_v31, %v1226_v17  ;;  %v4865_v17 = vld [vmem:[%s6119_s1] sm:$0xff] }
 0x261   : > { %1689 = vmatpush.msra.mxu0 %v4805_v38 }
 0x262   : > { %v1231_v45 = vsel %vm1230_vm7, %v3109_v31, %v1227_v50  ;;  %v4829_v31 = vld [vmem:[%s6119_s1 + $0x48] sm:$0xff]  ;;  %v4895_v50 = vld [vmem:[%s6121_s3 + $0x150] sm:$0xff] }
 0x263   : > { %v1236_v44 = vsel %vm1233_vm8, %v1235_v60, %v1231_v45  ;;  %1690 = vmatpush.msra.mxu0 %v4817_v42  ;;  %v4900_v60 = vld [vmem:[%s6121_s3 + $0x158] sm:$0xff]  ;;  %1788 = vmatpush.msra.mxu3 %v4895_v50 }
 0x264   : > { %v1253_v22 = vmul.f32 %v1236_v44, %v1211_v5  ;;  %v4908_v5 = vld [vmem:[%s6121_s3 + $0x138] sm:$0xff]  ;;  %v4926_v44 = vld [vmem:[%s6121_s3 + $0x128] sm:$0xff] }
 0x265   : > { %1691 = vmatpush.msra.mxu0 %v4829_v31  ;;  %1789 = vmatpush.msra.mxu3 %v4908_v5 }
 0x266   : > { %v1254_v0 = vadd.f32 %v1253_v22, %v1103_v10  ;;  %v4913_v10 = vld [vmem:[%s6121_s3 + $0x140] sm:$0xff] }
 0x267   : > { %1692 = vmatpush.msra.mxu0 %v4841_v51 }
 0x268   : > { %3110 = vtanh.f32 %v1254_v0 }
 0x269   : > { %1693 = vmatpush.msra.mxu0 %v4853_v3 }
 0x26b   : > { %1694 = vmatpush.msra.mxu0 %v4865_v17 }
 0x26d   : > { %1807 = vmatpush.msrb.mxu0 %v4882_v35 }
 0x26e   : > { %v3111_v6 = vpop.eup %3110 }
 0x26f   : > { %v1257_v47 = vmul.f32 %v3111_v6, %v1256_v37  ;;  %1808 = vmatpush.msrb.mxu0 %v4900_v60 }
 0x271   : > { %v4757_v34 = vadd.f32 %v1258_v52, %v1257_v47  ;;  %1809 = vmatpush.msrb.mxu0 %v4913_v10  ;;  %v1601_v47 = vld [vmem:[%s3284_s13 + $0xc] sm:$0x1] }
 0x273   : > { %v1261_v1 = vrot.slane %v4757_v34, 1  ;;  %v1262_v4 = vrot.slane %v4757_v34, 2  ;;  %v1263_v8 = vrot.slane %v4757_v34, 3  ;;  %1275 = vst [vmem:[%s3286_s14 + $0x2] sm:$0x1] %v4757_v34  ;;  %1486 = vmatmul.f32.vlgmr.msrb.gmra.mxu1 %v4757_v34  ;;  %1506 = vmatmul.f32.vlgmr.msrb.gmra.mxu2 %v4757_v34  ;;  %v1264_v63 = vrot.slane %v4757_v34, 4 }
 0x274   : > { %1526 = vmatmul.f32.vlgmr.msrb.gmra.mxu3 %v4757_v34  ;;  %v1265_v55 = vrot.slane %v4757_v34, 5  ;;  %v1266_v27 = vrot.slane %v4757_v34, 6  ;;  %v1267_v29 = vrot.slane %v4757_v34, 7  ;;  %1827 = vmatpush.msrb.mxu1 %v4887_v54  ;;  %v1655_v54 = vld [vmem:[%s6119_s1 + $0x178] sm:$0xff] }
 0x275   : > { %1276 = vst [vmem:[%s3286_s14 + $0xa] sm:$0x1] %v1261_v1  ;;  %1810 = vmatpush.msrb.mxu0 %v4926_v44  ;;  %v1602_v1 = vld [vmem:[%s3284_s13 + $0x14] sm:$0x1]  ;;  %1719 = vmatpush.msra.mxu2 %v1655_v54 }
 0x276   : > { %1277 = vst [vmem:[%s3286_s14 + $0x12] sm:$0x1] %v1262_v4  ;;  %1828 = vmatpush.msrb.mxu1 %v4644_v2  ;;  %v4921_v2 = vld [vmem:[%s6121_s3 + $0x120] sm:$0xff]  ;;  %v1664_v4 = vrot.slane %v1601_v47, 7 }
 0x277   : > { %1278 = vst [vmem:[%s3286_s14 + $0x1a] sm:$0x1] %v1263_v8  ;;  %1790 = vmatpush.msra.mxu3 %v4921_v2  ;;  %1811 = vmatpush.msrb.mxu0 %v4939_v62 }
 0x278   : > { %1279 = vst [vmem:[%s3286_s14 + $0x22] sm:$0x1] %v1264_v63  ;;  %1829 = vmatpush.msrb.mxu1 %v4650_v13  ;;  %v4934_v13 = vld [vmem:[%s6121_s3 + $0x108] sm:$0xff]  ;;  %v4996_v63 = vld [vmem:[%s6121_s3 + $0xb0] sm:$0xff] }
 0x279   : > { %1280 = vst [vmem:[%s3286_s14 + $0x2a] sm:$0x1] %v1265_v55  ;;  %1791 = vmatpush.msra.mxu3 %v4934_v13  ;;  %1812 = vmatpush.msrb.mxu0 %v4953_v11  ;;  %v5001_v55 = vld [vmem:[%s6121_s3 + $0xb8] sm:$0xff] }
 0x27a   : > { %1281 = vst [vmem:[%s3286_s14 + $0x32] sm:$0x1] %v1266_v27  ;;  %1830 = vmatpush.msrb.mxu1 %v4657_v20  ;;  %v4948_v20 = vld [vmem:[%s6121_s3 + $0xf0] sm:$0xff]  ;;  %v1666_v27 = vrot.slane %v1602_v1, 6 }
 0x27b   : > { %1282 = vst [vmem:[%s3286_s14 + $0x3a] sm:$0x1] %v1267_v29  ;;  %1792 = vmatpush.msra.mxu3 %v4948_v20  ;;  %1813 = vmatpush.msrb.mxu0 %v4966_v21 }
 0x27c   : > { %1831 = vmatpush.msrb.mxu1 %v4664_v49  ;;  %v4961_v49 = vld [vmem:[%s6121_s3 + $0xd8] sm:$0xff]  ;;  %6347 = vst [vmem:[#allocation32_spill] sm:$0xff] %v5001_v55 }
 0x27d   : > { %1793 = vmatpush.msra.mxu3 %v4961_v49  ;;  %1814 = vmatpush.msrb.mxu0 %v4977_v28 }
 0x27e   : > { %1832 = vmatpush.msrb.mxu1 %v4670_v39 }
 0x27f   : > { %1794 = vmatpush.msra.mxu3 %v4972_v25  ;;  %1815 = vmatpush.msrb.mxu0 %v4996_v63 }
 0x280   : > { %1833 = vmatpush.msrb.mxu1 %v4677_v12  ;;  %v4991_v12 = vld [vmem:[%s6121_s3 + $0xa8] sm:$0xff] }
 0x281   : > { %1795 = vmatpush.msra.mxu3 %v4991_v12 }
 0x282   : > { %1834 = vmatpush.msrb.mxu1 %v4684_v14  ;;  %v1600_v14 = vld [vmem:[%s3284_s13 + $0x4] sm:$0x1] }
 0x284   : > { %1835 = vmatpush.msrb.mxu1 %v5001_v55  ;;  %v1606_v55 = vld [vmem:[%s3284_s13 + $0x34] sm:$0x1] }
 0x286   : > { %v1379_v45 = vpop.f32.mrf.mxu2 }
 0x287   : > { %v1380_v18 = vadd.f32 %v1379_v45, %v6329_v46  ;;  %v1399_v6 = vpop.f32.mrf.mxu3  ;;  %v1603_v45 = vld [vmem:[%s3284_s13 + $0x1c] sm:$0x1] }
 0x288   : > { %v1400_v39 = vadd.f32 %v1399_v6, %v6327_v61  ;;  %v1665_v6 = vsel %vm390_vm0, %v1664_v4, %v1600_v14  ;;  %v1668_v47 = vrot.slane %v1603_v45, 5  ;;  %v5035_v46 = vld [vmem:[%s6121_s3 + $0x78] sm:$0xff]  ;;  %v5045_v4 = vld [vmem:[%s6121_s3 + $0x88] sm:$0xff]  ;;  %v1674_v14 = vrot.slane %v1606_v55, 2  ;;  %v5066_v55 = vld [vmem:[%s6121_s3 + $0x70] sm:$0xff] }
 0x289   : > { %6349 = vst [vmem:[#allocation34_spill] sm:$0xff] %v5045_v4  ;;  %v5144_v61 = vld [vmem:[%s6121_s3 + $0x8] sm:$0xff] }
 0x28a   : > { %6350 = vst [vmem:[#allocation27_spill] sm:$0xff] %v5066_v55 }
 0x28b   : > { %6357 = vst [vmem:[#allocation26_spill] sm:$0xff] %v5144_v61 }
 0x2f0   : > { %v1487_v22 = vpop.f32.mrf.mxu1 }
 0x2f1   : > { %v1488_v0 = vadd.f32 %v1487_v22, %v6330_v48  ;;  %v5013_v22 = vld [vmem:[%s6121_s3 + $0x90] sm:$0xff]  ;;  %v1667_v48 = vsel %vm393_vm1, %v1666_v27, %v1665_v6 }
 0x2f2   : > { %1796 = vmatpush.msra.mxu3 %v5013_v22 }
 0x2f3   : > { %v1530_v37 = vadd.f32 %v1488_v0, %v1380_v18  ;;  %v1604_v18 = vld [vmem:[%s3284_s13 + $0x24] sm:$0x1]  ;;  %v5018_v0 = vld [vmem:[%s6121_s3 + $0x98] sm:$0xff] }
 0x2f4   : > { %1816 = vmatpush.msrb.mxu0 %v5018_v0  ;;  %1797 = vmatpush.msra.mxu3 %v5035_v46 }
 0x2f5   : > { %v3027_v52 = vmul.f32 -1.442695, %v1530_v37  ;;  %v5023_v37 = vld [vmem:[%s6121_s3 + $0xa0] sm:$0xff] }
 0x2f6   : > { %v1507_v8 = vpop.f32.mrf.mxu2  ;;  %6348 = vst [vmem:[#allocation33_spill] sm:$0xff] %v5023_v37  ;;  %1836 = vmatpush.msrb.mxu1 %v5023_v37  ;;  %v5056_v37 = vld [vmem:[%s6121_s3 + $0x60] sm:$0xff] }
 0x2f7   : > { %3112 = vpow2.f32 %v3027_v52  ;;  %v1508_v29 = vadd.f32 %v1507_v8, %v6328_v59  ;;  %v1670_v52 = vrot.slane %v1604_v18, 4  ;;  %v1605_v8 = vld [vmem:[%s3284_s13 + $0x2c] sm:$0x1]  ;;  %v1607_v18 = vld [vmem:[%s3284_s13 + $0x3c] sm:$0x1]  ;;  %1798 = vmatpush.msra.mxu3 %v5056_v37  ;;  %v5139_v59 = vld [vmem:[%s6121_s3] sm:$0xff] }
 0x2f8   : > { %v1672_v27 = vrot.slane %v1605_v8, 3  ;;  %1837 = vmatpush.msrb.mxu1 %v5045_v4 }
 0x2f9   : > { %v1531_v1 = vadd.f32 %v1508_v29, %v1400_v39  ;;  %v5040_v39 = vld [vmem:[%s6121_s3 + $0x80] sm:$0xff]  ;;  %v1669_v29 = vsel %vm396_vm2, %v1668_v47, %v1667_v48  ;;  %v5061_v48 = vld [vmem:[%s6121_s3 + $0x68] sm:$0xff] }
 0x2fa   : > { %1817 = vmatpush.msrb.mxu0 %v5040_v39  ;;  %v1671_v6 = vsel %vm399_vm3, %v1670_v52, %v1669_v29  ;;  %v1676_v52 = vrot.slane %v1607_v18, 1  ;;  %1838 = vmatpush.msrb.mxu1 %v5066_v55  ;;  %v5101_v18 = vld [vmem:[%s6121_s3 + $0x30] sm:$0xff] }
 0x2fb   : > { %v3028_v45 = vmul.f32 -1.442695, %v1531_v1  ;;  %v1673_v47 = vsel %vm402_vm4, %v1672_v27, %v1671_v6  ;;  %v5081_v27 = vld [vmem:[%s6121_s3 + $0x48] sm:$0xff]  ;;  %v5106_v6 = vld [vmem:[%s6121_s3 + $0x38] sm:$0xff] }
 0x2fc   : > { %1818 = vmatpush.msrb.mxu0 %v5061_v48  ;;  %v1675_v8 = vsel %vm405_vm5, %v1674_v14, %v1673_v47  ;;  %v5091_v14 = vld [vmem:[%s6121_s3 + $0x58] sm:$0xff]  ;;  %1799 = vmatpush.msra.mxu3 %v5081_v27  ;;  %6353 = vst [vmem:[#allocation29_spill] sm:$0xff] %v5106_v6  ;;  %v5111_v47 = vld [vmem:[%s6121_s3 + $0x40] sm:$0xff] }
 0x2fd   : > { %v3113_v1 = vpop.eup %3112  ;;  %3114 = vpow2.f32 %v3028_v45  ;;  %v5076_v4 = vsel %vm408_vm6, %v1676_v52, %v1675_v8  ;;  %v5086_v45 = vld [vmem:[%s6121_s3 + $0x50] sm:$0xff]  ;;  %6352 = vst [vmem:[#allocation17_spill] sm:$0xff] %v5091_v14  ;;  %1839 = vmatpush.msrb.mxu1 %v5091_v14  ;;  %v5119_v52 = vld [vmem:[%s6121_s3 + $0x18] sm:$0xff]  ;;  %v5129_v8 = vld [vmem:[%s6121_s3 + $0x28] sm:$0xff] }
 0x2fe   : > { %v5072_v29 = vadd.f32 1.0, %v3113_v1  ;;  %6351 = vst [vmem:[#allocation23_spill] sm:$0xff] %v5086_v45  ;;  %1695 = vmatmul.f32.vlgmr.msra.gmra.mxu0 %v5076_v4  ;;  %1715 = vmatmul.f32.vlgmr.msra.gmra.mxu1 %v5076_v4  ;;  %v5124_v1 = vld [vmem:[%s6121_s3 + $0x20] sm:$0xff] }
 0x2ff   : > { %1819 = vmatpush.msrb.mxu0 %v5086_v45  ;;  %6354 = vst [vmem:[#allocation24_spill] sm:$0xff] %v5111_v47  ;;  %1800 = vmatpush.msra.mxu3 %v5101_v18 }
 0x300   : > { %3116 = vrcp.f32 %v5072_v29  ;;  %6355 = vst [vmem:[#allocation18_spill] sm:$0xff] %v5124_v1  ;;  %1840 = vmatpush.msrb.mxu1 %v5111_v47  ;;  %v5149_v47 = vld [vmem:[%s6121_s3 + $0x10] sm:$0xff]  ;;  %v1551_v7 = vand.u32 2147483648, %v5072_v29  ;;  %v1549_v40 = vand.u32 2147483647, %v5072_v29  ;;  %vm1545_vm14 = vweird.f32 %v5072_v29 }
 0x301   : > { %1820 = vmatpush.msrb.mxu0 %v5106_v6  ;;  %6356 = vst [vmem:[#allocation31_spill] sm:$0xff] %v5129_v8  ;;  %1801 = vmatpush.msra.mxu3 %v5119_v52 }
 0x302   : > { %6358 = vst [vmem:[#allocation19_spill] sm:$0xff] %v5149_v47  ;;  %1841 = vmatpush.msrb.mxu1 %v5129_v8  ;;  %v1652_v8 = vld [vmem:[%s6119_s1 + $0x160] sm:$0xff]  ;;  %vm1550_vm7 = vcmp.eq.f32.partialorder %v1549_v40, 8.507059e+37  ;;  %v1634_v40 = vld [vmem:[%s6119_s1 + $0xd0] sm:$0xff] }
 0x303   : > { %v3115_v14 = vpop.eup %3114  ;;  %1821 = vmatpush.msrb.mxu0 %v5124_v1  ;;  %1802 = vmatpush.msra.mxu3 %v5139_v59 }
 0x304   : > { %v5132_v55 = vadd.f32 1.0, %v3115_v14  ;;  %1842 = vmatpush.msrb.mxu1 %v5149_v47  ;;  %1720 = vmatpush.msra.mxu2 %v1652_v8  ;;  %v1646_v47 = vld [vmem:[%s6119_s1 + $0x130] sm:$0xff] }
 0x305   : > { %1822 = vmatpush.msrb.mxu0 %v5144_v61  ;;  %v1419_v61 = vpop.f32.mrf.mxu0 }
 0x306   : > { %v3117_v14 = vpop.eup %3116  ;;  %3118 = vrcp.f32 %v5132_v55  ;;  %2104 = vmatpush.msra.mxu1 %v4877_v56  ;;  %1721 = vmatpush.msra.mxu2 %v1649_v15  ;;  %v1527_v56 = vpop.f32.mrf.mxu3  ;;  %vm1560_vm9 = vweird.f32 %v5132_v55 }
 0x307   : > { %v1541_v26 = vmul.f32 %v3117_v14, %v5072_v29  ;;  %2036 = vmatpush.msra.mxu0 %v1655_v54  ;;  %vm1546_vm13 = vweird.f32 %v3117_v14  ;;  %v1566_v29 = vand.u32 2147483648, %v5132_v55 }
 0x308   : > { %2105 = vmatpush.msra.mxu1 %v4895_v50  ;;  %1722 = vmatpush.msra.mxu2 %v1646_v47  ;;  %vm1547_vm15 = vmor %vm1545_vm14, %vm1546_vm13  ;;  %v1420_v50 = vadd.f32 %v1419_v61, %v6339_v19 }
 0x309   : > { %v1542_v58 = vsub.f32 1.0, %v1541_v26  ;;  %2037 = vmatpush.msra.mxu0 %v1652_v8  ;;  %v1643_v26 = vld [vmem:[%s6119_s1 + $0x118] sm:$0xff]  ;;  %v1640_v8 = vld [vmem:[%s6119_s1 + $0x100] sm:$0xff] }
 0x30a   : > { %2106 = vmatpush.msra.mxu1 %v4908_v5  ;;  %1723 = vmatpush.msra.mxu2 %v1643_v26 }
 0x30b   : > { %v1543_v43 = vmul.f32 %v3117_v14, %v1542_v58  ;;  %2038 = vmatpush.msra.mxu0 %v1649_v15  ;;  %v1552_v58 = vor.u32 1.1754944e-38, %v1551_v7  ;;  %v1528_v15 = vadd.f32 %v1527_v56, %v4033_v41  ;;  %v1637_v7 = vld [vmem:[%s6119_s1 + $0xe8] sm:$0xff] }
 0x30c   : > { %v3119_v1 = vpop.eup %3118  ;;  %2107 = vmatpush.msra.mxu1 %v4921_v2  ;;  %1724 = vmatpush.msra.mxu2 %v1640_v8  ;;  %v1564_v2 = vand.u32 2147483647, %v5132_v55 }
 0x30d   : > { %v1556_v54 = vmul.f32 %v3119_v1, %v5132_v55  ;;  %v1544_v6 = vadd.f32 %v3117_v14, %v1543_v43  ;;  %2039 = vmatpush.msra.mxu0 %v1646_v47  ;;  %vm1561_vm8 = vweird.f32 %v3119_v1  ;;  %v1625_v55 = vld [vmem:[%s6119_s1 + $0x88] sm:$0xff] }
 0x30e   : > { %2108 = vmatpush.msra.mxu1 %v4934_v13  ;;  %1725 = vmatpush.msra.mxu2 %v1637_v7  ;;  %vm1562_vm10 = vmor %vm1560_vm9, %vm1561_vm8  ;;  %vm1565_vm11 = vcmp.eq.f32.partialorder %v1564_v2, 8.507059e+37 }
 0x30f   : > { %v1557_v45 = vsub.f32 1.0, %v1556_v54  ;;  %v1548_v5 = vsel %vm1547_vm15, %v3117_v14, %v1544_v6  ;;  %2040 = vmatpush.msra.mxu0 %v1643_v26  ;;  %v1567_v14 = vor.u32 1.1754944e-38, %v1566_v29 }
 0x310   : > { %v1553_v43 = vsel %vm1550_vm7, %v1552_v58, %v1548_v5  ;;  %2109 = vmatpush.msra.mxu1 %v4948_v20  ;;  %1726 = vmatpush.msra.mxu2 %v1634_v40  ;;  %v1628_v20 = vld [vmem:[%s6119_s1 + $0xa0] sm:$0xff] }
 0x311   : > { %v1558_v61 = vmul.f32 %v3119_v1, %v1557_v45  ;;  %v1570_v19 = vmul.f32 %v1553_v43, %v1528_v15  ;;  %2041 = vmatpush.msra.mxu0 %v1640_v8  ;;  %v1631_v45 = vld [vmem:[%s6119_s1 + $0xb8] sm:$0xff]  ;;  %v1610_v15 = vld [vmem:[%s6119_s1 + $0x10] sm:$0xff] }
 0x312   : > { %2110 = vmatpush.msra.mxu1 %v4961_v49  ;;  %1727 = vmatpush.msra.mxu2 %v1631_v45 }
 0x313   : > { %v1559_v6 = vadd.f32 %v3119_v1, %v1558_v61  ;;  %v1571_v13 = vadd.f32 %v1570_v19, %v1420_v50  ;;  %2042 = vmatpush.msra.mxu0 %v1637_v7  ;;  %v5350_v7 = vld [vmem:[%s6121_s3 + $0x100] sm:$0xff] }
 0x314   : > { %2111 = vmatpush.msra.mxu1 %v4972_v25  ;;  %1728 = vmatpush.msra.mxu2 %v1628_v20  ;;  %v6372_v61 = vld [vmem:[#allocation21_spill] sm:$0xff] }
 0x315   : > { %v1563_v47 = vsel %vm1562_vm10, %v3119_v1, %v1559_v6  ;;  %3120 = vtanh.f32 %v1571_v13  ;;  %2043 = vmatpush.msra.mxu0 %v1634_v40  ;;  %v1622_v1 = vld [vmem:[%s6119_s1 + $0x70] sm:$0xff]  ;;  %v5357_v6 = vld [vmem:[%s6121_s3 + $0xe8] sm:$0xff] }
 0x316   : > { %v1568_v19 = vsel %vm1565_vm11, %v1567_v14, %v1563_v47  ;;  %2112 = vmatpush.msra.mxu1 %v4991_v12  ;;  %1729 = vmatpush.msra.mxu2 %v1625_v55  ;;  %v1619_v12 = vld [vmem:[%s6119_s1 + $0x58] sm:$0xff]  ;;  %v6373_v13 = vld [vmem:[#allocation14_spill] sm:$0xff]  ;;  %v5364_v47 = vld [vmem:[%s6121_s3 + $0xd0] sm:$0xff] }
 0x317   : > { %2044 = vmatpush.msra.mxu0 %v1631_v45  ;;  %v1573_v49 = vsub.f32 1.0, %v1568_v19  ;;  %v1575_v26 = vmul.f32 %v1568_v19, %v4757_v34 }
 0x318   : > { %2113 = vmatpush.msra.mxu1 %v5013_v22  ;;  %1730 = vmatpush.msra.mxu2 %v1622_v1  ;;  %v1616_v22 = vld [vmem:[%s6119_s1 + $0x40] sm:$0xff] }
 0x319   : > { %2045 = vmatpush.msra.mxu0 %v1628_v20  ;;  %v1918_v20 = vld [vmem:[%s3284_s13 + $0xd] sm:$0x1] }
 0x31a   : > { %2114 = vmatpush.msra.mxu1 %v5035_v46  ;;  %1731 = vmatpush.msra.mxu2 %v1619_v12 }
 0x31b   : > { %v3121_v25 = vpop.eup %3120  ;;  %2046 = vmatpush.msra.mxu0 %v1625_v55  ;;  %v1919_v55 = vld [vmem:[%s3284_s13 + $0x15] sm:$0x1] }
 0x31c   : > { %v1574_v56 = vmul.f32 %v3121_v25, %v1573_v49  ;;  %2115 = vmatpush.msra.mxu1 %v5056_v37  ;;  %v1613_v37 = vld [vmem:[%s6119_s1 + $0x28] sm:$0xff]  ;;  %1732 = vmatpush.msra.mxu2 %v1616_v22  ;;  %v1981_v49 = vrot.slane %v1918_v20, 7  ;;  %v1920_v25 = vld [vmem:[%s3284_s13 + $0x1d] sm:$0x1] }
 0x31d   : > { %2047 = vmatpush.msra.mxu0 %v1622_v1  ;;  %v1917_v1 = vld [vmem:[%s3284_s13 + $0x5] sm:$0x1] }
 0x31e   : > { %v5217_v54 = vadd.f32 %v1575_v26, %v1574_v56  ;;  %2116 = vmatpush.msra.mxu1 %v5081_v27  ;;  %1733 = vmatpush.msra.mxu2 %v1613_v37  ;;  %v1983_v56 = vrot.slane %v1919_v55, 6  ;;  %v5421_v55 = vld [vmem:[%s6119_s1 + $0x108] sm:$0xff] }
 0x31f   : > { %2048 = vmatpush.msra.mxu0 %v1619_v12  ;;  %v6374_v12 = vld [vmem:[#allocation32_spill] sm:$0xff] }
 0x320   : > { %v1578_v34 = vrot.slane %v5217_v54, 1  ;;  %v1579_v58 = vrot.slane %v5217_v54, 2  ;;  %v1580_v46 = vrot.slane %v5217_v54, 3  ;;  %1592 = vst [vmem:[%s3286_s14 + $0x3] sm:$0x1] %v5217_v54  ;;  %1803 = vmatmul.f32.vlgmr.msra.gmra.mxu3 %v5217_v54  ;;  %1823 = vmatmul.f32.vlgmr.msrb.gmra.mxu0 %v5217_v54  ;;  %v1581_v50 = vrot.slane %v5217_v54, 4 }
 0x321   : > { %1843 = vmatmul.f32.vlgmr.msrb.gmra.mxu1 %v5217_v54  ;;  %v1582_v8 = vrot.slane %v5217_v54, 5  ;;  %v1583_v5 = vrot.slane %v5217_v54, 6  ;;  %v1584_v43 = vrot.slane %v5217_v54, 7  ;;  %2049 = vmatpush.msra.mxu0 %v1616_v22  ;;  %v1921_v22 = vld [vmem:[%s3284_s13 + $0x25] sm:$0x1] }
 0x322   : > { %1593 = vst [vmem:[%s3286_s14 + $0xb] sm:$0x1] %v1578_v34  ;;  %2117 = vmatpush.msra.mxu1 %v5101_v18  ;;  %1734 = vmatpush.msra.mxu2 %v1610_v15  ;;  %v5344_v18 = vld [vmem:[%s6121_s3 + $0x118] sm:$0xff]  ;;  %v1982_v34 = vsel %vm390_vm0, %v1981_v49, %v1917_v1  ;;  %v6382_v1 = vld [vmem:[#allocation15_spill] sm:$0xff] }
 0x323   : > { %1594 = vst [vmem:[%s3286_s14 + $0x13] sm:$0x1] %v1579_v58  ;;  %1735 = vmatmul.f32.vlgmr.msra.gmra.mxu2 %v5076_v4  ;;  %2050 = vmatpush.msra.mxu0 %v1613_v37  ;;  %v5337_v4 = vld [vmem:[%s6121_s3 + $0x130] sm:$0xff]  ;;  %v1985_v58 = vrot.slane %v1920_v25, 5  ;;  %v1922_v37 = vld [vmem:[%s3284_s13 + $0x2d] sm:$0x1] }
 0x324   : > { %1595 = vst [vmem:[%s3286_s14 + $0x1b] sm:$0x1] %v1580_v46  ;;  %2118 = vmatpush.msra.mxu1 %v5119_v52  ;;  %1996 = vmatpush.msrb.mxu2 %v4718_v57  ;;  %v1968_v57 = vld [vmem:[%s6119_s1 + $0x158] sm:$0xff] }
 0x325   : > { %1596 = vst [vmem:[%s3286_s14 + $0x23] sm:$0x1] %v1581_v50  ;;  %2051 = vmatpush.msra.mxu0 %v1610_v15  ;;  %v1984_v50 = vsel %vm393_vm1, %v1983_v56, %v1982_v34  ;;  %v6375_v15 = vld [vmem:[#allocation33_spill] sm:$0xff] }
 0x326   : > { %1597 = vst [vmem:[%s3286_s14 + $0x2b] sm:$0x1] %v1582_v8  ;;  %2119 = vmatpush.msra.mxu1 %v5139_v59  ;;  %1997 = vmatpush.msrb.mxu2 %v4723_v9  ;;  %v1971_v59 = vld [vmem:[%s6119_s1 + $0x170] sm:$0xff]  ;;  %v1987_v8 = vrot.slane %v1921_v22, 4 }
 0x327   : > { %1598 = vst [vmem:[%s3286_s14 + $0x33] sm:$0x1] %v1583_v5  ;;  %2016 = vmatpush.msrb.mxu3 %v1971_v59  ;;  %v6359_v9 = vld [vmem:[#allocation23_spill] sm:$0xff] }
 0x328   : > { %1599 = vst [vmem:[%s3286_s14 + $0x3b] sm:$0x1] %v1584_v43  ;;  %1998 = vmatpush.msrb.mxu2 %v4729_v24  ;;  %v1965_v24 = vld [vmem:[%s6119_s1 + $0x140] sm:$0xff]  ;;  %2333 = vmatpush.msrb.mxu1 %v1971_v59  ;;  %v1923_v5 = vld [vmem:[%s3284_s13 + $0x35] sm:$0x1]  ;;  %v1986_v43 = vsel %vm396_vm2, %v1985_v58, %v1984_v50  ;;  %v1989_v59 = vrot.slane %v1922_v37, 3 }
 0x329   : > { %2017 = vmatpush.msrb.mxu3 %v1968_v57  ;;  %v5429_v22 = vld [vmem:[%s6119_s1 + $0xf0] sm:$0xff] }
 0x32a   : > { %1999 = vmatpush.msrb.mxu2 %v4735_v16  ;;  %v6360_v16 = vld [vmem:[#allocation29_spill] sm:$0xff]  ;;  %2334 = vmatpush.msrb.mxu1 %v1968_v57  ;;  %v1924_v57 = vld [vmem:[%s3284_s13 + $0x3d] sm:$0x1] }
 0x32b   : > { %2018 = vmatpush.msrb.mxu3 %v1965_v24 }
 0x32c   : > { %2000 = vmatpush.msrb.mxu2 %v4741_v23  ;;  %v1962_v23 = vld [vmem:[%s6119_s1 + $0x128] sm:$0xff]  ;;  %2335 = vmatpush.msrb.mxu1 %v1965_v24  ;;  %v1988_v24 = vsel %vm399_vm3, %v1987_v8, %v1986_v43 }
 0x32d   : > { %2019 = vmatpush.msrb.mxu3 %v1962_v23 }
 0x32e   : > { %2001 = vmatpush.msrb.mxu2 %v4749_v53  ;;  %v6361_v53 = vld [vmem:[#allocation18_spill] sm:$0xff]  ;;  %2336 = vmatpush.msrb.mxu1 %v1962_v23  ;;  %v1993_v23 = vrot.slane %v1924_v57, 1 }
 0x330   : > { %2002 = vmatpush.msrb.mxu2 %v4781_v30  ;;  %v6362_v30 = vld [vmem:[#allocation26_spill] sm:$0xff] }
 0x332   : > { %2003 = vmatpush.msrb.mxu2 %v4787_v32  ;;  %v1959_v32 = vld [vmem:[%s6119_s1 + $0x110] sm:$0xff] }
 0x333   : > { %2020 = vmatpush.msrb.mxu3 %v1959_v32  ;;  %2337 = vmatpush.msrb.mxu1 %v1959_v32  ;;  %v6377_v32 = vld [vmem:[#allocation27_spill] sm:$0xff] }
 0x334   : > { %2004 = vmatpush.msrb.mxu2 %v4793_v33  ;;  %v1956_v33 = vld [vmem:[%s6119_s1 + $0xf8] sm:$0xff] }
 0x335   : > { %2021 = vmatpush.msrb.mxu3 %v1956_v33  ;;  %2338 = vmatpush.msrb.mxu1 %v1956_v33 }
 0x336   : > { %2005 = vmatpush.msrb.mxu2 %v4799_v36  ;;  %v1953_v36 = vld [vmem:[%s6119_s1 + $0xe0] sm:$0xff] }
 0x337   : > { %2022 = vmatpush.msrb.mxu3 %v1953_v36  ;;  %2339 = vmatpush.msrb.mxu1 %v1953_v36 }
 0x338   : > { %2006 = vmatpush.msrb.mxu2 %v4805_v38  ;;  %v1950_v38 = vld [vmem:[%s6119_s1 + $0xc8] sm:$0xff] }
 0x339   : > { %2023 = vmatpush.msrb.mxu3 %v1950_v38  ;;  %2340 = vmatpush.msrb.mxu1 %v1950_v38 }
 0x33a   : > { %2007 = vmatpush.msrb.mxu2 %v4817_v42  ;;  %v1947_v42 = vld [vmem:[%s6119_s1 + $0xb0] sm:$0xff] }
 0x33b   : > { %2024 = vmatpush.msrb.mxu3 %v1947_v42  ;;  %2341 = vmatpush.msrb.mxu1 %v1947_v42  ;;  %v6378_v42 = vld [vmem:[#allocation17_spill] sm:$0xff] }
 0x33c   : > { %2008 = vmatpush.msrb.mxu2 %v4829_v31  ;;  %v1944_v31 = vld [vmem:[%s6119_s1 + $0x98] sm:$0xff] }
 0x33d   : > { %2025 = vmatpush.msrb.mxu3 %v1944_v31  ;;  %2342 = vmatpush.msrb.mxu1 %v1944_v31 }
 0x33e   : > { %2009 = vmatpush.msrb.mxu2 %v4841_v51  ;;  %v6363_v51 = vld [vmem:[#allocation9_spill] sm:$0xff] }
 0x33f   : > { %2026 = vmatpush.msrb.mxu3 %v6363_v51  ;;  %v6379_v51 = vld [vmem:[#allocation24_spill] sm:$0xff] }
 0x340   : > { %2010 = vmatpush.msrb.mxu2 %v4853_v3  ;;  %v6364_v3 = vld [vmem:[#allocation10_spill] sm:$0xff] }
 0x341   : > { %2027 = vmatpush.msrb.mxu3 %v6364_v3 }
 0x342   : > { %2011 = vmatpush.msrb.mxu2 %v4865_v17 }
 0x344   : > { %2124 = vmatpush.msra.mxu2 %v4882_v35  ;;  %v6365_v35 = vld [vmem:[#allocation11_spill] sm:$0xff] }
 0x345   : > { %2028 = vmatpush.msrb.mxu3 %v6365_v35 }
 0x346   : > { %2125 = vmatpush.msra.mxu2 %v4900_v60  ;;  %v6366_v60 = vld [vmem:[#allocation12_spill] sm:$0xff] }
 0x347   : > { %2029 = vmatpush.msrb.mxu3 %v6366_v60  ;;  %v6381_v60 = vld [vmem:[#allocation19_spill] sm:$0xff] }
 0x348   : > { %2126 = vmatpush.msra.mxu2 %v4913_v10  ;;  %v6367_v10 = vld [vmem:[#allocation13_spill] sm:$0xff] }
 0x349   : > { %2030 = vmatpush.msrb.mxu3 %v6367_v10 }
 0x34a   : > { %2127 = vmatpush.msra.mxu2 %v4926_v44  ;;  %v6368_v44 = vld [vmem:[#allocation16_spill] sm:$0xff] }
 0x34b   : > { %2031 = vmatpush.msrb.mxu3 %v6368_v44 }
 0x34c   : > { %2128 = vmatpush.msra.mxu2 %v4939_v62  ;;  %v5324_v62 = vld [vmem:[%s6121_s3 + $0x160] sm:$0xff] }
 0x34e   : > { %2129 = vmatpush.msra.mxu2 %v4953_v11  ;;  %v6369_v11 = vld [vmem:[#allocation30_spill] sm:$0xff] }
 0x34f   : > { %2144 = vmatpush.msra.mxu3 %v6369_v11  ;;  %v5398_v11 = vld [vmem:[%s6119_s1 + $0x168] sm:$0xff] }
 0x350   : > { %2130 = vmatpush.msra.mxu2 %v4966_v21  ;;  %2313 = vmatpush.msrb.mxu0 %v5398_v11 }
 0x351   : > { %2145 = vmatpush.msra.mxu3 %v5324_v62 }
 0x352   : > { %2131 = vmatpush.msra.mxu2 %v4977_v28  ;;  %v5330_v28 = vld [vmem:[%s6121_s3 + $0x148] sm:$0xff] }
 0x353   : > { %2146 = vmatpush.msra.mxu3 %v5330_v28 }
 0x354   : > { %2132 = vmatpush.msra.mxu2 %v4996_v63  ;;  %v6370_v63 = vld [vmem:[#allocation25_spill] sm:$0xff] }
 0x355   : > { %2147 = vmatpush.msra.mxu3 %v5337_v4 }
 0x356   : > { %2133 = vmatpush.msra.mxu2 %v5018_v0 }
 0x357   : > { %2148 = vmatpush.msra.mxu3 %v5344_v18 }
 0x358   : > { %2134 = vmatpush.msra.mxu2 %v5040_v39 }
 0x359   : > { %2149 = vmatpush.msra.mxu3 %v5350_v7 }
 0x35a   : > { %2135 = vmatpush.msra.mxu2 %v5061_v48  ;;  %v6371_v48 = vld [vmem:[#allocation22_spill] sm:$0xff] }
 0x35b   : > { %2150 = vmatpush.msra.mxu3 %v5357_v6 }
 0x35c   : > { %2136 = vmatpush.msra.mxu2 %v6359_v9  ;;  %v6376_v9 = vld [vmem:[#allocation34_spill] sm:$0xff] }
 0x35d   : > { %2151 = vmatpush.msra.mxu3 %v5364_v47 }
 0x35e   : > { %2137 = vmatpush.msra.mxu2 %v6360_v16  ;;  %v1991_v16 = vrot.slane %v1923_v5, 2 }
 0x35f   : > { %2152 = vmatpush.msra.mxu3 %v6374_v12 }
 0x360   : > { %2138 = vmatpush.msra.mxu2 %v6361_v53  ;;  %v1990_v53 = vsel %vm402_vm4, %v1989_v59, %v1988_v24 }
 0x361   : > { %2153 = vmatpush.msra.mxu3 %v6375_v15  ;;  %v1992_v33 = vsel %vm405_vm5, %v1991_v16, %v1990_v53 }
 0x362   : > { %2139 = vmatpush.msra.mxu2 %v6362_v30  ;;  %v1994_v38 = vsel %vm408_vm6, %v1993_v23, %v1992_v33  ;;  %v5461_v33 = vld [vmem:[%s6119_s1 + $0xd8] sm:$0xff] }
 0x363   : > { %2154 = vmatpush.msra.mxu3 %v6376_v9  ;;  %2012 = vmatmul.f32.vlgmr.msrb.gmra.mxu2 %v1994_v38 }
 0x364   : > { %2032 = vmatmul.f32.vlgmr.msrb.gmra.mxu3 %v1994_v38  ;;  %2052 = vmatmul.f32.vlgmr.msra.gmra.mxu0 %v1994_v38  ;;  %v5473_v38 = vld [vmem:[%s6119_s1 + $0xa8] sm:$0xff] }
 0x365   : > { %2155 = vmatpush.msra.mxu3 %v6377_v32 }
 0x367   : > { %2156 = vmatpush.msra.mxu3 %v6378_v42  ;;  %v5479_v42 = vld [vmem:[%s6119_s1 + $0x90] sm:$0xff] }
 0x369   : > { %2157 = vmatpush.msra.mxu3 %v6379_v51  ;;  %v5490_v51 = vld [vmem:[%s6119_s1 + $0x80] sm:$0xff] }
 0x36a   : > { %6383 = vst [vmem:[#allocation28_spill] sm:$0xff] %v5490_v51  ;;  %2343 = vmatpush.msrb.mxu1 %v5490_v51 }
 0x37b   : > { %v1696_v17 = vpop.f32.mrf.mxu0  ;;  %v1716_v21 = vpop.f32.mrf.mxu1 }
 0x37c   : > { %v1717_v0 = vadd.f32 %v1716_v21, %v6370_v63  ;;  %v1697_v29 = vadd.f32 %v1696_v17, %v6372_v61  ;;  %v6380_v17 = vld [vmem:[#allocation31_spill] sm:$0xff] }
 0x37d   : > { %2158 = vmatpush.msra.mxu3 %v6380_v17  ;;  %v5403_v21 = vld [vmem:[%s6119_s1 + $0x150] sm:$0xff]  ;;  %v5502_v17 = vld [vmem:[%s6119_s1 + $0x68] sm:$0xff] }
 0x37e   : > { %2314 = vmatpush.msrb.mxu0 %v5403_v21  ;;  %6384 = vst [vmem:[#allocation20_spill] sm:$0xff] %v5502_v17  ;;  %2344 = vmatpush.msrb.mxu1 %v5502_v17 }
 0x37f   : > { %2159 = vmatpush.msra.mxu3 %v6381_v60  ;;  %v5514_v60 = vld [vmem:[%s6119_s1 + $0x50] sm:$0xff] }
 0x380   : > { %6385 = vst [vmem:[#allocation5_spill] sm:$0xff] %v5514_v60  ;;  %2345 = vmatpush.msrb.mxu1 %v5514_v60 }
 0x39d   : > { %v1824_v39 = vpop.f32.mrf.mxu0 }
 0x39e   : > { %v1825_v27 = vadd.f32 %v1824_v39, %v6371_v48 }
 0x3a0   : > { %v1848_v52 = vadd.f32 %v1825_v27, %v1717_v0  ;;  %v5409_v27 = vld [vmem:[%s6119_s1 + $0x138] sm:$0xff] }
 0x3a1   : > { %2315 = vmatpush.msrb.mxu0 %v5409_v27 }
 0x3a2   : > { %v3030_v2 = vmul.f32 -1.442695, %v1848_v52 }
 0x3a3   : > { %v1804_v40 = vpop.f32.mrf.mxu3 }
 0x3a4   : > { %3122 = vpow2.f32 %v3030_v2  ;;  %v1805_v45 = vadd.f32 %v1804_v40, %v6373_v13  ;;  %v1844_v40 = vpop.f32.mrf.mxu1 }
 0x3a5   : > { %v1845_v49 = vadd.f32 %v1844_v40, %v4033_v41  ;;  %v5562_v40 = vld [vmem:[%s6121_s3 + $0x170] sm:$0xff] }
 0x3a6   : > { %v1847_v14 = vadd.f32 %v1805_v45, %v1697_v29  ;;  %v1736_v45 = vpop.f32.mrf.mxu2 }
 0x3a7   : > { %v1737_v25 = vadd.f32 %v1736_v45, %v6382_v1  ;;  %v5567_v45 = vld [vmem:[%s6121_s3 + $0x178] sm:$0xff] }
 0x3a8   : > { %v3029_v19 = vmul.f32 -1.442695, %v1847_v14  ;;  %v5415_v14 = vld [vmem:[%s6119_s1 + $0x120] sm:$0xff]  ;;  %6389 = vst [vmem:[#allocation23_spill] sm:$0xff] %v5567_v45 }
 0x3a9   : > { %2316 = vmatpush.msrb.mxu0 %v5415_v14 }
 0x3aa   : > { %v3123_v26 = vpop.eup %3122  ;;  %3124 = vpow2.f32 %v3029_v19 }
 0x3ab   : > { %v5375_v46 = vadd.f32 1.0, %v3123_v26  ;;  %2317 = vmatpush.msrb.mxu0 %v5421_v55 }
 0x3ad   : > { %3126 = vrcp.f32 %v5375_v46  ;;  %v1883_v34 = vand.u32 2147483648, %v5375_v46  ;;  %vm1877_vm8 = vweird.f32 %v5375_v46  ;;  %v1881_v37 = vand.u32 2147483647, %v5375_v46  ;;  %2318 = vmatpush.msrb.mxu0 %v5429_v22 }
 0x3af   : > { %v1884_v15 = vor.u32 1.1754944e-38, %v1883_v34  ;;  %vm1882_vm10 = vcmp.eq.f32.partialorder %v1881_v37, 8.507059e+37  ;;  %2319 = vmatpush.msrb.mxu0 %v5461_v33  ;;  %v5633_v37 = vld [vmem:[%s6121_s3 + $0xf8] sm:$0xff] }
 0x3b0   : > { %v3125_v30 = vpop.eup %3124 }
 0x3b1   : > { %v1855_v36 = vadd.f32 1.0, %v3125_v30 }
 0x3b3   : > { %3128 = vrcp.f32 %v1855_v36  ;;  %v3127_v31 = vpop.eup %3126  ;;  %v1868_v39 = vand.u32 2147483648, %v1855_v36  ;;  %v1866_v29 = vand.u32 2147483647, %v1855_v36  ;;  %vm1862_vm13 = vweird.f32 %v1855_v36 }
 0x3b4   : > { %v1873_v3 = vmul.f32 %v3127_v31, %v5375_v46  ;;  %vm1878_vm7 = vweird.f32 %v3127_v31 }
 0x3b5   : > { %v1869_v19 = vor.u32 1.1754944e-38, %v1868_v39  ;;  %vm1867_vm15 = vcmp.eq.f32.partialorder %v1866_v29, 8.507059e+37  ;;  %vm1879_vm9 = vmor %vm1877_vm8, %vm1878_vm7  ;;  %v5538_v39 = vld [vmem:[%s6119_s1 + $0x20] sm:$0xff]  ;;  %v5550_v29 = vld [vmem:[%s6119_s1 + $0x8] sm:$0xff] }
 0x3b6   : > { %v1874_v44 = vsub.f32 1.0, %v1873_v3  ;;  %v5497_v3 = vld [vmem:[%s6119_s1 + $0x60] sm:$0xff]  ;;  %6387 = vst [vmem:[#allocation7_spill] sm:$0xff] %v5538_v39 }
 0x3b7   : > { %6388 = vst [vmem:[#allocation8_spill] sm:$0xff] %v5550_v29 }
 0x3b8   : > { %v1875_v2 = vmul.f32 %v3127_v31, %v1874_v44  ;;  %v5526_v44 = vld [vmem:[%s6119_s1 + $0x38] sm:$0xff] }
 0x3b9   : > { %v3129_v35 = vpop.eup %3128  ;;  %6386 = vst [vmem:[#allocation6_spill] sm:$0xff] %v5526_v44  ;;  %2346 = vmatpush.msrb.mxu1 %v5526_v44 }
 0x3ba   : > { %v1858_v10 = vmul.f32 %v3129_v35, %v1855_v36  ;;  %vm1863_vm12 = vweird.f32 %v3129_v35  ;;  %v1876_v12 = vadd.f32 %v3127_v31, %v1875_v2  ;;  %v5467_v36 = vld [vmem:[%s6119_s1 + $0xc0] sm:$0xff]  ;;  %v5557_v2 = vld [vmem:[%s6121_s3 + $0x168] sm:$0xff] }
 0x3bb   : > { %vm1864_vm14 = vmor %vm1862_vm13, %vm1863_vm12  ;;  %2320 = vmatpush.msrb.mxu0 %v5467_v36  ;;  %2347 = vmatpush.msrb.mxu1 %v5538_v39  ;;  %v2283_v39 = vld [vmem:[%s6119_s1 + $0x148] sm:$0xff] }
 0x3bc   : > { %v1859_v0 = vsub.f32 1.0, %v1858_v10  ;;  %v1880_v8 = vsel %vm1879_vm9, %v3127_v31, %v1876_v12  ;;  %v5485_v31 = vld [vmem:[%s6119_s1 + $0x78] sm:$0xff]  ;;  %v5521_v10 = vld [vmem:[%s6119_s1 + $0x30] sm:$0xff]  ;;  %2421 = vmatpush.msrb.mxu3 %v5557_v2 }
 0x3bd   : > { %v1885_v5 = vsel %vm1882_vm10, %v1884_v15, %v1880_v8  ;;  %2321 = vmatpush.msrb.mxu0 %v5473_v38  ;;  %2348 = vmatpush.msrb.mxu1 %v5550_v29  ;;  %v5619_v12 = vld [vmem:[%s6121_s3 + $0x110] sm:$0xff]  ;;  %v5646_v8 = vld [vmem:[%s6121_s3 + $0xe0] sm:$0xff] }
 0x3be   : > { %v1860_v52 = vmul.f32 %v3129_v35, %v1859_v0  ;;  %v1890_v43 = vsub.f32 1.0, %v1885_v5  ;;  %v1892_v9 = vmul.f32 %v1885_v5, %v5217_v54  ;;  %v5533_v0 = vld [vmem:[%s6119_s1 + $0x18] sm:$0xff]  ;;  %v5652_v15 = vld [vmem:[%s6121_s3 + $0xc0] sm:$0xff]  ;;  %v5657_v5 = vld [vmem:[%s6121_s3 + $0xc8] sm:$0xff] }
 0x3bf   : > { %2322 = vmatpush.msrb.mxu0 %v5479_v42 }
 0x3c0   : > { %v1861_v20 = vadd.f32 %v3129_v35, %v1860_v52  ;;  %v5545_v52 = vld [vmem:[%s6119_s1] sm:$0xff] }
 0x3c1   : > { %2323 = vmatpush.msrb.mxu0 %v5485_v31 }
 0x3c2   : > { %v1865_v56 = vsel %vm1864_vm14, %v3129_v35, %v1861_v20  ;;  %v5509_v35 = vld [vmem:[%s6119_s1 + $0x48] sm:$0xff]  ;;  %v5575_v20 = vld [vmem:[%s6121_s3 + $0x150] sm:$0xff] }
 0x3c3   : > { %v1870_v26 = vsel %vm1867_vm15, %v1869_v19, %v1865_v56  ;;  %2324 = vmatpush.msrb.mxu0 %v5497_v3  ;;  %v5580_v19 = vld [vmem:[%s6121_s3 + $0x158] sm:$0xff]  ;;  %2422 = vmatpush.msrb.mxu3 %v5575_v20 }
 0x3c4   : > { %v1887_v58 = vmul.f32 %v1870_v26, %v1845_v49  ;;  %v5588_v49 = vld [vmem:[%s6121_s3 + $0x138] sm:$0xff]  ;;  %v5606_v26 = vld [vmem:[%s6121_s3 + $0x128] sm:$0xff] }
 0x3c5   : > { %2325 = vmatpush.msrb.mxu0 %v5509_v35  ;;  %2423 = vmatpush.msrb.mxu3 %v5588_v49 }
 0x3c6   : > { %v1888_v50 = vadd.f32 %v1887_v58, %v1737_v25  ;;  %v5593_v25 = vld [vmem:[%s6121_s3 + $0x140] sm:$0xff] }
 0x3c7   : > { %2326 = vmatpush.msrb.mxu0 %v5521_v10 }
 0x3c8   : > { %3130 = vtanh.f32 %v1888_v50 }
 0x3c9   : > { %2327 = vmatpush.msrb.mxu0 %v5533_v0 }
 0x3cb   : > { %2328 = vmatpush.msrb.mxu0 %v5545_v52 }
 0x3cd   : > { %2441 = vmatpush.msra.mxu0 %v5562_v40 }
 0x3ce   : > { %v3131_v59 = vpop.eup %3130 }
 0x3cf   : > { %v1891_v57 = vmul.f32 %v3131_v59, %v1890_v43  ;;  %2442 = vmatpush.msra.mxu0 %v5580_v19 }
 0x3d1   : > { %v5437_v46 = vadd.f32 %v1892_v9, %v1891_v57  ;;  %2443 = vmatpush.msra.mxu0 %v5593_v25  ;;  %v2235_v57 = vld [vmem:[%s3284_s13 + $0xe] sm:$0x1] }
 0x3d3   : > { %v1895_v24 = vrot.slane %v5437_v46, 1  ;;  %v1896_v16 = vrot.slane %v5437_v46, 2  ;;  %v1897_v23 = vrot.slane %v5437_v46, 3  ;;  %1909 = vst [vmem:[%s3286_s14 + $0x4] sm:$0x1] %v5437_v46  ;;  %2120 = vmatmul.f32.vlgmr.msra.gmra.mxu1 %v5437_v46  ;;  %2140 = vmatmul.f32.vlgmr.msra.gmra.mxu2 %v5437_v46  ;;  %v1898_v54 = vrot.slane %v5437_v46, 4 }
 0x3d4   : > { %2160 = vmatmul.f32.vlgmr.msra.gmra.mxu3 %v5437_v46  ;;  %v1899_v53 = vrot.slane %v5437_v46, 5  ;;  %v1900_v30 = vrot.slane %v5437_v46, 6  ;;  %v1901_v32 = vrot.slane %v5437_v46, 7  ;;  %2461 = vmatpush.msra.mxu1 %v5567_v45  ;;  %v2289_v45 = vld [vmem:[%s6119_s1 + $0x178] sm:$0xff] }
 0x3d5   : > { %1910 = vst [vmem:[%s3286_s14 + $0xc] sm:$0x1] %v1895_v24  ;;  %2444 = vmatpush.msra.mxu0 %v5606_v26  ;;  %v2236_v24 = vld [vmem:[%s3284_s13 + $0x16] sm:$0x1]  ;;  %2353 = vmatpush.msrb.mxu2 %v2289_v45 }
 0x3d6   : > { %1911 = vst [vmem:[%s3286_s14 + $0x14] sm:$0x1] %v1896_v16  ;;  %2462 = vmatpush.msra.mxu1 %v5324_v62  ;;  %v5601_v62 = vld [vmem:[%s6121_s3 + $0x120] sm:$0xff]  ;;  %v2298_v16 = vrot.slane %v2235_v57, 7 }
 0x3d7   : > { %1912 = vst [vmem:[%s3286_s14 + $0x1c] sm:$0x1] %v1897_v23  ;;  %2424 = vmatpush.msrb.mxu3 %v5601_v62  ;;  %2445 = vmatpush.msra.mxu0 %v5619_v12 }
 0x3d8   : > { %1913 = vst [vmem:[%s3286_s14 + $0x24] sm:$0x1] %v1898_v54  ;;  %2463 = vmatpush.msra.mxu1 %v5330_v28  ;;  %v5614_v28 = vld [vmem:[%s6121_s3 + $0x108] sm:$0xff]  ;;  %v5676_v54 = vld [vmem:[%s6121_s3 + $0xb0] sm:$0xff] }
 0x3d9   : > { %1914 = vst [vmem:[%s3286_s14 + $0x2c] sm:$0x1] %v1899_v53  ;;  %2425 = vmatpush.msrb.mxu3 %v5614_v28  ;;  %2446 = vmatpush.msra.mxu0 %v5633_v37  ;;  %v5681_v53 = vld [vmem:[%s6121_s3 + $0xb8] sm:$0xff] }
 0x3da   : > { %1915 = vst [vmem:[%s3286_s14 + $0x34] sm:$0x1] %v1900_v30  ;;  %2464 = vmatpush.msra.mxu1 %v5337_v4  ;;  %v5628_v4 = vld [vmem:[%s6121_s3 + $0xf0] sm:$0xff]  ;;  %v2300_v30 = vrot.slane %v2236_v24, 6 }
 0x3db   : > { %1916 = vst [vmem:[%s3286_s14 + $0x3c] sm:$0x1] %v1901_v32  ;;  %2426 = vmatpush.msrb.mxu3 %v5628_v4  ;;  %2447 = vmatpush.msra.mxu0 %v5646_v8 }
 0x3dc   : > { %2465 = vmatpush.msra.mxu1 %v5344_v18  ;;  %v5641_v18 = vld [vmem:[%s6121_s3 + $0xd8] sm:$0xff]  ;;  %6390 = vst [vmem:[#allocation29_spill] sm:$0xff] %v5681_v53 }
 0x3dd   : > { %2427 = vmatpush.msrb.mxu3 %v5641_v18  ;;  %2448 = vmatpush.msra.mxu0 %v5657_v5 }
 0x3de   : > { %2466 = vmatpush.msra.mxu1 %v5350_v7 }
 0x3df   : > { %2428 = vmatpush.msrb.mxu3 %v5652_v15  ;;  %2449 = vmatpush.msra.mxu0 %v5676_v54 }
 0x3e0   : > { %2467 = vmatpush.msra.mxu1 %v5357_v6  ;;  %v5671_v6 = vld [vmem:[%s6121_s3 + $0xa8] sm:$0xff] }
 0x3e1   : > { %2429 = vmatpush.msrb.mxu3 %v5671_v6 }
 0x3e2   : > { %2468 = vmatpush.msra.mxu1 %v5364_v47  ;;  %v2234_v47 = vld [vmem:[%s3284_s13 + $0x6] sm:$0x1] }
 0x3e4   : > { %2469 = vmatpush.msra.mxu1 %v5681_v53  ;;  %v2240_v53 = vld [vmem:[%s3284_s13 + $0x36] sm:$0x1] }
 0x3e6   : > { %v2013_v56 = vpop.f32.mrf.mxu2 }
 0x3e7   : > { %v2014_v34 = vadd.f32 %v2013_v56, %v6372_v61  ;;  %v2033_v59 = vpop.f32.mrf.mxu3  ;;  %v2237_v56 = vld [vmem:[%s3284_s13 + $0x1e] sm:$0x1] }
 0x3e8   : > { %v2034_v7 = vadd.f32 %v2033_v59, %v6370_v63  ;;  %v2299_v59 = vsel %vm390_vm0, %v2298_v16, %v2234_v47  ;;  %v2302_v57 = vrot.slane %v2237_v56, 5  ;;  %v5715_v61 = vld [vmem:[%s6121_s3 + $0x78] sm:$0xff]  ;;  %v5725_v16 = vld [vmem:[%s6121_s3 + $0x88] sm:$0xff]  ;;  %v2308_v47 = vrot.slane %v2240_v53, 2  ;;  %v5746_v53 = vld [vmem:[%s6121_s3 + $0x70] sm:$0xff] }
 0x3e9   : > { %6392 = vst [vmem:[#allocation26_spill] sm:$0xff] %v5725_v16  ;;  %v5824_v63 = vld [vmem:[%s6121_s3 + $0x8] sm:$0xff] }
 0x3ea   : > { %6393 = vst [vmem:[#allocation9_spill] sm:$0xff] %v5746_v53 }
 0x3eb   : > { %6400 = vst [vmem:[#allocation32_spill] sm:$0xff] %v5824_v63 }
 0x450   : > { %v2121_v58 = vpop.f32.mrf.mxu1 }
 0x451   : > { %v2122_v50 = vadd.f32 %v2121_v58, %v6373_v13  ;;  %v5693_v58 = vld [vmem:[%s6121_s3 + $0x90] sm:$0xff]  ;;  %v2301_v13 = vsel %vm393_vm1, %v2300_v30, %v2299_v59 }
 0x452   : > { %2430 = vmatpush.msrb.mxu3 %v5693_v58 }
 0x453   : > { %v2164_v43 = vadd.f32 %v2122_v50, %v2014_v34  ;;  %v2238_v34 = vld [vmem:[%s3284_s13 + $0x26] sm:$0x1]  ;;  %v5698_v50 = vld [vmem:[%s6121_s3 + $0x98] sm:$0xff] }
 0x454   : > { %2450 = vmatpush.msra.mxu0 %v5698_v50  ;;  %2431 = vmatpush.msrb.mxu3 %v5715_v61 }
 0x455   : > { %v3031_v9 = vmul.f32 -1.442695, %v2164_v43  ;;  %v5703_v43 = vld [vmem:[%s6121_s3 + $0xa0] sm:$0xff] }
 0x456   : > { %v2141_v23 = vpop.f32.mrf.mxu2  ;;  %6391 = vst [vmem:[#allocation18_spill] sm:$0xff] %v5703_v43  ;;  %2470 = vmatpush.msra.mxu1 %v5703_v43  ;;  %v5736_v43 = vld [vmem:[%s6121_s3 + $0x60] sm:$0xff] }
 0x457   : > { %3132 = vpow2.f32 %v3031_v9  ;;  %v2142_v32 = vadd.f32 %v2141_v23, %v6371_v48  ;;  %v2304_v9 = vrot.slane %v2238_v34, 4  ;;  %v2239_v23 = vld [vmem:[%s3284_s13 + $0x2e] sm:$0x1]  ;;  %v2241_v34 = vld [vmem:[%s3284_s13 + $0x3e] sm:$0x1]  ;;  %2432 = vmatpush.msrb.mxu3 %v5736_v43  ;;  %v5819_v48 = vld [vmem:[%s6121_s3] sm:$0xff] }
 0x458   : > { %v2306_v30 = vrot.slane %v2239_v23, 3  ;;  %2471 = vmatpush.msra.mxu1 %v5725_v16 }
 0x459   : > { %v2165_v24 = vadd.f32 %v2142_v32, %v2034_v7  ;;  %v5720_v7 = vld [vmem:[%s6121_s3 + $0x80] sm:$0xff]  ;;  %v2303_v32 = vsel %vm396_vm2, %v2302_v57, %v2301_v13  ;;  %v5741_v13 = vld [vmem:[%s6121_s3 + $0x68] sm:$0xff] }
 0x45a   : > { %2451 = vmatpush.msra.mxu0 %v5720_v7  ;;  %v2305_v59 = vsel %vm399_vm3, %v2304_v9, %v2303_v32  ;;  %v2310_v9 = vrot.slane %v2241_v34, 1  ;;  %2472 = vmatpush.msra.mxu1 %v5746_v53  ;;  %v5781_v34 = vld [vmem:[%s6121_s3 + $0x30] sm:$0xff] }
 0x45b   : > { %v3032_v56 = vmul.f32 -1.442695, %v2165_v24  ;;  %v2307_v57 = vsel %vm402_vm4, %v2306_v30, %v2305_v59  ;;  %v5761_v30 = vld [vmem:[%s6121_s3 + $0x48] sm:$0xff]  ;;  %v5786_v59 = vld [vmem:[%s6121_s3 + $0x38] sm:$0xff] }
 0x45c   : > { %2452 = vmatpush.msra.mxu0 %v5741_v13  ;;  %v2309_v23 = vsel %vm405_vm5, %v2308_v47, %v2307_v57  ;;  %v5771_v47 = vld [vmem:[%s6121_s3 + $0x58] sm:$0xff]  ;;  %2433 = vmatpush.msrb.mxu3 %v5761_v30  ;;  %6396 = vst [vmem:[#allocation12_spill] sm:$0xff] %v5786_v59  ;;  %v5791_v57 = vld [vmem:[%s6121_s3 + $0x40] sm:$0xff] }
 0x45d   : > { %v3133_v24 = vpop.eup %3132  ;;  %3134 = vpow2.f32 %v3032_v56  ;;  %v5756_v16 = vsel %vm408_vm6, %v2310_v9, %v2309_v23  ;;  %v5766_v56 = vld [vmem:[%s6121_s3 + $0x50] sm:$0xff]  ;;  %6395 = vst [vmem:[#allocation11_spill] sm:$0xff] %v5771_v47  ;;  %2473 = vmatpush.msra.mxu1 %v5771_v47  ;;  %v5799_v9 = vld [vmem:[%s6121_s3 + $0x18] sm:$0xff]  ;;  %v5809_v23 = vld [vmem:[%s6121_s3 + $0x28] sm:$0xff] }
 0x45e   : > { %v5752_v32 = vadd.f32 1.0, %v3133_v24  ;;  %6394 = vst [vmem:[#allocation10_spill] sm:$0xff] %v5766_v56  ;;  %2329 = vmatmul.f32.vlgmr.msrb.gmra.mxu0 %v5756_v16  ;;  %2349 = vmatmul.f32.vlgmr.msrb.gmra.mxu1 %v5756_v16  ;;  %v5804_v24 = vld [vmem:[%s6121_s3 + $0x20] sm:$0xff] }
 0x45f   : > { %2453 = vmatpush.msra.mxu0 %v5766_v56  ;;  %6397 = vst [vmem:[#allocation13_spill] sm:$0xff] %v5791_v57  ;;  %2434 = vmatpush.msrb.mxu3 %v5781_v34 }
 0x460   : > { %3136 = vrcp.f32 %v5752_v32  ;;  %6398 = vst [vmem:[#allocation16_spill] sm:$0xff] %v5804_v24  ;;  %2474 = vmatpush.msra.mxu1 %v5791_v57  ;;  %v5829_v57 = vld [vmem:[%s6121_s3 + $0x10] sm:$0xff]  ;;  %v2185_v60 = vand.u32 2147483648, %v5752_v32  ;;  %v2183_v51 = vand.u32 2147483647, %v5752_v32  ;;  %vm2179_vm12 = vweird.f32 %v5752_v32 }
 0x461   : > { %2454 = vmatpush.msra.mxu0 %v5786_v59  ;;  %6399 = vst [vmem:[#allocation30_spill] sm:$0xff] %v5809_v23  ;;  %2435 = vmatpush.msrb.mxu3 %v5799_v9 }
 0x462   : > { %6401 = vst [vmem:[#allocation33_spill] sm:$0xff] %v5829_v57  ;;  %2475 = vmatpush.msra.mxu1 %v5809_v23  ;;  %v2286_v23 = vld [vmem:[%s6119_s1 + $0x160] sm:$0xff]  ;;  %vm2184_vm14 = vcmp.eq.f32.partialorder %v2183_v51, 8.507059e+37  ;;  %v2268_v51 = vld [vmem:[%s6119_s1 + $0xd0] sm:$0xff] }
 0x463   : > { %v3135_v47 = vpop.eup %3134  ;;  %2455 = vmatpush.msra.mxu0 %v5804_v24  ;;  %2436 = vmatpush.msrb.mxu3 %v5819_v48 }
 0x464   : > { %v5812_v53 = vadd.f32 1.0, %v3135_v47  ;;  %2476 = vmatpush.msra.mxu1 %v5829_v57  ;;  %2354 = vmatpush.msrb.mxu2 %v2286_v23  ;;  %v2280_v57 = vld [vmem:[%s6119_s1 + $0x130] sm:$0xff] }
 0x465   : > { %2456 = vmatpush.msra.mxu0 %v5824_v63  ;;  %v2053_v63 = vpop.f32.mrf.mxu0 }
 0x466   : > { %v3137_v47 = vpop.eup %3136  ;;  %3138 = vrcp.f32 %v5812_v53  ;;  %2738 = vmatpush.msrb.mxu1 %v5557_v2  ;;  %2355 = vmatpush.msrb.mxu2 %v2283_v39  ;;  %v2161_v2 = vpop.f32.mrf.mxu3  ;;  %vm2194_vm7 = vweird.f32 %v5812_v53 }
 0x467   : > { %v2175_v29 = vmul.f32 %v3137_v47, %v5752_v32  ;;  %2670 = vmatpush.msrb.mxu0 %v2289_v45  ;;  %vm2180_vm11 = vweird.f32 %v3137_v47  ;;  %v2200_v32 = vand.u32 2147483648, %v5812_v53 }
 0x468   : > { %2739 = vmatpush.msrb.mxu1 %v5575_v20  ;;  %2356 = vmatpush.msrb.mxu2 %v2280_v57  ;;  %vm2181_vm13 = vmor %vm2179_vm12, %vm2180_vm11  ;;  %v2054_v20 = vadd.f32 %v2053_v63, %v6382_v1 }
 0x469   : > { %v2176_v44 = vsub.f32 1.0, %v2175_v29  ;;  %2671 = vmatpush.msrb.mxu0 %v2286_v23  ;;  %v2277_v29 = vld [vmem:[%s6119_s1 + $0x118] sm:$0xff]  ;;  %v2274_v23 = vld [vmem:[%s6119_s1 + $0x100] sm:$0xff] }
 0x46a   : > { %2740 = vmatpush.msrb.mxu1 %v5588_v49  ;;  %2357 = vmatpush.msrb.mxu2 %v2277_v29 }
 0x46b   : > { %v2177_v17 = vmul.f32 %v3137_v47, %v2176_v44  ;;  %2672 = vmatpush.msrb.mxu0 %v2283_v39  ;;  %v2186_v44 = vor.u32 1.1754944e-38, %v2185_v60  ;;  %v2162_v39 = vadd.f32 %v2161_v2, %v4033_v41  ;;  %v2271_v60 = vld [vmem:[%s6119_s1 + $0xe8] sm:$0xff] }
 0x46c   : > { %v3139_v24 = vpop.eup %3138  ;;  %2741 = vmatpush.msrb.mxu1 %v5601_v62  ;;  %2358 = vmatpush.msrb.mxu2 %v2274_v23  ;;  %v2198_v62 = vand.u32 2147483647, %v5812_v53 }
 0x46d   : > { %v2190_v45 = vmul.f32 %v3139_v24, %v5812_v53  ;;  %v2178_v59 = vadd.f32 %v3137_v47, %v2177_v17  ;;  %2673 = vmatpush.msrb.mxu0 %v2280_v57  ;;  %vm2195_vm15 = vweird.f32 %v3139_v24  ;;  %v2259_v53 = vld [vmem:[%s6119_s1 + $0x88] sm:$0xff] }
 0x46e   : > { %2742 = vmatpush.msrb.mxu1 %v5614_v28  ;;  %2359 = vmatpush.msrb.mxu2 %v2271_v60  ;;  %vm2196_vm8 = vmor %vm2194_vm7, %vm2195_vm15  ;;  %vm2199_vm9 = vcmp.eq.f32.partialorder %v2198_v62, 8.507059e+37 }
 0x46f   : > { %v2191_v56 = vsub.f32 1.0, %v2190_v45  ;;  %v2182_v49 = vsel %vm2181_vm13, %v3137_v47, %v2178_v59  ;;  %2674 = vmatpush.msrb.mxu0 %v2277_v29  ;;  %v2201_v47 = vor.u32 1.1754944e-38, %v2200_v32 }
 0x470   : > { %v2187_v17 = vsel %vm2184_vm14, %v2186_v44, %v2182_v49  ;;  %2743 = vmatpush.msrb.mxu1 %v5628_v4  ;;  %2360 = vmatpush.msrb.mxu2 %v2268_v51  ;;  %v2262_v4 = vld [vmem:[%s6119_s1 + $0xa0] sm:$0xff] }
 0x471   : > { %v2192_v63 = vmul.f32 %v3139_v24, %v2191_v56  ;;  %v2204_v1 = vmul.f32 %v2187_v17, %v2162_v39  ;;  %2675 = vmatpush.msrb.mxu0 %v2274_v23  ;;  %v2265_v56 = vld [vmem:[%s6119_s1 + $0xb8] sm:$0xff]  ;;  %v2244_v39 = vld [vmem:[%s6119_s1 + $0x10] sm:$0xff] }
 0x472   : > { %2744 = vmatpush.msrb.mxu1 %v5641_v18  ;;  %2361 = vmatpush.msrb.mxu2 %v2265_v56 }
 0x473   : > { %v2193_v59 = vadd.f32 %v3139_v24, %v2192_v63  ;;  %v2205_v28 = vadd.f32 %v2204_v1, %v2054_v20  ;;  %2676 = vmatpush.msrb.mxu0 %v2271_v60  ;;  %v2722_v60 = vld [vmem:[%s6121_s3 + $0x100] sm:$0xff] }
 0x474   : > { %2745 = vmatpush.msrb.mxu1 %v5652_v15  ;;  %2362 = vmatpush.msrb.mxu2 %v2262_v4  ;;  %v6415_v63 = vld [vmem:[#allocation21_spill] sm:$0xff] }
 0x475   : > { %v2197_v57 = vsel %vm2196_vm8, %v3139_v24, %v2193_v59  ;;  %3140 = vtanh.f32 %v2205_v28  ;;  %2677 = vmatpush.msrb.mxu0 %v2268_v51  ;;  %v2256_v24 = vld [vmem:[%s6119_s1 + $0x70] sm:$0xff]  ;;  %v2719_v59 = vld [vmem:[%s6121_s3 + $0xe8] sm:$0xff] }
 0x476   : > { %v2202_v1 = vsel %vm2199_vm9, %v2201_v47, %v2197_v57  ;;  %2746 = vmatpush.msrb.mxu1 %v5671_v6  ;;  %2363 = vmatpush.msrb.mxu2 %v2259_v53  ;;  %v2253_v6 = vld [vmem:[%s6119_s1 + $0x58] sm:$0xff]  ;;  %v6416_v28 = vld [vmem:[#allocation14_spill] sm:$0xff]  ;;  %v2716_v57 = vld [vmem:[%s6121_s3 + $0xd0] sm:$0xff] }
 0x477   : > { %2678 = vmatpush.msrb.mxu0 %v2265_v56  ;;  %v2207_v18 = vsub.f32 1.0, %v2202_v1  ;;  %v2209_v29 = vmul.f32 %v2202_v1, %v5437_v46 }
 0x478   : > { %2747 = vmatpush.msrb.mxu1 %v5693_v58  ;;  %2364 = vmatpush.msrb.mxu2 %v2256_v24  ;;  %v2250_v58 = vld [vmem:[%s6119_s1 + $0x40] sm:$0xff] }
 0x479   : > { %2679 = vmatpush.msrb.mxu0 %v2262_v4  ;;  %v2552_v4 = vld [vmem:[%s3284_s13 + $0xf] sm:$0x1] }
 0x47a   : > { %2748 = vmatpush.msrb.mxu1 %v5715_v61  ;;  %2365 = vmatpush.msrb.mxu2 %v2253_v6 }
 0x47b   : > { %v3141_v15 = vpop.eup %3140  ;;  %2680 = vmatpush.msrb.mxu0 %v2259_v53  ;;  %v2553_v53 = vld [vmem:[%s3284_s13 + $0x17] sm:$0x1] }
 0x47c   : > { %v2208_v2 = vmul.f32 %v3141_v15, %v2207_v18  ;;  %2749 = vmatpush.msrb.mxu1 %v5736_v43  ;;  %v2247_v43 = vld [vmem:[%s6119_s1 + $0x28] sm:$0xff]  ;;  %2366 = vmatpush.msrb.mxu2 %v2250_v58  ;;  %v2615_v18 = vrot.slane %v2552_v4, 7  ;;  %v2554_v15 = vld [vmem:[%s3284_s13 + $0x1f] sm:$0x1] }
 0x47d   : > { %2681 = vmatpush.msrb.mxu0 %v2256_v24  ;;  %v2551_v24 = vld [vmem:[%s3284_s13 + $0x7] sm:$0x1] }
 0x47e   : > { %v5897_v45 = vadd.f32 %v2209_v29, %v2208_v2  ;;  %2750 = vmatpush.msrb.mxu1 %v5761_v30  ;;  %2367 = vmatpush.msrb.mxu2 %v2247_v43  ;;  %v2617_v2 = vrot.slane %v2553_v53, 6 }
 0x47f   : > { %2682 = vmatpush.msrb.mxu0 %v2253_v6  ;;  %v6417_v6 = vld [vmem:[#allocation29_spill] sm:$0xff] }
 0x480   : > { %v2212_v46 = vrot.slane %v5897_v45, 1  ;;  %v2213_v44 = vrot.slane %v5897_v45, 2  ;;  %v2214_v61 = vrot.slane %v5897_v45, 3  ;;  %2226 = vst [vmem:[%s3286_s14 + $0x5] sm:$0x1] %v5897_v45  ;;  %2437 = vmatmul.f32.vlgmr.msrb.gmra.mxu3 %v5897_v45  ;;  %2457 = vmatmul.f32.vlgmr.msra.gmra.mxu0 %v5897_v45  ;;  %v2215_v20 = vrot.slane %v5897_v45, 4 }
 0x481   : > { %2477 = vmatmul.f32.vlgmr.msra.gmra.mxu1 %v5897_v45  ;;  %v2216_v23 = vrot.slane %v5897_v45, 5  ;;  %v2217_v49 = vrot.slane %v5897_v45, 6  ;;  %v2218_v17 = vrot.slane %v5897_v45, 7  ;;  %2683 = vmatpush.msrb.mxu0 %v2250_v58  ;;  %v2555_v58 = vld [vmem:[%s3284_s13 + $0x27] sm:$0x1] }
 0x482   : > { %2227 = vst [vmem:[%s3286_s14 + $0xd] sm:$0x1] %v2212_v46  ;;  %2751 = vmatpush.msrb.mxu1 %v5781_v34  ;;  %2368 = vmatpush.msrb.mxu2 %v2244_v39  ;;  %v2725_v34 = vld [vmem:[%s6121_s3 + $0x118] sm:$0xff]  ;;  %v2616_v46 = vsel %vm390_vm0, %v2615_v18, %v2551_v24 }
 0x483   : > { %2228 = vst [vmem:[%s3286_s14 + $0x15] sm:$0x1] %v2213_v44  ;;  %2369 = vmatmul.f32.vlgmr.msrb.gmra.mxu2 %v5756_v16  ;;  %2684 = vmatpush.msrb.mxu0 %v2247_v43  ;;  %v2728_v16 = vld [vmem:[%s6121_s3 + $0x130] sm:$0xff]  ;;  %v2619_v44 = vrot.slane %v2554_v15, 5  ;;  %v2556_v43 = vld [vmem:[%s3284_s13 + $0x2f] sm:$0x1] }
 0x484   : > { %2229 = vst [vmem:[%s3286_s14 + $0x1d] sm:$0x1] %v2214_v61  ;;  %2752 = vmatpush.msrb.mxu1 %v5799_v9  ;;  %2630 = vmatpush.msra.mxu2 %v5398_v11  ;;  %v2602_v11 = vld [vmem:[%s6119_s1 + $0x158] sm:$0xff] }
 0x485   : > { %2230 = vst [vmem:[%s3286_s14 + $0x25] sm:$0x1] %v2215_v20  ;;  %2685 = vmatpush.msrb.mxu0 %v2244_v39  ;;  %v2618_v20 = vsel %vm393_vm1, %v2617_v2, %v2616_v46  ;;  %v6418_v39 = vld [vmem:[#allocation18_spill] sm:$0xff] }
 0x486   : > { %2231 = vst [vmem:[%s3286_s14 + $0x2d] sm:$0x1] %v2216_v23  ;;  %2753 = vmatpush.msrb.mxu1 %v5819_v48  ;;  %2631 = vmatpush.msra.mxu2 %v5403_v21  ;;  %v2605_v48 = vld [vmem:[%s6119_s1 + $0x170] sm:$0xff]  ;;  %v6402_v21 = vld [vmem:[#allocation10_spill] sm:$0xff]  ;;  %v2621_v23 = vrot.slane %v2555_v58, 4 }
 0x487   : > { %2232 = vst [vmem:[%s3286_s14 + $0x35] sm:$0x1] %v2217_v49  ;;  %2650 = vmatpush.msra.mxu3 %v2605_v48  ;;  %v2557_v49 = vld [vmem:[%s3284_s13 + $0x37] sm:$0x1]  ;;  %v2623_v48 = vrot.slane %v2556_v43, 3 }
 0x488   : > { %2233 = vst [vmem:[%s3286_s14 + $0x3d] sm:$0x1] %v2218_v17  ;;  %2632 = vmatpush.msra.mxu2 %v5409_v27  ;;  %v2599_v27 = vld [vmem:[%s6119_s1 + $0x140] sm:$0xff]  ;;  %v2620_v17 = vsel %vm396_vm2, %v2619_v44, %v2618_v20 }
 0x489   : > { %2651 = vmatpush.msra.mxu3 %v2602_v11  ;;  %v2558_v11 = vld [vmem:[%s3284_s13 + $0x3f] sm:$0x1]  ;;  %s3038_s13 = sshll.u32 (%p3268_p6), %s3192_s20, 3 }
 0x48a   : > { %2633 = vmatpush.msra.mxu2 %v5415_v14  ;;  %v6403_v14 = vld [vmem:[#allocation12_spill] sm:$0xff]  ;;  %s2880_s26 = scalar_lea.vmem (%p3268_p6), %s6123_s5, %s3038_s13 }
 0x48b   : > { %2652 = vmatpush.msra.mxu3 %v2599_v27  ;;  %v2622_v27 = vsel %vm399_vm3, %v2621_v23, %v2620_v17 }
 0x48c   : > { %2634 = vmatpush.msra.mxu2 %v5421_v55  ;;  %v2596_v55 = vld [vmem:[%s6119_s1 + $0x128] sm:$0xff] }
 0x48d   : > { %2653 = vmatpush.msra.mxu3 %v2596_v55  ;;  %v2627_v55 = vrot.slane %v2558_v11, 1 }
 0x48e   : > { %2635 = vmatpush.msra.mxu2 %v5429_v22  ;;  %v6404_v22 = vld [vmem:[#allocation16_spill] sm:$0xff] }
 0x490   : > { %2636 = vmatpush.msra.mxu2 %v5461_v33  ;;  %v6405_v33 = vld [vmem:[#allocation32_spill] sm:$0xff] }
 0x492   : > { %2637 = vmatpush.msra.mxu2 %v5467_v36  ;;  %v2593_v36 = vld [vmem:[%s6119_s1 + $0x110] sm:$0xff] }
 0x493   : > { %2654 = vmatpush.msra.mxu3 %v2593_v36  ;;  %v6420_v36 = vld [vmem:[#allocation9_spill] sm:$0xff] }
 0x494   : > { %2638 = vmatpush.msra.mxu2 %v5473_v38  ;;  %v2590_v38 = vld [vmem:[%s6119_s1 + $0xf8] sm:$0xff] }
 0x495   : > { %2655 = vmatpush.msra.mxu3 %v2590_v38 }
 0x496   : > { %2639 = vmatpush.msra.mxu2 %v5479_v42  ;;  %v2587_v42 = vld [vmem:[%s6119_s1 + $0xe0] sm:$0xff] }
 0x497   : > { %2656 = vmatpush.msra.mxu3 %v2587_v42 }
 0x498   : > { %2640 = vmatpush.msra.mxu2 %v5485_v31  ;;  %v2584_v31 = vld [vmem:[%s6119_s1 + $0xc8] sm:$0xff] }
 0x499   : > { %2657 = vmatpush.msra.mxu3 %v2584_v31 }
 0x49a   : > { %2641 = vmatpush.msra.mxu2 %v5497_v3  ;;  %v2581_v3 = vld [vmem:[%s6119_s1 + $0xb0] sm:$0xff] }
 0x49b   : > { %2658 = vmatpush.msra.mxu3 %v2581_v3  ;;  %v6421_v3 = vld [vmem:[#allocation11_spill] sm:$0xff] }
 0x49c   : > { %2642 = vmatpush.msra.mxu2 %v5509_v35  ;;  %v2578_v35 = vld [vmem:[%s6119_s1 + $0x98] sm:$0xff] }
 0x49d   : > { %2659 = vmatpush.msra.mxu3 %v2578_v35 }
 0x49e   : > { %2643 = vmatpush.msra.mxu2 %v5521_v10  ;;  %v6406_v10 = vld [vmem:[#allocation28_spill] sm:$0xff] }
 0x49f   : > { %2660 = vmatpush.msra.mxu3 %v6406_v10  ;;  %v6422_v10 = vld [vmem:[#allocation13_spill] sm:$0xff] }
 0x4a0   : > { %2644 = vmatpush.msra.mxu2 %v5533_v0  ;;  %v6407_v0 = vld [vmem:[#allocation20_spill] sm:$0xff] }
 0x4a1   : > { %2661 = vmatpush.msra.mxu3 %v6407_v0 }
 0x4a2   : > { %2645 = vmatpush.msra.mxu2 %v5545_v52 }
 0x4a4   : > { %2758 = vmatpush.msrb.mxu2 %v5562_v40  ;;  %v6408_v40 = vld [vmem:[#allocation5_spill] sm:$0xff] }
 0x4a5   : > { %2662 = vmatpush.msra.mxu3 %v6408_v40 }
 0x4a6   : > { %2759 = vmatpush.msrb.mxu2 %v5580_v19  ;;  %v6409_v19 = vld [vmem:[#allocation6_spill] sm:$0xff] }
 0x4a7   : > { %2663 = vmatpush.msra.mxu3 %v6409_v19  ;;  %v6424_v19 = vld [vmem:[#allocation33_spill] sm:$0xff] }
 0x4a8   : > { %2760 = vmatpush.msrb.mxu2 %v5593_v25  ;;  %v6410_v25 = vld [vmem:[#allocation7_spill] sm:$0xff] }
 0x4a9   : > { %2664 = vmatpush.msra.mxu3 %v6410_v25 }
 0x4aa   : > { %2761 = vmatpush.msrb.mxu2 %v5606_v26  ;;  %v6411_v26 = vld [vmem:[#allocation8_spill] sm:$0xff] }
 0x4ab   : > { %2665 = vmatpush.msra.mxu3 %v6411_v26 }
 0x4ac   : > { %2762 = vmatpush.msrb.mxu2 %v5619_v12  ;;  %v2734_v12 = vld [vmem:[%s6121_s3 + $0x160] sm:$0xff] }
 0x4ae   : > { %2763 = vmatpush.msrb.mxu2 %v5633_v37  ;;  %v6412_v37 = vld [vmem:[#allocation23_spill] sm:$0xff] }
 0x4af   : > { %2778 = vmatpush.msrb.mxu3 %v6412_v37 }
 0x4b0   : > { %2764 = vmatpush.msrb.mxu2 %v5646_v8 }
 0x4b1   : > { %2779 = vmatpush.msrb.mxu3 %v2734_v12 }
 0x4b2   : > { %2765 = vmatpush.msrb.mxu2 %v5657_v5  ;;  %v2731_v5 = vld [vmem:[%s6121_s3 + $0x148] sm:$0xff] }
 0x4b3   : > { %2780 = vmatpush.msrb.mxu3 %v2731_v5 }
 0x4b4   : > { %2766 = vmatpush.msrb.mxu2 %v5676_v54  ;;  %v6413_v54 = vld [vmem:[#allocation25_spill] sm:$0xff] }
 0x4b5   : > { %2781 = vmatpush.msrb.mxu3 %v2728_v16 }
 0x4b6   : > { %2767 = vmatpush.msrb.mxu2 %v5698_v50 }
 0x4b7   : > { %2782 = vmatpush.msrb.mxu3 %v2725_v34 }
 0x4b8   : > { %2768 = vmatpush.msrb.mxu2 %v5720_v7 }
 0x4b9   : > { %2783 = vmatpush.msrb.mxu3 %v2722_v60  ;;  %v6425_v60 = vld [vmem:[#allocation15_spill] sm:$0xff] }
 0x4ba   : > { %2769 = vmatpush.msrb.mxu2 %v5741_v13  ;;  %v6414_v13 = vld [vmem:[#allocation22_spill] sm:$0xff] }
 0x4bb   : > { %2784 = vmatpush.msrb.mxu3 %v2719_v59 }
 0x4bc   : > { %2770 = vmatpush.msrb.mxu2 %v6402_v21  ;;  %v6419_v21 = vld [vmem:[#allocation26_spill] sm:$0xff] }
 0x4bd   : > { %2785 = vmatpush.msrb.mxu3 %v2716_v57 }
 0x4be   : > { %2771 = vmatpush.msrb.mxu2 %v6403_v14  ;;  %v2625_v14 = vrot.slane %v2557_v49, 2 }
 0x4bf   : > { %2786 = vmatpush.msrb.mxu3 %v6417_v6 }
 0x4c0   : > { %2772 = vmatpush.msrb.mxu2 %v6404_v22  ;;  %v2624_v22 = vsel %vm402_vm4, %v2623_v48, %v2622_v27 }
 0x4c1   : > { %2787 = vmatpush.msrb.mxu3 %v6418_v39  ;;  %v2626_v38 = vsel %vm405_vm5, %v2625_v14, %v2624_v22 }
 0x4c2   : > { %2773 = vmatpush.msrb.mxu2 %v6405_v33  ;;  %v2628_v31 = vsel %vm408_vm6, %v2627_v55, %v2626_v38 }
 0x4c3   : > { %2788 = vmatpush.msrb.mxu3 %v6419_v21  ;;  %2646 = vmatmul.f32.vlgmr.msra.gmra.mxu2 %v2628_v31 }
 0x4c4   : > { %2666 = vmatmul.f32.vlgmr.msra.gmra.mxu3 %v2628_v31  ;;  %2686 = vmatmul.f32.vlgmr.msrb.gmra.mxu0 %v2628_v31 }
 0x4c5   : > { %2789 = vmatpush.msrb.mxu3 %v6420_v36 }
 0x4c7   : > { %2790 = vmatpush.msrb.mxu3 %v6421_v3 }
 0x4c9   : > { %2791 = vmatpush.msrb.mxu3 %v6422_v10 }
 0x4db   : > { %v2330_v52 = vpop.f32.mrf.mxu0  ;;  %v2350_v8 = vpop.f32.mrf.mxu1 }
 0x4dc   : > { %v2351_v50 = vadd.f32 %v2350_v8, %v6413_v54  ;;  %v2331_v32 = vadd.f32 %v2330_v52, %v6415_v63  ;;  %v6423_v52 = vld [vmem:[#allocation30_spill] sm:$0xff] }
 0x4dd   : > { %2792 = vmatpush.msrb.mxu3 %v6423_v52 }
 0x4df   : > { %2793 = vmatpush.msrb.mxu3 %v6424_v19 }
 0x4fd   : > { %v2458_v7 = vpop.f32.mrf.mxu0 }
 0x4fe   : > { %v2459_v30 = vadd.f32 %v2458_v7, %v6414_v13  ;;  %v2478_v7 = vpop.f32.mrf.mxu1 }
 0x500   : > { %v2482_v9 = vadd.f32 %v2459_v30, %v2351_v50 }
 0x502   : > { %v3034_v62 = vmul.f32 -1.442695, %v2482_v9  ;;  %v2479_v9 = vadd.f32 %v2478_v7, %v4033_v41 }
 0x503   : > { %v2438_v51 = vpop.f32.mrf.mxu3 }
 0x504   : > { %3142 = vpow2.f32 %v3034_v62  ;;  %v2439_v56 = vadd.f32 %v2438_v51, %v6416_v28 }
 0x506   : > { %v2481_v47 = vadd.f32 %v2439_v56, %v2331_v32  ;;  %v2370_v16 = vpop.f32.mrf.mxu2 }
 0x507   : > { %v2371_v32 = vadd.f32 %v2370_v16, %v6425_v60 }
 0x508   : > { %v3033_v1 = vmul.f32 -1.442695, %v2481_v47 }
 0x50a   : > { %v3143_v29 = vpop.eup %3142  ;;  %3144 = vpow2.f32 %v3033_v1 }
 0x50b   : > { %v2490_v61 = vadd.f32 1.0, %v3143_v29 }
 0x50d   : > { %3146 = vrcp.f32 %v2490_v61  ;;  %v2517_v56 = vand.u32 2147483648, %v2490_v61  ;;  %vm2511_vm5 = vweird.f32 %v2490_v61  ;;  %v2515_v47 = vand.u32 2147483647, %v2490_v61 }
 0x50f   : > { %v2518_v53 = vor.u32 1.1754944e-38, %v2517_v56  ;;  %vm2516_vm10 = vcmp.eq.f32.partialorder %v2515_v47, 8.507059e+37 }
 0x510   : > { %v3145_v33 = vpop.eup %3144 }
 0x511   : > { %v2489_v42 = vadd.f32 1.0, %v3145_v33 }
 0x513   : > { %3148 = vrcp.f32 %v2489_v42  ;;  %v3147_v35 = vpop.eup %3146  ;;  %v2502_v37 = vand.u32 2147483648, %v2489_v42  ;;  %v2500_v5 = vand.u32 2147483647, %v2489_v42  ;;  %vm2496_vm1 = vweird.f32 %v2489_v42 }
 0x514   : > { %v2507_v0 = vmul.f32 %v3147_v35, %v2490_v61  ;;  %vm2512_vm4 = vweird.f32 %v3147_v35 }
 0x515   : > { %v2503_v34 = vor.u32 1.1754944e-38, %v2502_v37  ;;  %vm2501_vm3 = vcmp.eq.f32.partialorder %v2500_v5, 8.507059e+37  ;;  %vm2513_vm6 = vmor %vm2511_vm5, %vm2512_vm4 }
 0x516   : > { %v2508_v26 = vsub.f32 1.0, %v2507_v0 }
 0x518   : > { %v2509_v50 = vmul.f32 %v3147_v35, %v2508_v26 }
 0x519   : > { %v3149_v40 = vpop.eup %3148 }
 0x51a   : > { %v2492_v25 = vmul.f32 %v3149_v40, %v2489_v42  ;;  %vm2497_vm0 = vweird.f32 %v3149_v40  ;;  %v2510_v59 = vadd.f32 %v3147_v35, %v2509_v50 }
 0x51b   : > { %vm2498_vm2 = vmor %vm2496_vm1, %vm2497_vm0 }
 0x51c   : > { %v2493_v12 = vsub.f32 1.0, %v2492_v25  ;;  %v2514_v1 = vsel %vm2513_vm6, %v3147_v35, %v2510_v59 }
 0x51d   : > { %v2519_v18 = vsel %vm2516_vm10, %v2518_v53, %v2514_v1 }
 0x51e   : > { %v2494_v8 = vmul.f32 %v3149_v40, %v2493_v12  ;;  %v2524_v24 = vsub.f32 1.0, %v2519_v18  ;;  %v2526_v29 = vmul.f32 %v2519_v18, %v5897_v45 }
 0x520   : > { %v2495_v30 = vadd.f32 %v3149_v40, %v2494_v8 }
 0x522   : > { %v2499_v62 = vsel %vm2498_vm2, %v3149_v40, %v2495_v30 }
 0x523   : > { %v2504_v51 = vsel %vm2501_vm3, %v2503_v34, %v2499_v62 }
 0x524   : > { %v2521_v57 = vmul.f32 %v2504_v51, %v2479_v9 }
 0x526   : > { %v2522_v4 = vadd.f32 %v2521_v57, %v2371_v32 }
 0x528   : > { %3150 = vtanh.f32 %v2522_v4 }
 0x52e   : > { %v3151_v15 = vpop.eup %3150 }
 0x52f   : > { %v2525_v2 = vmul.f32 %v3151_v15, %v2524_v24 }
 0x531   : > { %v6053_v6 = vadd.f32 %v2526_v29, %v2525_v2 }
 0x533   : > { %v2529_v58 = vrot.slane %v6053_v6, 1  ;;  %v2530_v46 = vrot.slane %v6053_v6, 2  ;;  %v2531_v44 = vrot.slane %v6053_v6, 3  ;;  %2543 = vst [vmem:[%s3286_s14 + $0x6] sm:$0x1] %v6053_v6  ;;  %2754 = vmatmul.f32.vlgmr.msrb.gmra.mxu1 %v6053_v6  ;;  %2774 = vmatmul.f32.vlgmr.msrb.gmra.mxu2 %v6053_v6  ;;  %v2532_v45 = vrot.slane %v6053_v6, 4 }
 0x534   : > { %2794 = vmatmul.f32.vlgmr.msrb.gmra.mxu3 %v6053_v6  ;;  %v2533_v61 = vrot.slane %v6053_v6, 5  ;;  %v2534_v43 = vrot.slane %v6053_v6, 6  ;;  %v2535_v20 = vrot.slane %v6053_v6, 7 }
 0x535   : > { %2544 = vst [vmem:[%s3286_s14 + $0xe] sm:$0x1] %v2529_v58 }
 0x536   : > { %2545 = vst [vmem:[%s3286_s14 + $0x16] sm:$0x1] %v2530_v46 }
 0x537   : > { %2546 = vst [vmem:[%s3286_s14 + $0x1e] sm:$0x1] %v2531_v44 }
 0x538   : > { %2547 = vst [vmem:[%s3286_s14 + $0x26] sm:$0x1] %v2532_v45 }
 0x539   : > { %2548 = vst [vmem:[%s3286_s14 + $0x2e] sm:$0x1] %v2533_v61 }
 0x53a   : > { %2549 = vst [vmem:[%s3286_s14 + $0x36] sm:$0x1] %v2534_v43 }
 0x53b   : > { %2550 = vst [vmem:[%s3286_s14 + $0x3e] sm:$0x1] %v2535_v20 }
 0x541   : > { %v2687_v0 = vpop.f32.mrf.mxu0 }
 0x542   : > { %v2688_v26 = vadd.f32 %v2687_v0, %v6425_v60 }
 0x546   : > { %v2647_v23 = vpop.f32.mrf.mxu2 }
 0x547   : > { %v2648_v39 = vadd.f32 %v2647_v23, %v6415_v63  ;;  %v2667_v11 = vpop.f32.mrf.mxu3 }
 0x548   : > { %v2668_v21 = vadd.f32 %v2667_v11, %v6413_v54 }
 0x5b0   : > { %v2755_v49 = vpop.f32.mrf.mxu1 }
 0x5b1   : > { %v2756_v17 = vadd.f32 %v2755_v49, %v6416_v28 }
 0x5b3   : > { %v2798_v48 = vadd.f32 %v2756_v17, %v2648_v39 }
 0x5b5   : > { %v3035_v27 = vmul.f32 -1.442695, %v2798_v48 }
 0x5b6   : > { %v2775_v14 = vpop.f32.mrf.mxu2 }
 0x5b7   : > { %3152 = vpow2.f32 %v3035_v27  ;;  %v2776_v55 = vadd.f32 %v2775_v14, %v6414_v13  ;;  %v2795_v40 = vpop.f32.mrf.mxu3 }
 0x5b8   : > { %v2796_v37 = vadd.f32 %v2795_v40, %v4033_v41 }
 0x5b9   : > { %v2799_v22 = vadd.f32 %v2776_v55, %v2668_v21 }
 0x5bb   : > { %v3036_v33 = vmul.f32 -1.442695, %v2799_v22 }
 0x5bd   : > { %v3153_v36 = vpop.eup %3152  ;;  %3154 = vpow2.f32 %v3036_v33 }
 0x5be   : > { %v2806_v38 = vadd.f32 1.0, %v3153_v36 }
 0x5c0   : > { %3156 = vrcp.f32 %v2806_v38  ;;  %v2819_v35 = vand.u32 2147483648, %v2806_v38  ;;  %v2817_v54 = vand.u32 2147483647, %v2806_v38  ;;  %vm2813_vm12 = vweird.f32 %v2806_v38 }
 0x5c2   : > { %v2820_v25 = vor.u32 1.1754944e-38, %v2819_v35  ;;  %vm2818_vm14 = vcmp.eq.f32.partialorder %v2817_v54, 8.507059e+37 }
 0x5c3   : > { %v3155_v42 = vpop.eup %3154 }
 0x5c4   : > { %v2807_v63 = vadd.f32 1.0, %v3155_v42 }
 0x5c6   : > { %v3157_v31 = vpop.eup %3156  ;;  %3158 = vrcp.f32 %v2807_v63  ;;  %v2834_v7 = vand.u32 2147483648, %v2807_v63  ;;  %v2832_v30 = vand.u32 2147483647, %v2807_v63  ;;  %vm2828_vm7 = vweird.f32 %v2807_v63 }
 0x5c7   : > { %v2809_v28 = vmul.f32 %v3157_v31, %v2806_v38  ;;  %vm2814_vm11 = vweird.f32 %v3157_v31 }
 0x5c8   : > { %vm2815_vm13 = vmor %vm2813_vm12, %vm2814_vm11  ;;  %v2835_v62 = vor.u32 1.1754944e-38, %v2834_v7  ;;  %vm2833_vm9 = vcmp.eq.f32.partialorder %v2832_v30, 8.507059e+37 }
 0x5c9   : > { %v2810_v3 = vsub.f32 1.0, %v2809_v28 }
 0x5cb   : > { %v2811_v10 = vmul.f32 %v3157_v31, %v2810_v3 }
 0x5cc   : > { %v3159_v52 = vpop.eup %3158 }
 0x5cd   : > { %v2824_v13 = vmul.f32 %v3159_v52, %v2807_v63  ;;  %v2812_v19 = vadd.f32 %v3157_v31, %v2811_v10  ;;  %vm2829_vm15 = vweird.f32 %v3159_v52 }
 0x5ce   : > { %vm2830_vm8 = vmor %vm2828_vm7, %vm2829_vm15 }
 0x5cf   : > { %v2825_v12 = vsub.f32 1.0, %v2824_v13  ;;  %v2816_v8 = vsel %vm2815_vm13, %v3157_v31, %v2812_v19 }
 0x5d0   : > { %v2821_v5 = vsel %vm2818_vm14, %v2820_v25, %v2816_v8 }
 0x5d1   : > { %v2826_v50 = vmul.f32 %v3159_v52, %v2825_v12  ;;  %v2838_v16 = vmul.f32 %v2821_v5, %v2796_v37 }
 0x5d3   : > { %v2827_v34 = vadd.f32 %v3159_v52, %v2826_v50  ;;  %v2839_v9 = vadd.f32 %v2838_v16, %v2688_v26 }
 0x5d5   : > { %v2831_v32 = vsel %vm2830_vm8, %v3159_v52, %v2827_v34  ;;  %3160 = vtanh.f32 %v2839_v9 }
 0x5d6   : > { %v2836_v41 = vsel %vm2833_vm9, %v2835_v62, %v2831_v32 }
 0x5d7   : > { %v2841_v60 = vsub.f32 1.0, %v2836_v41  ;;  %v2843_v56 = vmul.f32 %v2836_v41, %v6053_v6 }
 0x5db   : > { %v3161_v51 = vpop.eup %3160 }
 0x5dc   : > { %v2842_v59 = vmul.f32 %v3161_v51, %v2841_v60 }
 0x5de   : > { %v2844_v57 = vadd.f32 %v2843_v56, %v2842_v59 }
 0x5e0   : > { %v2846_v47 = vrot.slane %v2844_v57, 1  ;;  %v2847_v4 = vrot.slane %v2844_v57, 2  ;;  %v2848_v1 = vrot.slane %v2844_v57, 3  ;;  %2860 = vst [vmem:[%s3286_s14 + $0x7] sm:$0x1] %v2844_v57  ;;  %v2849_v53 = vrot.slane %v2844_v57, 4 }
 0x5e1   : > { %2868 = vst [vmem:[#allocation2] sm:$0xff] %v2844_v57  ;;  %v2850_v18 = vrot.slane %v2844_v57, 5  ;;  %v2851_v24 = vrot.slane %v2844_v57, 6  ;;  %v2852_v15 = vrot.slane %v2844_v57, 7 }
 0x5e2   : > { %2861 = vst [vmem:[%s3286_s14 + $0xf] sm:$0x1] %v2846_v47 }
 0x5e3   : > { %2862 = vst [vmem:[%s3286_s14 + $0x17] sm:$0x1] %v2847_v4 }
 0x5e4   : > { %2863 = vst [vmem:[%s3286_s14 + $0x1f] sm:$0x1] %v2848_v1  ;;  %2875 = sbr.rel (!%p3268_p6) target bundleno = 1521 (0x5f1), region = 86 }
 0x5e5   : > { %2864 = vst [vmem:[%s3286_s14 + $0x27] sm:$0x1] %v2849_v53 }
 0x5e6   : > { %2865 = vst [vmem:[%s3286_s14 + $0x2f] sm:$0x1] %v2850_v18 }
 0x5e7   : > { %2866 = vst [vmem:[%s3286_s14 + $0x37] sm:$0x1] %v2851_v24  ;;  %v2923_v2 = vld [vmem:[%s3286_s14] sm:$0xff] (%p3268_p6) }
 0x5e8   : > { %2867 = vst [vmem:[%s3286_s14 + $0x3f] sm:$0x1] %v2852_v15 }
 0x5e9   : > { %v2925_v29 = vld [vmem:[%s3286_s14 + $0x8] sm:$0xff]  ;;  %2924 = vst [vmem:[%s2880_s26] sm:$0xff] %v2923_v2 }
 0x5ea   : > { %v2927_v6 = vld [vmem:[%s3286_s14 + $0x10] sm:$0xff]  ;;  %2926 = vst [vmem:[%s2880_s26 + $0x10] sm:$0xff] %v2925_v29 }
 0x5eb   : > { %v2929_v58 = vld [vmem:[%s3286_s14 + $0x18] sm:$0xff]  ;;  %2928 = vst [vmem:[%s2880_s26 + $0x20] sm:$0xff] %v2927_v6 }
 0x5ec   : > { %v2931_v46 = vld [vmem:[%s3286_s14 + $0x20] sm:$0xff]  ;;  %2930 = vst [vmem:[%s2880_s26 + $0x30] sm:$0xff] %v2929_v58 }
 0x5ed   : > { %v2933_v44 = vld [vmem:[%s3286_s14 + $0x28] sm:$0xff]  ;;  %2932 = vst [vmem:[%s2880_s26 + $0x40] sm:$0xff] %v2931_v46 }
 0x5ee   : > { %v2935_v45 = vld [vmem:[%s3286_s14 + $0x30] sm:$0xff]  ;;  %2934 = vst [vmem:[%s2880_s26 + $0x50] sm:$0xff] %v2933_v44 }
 0x5ef   : > { %v2937_v61 = vld [vmem:[%s3286_s14 + $0x38] sm:$0xff]  ;;  %2936 = vst [vmem:[%s2880_s26 + $0x60] sm:$0xff] %v2935_v45 }
 0x5f0   : > { %2938 = vst [vmem:[%s2880_s26 + $0x70] sm:$0xff] %v2937_v61 }
 0x5f1 PF: > { %s15_s22 = sadd.s32 1, %s3200_s22   ;;  %s6426_s18 = smov %s3188_s19 }
 0x5f2   : > { %p12_p12 = scmp.ge.s32.totalorder %s15_s22, 4   ;;  %s6427_s19 = smov %s3273_s28 }
 0x5f3   : > { %s6428_s20 = smov %s3196_s21  ;;  %s6429_s21 = smov %s6431_s23 }
 0x5f4   :  { %14 = sbr.rel (!%p12_p12) target bundleno = 3 (0x3), region = 155 }

</bundles_post_ra>
